<compile_context>
chip_gen: v6e
topology: v6e:2x2x1
jax: 0.10.0
libtpu: 0.0.40
codegen_flags: <defaults>
</compile_context>

<pallas_src>
import functools
import math

import jax
import jax.numpy as jnp
from jax import lax
from jax.experimental import pallas as pl
from jax.experimental.pallas import tpu as pltpu


def _attention_kernel(mask_ref, q_ref, k_ref, v_ref,
                      wq_ref, wk_ref, wv_ref, wo_ref, b_ref,
                      o_ref,
                      qp_ref, kp_ref, vp_ref, m_ref, l_ref, acc_ref,
                      *, heads, scale, neg_fill):
    """One (batch, q-block, kv-block) grid step.

    Ref shapes (batch dim squeezed by the BlockSpecs):
      mask_ref (tq, tk) int8        q_ref (tq, E)      k_ref/v_ref (tk, E)
      w*_ref   (E, E)               b_ref (4, E) f32 rows = [bq, bk, bv, bo]
      o_ref    (tq, E)
    Scratch:
      qp_ref (tq, E), kp_ref/vp_ref (tk, E)   projected activations (MXU dtype)
      m_ref/l_ref (heads, tq, 1) f32          online-softmax running max/denom
      acc_ref (tq, E) f32                     unnormalized per-head context
    """
    ki = pl.program_id(2)
    nk = pl.num_programs(2)
    e = q_ref.shape[-1]
    dh = e // heads

    # ---- once per (batch, q-block): project + pre-scale Q, reset flash state.
    @pl.when(ki == 0)
    def _init():
        qp = jnp.dot(q_ref[...], wq_ref[...], preferred_element_type=jnp.float32)
        qp = (qp + b_ref[0:1, :]) * scale          # fold 1/sqrt(E) into Q once
        qp_ref[...] = qp.astype(qp_ref.dtype)
        m_ref[...] = jnp.full(m_ref.shape, -jnp.inf, jnp.float32)
        l_ref[...] = jnp.zeros(l_ref.shape, jnp.float32)
        acc_ref[...] = jnp.zeros(acc_ref.shape, jnp.float32)

    # ---- per kv block: project K and V (recomputed per q-block; see header).
    kp = jnp.dot(k_ref[...], wk_ref[...], preferred_element_type=jnp.float32)
    vp = jnp.dot(v_ref[...], wv_ref[...], preferred_element_type=jnp.float32)
    kp_ref[...] = (kp + b_ref[1:2, :]).astype(kp_ref.dtype)
    vp_ref[...] = (vp + b_ref[2:3, :]).astype(vp_ref.dtype)

    # Head-invariant mask: evaluated once per kv block, outside the head loop.
    masked_out = mask_ref[...].astype(jnp.float32) == 0.0       # (tq, tk) bool

    # ---- per head: QK^T -> mask -> online softmax -> PV ---------------------
    # Static loop with per-head *Ref* slices: each iteration only materializes
    # its own (tq,dh)/(tk,dh)/(tq,tk) working set, so live ranges stay bounded.
    # Offsets are static multiples of dh (whole-tile slices when dh >= 128).
    # TODO(synk): for very large head counts switch to lax.fori_loop to bound
    # code size (heads is small for this module, so full unroll is preferred).
    for h in range(heads):
        lo = h * dh
        qh = qp_ref[:, lo:lo + dh]                                # (tq, dh)
        kh = kp_ref[:, lo:lo + dh]                                # (tk, dh)
        s = lax.dot_general(qh, kh, (((1,), (1,)), ((), ())),
                            preferred_element_type=jnp.float32)   # (tq, tk)
        s = jnp.where(masked_out, neg_fill, s)

        m_prev = m_ref[h]                                         # (tq, 1)
        m_new = jnp.maximum(m_prev, jnp.max(s, axis=-1, keepdims=True))
        alpha = jnp.exp(m_prev - m_new)
        p = jnp.exp(s - m_new)                                    # (tq, tk) f32
        l_ref[h] = alpha * l_ref[h] + jnp.sum(p, axis=-1, keepdims=True)
        acc_ref[:, lo:lo + dh] = (
            alpha * acc_ref[:, lo:lo + dh]
            + jnp.dot(p.astype(vp_ref.dtype), vp_ref[:, lo:lo + dh],
                      preferred_element_type=jnp.float32))
        m_ref[h] = m_new

    # ---- after the last kv block: normalize and apply fc_out (one matmul). --
    @pl.when(ki == nk - 1)
    def _finalize():
        for h in range(heads):
            lo = h * dh
            inv = pl.reciprocal(l_ref[h], approx=True)            # EUP slot
            acc_ref[:, lo:lo + dh] = acc_ref[:, lo:lo + dh] * inv
        ctx = acc_ref[...].astype(wo_ref.dtype)                   # (tq, E)
        out = jnp.dot(ctx, wo_ref[...], preferred_element_type=jnp.float32)
        o_ref[...] = (out + b_ref[3:4, :]).astype(o_ref.dtype)


def _vmem_limit_bytes(tq, tk, e, heads, compute_dtype, out_dtype, single_buffered):
    """Explicit VMEM budget for CompilerParams (review item: v7x 64 MiB)."""
    cb = jnp.dtype(compute_dtype).itemsize
    ob = jnp.dtype(out_dtype).itemsize
    wbuf = 1 if single_buffered else 2
    weights = wbuf * (4 * e * e * cb + 4 * e * 4)
    blocks = 2 * (tq * tk + tq * e * cb + 2 * tk * e * cb + tq * e * ob)
    scratch = (tq * e + 2 * tk * e) * cb + (tq * e + 2 * heads * tq * 128) * 4
    est = weights + blocks + scratch
    return int(min(max(2 * est, 32 * 1024 * 1024), 96 * 1024 * 1024))


def self_attention(q, k, v, mask, params, *, heads,
                   block_q=256, block_k=512,
                   compute_dtype=jnp.bfloat16,
                   single_buffer_weights=True):
    """Pallas forward of SelfAttention.

    params = (wq, bq, wk, bk, wv, bv, wo, bo) with weights stored as
    (in_features, out_features), i.e. the transpose of nn.Linear.weight.
    `mask` may be None, (Sq,Sk), (N_or_1,Sq,Sk) or (N_or_1,1,Sq,Sk); it must be
    head-invariant.
    """
    wq, bq, wk, bk, wv, bv, wo, bo = params
    N, Sq, E = q.shape
    Sk = k.shape[1]
    assert E % heads == 0
    assert k.shape == (N, Sk, E) and v.shape == (N, Sk, E)
    out_dtype = q.dtype
    scale = 1.0 / math.sqrt(E)

    # Sequence tiles (keep (8,128)-friendly; shrink to full extent when small).
    tq = Sq if Sq <= block_q else block_q
    tk = Sk if Sk <= block_k else block_k
    assert Sq % tq == 0 and Sk % tk == 0, "sequence lengths must divide the tiles"
    nq, nk = Sq // tq, Sk // tk

    # Mask: narrow int8, head-invariant, no (N,H,Sq,Sk) / f32 materialization.
    # TODO(synk): per-head (head-varying) masks are not supported by the fused kernel.
    if mask is None:
        mask_nsk = jnp.ones((1, Sq, Sk), jnp.int8)
    else:
        m = mask
        if m.ndim == 2:
            m = m[None]
        elif m.ndim == 4:
            assert m.shape[1] == 1, "per-head masks are not supported"
            m = m[:, 0]
        assert m.ndim == 3, f"unsupported mask rank: {mask.shape}"
        m = jnp.broadcast_to(m, (m.shape[0], Sq, Sk))
        mask_nsk = (m != 0).astype(jnp.int8)
    mask_n = mask_nsk.shape[0]
    assert mask_n in (1, N)

    # bf16 (default) into the MXU; f32 accumulation happens inside the kernel.
    qc, kc, vc = (x.astype(compute_dtype) for x in (q, k, v))
    wqc, wkc, wvc, woc = (w.astype(compute_dtype) for w in (wq, wk, wv, wo))
    biases = jnp.stack([bq, bk, bv, bo]).astype(jnp.float32)      # (4, E) f32

    kernel = functools.partial(_attention_kernel, heads=heads, scale=scale,
                               neg_fill=float(-1e20 * scale))

    def build_call(single_buffered):
        pipeline_mode = pl.Buffered(1) if single_buffered else None

        def const_spec(shape):
            index_map = lambda n, qi, ki: (0,) * len(shape)
            if pipeline_mode is None:
                return pl.BlockSpec(shape, index_map)
            return pl.BlockSpec(shape, index_map, pipeline_mode=pipeline_mode)

        w_spec = const_spec((E, E))
        b_spec = const_spec((4, E))
        mask_map = (lambda n, qi, ki: (n, qi, ki)) if mask_n == N else \
                   (lambda n, qi, ki: (0, qi, ki))

        in_specs = [
            pl.BlockSpec((None, tq, tk), mask_map),                     # mask
            pl.BlockSpec((None, tq, E), lambda n, qi, ki: (n, qi, 0)),  # q
            pl.BlockSpec((None, tk, E), lambda n, qi, ki: (n, ki, 0)),  # k
            pl.BlockSpec((None, tk, E), lambda n, qi, ki: (n, ki, 0)),  # v
            w_spec, w_spec, w_spec, w_spec,                             # wq..wo
            b_spec,                                                     # biases
        ]
        out_spec = pl.BlockSpec((None, tq, E), lambda n, qi, ki: (n, qi, 0))
        scratch = [
            pltpu.VMEM((tq, E), compute_dtype),        # projected, scaled Q
            pltpu.VMEM((tk, E), compute_dtype),        # projected K
            pltpu.VMEM((tk, E), compute_dtype),        # projected V
            pltpu.VMEM((heads, tq, 1), jnp.float32),   # running max
            pltpu.VMEM((heads, tq, 1), jnp.float32),   # running denom
            pltpu.VMEM((tq, E), jnp.float32),          # unnormalized context
        ]
        return pl.pallas_call(
            kernel,
            out_shape=jax.ShapeDtypeStruct((N, Sq, E), out_dtype),
            grid=(N, nq, nk),
            in_specs=in_specs,
            out_specs=out_spec,
            scratch_shapes=scratch,
            compiler_params=pltpu.CompilerParams(
                dimension_semantics=("parallel", "parallel", "arbitrary"),
                vmem_limit_bytes=_vmem_limit_bytes(
                    tq, tk, E, heads, compute_dtype, out_dtype, single_buffered),
            ),
        )

    operands = (mask_nsk, qc, kc, vc, wqc, wkc, wvc, woc, biases)
    if single_buffer_weights and hasattr(pl, "Buffered"):
        try:
            return build_call(True)(*operands)
        except Exception:
            # pl.Buffered(1) / pipeline_mode not supported by this jax/Mosaic
            # version: fall back to default double-buffering (identical
            # results; only costs extra VMEM reservation for the weights).
            pass
    return build_call(False)(*operands)


def _reference(q, k, v, mask, params, *, heads):
    """Pure-JAX mirror of the PyTorch forward (weights already (in, out))."""
    wq, bq, wk, bk, wv, bv, wo, bo = params
    N, Sq, E = q.shape
    Sk = k.shape[1]
    Dh = E // heads
    qp = (q @ wq + bq).reshape(N, Sq, heads, Dh)
    kp = (k @ wk + bk).reshape(N, Sk, heads, Dh)
    vp = (v @ wv + bv).reshape(N, Sk, heads, Dh)
    energy = jnp.einsum('nqhd,nkhd->nhqk', qp, kp)
    if mask is not None:
        energy = jnp.where(mask == 0, jnp.float32(-1e20), energy)
    attn = jax.nn.softmax(energy / math.sqrt(E), axis=3)
    out = jnp.einsum('nhql,nlhd->nqhd', attn, vp).reshape(N, Sq, E)
    return out @ wo + bo


if __name__ == "__main__":
    N, Sq, Sk, E, H = 2, 128, 256, 64, 4

    key = jax.random.PRNGKey(0)
    ks = jax.random.split(key, 11)

    q = jax.random.normal(ks[0], (N, Sq, E), jnp.float32)
    k = jax.random.normal(ks[1], (N, Sk, E), jnp.float32)
    v = jax.random.normal(ks[2], (N, Sk, E), jnp.float32)

    # Head-invariant "causal-style" mask at its natural shape (N, 1, Sq, Sk).
    causal = (jnp.arange(Sk)[None, :] <= jnp.arange(Sq)[:, None] + (Sk - Sq))
    mask = jnp.broadcast_to(causal[None, None].astype(jnp.float32),
                            (N, 1, Sq, Sk))

    w_init = 1.0 / math.sqrt(E)
    params = (
        jax.random.normal(ks[3], (E, E), jnp.float32) * w_init,   # wq (in,out)
        jax.random.normal(ks[4], (E,), jnp.float32) * 0.1,        # bq
        jax.random.normal(ks[5], (E, E), jnp.float32) * w_init,   # wk
        jax.random.normal(ks[6], (E,), jnp.float32) * 0.1,        # bk
        jax.random.normal(ks[7], (E, E), jnp.float32) * w_init,   # wv
        jax.random.normal(ks[8], (E,), jnp.float32) * 0.1,        # bv
        jax.random.normal(ks[9], (E, E), jnp.float32) * w_init,   # wo
        jax.random.normal(ks[10], (E,), jnp.float32) * 0.1,       # bo
    )

    # (1) Exactness check: f32 MXU path vs the f32 reference (grid (2,2,2)
    #     exercises both the q tiling and the online-softmax kv tiling).
    out_f32 = self_attention(q, k, v, mask, params, heads=H,
                             block_q=64, block_k=128,
                             compute_dtype=jnp.float32)
    out_f32 = jax.block_until_ready(out_f32)
    ref_f32 = _reference(q, k, v, mask, params, heads=H)
    assert out_f32.shape == (N, Sq, E) and out_f32.dtype == q.dtype
    err32 = float(jnp.max(jnp.abs(out_f32 - ref_f32)))
    assert jnp.allclose(out_f32, ref_f32, atol=5e-3, rtol=5e-3), err32

    # (2) Performance config: bf16 into the MXU (f32 accumulation), compared
    #     against a reference whose inputs/weights are rounded to bf16 too.
    out_bf16 = self_attention(q, k, v, mask, params, heads=H,
                              block_q=64, block_k=128)
    out_bf16 = jax.block_until_ready(out_bf16)
    to_bf = lambda x: x.astype(jnp.bfloat16).astype(jnp.float32)
    params_bf = tuple(to_bf(p) if p.ndim == 2 else p for p in params)
    ref_bf16 = _reference(to_bf(q), to_bf(k), to_bf(v), mask, params_bf, heads=H)
    errbf = float(jnp.max(jnp.abs(out_bf16 - ref_bf16)))
    assert jnp.allclose(out_bf16, ref_bf16, atol=1e-1, rtol=5e-2), errbf

    print("KERNEL_OK")
</pallas_src>

<mosaic_0001>
module attributes {stable_mosaic.version = 11 : i64} {
  func.func @_attention_kernel(%arg0: i32, %arg1: i32, %arg2: i32, %arg3: memref<1x64x128xi8, #tpu.memory_space<vmem>>, %arg4: memref<1x64x64xf32, #tpu.memory_space<vmem>>, %arg5: memref<1x128x64xf32, #tpu.memory_space<vmem>>, %arg6: memref<1x128x64xf32, #tpu.memory_space<vmem>>, %arg7: memref<64x64xf32, #tpu.memory_space<vmem>>, %arg8: memref<64x64xf32, #tpu.memory_space<vmem>>, %arg9: memref<64x64xf32, #tpu.memory_space<vmem>>, %arg10: memref<64x64xf32, #tpu.memory_space<vmem>>, %arg11: memref<4x64xf32, #tpu.memory_space<vmem>>, %arg12: memref<1x64x64xf32, #tpu.memory_space<vmem>>, %arg13: memref<64x64xf32, #tpu.memory_space<vmem>>, %arg14: memref<128x64xf32, #tpu.memory_space<vmem>>, %arg15: memref<128x64xf32, #tpu.memory_space<vmem>>, %arg16: memref<4x64x1xf32, #tpu.memory_space<vmem>>, %arg17: memref<4x64x1xf32, #tpu.memory_space<vmem>>, %arg18: memref<64x64xf32, #tpu.memory_space<vmem>>) attributes {dimension_semantics = [#tpu.dimension_semantics<parallel>, #tpu.dimension_semantics<parallel>, #tpu.dimension_semantics<arbitrary>], iteration_bounds = array<i64: 2, 2, 2>, scalar_prefetch = 0 : i64, scratch_operands = 6 : i64, tpu.core_type = #tpu.core_type<tc>, window_params = [{transform_indices = @transform_0, window_bounds = array<i64: 1, 64, 128>}, {transform_indices = @transform_1, window_bounds = array<i64: 1, 64, 64>}, {transform_indices = @transform_2, window_bounds = array<i64: 1, 128, 64>}, {transform_indices = @transform_3, window_bounds = array<i64: 1, 128, 64>}, {pipeline_mode = #tpu.pipeline_mode<synchronous>, transform_indices = @transform_4, window_bounds = array<i64: 64, 64>}, {pipeline_mode = #tpu.pipeline_mode<synchronous>, transform_indices = @transform_5, window_bounds = array<i64: 64, 64>}, {pipeline_mode = #tpu.pipeline_mode<synchronous>, transform_indices = @transform_6, window_bounds = array<i64: 64, 64>}, {pipeline_mode = #tpu.pipeline_mode<synchronous>, transform_indices = @transform_7, window_bounds = array<i64: 64, 64>}, {pipeline_mode = #tpu.pipeline_mode<synchronous>, transform_indices = @transform_8, window_bounds = array<i64: 4, 64>}, {transform_indices = @transform_9, window_bounds = array<i64: 1, 64, 64>}]} {
    %c0_i32 = arith.constant 0 : i32
    %0 = arith.cmpi eq, %arg2, %c0_i32 : i32
    %1 = arith.extui %0 : i1 to i32
    %c0_i32_0 = arith.constant 0 : i32
    %2 = arith.cmpi ne, %1, %c0_i32_0 : i32
    scf.if %2 {
      %c0_126 = arith.constant 0 : index
      %c0_127 = arith.constant 0 : index
      %c0_128 = arith.constant 0 : index
      %163 = vector.load %arg4[%c0_126, %c0_127, %c0_128] : memref<1x64x64xf32, #tpu.memory_space<vmem>>, vector<1x64x64xf32>
      %164 = vector.shape_cast %163 : vector<1x64x64xf32> to vector<64x64xf32>
      %c0_129 = arith.constant 0 : index
      %c0_130 = arith.constant 0 : index
      %165 = vector.load %arg7[%c0_129, %c0_130] : memref<64x64xf32, #tpu.memory_space<vmem>>, vector<64x64xf32>
      %cst_131 = arith.constant dense<0.000000e+00> : vector<64x64xf32>
      %166 = tpu.matmul %164, %165, %cst_131 {dimension_numbers = #tpu.dot_dimension_numbers<[1], [0], [0], [1], [0, 0, 1, 1], [], []>} : vector<64x64xf32>, vector<64x64xf32>, vector<64x64xf32> -> vector<64x64xf32>
      %c0_132 = arith.constant 0 : index
      %c0_133 = arith.constant 0 : index
      %167 = vector.load %arg11[%c0_132, %c0_133] : memref<4x64xf32, #tpu.memory_space<vmem>>, vector<1x64xf32>
      %168 = vector.broadcast %167 : vector<1x64xf32> to vector<64x64xf32>
      %169 = arith.addf %166, %168 : vector<64x64xf32>
      %cst_134 = arith.constant 1.250000e-01 : f32
      %170 = vector.broadcast %cst_134 : f32 to vector<64x64xf32>
      %171 = arith.mulf %169, %170 : vector<64x64xf32>
      %c0_135 = arith.constant 0 : index
      %c0_136 = arith.constant 0 : index
      %172 = vector.load %arg13[%c0_135, %c0_136] : memref<64x64xf32, #tpu.memory_space<vmem>>, vector<64x64xf32>
      tpu.vector_store %arg13[%c0_135, %c0_136], %171 {strides = array<i32>} : memref<64x64xf32, #tpu.memory_space<vmem>>, vector<64x64xf32>,
      %cst_137 = arith.constant 0xFF800000 : f32
      %173 = vector.broadcast %cst_137 : f32 to vector<4x64x1xf32>
      %c0_138 = arith.constant 0 : index
      %c0_139 = arith.constant 0 : index
      %c0_140 = arith.constant 0 : index
      %174 = vector.load %arg16[%c0_138, %c0_139, %c0_140] : memref<4x64x1xf32, #tpu.memory_space<vmem>>, vector<4x64x1xf32>
      tpu.vector_store %arg16[%c0_138, %c0_139, %c0_140], %173 {strides = array<i32>} : memref<4x64x1xf32, #tpu.memory_space<vmem>>, vector<4x64x1xf32>,
      %cst_141 = arith.constant 0.000000e+00 : f32
      %175 = vector.broadcast %cst_141 : f32 to vector<4x64x1xf32>
      %c0_142 = arith.constant 0 : index
      %c0_143 = arith.constant 0 : index
      %c0_144 = arith.constant 0 : index
      %176 = vector.load %arg17[%c0_142, %c0_143, %c0_144] : memref<4x64x1xf32, #tpu.memory_space<vmem>>, vector<4x64x1xf32>
      tpu.vector_store %arg17[%c0_142, %c0_143, %c0_144], %175 {strides = array<i32>} : memref<4x64x1xf32, #tpu.memory_space<vmem>>, vector<4x64x1xf32>,
      %cst_145 = arith.constant 0.000000e+00 : f32
      %177 = vector.broadcast %cst_145 : f32 to vector<64x64xf32>
      %c0_146 = arith.constant 0 : index
      %c0_147 = arith.constant 0 : index
      %178 = vector.load %arg18[%c0_146, %c0_147] : memref<64x64xf32, #tpu.memory_space<vmem>>, vector<64x64xf32>
      tpu.vector_store %arg18[%c0_146, %c0_147], %177 {strides = array<i32>} : memref<64x64xf32, #tpu.memory_space<vmem>>, vector<64x64xf32>,
    } else {
    }
    %c0 = arith.constant 0 : index
    %c0_1 = arith.constant 0 : index
    %c0_2 = arith.constant 0 : index
    %3 = vector.load %arg5[%c0, %c0_1, %c0_2] : memref<1x128x64xf32, #tpu.memory_space<vmem>>, vector<1x128x64xf32>
    %4 = vector.shape_cast %3 : vector<1x128x64xf32> to vector<128x64xf32>
    %c0_3 = arith.constant 0 : index
    %c0_4 = arith.constant 0 : index
    %5 = vector.load %arg8[%c0_3, %c0_4] : memref<64x64xf32, #tpu.memory_space<vmem>>, vector<64x64xf32>
    %cst = arith.constant dense<0.000000e+00> : vector<128x64xf32>
    %6 = tpu.matmul %4, %5, %cst {dimension_numbers = #tpu.dot_dimension_numbers<[1], [0], [0], [1], [0, 0, 1, 1], [], []>} : vector<128x64xf32>, vector<64x64xf32>, vector<128x64xf32> -> vector<128x64xf32>
    %c0_5 = arith.constant 0 : index
    %c0_6 = arith.constant 0 : index
    %c0_7 = arith.constant 0 : index
    %7 = vector.load %arg6[%c0_5, %c0_6, %c0_7] : memref<1x128x64xf32, #tpu.memory_space<vmem>>, vector<1x128x64xf32>
    %8 = vector.shape_cast %7 : vector<1x128x64xf32> to vector<128x64xf32>
    %c0_8 = arith.constant 0 : index
    %c0_9 = arith.constant 0 : index
    %9 = vector.load %arg9[%c0_8, %c0_9] : memref<64x64xf32, #tpu.memory_space<vmem>>, vector<64x64xf32>
    %cst_10 = arith.constant dense<0.000000e+00> : vector<128x64xf32>
    %10 = tpu.matmul %8, %9, %cst_10 {dimension_numbers = #tpu.dot_dimension_numbers<[1], [0], [0], [1], [0, 0, 1, 1], [], []>} : vector<128x64xf32>, vector<64x64xf32>, vector<128x64xf32> -> vector<128x64xf32>
    %c1 = arith.constant 1 : index
    %c0_11 = arith.constant 0 : index
    %11 = vector.load %arg11[%c1, %c0_11] : memref<4x64xf32, #tpu.memory_space<vmem>>, vector<1x64xf32>
    %12 = vector.broadcast %11 : vector<1x64xf32> to vector<128x64xf32>
    %13 = arith.addf %6, %12 : vector<128x64xf32>
    %c0_12 = arith.constant 0 : index
    %c0_13 = arith.constant 0 : index
    %14 = vector.load %arg14[%c0_12, %c0_13] : memref<128x64xf32, #tpu.memory_space<vmem>>, vector<128x64xf32>
    tpu.vector_store %arg14[%c0_12, %c0_13], %13 {strides = array<i32>} : memref<128x64xf32, #tpu.memory_space<vmem>>, vector<128x64xf32>,
    %c2 = arith.constant 2 : index
    %c0_14 = arith.constant 0 : index
    %15 = vector.load %arg11[%c2, %c0_14] : memref<4x64xf32, #tpu.memory_space<vmem>>, vector<1x64xf32>
    %16 = vector.broadcast %15 : vector<1x64xf32> to vector<128x64xf32>
    %17 = arith.addf %10, %16 : vector<128x64xf32>
    %c0_15 = arith.constant 0 : index
    %c0_16 = arith.constant 0 : index
    %18 = vector.load %arg15[%c0_15, %c0_16] : memref<128x64xf32, #tpu.memory_space<vmem>>, vector<128x64xf32>
    tpu.vector_store %arg15[%c0_15, %c0_16], %17 {strides = array<i32>} : memref<128x64xf32, #tpu.memory_space<vmem>>, vector<128x64xf32>,
    %c0_17 = arith.constant 0 : index
    %c0_18 = arith.constant 0 : index
    %c0_19 = arith.constant 0 : index
    %19 = vector.load %arg3[%c0_17, %c0_18, %c0_19] : memref<1x64x128xi8, #tpu.memory_space<vmem>>, vector<1x64x128xi8>
    %20 = vector.shape_cast %19 : vector<1x64x128xi8> to vector<64x128xi8>
    %21 = arith.sitofp %20 : vector<64x128xi8> to vector<64x128xf32>
    %cst_20 = arith.constant 0.000000e+00 : f32
    %22 = vector.broadcast %cst_20 : f32 to vector<64x128xf32>
    %23 = arith.cmpf oeq, %21, %22 : vector<64x128xf32>
    %c0_21 = arith.constant 0 : index
    %c0_22 = arith.constant 0 : index
    %24 = vector.load %arg13[%c0_21, %c0_22] : memref<64x64xf32, #tpu.memory_space<vmem>>, vector<64x16xf32>
    %c0_23 = arith.constant 0 : index
    %c0_24 = arith.constant 0 : index
    %25 = vector.load %arg14[%c0_23, %c0_24] : memref<128x64xf32, #tpu.memory_space<vmem>>, vector<128x16xf32>
    %cst_25 = arith.constant dense<0.000000e+00> : vector<64x128xf32>
    %26 = tpu.matmul %24, %25, %cst_25 {dimension_numbers = #tpu.dot_dimension_numbers<[1], [1], [0], [0], [0, 0, 1, 0], [], []>} : vector<64x16xf32>, vector<128x16xf32>, vector<64x128xf32> -> vector<64x128xf32>
    %cst_26 = arith.constant -1.250000e+19 : f32
    %27 = vector.broadcast %cst_26 : f32 to vector<64x128xf32>
    %28 = arith.select %23, %27, %26 : vector<64x128xi1>, vector<64x128xf32>
    %c0_27 = arith.constant 0 : index
    %c0_28 = arith.constant 0 : index
    %c0_29 = arith.constant 0 : index
    %29 = vector.load %arg16[%c0_27, %c0_28, %c0_29] : memref<4x64x1xf32, #tpu.memory_space<vmem>>, vector<1x64x1xf32>
    %30 = vector.shape_cast %29 : vector<1x64x1xf32> to vector<64x1xf32>
    %cst_30 = arith.constant dense<0xFF800000> : vector<64xf32>
    %31 = vector.multi_reduction <maximumf>, %28, %cst_30 [1] : vector<64x128xf32> to vector<64xf32>
    %32 = vector.shape_cast %31 : vector<64xf32> to vector<64x1xf32>
    %33 = arith.maximumf %30, %32 : vector<64x1xf32>
    %34 = arith.subf %30, %33 : vector<64x1xf32>
    %35 = math.exp %34 : vector<64x1xf32>
    %36 = vector.broadcast %33 : vector<64x1xf32> to vector<64x128xf32>
    %37 = arith.subf %28, %36 : vector<64x128xf32>
    %38 = math.exp %37 : vector<64x128xf32>
    %c0_31 = arith.constant 0 : index
    %c0_32 = arith.constant 0 : index
    %c0_33 = arith.constant 0 : index
    %39 = vector.load %arg17[%c0_31, %c0_32, %c0_33] : memref<4x64x1xf32, #tpu.memory_space<vmem>>, vector<1x64x1xf32>
    %40 = vector.shape_cast %39 : vector<1x64x1xf32> to vector<64x1xf32>
    %41 = arith.mulf %35, %40 : vector<64x1xf32>
    %cst_34 = arith.constant dense<0.000000e+00> : vector<64xf32>
    %42 = vector.multi_reduction <add>, %38, %cst_34 [1] : vector<64x128xf32> to vector<64xf32>
    %43 = vector.shape_cast %42 : vector<64xf32> to vector<64x1xf32>
    %44 = arith.addf %41, %43 : vector<64x1xf32>
    %c0_35 = arith.constant 0 : index
    %c0_36 = arith.constant 0 : index
    %c0_37 = arith.constant 0 : index
    %45 = vector.load %arg17[%c0_35, %c0_36, %c0_37] : memref<4x64x1xf32, #tpu.memory_space<vmem>>, vector<1x64x1xf32>
    %46 = vector.shape_cast %45 : vector<1x64x1xf32> to vector<64x1xf32>
    %47 = vector.shape_cast %44 : vector<64x1xf32> to vector<1x64x1xf32>
    tpu.vector_store %arg17[%c0_35, %c0_36, %c0_37], %47 {strides = array<i32>} : memref<4x64x1xf32, #tpu.memory_space<vmem>>, vector<1x64x1xf32>,
    %c0_38 = arith.constant 0 : index
    %c0_39 = arith.constant 0 : index
    %48 = vector.load %arg18[%c0_38, %c0_39] : memref<64x64xf32, #tpu.memory_space<vmem>>, vector<64x16xf32>
    %49 = vector.broadcast %35 : vector<64x1xf32> to vector<64x16xf32>
    %50 = arith.mulf %49, %48 : vector<64x16xf32>
    %c0_40 = arith.constant 0 : index
    %c0_41 = arith.constant 0 : index
    %51 = vector.load %arg15[%c0_40, %c0_41] : memref<128x64xf32, #tpu.memory_space<vmem>>, vector<128x16xf32>
    %cst_42 = arith.constant dense<0.000000e+00> : vector<64x16xf32>
    %52 = tpu.matmul %38, %51, %cst_42 {dimension_numbers = #tpu.dot_dimension_numbers<[1], [0], [0], [1], [0, 0, 1, 1], [], []>} : vector<64x128xf32>, vector<128x16xf32>, vector<64x16xf32> -> vector<64x16xf32>
    %53 = arith.addf %50, %52 : vector<64x16xf32>
    %c0_43 = arith.constant 0 : index
    %c0_44 = arith.constant 0 : index
    %54 = vector.load %arg18[%c0_43, %c0_44] : memref<64x64xf32, #tpu.memory_space<vmem>>, vector<64x16xf32>
    tpu.vector_store %arg18[%c0_43, %c0_44], %53 {strides = array<i32>} : memref<64x64xf32, #tpu.memory_space<vmem>>, vector<64x16xf32>,
    %c0_45 = arith.constant 0 : index
    %c0_46 = arith.constant 0 : index
    %c0_47 = arith.constant 0 : index
    %55 = vector.load %arg16[%c0_45, %c0_46, %c0_47] : memref<4x64x1xf32, #tpu.memory_space<vmem>>, vector<1x64x1xf32>
    %56 = vector.shape_cast %55 : vector<1x64x1xf32> to vector<64x1xf32>
    %57 = vector.shape_cast %33 : vector<64x1xf32> to vector<1x64x1xf32>
    tpu.vector_store %arg16[%c0_45, %c0_46, %c0_47], %57 {strides = array<i32>} : memref<4x64x1xf32, #tpu.memory_space<vmem>>, vector<1x64x1xf32>,
    %c0_48 = arith.constant 0 : index
    %c16 = arith.constant 16 : index
    %58 = vector.load %arg13[%c0_48, %c16] : memref<64x64xf32, #tpu.memory_space<vmem>>, vector<64x16xf32>
    %c0_49 = arith.constant 0 : index
    %c16_50 = arith.constant 16 : index
    %59 = vector.load %arg14[%c0_49, %c16_50] : memref<128x64xf32, #tpu.memory_space<vmem>>, vector<128x16xf32>
    %cst_51 = arith.constant dense<0.000000e+00> : vector<64x128xf32>
    %60 = tpu.matmul %58, %59, %cst_51 {dimension_numbers = #tpu.dot_dimension_numbers<[1], [1], [0], [0], [0, 0, 1, 0], [], []>} : vector<64x16xf32>, vector<128x16xf32>, vector<64x128xf32> -> vector<64x128xf32>
    %cst_52 = arith.constant -1.250000e+19 : f32
    %61 = vector.broadcast %cst_52 : f32 to vector<64x128xf32>
    %62 = arith.select %23, %61, %60 : vector<64x128xi1>, vector<64x128xf32>
    %c1_53 = arith.constant 1 : index
    %c0_54 = arith.constant 0 : index
    %c0_55 = arith.constant 0 : index
    %63 = vector.load %arg16[%c1_53, %c0_54, %c0_55] : memref<4x64x1xf32, #tpu.memory_space<vmem>>, vector<1x64x1xf32>
    %64 = vector.shape_cast %63 : vector<1x64x1xf32> to vector<64x1xf32>
    %cst_56 = arith.constant dense<0xFF800000> : vector<64xf32>
    %65 = vector.multi_reduction <maximumf>, %62, %cst_56 [1] : vector<64x128xf32> to vector<64xf32>
    %66 = vector.shape_cast %65 : vector<64xf32> to vector<64x1xf32>
    %67 = arith.maximumf %64, %66 : vector<64x1xf32>
    %68 = arith.subf %64, %67 : vector<64x1xf32>
    %69 = math.exp %68 : vector<64x1xf32>
    %70 = vector.broadcast %67 : vector<64x1xf32> to vector<64x128xf32>
    %71 = arith.subf %62, %70 : vector<64x128xf32>
    %72 = math.exp %71 : vector<64x128xf32>
    %c1_57 = arith.constant 1 : index
    %c0_58 = arith.constant 0 : index
    %c0_59 = arith.constant 0 : index
    %73 = vector.load %arg17[%c1_57, %c0_58, %c0_59] : memref<4x64x1xf32, #tpu.memory_space<vmem>>, vector<1x64x1xf32>
    %74 = vector.shape_cast %73 : vector<1x64x1xf32> to vector<64x1xf32>
    %75 = arith.mulf %69, %74 : vector<64x1xf32>
    %cst_60 = arith.constant dense<0.000000e+00> : vector<64xf32>
    %76 = vector.multi_reduction <add>, %72, %cst_60 [1] : vector<64x128xf32> to vector<64xf32>
    %77 = vector.shape_cast %76 : vector<64xf32> to vector<64x1xf32>
    %78 = arith.addf %75, %77 : vector<64x1xf32>
    %c1_61 = arith.constant 1 : index
    %c0_62 = arith.constant 0 : index
    %c0_63 = arith.constant 0 : index
    %79 = vector.load %arg17[%c1_61, %c0_62, %c0_63] : memref<4x64x1xf32, #tpu.memory_space<vmem>>, vector<1x64x1xf32>
    %80 = vector.shape_cast %79 : vector<1x64x1xf32> to vector<64x1xf32>
    %81 = vector.shape_cast %78 : vector<64x1xf32> to vector<1x64x1xf32>
    tpu.vector_store %arg17[%c1_61, %c0_62, %c0_63], %81 {strides = array<i32>} : memref<4x64x1xf32, #tpu.memory_space<vmem>>, vector<1x64x1xf32>,
    %c0_64 = arith.constant 0 : index
    %c16_65 = arith.constant 16 : index
    %82 = vector.load %arg18[%c0_64, %c16_65] : memref<64x64xf32, #tpu.memory_space<vmem>>, vector<64x16xf32>
    %83 = vector.broadcast %69 : vector<64x1xf32> to vector<64x16xf32>
    %84 = arith.mulf %83, %82 : vector<64x16xf32>
    %c0_66 = arith.constant 0 : index
    %c16_67 = arith.constant 16 : index
    %85 = vector.load %arg15[%c0_66, %c16_67] : memref<128x64xf32, #tpu.memory_space<vmem>>, vector<128x16xf32>
    %cst_68 = arith.constant dense<0.000000e+00> : vector<64x16xf32>
    %86 = tpu.matmul %72, %85, %cst_68 {dimension_numbers = #tpu.dot_dimension_numbers<[1], [0], [0], [1], [0, 0, 1, 1], [], []>} : vector<64x128xf32>, vector<128x16xf32>, vector<64x16xf32> -> vector<64x16xf32>
    %87 = arith.addf %84, %86 : vector<64x16xf32>
    %c0_69 = arith.constant 0 : index
    %c16_70 = arith.constant 16 : index
    %88 = vector.load %arg18[%c0_69, %c16_70] : memref<64x64xf32, #tpu.memory_space<vmem>>, vector<64x16xf32>
    tpu.vector_store %arg18[%c0_69, %c16_70], %87 {strides = array<i32>} : memref<64x64xf32, #tpu.memory_space<vmem>>, vector<64x16xf32>,
    %c1_71 = arith.constant 1 : index
    %c0_72 = arith.constant 0 : index
    %c0_73 = arith.constant 0 : index
    %89 = vector.load %arg16[%c1_71, %c0_72, %c0_73] : memref<4x64x1xf32, #tpu.memory_space<vmem>>, vector<1x64x1xf32>
    %90 = vector.shape_cast %89 : vector<1x64x1xf32> to vector<64x1xf32>
    %91 = vector.shape_cast %67 : vector<64x1xf32> to vector<1x64x1xf32>
    tpu.vector_store %arg16[%c1_71, %c0_72, %c0_73], %91 {strides = array<i32>} : memref<4x64x1xf32, #tpu.memory_space<vmem>>, vector<1x64x1xf32>,
    %c0_74 = arith.constant 0 : index
    %c32 = arith.constant 32 : index
    %92 = vector.load %arg13[%c0_74, %c32] : memref<64x64xf32, #tpu.memory_space<vmem>>, vector<64x16xf32>
    %c0_75 = arith.constant 0 : index
    %c32_76 = arith.constant 32 : index
    %93 = vector.load %arg14[%c0_75, %c32_76] : memref<128x64xf32, #tpu.memory_space<vmem>>, vector<128x16xf32>
    %cst_77 = arith.constant dense<0.000000e+00> : vector<64x128xf32>
    %94 = tpu.matmul %92, %93, %cst_77 {dimension_numbers = #tpu.dot_dimension_numbers<[1], [1], [0], [0], [0, 0, 1, 0], [], []>} : vector<64x16xf32>, vector<128x16xf32>, vector<64x128xf32> -> vector<64x128xf32>
    %cst_78 = arith.constant -1.250000e+19 : f32
    %95 = vector.broadcast %cst_78 : f32 to vector<64x128xf32>
    %96 = arith.select %23, %95, %94 : vector<64x128xi1>, vector<64x128xf32>
    %c2_79 = arith.constant 2 : index
    %c0_80 = arith.constant 0 : index
    %c0_81 = arith.constant 0 : index
    %97 = vector.load %arg16[%c2_79, %c0_80, %c0_81] : memref<4x64x1xf32, #tpu.memory_space<vmem>>, vector<1x64x1xf32>
    %98 = vector.shape_cast %97 : vector<1x64x1xf32> to vector<64x1xf32>
    %cst_82 = arith.constant dense<0xFF800000> : vector<64xf32>
    %99 = vector.multi_reduction <maximumf>, %96, %cst_82 [1] : vector<64x128xf32> to vector<64xf32>
    %100 = vector.shape_cast %99 : vector<64xf32> to vector<64x1xf32>
    %101 = arith.maximumf %98, %100 : vector<64x1xf32>
    %102 = arith.subf %98, %101 : vector<64x1xf32>
    %103 = math.exp %102 : vector<64x1xf32>
    %104 = vector.broadcast %101 : vector<64x1xf32> to vector<64x128xf32>
    %105 = arith.subf %96, %104 : vector<64x128xf32>
    %106 = math.exp %105 : vector<64x128xf32>
    %c2_83 = arith.constant 2 : index
    %c0_84 = arith.constant 0 : index
    %c0_85 = arith.constant 0 : index
    %107 = vector.load %arg17[%c2_83, %c0_84, %c0_85] : memref<4x64x1xf32, #tpu.memory_space<vmem>>, vector<1x64x1xf32>
    %108 = vector.shape_cast %107 : vector<1x64x1xf32> to vector<64x1xf32>
    %109 = arith.mulf %103, %108 : vector<64x1xf32>
    %cst_86 = arith.constant dense<0.000000e+00> : vector<64xf32>
    %110 = vector.multi_reduction <add>, %106, %cst_86 [1] : vector<64x128xf32> to vector<64xf32>
    %111 = vector.shape_cast %110 : vector<64xf32> to vector<64x1xf32>
    %112 = arith.addf %109, %111 : vector<64x1xf32>
    %c2_87 = arith.constant 2 : index
    %c0_88 = arith.constant 0 : index
    %c0_89 = arith.constant 0 : index
    %113 = vector.load %arg17[%c2_87, %c0_88, %c0_89] : memref<4x64x1xf32, #tpu.memory_space<vmem>>, vector<1x64x1xf32>
    %114 = vector.shape_cast %113 : vector<1x64x1xf32> to vector<64x1xf32>
    %115 = vector.shape_cast %112 : vector<64x1xf32> to vector<1x64x1xf32>
    tpu.vector_store %arg17[%c2_87, %c0_88, %c0_89], %115 {strides = array<i32>} : memref<4x64x1xf32, #tpu.memory_space<vmem>>, vector<1x64x1xf32>,
    %c0_90 = arith.constant 0 : index
    %c32_91 = arith.constant 32 : index
    %116 = vector.load %arg18[%c0_90, %c32_91] : memref<64x64xf32, #tpu.memory_space<vmem>>, vector<64x16xf32>
    %117 = vector.broadcast %103 : vector<64x1xf32> to vector<64x16xf32>
    %118 = arith.mulf %117, %116 : vector<64x16xf32>
    %c0_92 = arith.constant 0 : index
    %c32_93 = arith.constant 32 : index
    %119 = vector.load %arg15[%c0_92, %c32_93] : memref<128x64xf32, #tpu.memory_space<vmem>>, vector<128x16xf32>
    %cst_94 = arith.constant dense<0.000000e+00> : vector<64x16xf32>
    %120 = tpu.matmul %106, %119, %cst_94 {dimension_numbers = #tpu.dot_dimension_numbers<[1], [0], [0], [1], [0, 0, 1, 1], [], []>} : vector<64x128xf32>, vector<128x16xf32>, vector<64x16xf32> -> vector<64x16xf32>
    %121 = arith.addf %118, %120 : vector<64x16xf32>
    %c0_95 = arith.constant 0 : index
    %c32_96 = arith.constant 32 : index
    %122 = vector.load %arg18[%c0_95, %c32_96] : memref<64x64xf32, #tpu.memory_space<vmem>>, vector<64x16xf32>
    tpu.vector_store %arg18[%c0_95, %c32_96], %121 {strides = array<i32>} : memref<64x64xf32, #tpu.memory_space<vmem>>, vector<64x16xf32>,
    %c2_97 = arith.constant 2 : index
    %c0_98 = arith.constant 0 : index
    %c0_99 = arith.constant 0 : index
    %123 = vector.load %arg16[%c2_97, %c0_98, %c0_99] : memref<4x64x1xf32, #tpu.memory_space<vmem>>, vector<1x64x1xf32>
    %124 = vector.shape_cast %123 : vector<1x64x1xf32> to vector<64x1xf32>
    %125 = vector.shape_cast %101 : vector<64x1xf32> to vector<1x64x1xf32>
    tpu.vector_store %arg16[%c2_97, %c0_98, %c0_99], %125 {strides = array<i32>} : memref<4x64x1xf32, #tpu.memory_space<vmem>>, vector<1x64x1xf32>,
    %c0_100 = arith.constant 0 : index
    %c48 = arith.constant 48 : index
    %126 = vector.load %arg13[%c0_100, %c48] : memref<64x64xf32, #tpu.memory_space<vmem>>, vector<64x16xf32>
    %c0_101 = arith.constant 0 : index
    %c48_102 = arith.constant 48 : index
    %127 = vector.load %arg14[%c0_101, %c48_102] : memref<128x64xf32, #tpu.memory_space<vmem>>, vector<128x16xf32>
    %cst_103 = arith.constant dense<0.000000e+00> : vector<64x128xf32>
    %128 = tpu.matmul %126, %127, %cst_103 {dimension_numbers = #tpu.dot_dimension_numbers<[1], [1], [0], [0], [0, 0, 1, 0], [], []>} : vector<64x16xf32>, vector<128x16xf32>, vector<64x128xf32> -> vector<64x128xf32>
    %cst_104 = arith.constant -1.250000e+19 : f32
    %129 = vector.broadcast %cst_104 : f32 to vector<64x128xf32>
    %130 = arith.select %23, %129, %128 : vector<64x128xi1>, vector<64x128xf32>
    %c3 = arith.constant 3 : index
    %c0_105 = arith.constant 0 : index
    %c0_106 = arith.constant 0 : index
    %131 = vector.load %arg16[%c3, %c0_105, %c0_106] : memref<4x64x1xf32, #tpu.memory_space<vmem>>, vector<1x64x1xf32>
    %132 = vector.shape_cast %131 : vector<1x64x1xf32> to vector<64x1xf32>
    %cst_107 = arith.constant dense<0xFF800000> : vector<64xf32>
    %133 = vector.multi_reduction <maximumf>, %130, %cst_107 [1] : vector<64x128xf32> to vector<64xf32>
    %134 = vector.shape_cast %133 : vector<64xf32> to vector<64x1xf32>
    %135 = arith.maximumf %132, %134 : vector<64x1xf32>
    %136 = arith.subf %132, %135 : vector<64x1xf32>
    %137 = math.exp %136 : vector<64x1xf32>
    %138 = vector.broadcast %135 : vector<64x1xf32> to vector<64x128xf32>
    %139 = arith.subf %130, %138 : vector<64x128xf32>
    %140 = math.exp %139 : vector<64x128xf32>
    %c3_108 = arith.constant 3 : index
    %c0_109 = arith.constant 0 : index
    %c0_110 = arith.constant 0 : index
    %141 = vector.load %arg17[%c3_108, %c0_109, %c0_110] : memref<4x64x1xf32, #tpu.memory_space<vmem>>, vector<1x64x1xf32>
    %142 = vector.shape_cast %141 : vector<1x64x1xf32> to vector<64x1xf32>
    %143 = arith.mulf %137, %142 : vector<64x1xf32>
    %cst_111 = arith.constant dense<0.000000e+00> : vector<64xf32>
    %144 = vector.multi_reduction <add>, %140, %cst_111 [1] : vector<64x128xf32> to vector<64xf32>
    %145 = vector.shape_cast %144 : vector<64xf32> to vector<64x1xf32>
    %146 = arith.addf %143, %145 : vector<64x1xf32>
    %c3_112 = arith.constant 3 : index
    %c0_113 = arith.constant 0 : index
    %c0_114 = arith.constant 0 : index
    %147 = vector.load %arg17[%c3_112, %c0_113, %c0_114] : memref<4x64x1xf32, #tpu.memory_space<vmem>>, vector<1x64x1xf32>
    %148 = vector.shape_cast %147 : vector<1x64x1xf32> to vector<64x1xf32>
    %149 = vector.shape_cast %146 : vector<64x1xf32> to vector<1x64x1xf32>
    tpu.vector_store %arg17[%c3_112, %c0_113, %c0_114], %149 {strides = array<i32>} : memref<4x64x1xf32, #tpu.memory_space<vmem>>, vector<1x64x1xf32>,
    %c0_115 = arith.constant 0 : index
    %c48_116 = arith.constant 48 : index
    %150 = vector.load %arg18[%c0_115, %c48_116] : memref<64x64xf32, #tpu.memory_space<vmem>>, vector<64x16xf32>
    %151 = vector.broadcast %137 : vector<64x1xf32> to vector<64x16xf32>
    %152 = arith.mulf %151, %150 : vector<64x16xf32>
    %c0_117 = arith.constant 0 : index
    %c48_118 = arith.constant 48 : index
    %153 = vector.load %arg15[%c0_117, %c48_118] : memref<128x64xf32, #tpu.memory_space<vmem>>, vector<128x16xf32>
    %cst_119 = arith.constant dense<0.000000e+00> : vector<64x16xf32>
    %154 = tpu.matmul %140, %153, %cst_119 {dimension_numbers = #tpu.dot_dimension_numbers<[1], [0], [0], [1], [0, 0, 1, 1], [], []>} : vector<64x128xf32>, vector<128x16xf32>, vector<64x16xf32> -> vector<64x16xf32>
    %155 = arith.addf %152, %154 : vector<64x16xf32>
    %c0_120 = arith.constant 0 : index
    %c48_121 = arith.constant 48 : index
    %156 = vector.load %arg18[%c0_120, %c48_121] : memref<64x64xf32, #tpu.memory_space<vmem>>, vector<64x16xf32>
    tpu.vector_store %arg18[%c0_120, %c48_121], %155 {strides = array<i32>} : memref<64x64xf32, #tpu.memory_space<vmem>>, vector<64x16xf32>,
    %c3_122 = arith.constant 3 : index
    %c0_123 = arith.constant 0 : index
    %c0_124 = arith.constant 0 : index
    %157 = vector.load %arg16[%c3_122, %c0_123, %c0_124] : memref<4x64x1xf32, #tpu.memory_space<vmem>>, vector<1x64x1xf32>
    %158 = vector.shape_cast %157 : vector<1x64x1xf32> to vector<64x1xf32>
    %159 = vector.shape_cast %135 : vector<64x1xf32> to vector<1x64x1xf32>
    tpu.vector_store %arg16[%c3_122, %c0_123, %c0_124], %159 {strides = array<i32>} : memref<4x64x1xf32, #tpu.memory_space<vmem>>, vector<1x64x1xf32>,
    %c1_i32 = arith.constant 1 : i32
    %160 = arith.cmpi eq, %arg2, %c1_i32 : i32
    %161 = arith.extui %160 : i1 to i32
    %c0_i32_125 = arith.constant 0 : i32
    %162 = arith.cmpi ne, %161, %c0_i32_125 : i32
    scf.if %162 {
      %c0_126 = arith.constant 0 : index
      %c0_127 = arith.constant 0 : index
      %c0_128 = arith.constant 0 : index
      %163 = vector.load %arg17[%c0_126, %c0_127, %c0_128] : memref<4x64x1xf32, #tpu.memory_space<vmem>>, vector<1x64x1xf32>
      %164 = vector.shape_cast %163 : vector<1x64x1xf32> to vector<64x1xf32>
      %165 = tpu.reciprocal %164 {approx = true} : vector<64x1xf32> -> vector<64x1xf32>
      %c0_129 = arith.constant 0 : index
      %c0_130 = arith.constant 0 : index
      %166 = vector.load %arg18[%c0_129, %c0_130] : memref<64x64xf32, #tpu.memory_space<vmem>>, vector<64x16xf32>
      %167 = vector.broadcast %165 : vector<64x1xf32> to vector<64x16xf32>
      %168 = arith.mulf %166, %167 : vector<64x16xf32>
      %c0_131 = arith.constant 0 : index
      %c0_132 = arith.constant 0 : index
      %169 = vector.load %arg18[%c0_131, %c0_132] : memref<64x64xf32, #tpu.memory_space<vmem>>, vector<64x16xf32>
      tpu.vector_store %arg18[%c0_131, %c0_132], %168 {strides = array<i32>} : memref<64x64xf32, #tpu.memory_space<vmem>>, vector<64x16xf32>,
      %c1_133 = arith.constant 1 : index
      %c0_134 = arith.constant 0 : index
      %c0_135 = arith.constant 0 : index
      %170 = vector.load %arg17[%c1_133, %c0_134, %c0_135] : memref<4x64x1xf32, #tpu.memory_space<vmem>>, vector<1x64x1xf32>
      %171 = vector.shape_cast %170 : vector<1x64x1xf32> to vector<64x1xf32>
      %172 = tpu.reciprocal %171 {approx = true} : vector<64x1xf32> -> vector<64x1xf32>
      %c0_136 = arith.constant 0 : index
      %c16_137 = arith.constant 16 : index
      %173 = vector.load %arg18[%c0_136, %c16_137] : memref<64x64xf32, #tpu.memory_space<vmem>>, vector<64x16xf32>
      %174 = vector.broadcast %172 : vector<64x1xf32> to vector<64x16xf32>
      %175 = arith.mulf %173, %174 : vector<64x16xf32>
      %c0_138 = arith.constant 0 : index
      %c16_139 = arith.constant 16 : index
      %176 = vector.load %arg18[%c0_138, %c16_139] : memref<64x64xf32, #tpu.memory_space<vmem>>, vector<64x16xf32>
      tpu.vector_store %arg18[%c0_138, %c16_139], %175 {strides = array<i32>} : memref<64x64xf32, #tpu.memory_space<vmem>>, vector<64x16xf32>,
      %c2_140 = arith.constant 2 : index
      %c0_141 = arith.constant 0 : index
      %c0_142 = arith.constant 0 : index
      %177 = vector.load %arg17[%c2_140, %c0_141, %c0_142] : memref<4x64x1xf32, #tpu.memory_space<vmem>>, vector<1x64x1xf32>
      %178 = vector.shape_cast %177 : vector<1x64x1xf32> to vector<64x1xf32>
      %179 = tpu.reciprocal %178 {approx = true} : vector<64x1xf32> -> vector<64x1xf32>
      %c0_143 = arith.constant 0 : index
      %c32_144 = arith.constant 32 : index
      %180 = vector.load %arg18[%c0_143, %c32_144] : memref<64x64xf32, #tpu.memory_space<vmem>>, vector<64x16xf32>
      %181 = vector.broadcast %179 : vector<64x1xf32> to vector<64x16xf32>
      %182 = arith.mulf %180, %181 : vector<64x16xf32>
      %c0_145 = arith.constant 0 : index
      %c32_146 = arith.constant 32 : index
      %183 = vector.load %arg18[%c0_145, %c32_146] : memref<64x64xf32, #tpu.memory_space<vmem>>, vector<64x16xf32>
      tpu.vector_store %arg18[%c0_145, %c32_146], %182 {strides = array<i32>} : memref<64x64xf32, #tpu.memory_space<vmem>>, vector<64x16xf32>,
      %c3_147 = arith.constant 3 : index
      %c0_148 = arith.constant 0 : index
      %c0_149 = arith.constant 0 : index
      %184 = vector.load %arg17[%c3_147, %c0_148, %c0_149] : memref<4x64x1xf32, #tpu.memory_space<vmem>>, vector<1x64x1xf32>
      %185 = vector.shape_cast %184 : vector<1x64x1xf32> to vector<64x1xf32>
      %186 = tpu.reciprocal %185 {approx = true} : vector<64x1xf32> -> vector<64x1xf32>
      %c0_150 = arith.constant 0 : index
      %c48_151 = arith.constant 48 : index
      %187 = vector.load %arg18[%c0_150, %c48_151] : memref<64x64xf32, #tpu.memory_space<vmem>>, vector<64x16xf32>
      %188 = vector.broadcast %186 : vector<64x1xf32> to vector<64x16xf32>
      %189 = arith.mulf %187, %188 : vector<64x16xf32>
      %c0_152 = arith.constant 0 : index
      %c48_153 = arith.constant 48 : index
      %190 = vector.load %arg18[%c0_152, %c48_153] : memref<64x64xf32, #tpu.memory_space<vmem>>, vector<64x16xf32>
      tpu.vector_store %arg18[%c0_152, %c48_153], %189 {strides = array<i32>} : memref<64x64xf32, #tpu.memory_space<vmem>>, vector<64x16xf32>,
      %c0_154 = arith.constant 0 : index
      %c0_155 = arith.constant 0 : index
      %191 = vector.load %arg18[%c0_154, %c0_155] : memref<64x64xf32, #tpu.memory_space<vmem>>, vector<64x64xf32>
      %c0_156 = arith.constant 0 : index
      %c0_157 = arith.constant 0 : index
      %192 = vector.load %arg10[%c0_156, %c0_157] : memref<64x64xf32, #tpu.memory_space<vmem>>, vector<64x64xf32>
      %cst_158 = arith.constant dense<0.000000e+00> : vector<64x64xf32>
      %193 = tpu.matmul %191, %192, %cst_158 {dimension_numbers = #tpu.dot_dimension_numbers<[1], [0], [0], [1], [0, 0, 1, 1], [], []>} : vector<64x64xf32>, vector<64x64xf32>, vector<64x64xf32> -> vector<64x64xf32>
      %c3_159 = arith.constant 3 : index
      %c0_160 = arith.constant 0 : index
      %194 = vector.load %arg11[%c3_159, %c0_160] : memref<4x64xf32, #tpu.memory_space<vmem>>, vector<1x64xf32>
      %195 = vector.broadcast %194 : vector<1x64xf32> to vector<64x64xf32>
      %196 = arith.addf %193, %195 : vector<64x64xf32>
      %c0_161 = arith.constant 0 : index
      %c0_162 = arith.constant 0 : index
      %c0_163 = arith.constant 0 : index
      %197 = vector.load %arg12[%c0_161, %c0_162, %c0_163] : memref<1x64x64xf32, #tpu.memory_space<vmem>>, vector<1x64x64xf32>
      %198 = vector.shape_cast %197 : vector<1x64x64xf32> to vector<64x64xf32>
      %199 = vector.shape_cast %196 : vector<64x64xf32> to vector<1x64x64xf32>
      tpu.vector_store %arg12[%c0_161, %c0_162, %c0_163], %199 {strides = array<i32>} : memref<1x64x64xf32, #tpu.memory_space<vmem>>, vector<1x64x64xf32>,
    } else {
    }
    return
  }
  func.func @transform_0(%arg0: i32, %arg1: i32, %arg2: i32) -> (i32, i32, i32) {
    %c0_i32 = arith.constant 0 : i32
    return %arg0, %arg1, %arg2 : i32, i32, i32
  }
  func.func @transform_1(%arg0: i32, %arg1: i32, %arg2: i32) -> (i32, i32, i32) {
    %c0_i32 = arith.constant 0 : i32
    %c0_i32_0 = arith.constant 0 : i32
    return %arg0, %arg1, %c0_i32 : i32, i32, i32
  }
  func.func @transform_2(%arg0: i32, %arg1: i32, %arg2: i32) -> (i32, i32, i32) {
    %c0_i32 = arith.constant 0 : i32
    %c0_i32_0 = arith.constant 0 : i32
    return %arg0, %arg2, %c0_i32 : i32, i32, i32
  }
  func.func @transform_3(%arg0: i32, %arg1: i32, %arg2: i32) -> (i32, i32, i32) {
    %c0_i32 = arith.constant 0 : i32
    %c0_i32_0 = arith.constant 0 : i32
    return %arg0, %arg2, %c0_i32 : i32, i32, i32
  }
  func.func @transform_4(%arg0: i32, %arg1: i32, %arg2: i32) -> (i32, i32) {
    %c0_i32 = arith.constant 0 : i32
    %c0_i32_0 = arith.constant 0 : i32
    %c0_i32_1 = arith.constant 0 : i32
    return %c0_i32, %c0_i32_0 : i32, i32
  }
  func.func @transform_5(%arg0: i32, %arg1: i32, %arg2: i32) -> (i32, i32) {
    %c0_i32 = arith.constant 0 : i32
    %c0_i32_0 = arith.constant 0 : i32
    %c0_i32_1 = arith.constant 0 : i32
    return %c0_i32, %c0_i32_0 : i32, i32
  }
  func.func @transform_6(%arg0: i32, %arg1: i32, %arg2: i32) -> (i32, i32) {
    %c0_i32 = arith.constant 0 : i32
    %c0_i32_0 = arith.constant 0 : i32
    %c0_i32_1 = arith.constant 0 : i32
    return %c0_i32, %c0_i32_0 : i32, i32
  }
  func.func @transform_7(%arg0: i32, %arg1: i32, %arg2: i32) -> (i32, i32) {
    %c0_i32 = arith.constant 0 : i32
    %c0_i32_0 = arith.constant 0 : i32
    %c0_i32_1 = arith.constant 0 : i32
    return %c0_i32, %c0_i32_0 : i32, i32
  }
  func.func @transform_8(%arg0: i32, %arg1: i32, %arg2: i32) -> (i32, i32) {
    %c0_i32 = arith.constant 0 : i32
    %c0_i32_0 = arith.constant 0 : i32
    %c0_i32_1 = arith.constant 0 : i32
    return %c0_i32, %c0_i32_0 : i32, i32
  }
  func.func @transform_9(%arg0: i32, %arg1: i32, %arg2: i32) -> (i32, i32, i32) {
    %c0_i32 = arith.constant 0 : i32
    %c0_i32_0 = arith.constant 0 : i32
    return %arg0, %arg1, %c0_i32 : i32, i32, i32
  }
}

module attributes {stable_mosaic.version = 11 : i64} {
  func.func @_attention_kernel(%arg0: i32, %arg1: i32, %arg2: i32, %arg3: memref<1x64x128xi8, #tpu.memory_space<vmem>>, %arg4: memref<1x64x64xf32, #tpu.memory_space<vmem>>, %arg5: memref<1x128x64xf32, #tpu.memory_space<vmem>>, %arg6: memref<1x128x64xf32, #tpu.memory_space<vmem>>, %arg7: memref<64x64xf32, #tpu.memory_space<vmem>>, %arg8: memref<64x64xf32, #tpu.memory_space<vmem>>, %arg9: memref<64x64xf32, #tpu.memory_space<vmem>>, %arg10: memref<64x64xf32, #tpu.memory_space<vmem>>, %arg11: memref<4x64xf32, #tpu.memory_space<vmem>>, %arg12: memref<1x64x64xf32, #tpu.memory_space<vmem>>, %arg13: memref<64x64xf32, #tpu.memory_space<vmem>>, %arg14: memref<128x64xf32, #tpu.memory_space<vmem>>, %arg15: memref<128x64xf32, #tpu.memory_space<vmem>>, %arg16: memref<4x64x1xf32, #tpu.memory_space<vmem>>, %arg17: memref<4x64x1xf32, #tpu.memory_space<vmem>>, %arg18: memref<64x64xf32, #tpu.memory_space<vmem>>) attributes {dimension_semantics = [#tpu.dimension_semantics<parallel>, #tpu.dimension_semantics<parallel>, #tpu.dimension_semantics<arbitrary>], iteration_bounds = array<i64: 2, 2, 2>, scalar_prefetch = 0 : i64, scratch_operands = 6 : i64, tpu.core_type = #tpu.core_type<tc>, window_params = [{transform_indices = @transform_0, window_bounds = array<i64: 1, 64, 128>}, {transform_indices = @transform_1, window_bounds = array<i64: 1, 64, 64>}, {transform_indices = @transform_2, window_bounds = array<i64: 1, 128, 64>}, {transform_indices = @transform_3, window_bounds = array<i64: 1, 128, 64>}, {pipeline_mode = #tpu.pipeline_mode<synchronous>, transform_indices = @transform_4, window_bounds = array<i64: 64, 64>}, {pipeline_mode = #tpu.pipeline_mode<synchronous>, transform_indices = @transform_5, window_bounds = array<i64: 64, 64>}, {pipeline_mode = #tpu.pipeline_mode<synchronous>, transform_indices = @transform_6, window_bounds = array<i64: 64, 64>}, {pipeline_mode = #tpu.pipeline_mode<synchronous>, transform_indices = @transform_7, window_bounds = array<i64: 64, 64>}, {pipeline_mode = #tpu.pipeline_mode<synchronous>, transform_indices = @transform_8, window_bounds = array<i64: 4, 64>}, {transform_indices = @transform_9, window_bounds = array<i64: 1, 64, 64>}]} {
    %c0_i32 = arith.constant 0 : i32
    %0 = arith.cmpi eq, %arg2, %c0_i32 : i32
    %1 = arith.extui %0 : i1 to i32
    %c0_i32_0 = arith.constant 0 : i32
    %2 = arith.cmpi ne, %1, %c0_i32_0 : i32
    scf.if %2 {
      %c0_126 = arith.constant 0 : index
      %c0_127 = arith.constant 0 : index
      %c0_128 = arith.constant 0 : index
      %163 = vector.load %arg4[%c0_126, %c0_127, %c0_128] : memref<1x64x64xf32, #tpu.memory_space<vmem>>, vector<1x64x64xf32>
      %164 = vector.shape_cast %163 : vector<1x64x64xf32> to vector<64x64xf32>
      %c0_129 = arith.constant 0 : index
      %c0_130 = arith.constant 0 : index
      %165 = vector.load %arg7[%c0_129, %c0_130] : memref<64x64xf32, #tpu.memory_space<vmem>>, vector<64x64xf32>
      %cst_131 = arith.constant dense<0.000000e+00> : vector<64x64xf32>
      %166 = tpu.matmul %164, %165, %cst_131 {dimension_numbers = #tpu.dot_dimension_numbers<[1], [0], [0], [1], [0, 0, 1, 1], [], []>} : vector<64x64xf32>, vector<64x64xf32>, vector<64x64xf32> -> vector<64x64xf32>
      %c0_132 = arith.constant 0 : index
      %c0_133 = arith.constant 0 : index
      %167 = vector.load %arg11[%c0_132, %c0_133] : memref<4x64xf32, #tpu.memory_space<vmem>>, vector<1x64xf32>
      %168 = vector.broadcast %167 : vector<1x64xf32> to vector<64x64xf32>
      %169 = arith.addf %166, %168 : vector<64x64xf32>
      %cst_134 = arith.constant 1.250000e-01 : f32
      %170 = vector.broadcast %cst_134 : f32 to vector<64x64xf32>
      %171 = arith.mulf %169, %170 : vector<64x64xf32>
      %c0_135 = arith.constant 0 : index
      %c0_136 = arith.constant 0 : index
      %172 = vector.load %arg13[%c0_135, %c0_136] : memref<64x64xf32, #tpu.memory_space<vmem>>, vector<64x64xf32>
      tpu.vector_store %arg13[%c0_135, %c0_136], %171 {strides = array<i32>} : memref<64x64xf32, #tpu.memory_space<vmem>>, vector<64x64xf32>,
      %cst_137 = arith.constant 0xFF800000 : f32
      %173 = vector.broadcast %cst_137 : f32 to vector<4x64x1xf32>
      %c0_138 = arith.constant 0 : index
      %c0_139 = arith.constant 0 : index
      %c0_140 = arith.constant 0 : index
      %174 = vector.load %arg16[%c0_138, %c0_139, %c0_140] : memref<4x64x1xf32, #tpu.memory_space<vmem>>, vector<4x64x1xf32>
      tpu.vector_store %arg16[%c0_138, %c0_139, %c0_140], %173 {strides = array<i32>} : memref<4x64x1xf32, #tpu.memory_space<vmem>>, vector<4x64x1xf32>,
      %cst_141 = arith.constant 0.000000e+00 : f32
      %175 = vector.broadcast %cst_141 : f32 to vector<4x64x1xf32>
      %c0_142 = arith.constant 0 : index
      %c0_143 = arith.constant 0 : index
      %c0_144 = arith.constant 0 : index
      %176 = vector.load %arg17[%c0_142, %c0_143, %c0_144] : memref<4x64x1xf32, #tpu.memory_space<vmem>>, vector<4x64x1xf32>
      tpu.vector_store %arg17[%c0_142, %c0_143, %c0_144], %175 {strides = array<i32>} : memref<4x64x1xf32, #tpu.memory_space<vmem>>, vector<4x64x1xf32>,
      %cst_145 = arith.constant 0.000000e+00 : f32
      %177 = vector.broadcast %cst_145 : f32 to vector<64x64xf32>
      %c0_146 = arith.constant 0 : index
      %c0_147 = arith.constant 0 : index
      %178 = vector.load %arg18[%c0_146, %c0_147] : memref<64x64xf32, #tpu.memory_space<vmem>>, vector<64x64xf32>
      tpu.vector_store %arg18[%c0_146, %c0_147], %177 {strides = array<i32>} : memref<64x64xf32, #tpu.memory_space<vmem>>, vector<64x64xf32>,
    } else {
    }
    %c0 = arith.constant 0 : index
    %c0_1 = arith.constant 0 : index
    %c0_2 = arith.constant 0 : index
    %3 = vector.load %arg5[%c0, %c0_1, %c0_2] : memref<1x128x64xf32, #tpu.memory_space<vmem>>, vector<1x128x64xf32>
    %4 = vector.shape_cast %3 : vector<1x128x64xf32> to vector<128x64xf32>
    %c0_3 = arith.constant 0 : index
    %c0_4 = arith.constant 0 : index
    %5 = vector.load %arg8[%c0_3, %c0_4] : memref<64x64xf32, #tpu.memory_space<vmem>>, vector<64x64xf32>
    %cst = arith.constant dense<0.000000e+00> : vector<128x64xf32>
    %6 = tpu.matmul %4, %5, %cst {dimension_numbers = #tpu.dot_dimension_numbers<[1], [0], [0], [1], [0, 0, 1, 1], [], []>} : vector<128x64xf32>, vector<64x64xf32>, vector<128x64xf32> -> vector<128x64xf32>
    %c0_5 = arith.constant 0 : index
    %c0_6 = arith.constant 0 : index
    %c0_7 = arith.constant 0 : index
    %7 = vector.load %arg6[%c0_5, %c0_6, %c0_7] : memref<1x128x64xf32, #tpu.memory_space<vmem>>, vector<1x128x64xf32>
    %8 = vector.shape_cast %7 : vector<1x128x64xf32> to vector<128x64xf32>
    %c0_8 = arith.constant 0 : index
    %c0_9 = arith.constant 0 : index
    %9 = vector.load %arg9[%c0_8, %c0_9] : memref<64x64xf32, #tpu.memory_space<vmem>>, vector<64x64xf32>
    %cst_10 = arith.constant dense<0.000000e+00> : vector<128x64xf32>
    %10 = tpu.matmul %8, %9, %cst_10 {dimension_numbers = #tpu.dot_dimension_numbers<[1], [0], [0], [1], [0, 0, 1, 1], [], []>} : vector<128x64xf32>, vector<64x64xf32>, vector<128x64xf32> -> vector<128x64xf32>
    %c1 = arith.constant 1 : index
    %c0_11 = arith.constant 0 : index
    %11 = vector.load %arg11[%c1, %c0_11] : memref<4x64xf32, #tpu.memory_space<vmem>>, vector<1x64xf32>
    %12 = vector.broadcast %11 : vector<1x64xf32> to vector<128x64xf32>
    %13 = arith.addf %6, %12 : vector<128x64xf32>
    %c0_12 = arith.constant 0 : index
    %c0_13 = arith.constant 0 : index
    %14 = vector.load %arg14[%c0_12, %c0_13] : memref<128x64xf32, #tpu.memory_space<vmem>>, vector<128x64xf32>
    tpu.vector_store %arg14[%c0_12, %c0_13], %13 {strides = array<i32>} : memref<128x64xf32, #tpu.memory_space<vmem>>, vector<128x64xf32>,
    %c2 = arith.constant 2 : index
    %c0_14 = arith.constant 0 : index
    %15 = vector.load %arg11[%c2, %c0_14] : memref<4x64xf32, #tpu.memory_space<vmem>>, vector<1x64xf32>
    %16 = vector.broadcast %15 : vector<1x64xf32> to vector<128x64xf32>
    %17 = arith.addf %10, %16 : vector<128x64xf32>
    %c0_15 = arith.constant 0 : index
    %c0_16 = arith.constant 0 : index
    %18 = vector.load %arg15[%c0_15, %c0_16] : memref<128x64xf32, #tpu.memory_space<vmem>>, vector<128x64xf32>
    tpu.vector_store %arg15[%c0_15, %c0_16], %17 {strides = array<i32>} : memref<128x64xf32, #tpu.memory_space<vmem>>, vector<128x64xf32>,
    %c0_17 = arith.constant 0 : index
    %c0_18 = arith.constant 0 : index
    %c0_19 = arith.constant 0 : index
    %19 = vector.load %arg3[%c0_17, %c0_18, %c0_19] : memref<1x64x128xi8, #tpu.memory_space<vmem>>, vector<1x64x128xi8>
    %20 = vector.shape_cast %19 : vector<1x64x128xi8> to vector<64x128xi8>
    %21 = arith.sitofp %20 : vector<64x128xi8> to vector<64x128xf32>
    %cst_20 = arith.constant 0.000000e+00 : f32
    %22 = vector.broadcast %cst_20 : f32 to vector<64x128xf32>
    %23 = arith.cmpf oeq, %21, %22 : vector<64x128xf32>
    %c0_21 = arith.constant 0 : index
    %c0_22 = arith.constant 0 : index
    %24 = vector.load %arg13[%c0_21, %c0_22] : memref<64x64xf32, #tpu.memory_space<vmem>>, vector<64x16xf32>
    %c0_23 = arith.constant 0 : index
    %c0_24 = arith.constant 0 : index
    %25 = vector.load %arg14[%c0_23, %c0_24] : memref<128x64xf32, #tpu.memory_space<vmem>>, vector<128x16xf32>
    %cst_25 = arith.constant dense<0.000000e+00> : vector<64x128xf32>
    %26 = tpu.matmul %24, %25, %cst_25 {dimension_numbers = #tpu.dot_dimension_numbers<[1], [1], [0], [0], [0, 0, 1, 0], [], []>} : vector<64x16xf32>, vector<128x16xf32>, vector<64x128xf32> -> vector<64x128xf32>
    %cst_26 = arith.constant -1.250000e+19 : f32
    %27 = vector.broadcast %cst_26 : f32 to vector<64x128xf32>
    %28 = arith.select %23, %27, %26 : vector<64x128xi1>, vector<64x128xf32>
    %c0_27 = arith.constant 0 : index
    %c0_28 = arith.constant 0 : index
    %c0_29 = arith.constant 0 : index
    %29 = vector.load %arg16[%c0_27, %c0_28, %c0_29] : memref<4x64x1xf32, #tpu.memory_space<vmem>>, vector<1x64x1xf32>
    %30 = vector.shape_cast %29 : vector<1x64x1xf32> to vector<64x1xf32>
    %cst_30 = arith.constant dense<0xFF800000> : vector<64xf32>
    %31 = vector.multi_reduction <maximumf>, %28, %cst_30 [1] : vector<64x128xf32> to vector<64xf32>
    %32 = vector.shape_cast %31 : vector<64xf32> to vector<64x1xf32>
    %33 = arith.maximumf %30, %32 : vector<64x1xf32>
    %34 = arith.subf %30, %33 : vector<64x1xf32>
    %35 = math.exp %34 : vector<64x1xf32>
    %36 = vector.broadcast %33 : vector<64x1xf32> to vector<64x128xf32>
    %37 = arith.subf %28, %36 : vector<64x128xf32>
    %38 = math.exp %37 : vector<64x128xf32>
    %c0_31 = arith.constant 0 : index
    %c0_32 = arith.constant 0 : index
    %c0_33 = arith.constant 0 : index
    %39 = vector.load %arg17[%c0_31, %c0_32, %c0_33] : memref<4x64x1xf32, #tpu.memory_space<vmem>>, vector<1x64x1xf32>
    %40 = vector.shape_cast %39 : vector<1x64x1xf32> to vector<64x1xf32>
    %41 = arith.mulf %35, %40 : vector<64x1xf32>
    %cst_34 = arith.constant dense<0.000000e+00> : vector<64xf32>
    %42 = vector.multi_reduction <add>, %38, %cst_34 [1] : vector<64x128xf32> to vector<64xf32>
    %43 = vector.shape_cast %42 : vector<64xf32> to vector<64x1xf32>
    %44 = arith.addf %41, %43 : vector<64x1xf32>
    %c0_35 = arith.constant 0 : index
    %c0_36 = arith.constant 0 : index
    %c0_37 = arith.constant 0 : index
    %45 = vector.load %arg17[%c0_35, %c0_36, %c0_37] : memref<4x64x1xf32, #tpu.memory_space<vmem>>, vector<1x64x1xf32>
    %46 = vector.shape_cast %45 : vector<1x64x1xf32> to vector<64x1xf32>
    %47 = vector.shape_cast %44 : vector<64x1xf32> to vector<1x64x1xf32>
    tpu.vector_store %arg17[%c0_35, %c0_36, %c0_37], %47 {strides = array<i32>} : memref<4x64x1xf32, #tpu.memory_space<vmem>>, vector<1x64x1xf32>,
    %c0_38 = arith.constant 0 : index
    %c0_39 = arith.constant 0 : index
    %48 = vector.load %arg18[%c0_38, %c0_39] : memref<64x64xf32, #tpu.memory_space<vmem>>, vector<64x16xf32>
    %49 = vector.broadcast %35 : vector<64x1xf32> to vector<64x16xf32>
    %50 = arith.mulf %49, %48 : vector<64x16xf32>
    %c0_40 = arith.constant 0 : index
    %c0_41 = arith.constant 0 : index
    %51 = vector.load %arg15[%c0_40, %c0_41] : memref<128x64xf32, #tpu.memory_space<vmem>>, vector<128x16xf32>
    %cst_42 = arith.constant dense<0.000000e+00> : vector<64x16xf32>
    %52 = tpu.matmul %38, %51, %cst_42 {dimension_numbers = #tpu.dot_dimension_numbers<[1], [0], [0], [1], [0, 0, 1, 1], [], []>} : vector<64x128xf32>, vector<128x16xf32>, vector<64x16xf32> -> vector<64x16xf32>
    %53 = arith.addf %50, %52 : vector<64x16xf32>
    %c0_43 = arith.constant 0 : index
    %c0_44 = arith.constant 0 : index
    %54 = vector.load %arg18[%c0_43, %c0_44] : memref<64x64xf32, #tpu.memory_space<vmem>>, vector<64x16xf32>
    tpu.vector_store %arg18[%c0_43, %c0_44], %53 {strides = array<i32>} : memref<64x64xf32, #tpu.memory_space<vmem>>, vector<64x16xf32>,
    %c0_45 = arith.constant 0 : index
    %c0_46 = arith.constant 0 : index
    %c0_47 = arith.constant 0 : index
    %55 = vector.load %arg16[%c0_45, %c0_46, %c0_47] : memref<4x64x1xf32, #tpu.memory_space<vmem>>, vector<1x64x1xf32>
    %56 = vector.shape_cast %55 : vector<1x64x1xf32> to vector<64x1xf32>
    %57 = vector.shape_cast %33 : vector<64x1xf32> to vector<1x64x1xf32>
    tpu.vector_store %arg16[%c0_45, %c0_46, %c0_47], %57 {strides = array<i32>} : memref<4x64x1xf32, #tpu.memory_space<vmem>>, vector<1x64x1xf32>,
    %c0_48 = arith.constant 0 : index
    %c16 = arith.constant 16 : index
    %58 = vector.load %arg13[%c0_48, %c16] : memref<64x64xf32, #tpu.memory_space<vmem>>, vector<64x16xf32>
    %c0_49 = arith.constant 0 : index
    %c16_50 = arith.constant 16 : index
    %59 = vector.load %arg14[%c0_49, %c16_50] : memref<128x64xf32, #tpu.memory_space<vmem>>, vector<128x16xf32>
    %cst_51 = arith.constant dense<0.000000e+00> : vector<64x128xf32>
    %60 = tpu.matmul %58, %59, %cst_51 {dimension_numbers = #tpu.dot_dimension_numbers<[1], [1], [0], [0], [0, 0, 1, 0], [], []>} : vector<64x16xf32>, vector<128x16xf32>, vector<64x128xf32> -> vector<64x128xf32>
    %cst_52 = arith.constant -1.250000e+19 : f32
    %61 = vector.broadcast %cst_52 : f32 to vector<64x128xf32>
    %62 = arith.select %23, %61, %60 : vector<64x128xi1>, vector<64x128xf32>
    %c1_53 = arith.constant 1 : index
    %c0_54 = arith.constant 0 : index
    %c0_55 = arith.constant 0 : index
    %63 = vector.load %arg16[%c1_53, %c0_54, %c0_55] : memref<4x64x1xf32, #tpu.memory_space<vmem>>, vector<1x64x1xf32>
    %64 = vector.shape_cast %63 : vector<1x64x1xf32> to vector<64x1xf32>
    %cst_56 = arith.constant dense<0xFF800000> : vector<64xf32>
    %65 = vector.multi_reduction <maximumf>, %62, %cst_56 [1] : vector<64x128xf32> to vector<64xf32>
    %66 = vector.shape_cast %65 : vector<64xf32> to vector<64x1xf32>
    %67 = arith.maximumf %64, %66 : vector<64x1xf32>
    %68 = arith.subf %64, %67 : vector<64x1xf32>
    %69 = math.exp %68 : vector<64x1xf32>
    %70 = vector.broadcast %67 : vector<64x1xf32> to vector<64x128xf32>
    %71 = arith.subf %62, %70 : vector<64x128xf32>
    %72 = math.exp %71 : vector<64x128xf32>
    %c1_57 = arith.constant 1 : index
    %c0_58 = arith.constant 0 : index
    %c0_59 = arith.constant 0 : index
    %73 = vector.load %arg17[%c1_57, %c0_58, %c0_59] : memref<4x64x1xf32, #tpu.memory_space<vmem>>, vector<1x64x1xf32>
    %74 = vector.shape_cast %73 : vector<1x64x1xf32> to vector<64x1xf32>
    %75 = arith.mulf %69, %74 : vector<64x1xf32>
    %cst_60 = arith.constant dense<0.000000e+00> : vector<64xf32>
    %76 = vector.multi_reduction <add>, %72, %cst_60 [1] : vector<64x128xf32> to vector<64xf32>
    %77 = vector.shape_cast %76 : vector<64xf32> to vector<64x1xf32>
    %78 = arith.addf %75, %77 : vector<64x1xf32>
    %c1_61 = arith.constant 1 : index
    %c0_62 = arith.constant 0 : index
    %c0_63 = arith.constant 0 : index
    %79 = vector.load %arg17[%c1_61, %c0_62, %c0_63] : memref<4x64x1xf32, #tpu.memory_space<vmem>>, vector<1x64x1xf32>
    %80 = vector.shape_cast %79 : vector<1x64x1xf32> to vector<64x1xf32>
    %81 = vector.shape_cast %78 : vector<64x1xf32> to vector<1x64x1xf32>
    tpu.vector_store %arg17[%c1_61, %c0_62, %c0_63], %81 {strides = array<i32>} : memref<4x64x1xf32, #tpu.memory_space<vmem>>, vector<1x64x1xf32>,
    %c0_64 = arith.constant 0 : index
    %c16_65 = arith.constant 16 : index
    %82 = vector.load %arg18[%c0_64, %c16_65] : memref<64x64xf32, #tpu.memory_space<vmem>>, vector<64x16xf32>
    %83 = vector.broadcast %69 : vector<64x1xf32> to vector<64x16xf32>
    %84 = arith.mulf %83, %82 : vector<64x16xf32>
    %c0_66 = arith.constant 0 : index
    %c16_67 = arith.constant 16 : index
    %85 = vector.load %arg15[%c0_66, %c16_67] : memref<128x64xf32, #tpu.memory_space<vmem>>, vector<128x16xf32>
    %cst_68 = arith.constant dense<0.000000e+00> : vector<64x16xf32>
    %86 = tpu.matmul %72, %85, %cst_68 {dimension_numbers = #tpu.dot_dimension_numbers<[1], [0], [0], [1], [0, 0, 1, 1], [], []>} : vector<64x128xf32>, vector<128x16xf32>, vector<64x16xf32> -> vector<64x16xf32>
    %87 = arith.addf %84, %86 : vector<64x16xf32>
    %c0_69 = arith.constant 0 : index
    %c16_70 = arith.constant 16 : index
    %88 = vector.load %arg18[%c0_69, %c16_70] : memref<64x64xf32, #tpu.memory_space<vmem>>, vector<64x16xf32>
    tpu.vector_store %arg18[%c0_69, %c16_70], %87 {strides = array<i32>} : memref<64x64xf32, #tpu.memory_space<vmem>>, vector<64x16xf32>,
    %c1_71 = arith.constant 1 : index
    %c0_72 = arith.constant 0 : index
    %c0_73 = arith.constant 0 : index
    %89 = vector.load %arg16[%c1_71, %c0_72, %c0_73] : memref<4x64x1xf32, #tpu.memory_space<vmem>>, vector<1x64x1xf32>
    %90 = vector.shape_cast %89 : vector<1x64x1xf32> to vector<64x1xf32>
    %91 = vector.shape_cast %67 : vector<64x1xf32> to vector<1x64x1xf32>
    tpu.vector_store %arg16[%c1_71, %c0_72, %c0_73], %91 {strides = array<i32>} : memref<4x64x1xf32, #tpu.memory_space<vmem>>, vector<1x64x1xf32>,
    %c0_74 = arith.constant 0 : index
    %c32 = arith.constant 32 : index
    %92 = vector.load %arg13[%c0_74, %c32] : memref<64x64xf32, #tpu.memory_space<vmem>>, vector<64x16xf32>
    %c0_75 = arith.constant 0 : index
    %c32_76 = arith.constant 32 : index
    %93 = vector.load %arg14[%c0_75, %c32_76] : memref<128x64xf32, #tpu.memory_space<vmem>>, vector<128x16xf32>
    %cst_77 = arith.constant dense<0.000000e+00> : vector<64x128xf32>
    %94 = tpu.matmul %92, %93, %cst_77 {dimension_numbers = #tpu.dot_dimension_numbers<[1], [1], [0], [0], [0, 0, 1, 0], [], []>} : vector<64x16xf32>, vector<128x16xf32>, vector<64x128xf32> -> vector<64x128xf32>
    %cst_78 = arith.constant -1.250000e+19 : f32
    %95 = vector.broadcast %cst_78 : f32 to vector<64x128xf32>
    %96 = arith.select %23, %95, %94 : vector<64x128xi1>, vector<64x128xf32>
    %c2_79 = arith.constant 2 : index
    %c0_80 = arith.constant 0 : index
    %c0_81 = arith.constant 0 : index
    %97 = vector.load %arg16[%c2_79, %c0_80, %c0_81] : memref<4x64x1xf32, #tpu.memory_space<vmem>>, vector<1x64x1xf32>
    %98 = vector.shape_cast %97 : vector<1x64x1xf32> to vector<64x1xf32>
    %cst_82 = arith.constant dense<0xFF800000> : vector<64xf32>
    %99 = vector.multi_reduction <maximumf>, %96, %cst_82 [1] : vector<64x128xf32> to vector<64xf32>
    %100 = vector.shape_cast %99 : vector<64xf32> to vector<64x1xf32>
    %101 = arith.maximumf %98, %100 : vector<64x1xf32>
    %102 = arith.subf %98, %101 : vector<64x1xf32>
    %103 = math.exp %102 : vector<64x1xf32>
    %104 = vector.broadcast %101 : vector<64x1xf32> to vector<64x128xf32>
    %105 = arith.subf %96, %104 : vector<64x128xf32>
    %106 = math.exp %105 : vector<64x128xf32>
    %c2_83 = arith.constant 2 : index
    %c0_84 = arith.constant 0 : index
    %c0_85 = arith.constant 0 : index
    %107 = vector.load %arg17[%c2_83, %c0_84, %c0_85] : memref<4x64x1xf32, #tpu.memory_space<vmem>>, vector<1x64x1xf32>
    %108 = vector.shape_cast %107 : vector<1x64x1xf32> to vector<64x1xf32>
    %109 = arith.mulf %103, %108 : vector<64x1xf32>
    %cst_86 = arith.constant dense<0.000000e+00> : vector<64xf32>
    %110 = vector.multi_reduction <add>, %106, %cst_86 [1] : vector<64x128xf32> to vector<64xf32>
    %111 = vector.shape_cast %110 : vector<64xf32> to vector<64x1xf32>
    %112 = arith.addf %109, %111 : vector<64x1xf32>
    %c2_87 = arith.constant 2 : index
    %c0_88 = arith.constant 0 : index
    %c0_89 = arith.constant 0 : index
    %113 = vector.load %arg17[%c2_87, %c0_88, %c0_89] : memref<4x64x1xf32, #tpu.memory_space<vmem>>, vector<1x64x1xf32>
    %114 = vector.shape_cast %113 : vector<1x64x1xf32> to vector<64x1xf32>
    %115 = vector.shape_cast %112 : vector<64x1xf32> to vector<1x64x1xf32>
    tpu.vector_store %arg17[%c2_87, %c0_88, %c0_89], %115 {strides = array<i32>} : memref<4x64x1xf32, #tpu.memory_space<vmem>>, vector<1x64x1xf32>,
    %c0_90 = arith.constant 0 : index
    %c32_91 = arith.constant 32 : index
    %116 = vector.load %arg18[%c0_90, %c32_91] : memref<64x64xf32, #tpu.memory_space<vmem>>, vector<64x16xf32>
    %117 = vector.broadcast %103 : vector<64x1xf32> to vector<64x16xf32>
    %118 = arith.mulf %117, %116 : vector<64x16xf32>
    %c0_92 = arith.constant 0 : index
    %c32_93 = arith.constant 32 : index
    %119 = vector.load %arg15[%c0_92, %c32_93] : memref<128x64xf32, #tpu.memory_space<vmem>>, vector<128x16xf32>
    %cst_94 = arith.constant dense<0.000000e+00> : vector<64x16xf32>
    %120 = tpu.matmul %106, %119, %cst_94 {dimension_numbers = #tpu.dot_dimension_numbers<[1], [0], [0], [1], [0, 0, 1, 1], [], []>} : vector<64x128xf32>, vector<128x16xf32>, vector<64x16xf32> -> vector<64x16xf32>
    %121 = arith.addf %118, %120 : vector<64x16xf32>
    %c0_95 = arith.constant 0 : index
    %c32_96 = arith.constant 32 : index
    %122 = vector.load %arg18[%c0_95, %c32_96] : memref<64x64xf32, #tpu.memory_space<vmem>>, vector<64x16xf32>
    tpu.vector_store %arg18[%c0_95, %c32_96], %121 {strides = array<i32>} : memref<64x64xf32, #tpu.memory_space<vmem>>, vector<64x16xf32>,
    %c2_97 = arith.constant 2 : index
    %c0_98 = arith.constant 0 : index
    %c0_99 = arith.constant 0 : index
    %123 = vector.load %arg16[%c2_97, %c0_98, %c0_99] : memref<4x64x1xf32, #tpu.memory_space<vmem>>, vector<1x64x1xf32>
    %124 = vector.shape_cast %123 : vector<1x64x1xf32> to vector<64x1xf32>
    %125 = vector.shape_cast %101 : vector<64x1xf32> to vector<1x64x1xf32>
    tpu.vector_store %arg16[%c2_97, %c0_98, %c0_99], %125 {strides = array<i32>} : memref<4x64x1xf32, #tpu.memory_space<vmem>>, vector<1x64x1xf32>,
    %c0_100 = arith.constant 0 : index
    %c48 = arith.constant 48 : index
    %126 = vector.load %arg13[%c0_100, %c48] : memref<64x64xf32, #tpu.memory_space<vmem>>, vector<64x16xf32>
    %c0_101 = arith.constant 0 : index
    %c48_102 = arith.constant 48 : index
    %127 = vector.load %arg14[%c0_101, %c48_102] : memref<128x64xf32, #tpu.memory_space<vmem>>, vector<128x16xf32>
    %cst_103 = arith.constant dense<0.000000e+00> : vector<64x128xf32>
    %128 = tpu.matmul %126, %127, %cst_103 {dimension_numbers = #tpu.dot_dimension_numbers<[1], [1], [0], [0], [0, 0, 1, 0], [], []>} : vector<64x16xf32>, vector<128x16xf32>, vector<64x128xf32> -> vector<64x128xf32>
    %cst_104 = arith.constant -1.250000e+19 : f32
    %129 = vector.broadcast %cst_104 : f32 to vector<64x128xf32>
    %130 = arith.select %23, %129, %128 : vector<64x128xi1>, vector<64x128xf32>
    %c3 = arith.constant 3 : index
    %c0_105 = arith.constant 0 : index
    %c0_106 = arith.constant 0 : index
    %131 = vector.load %arg16[%c3, %c0_105, %c0_106] : memref<4x64x1xf32, #tpu.memory_space<vmem>>, vector<1x64x1xf32>
    %132 = vector.shape_cast %131 : vector<1x64x1xf32> to vector<64x1xf32>
    %cst_107 = arith.constant dense<0xFF800000> : vector<64xf32>
    %133 = vector.multi_reduction <maximumf>, %130, %cst_107 [1] : vector<64x128xf32> to vector<64xf32>
    %134 = vector.shape_cast %133 : vector<64xf32> to vector<64x1xf32>
    %135 = arith.maximumf %132, %134 : vector<64x1xf32>
    %136 = arith.subf %132, %135 : vector<64x1xf32>
    %137 = math.exp %136 : vector<64x1xf32>
    %138 = vector.broadcast %135 : vector<64x1xf32> to vector<64x128xf32>
    %139 = arith.subf %130, %138 : vector<64x128xf32>
    %140 = math.exp %139 : vector<64x128xf32>
    %c3_108 = arith.constant 3 : index
    %c0_109 = arith.constant 0 : index
    %c0_110 = arith.constant 0 : index
    %141 = vector.load %arg17[%c3_108, %c0_109, %c0_110] : memref<4x64x1xf32, #tpu.memory_space<vmem>>, vector<1x64x1xf32>
    %142 = vector.shape_cast %141 : vector<1x64x1xf32> to vector<64x1xf32>
    %143 = arith.mulf %137, %142 : vector<64x1xf32>
    %cst_111 = arith.constant dense<0.000000e+00> : vector<64xf32>
    %144 = vector.multi_reduction <add>, %140, %cst_111 [1] : vector<64x128xf32> to vector<64xf32>
    %145 = vector.shape_cast %144 : vector<64xf32> to vector<64x1xf32>
    %146 = arith.addf %143, %145 : vector<64x1xf32>
    %c3_112 = arith.constant 3 : index
    %c0_113 = arith.constant 0 : index
    %c0_114 = arith.constant 0 : index
    %147 = vector.load %arg17[%c3_112, %c0_113, %c0_114] : memref<4x64x1xf32, #tpu.memory_space<vmem>>, vector<1x64x1xf32>
    %148 = vector.shape_cast %147 : vector<1x64x1xf32> to vector<64x1xf32>
    %149 = vector.shape_cast %146 : vector<64x1xf32> to vector<1x64x1xf32>
    tpu.vector_store %arg17[%c3_112, %c0_113, %c0_114], %149 {strides = array<i32>} : memref<4x64x1xf32, #tpu.memory_space<vmem>>, vector<1x64x1xf32>,
    %c0_115 = arith.constant 0 : index
    %c48_116 = arith.constant 48 : index
    %150 = vector.load %arg18[%c0_115, %c48_116] : memref<64x64xf32, #tpu.memory_space<vmem>>, vector<64x16xf32>
    %151 = vector.broadcast %137 : vector<64x1xf32> to vector<64x16xf32>
    %152 = arith.mulf %151, %150 : vector<64x16xf32>
    %c0_117 = arith.constant 0 : index
    %c48_118 = arith.constant 48 : index
    %153 = vector.load %arg15[%c0_117, %c48_118] : memref<128x64xf32, #tpu.memory_space<vmem>>, vector<128x16xf32>
    %cst_119 = arith.constant dense<0.000000e+00> : vector<64x16xf32>
    %154 = tpu.matmul %140, %153, %cst_119 {dimension_numbers = #tpu.dot_dimension_numbers<[1], [0], [0], [1], [0, 0, 1, 1], [], []>} : vector<64x128xf32>, vector<128x16xf32>, vector<64x16xf32> -> vector<64x16xf32>
    %155 = arith.addf %152, %154 : vector<64x16xf32>
    %c0_120 = arith.constant 0 : index
    %c48_121 = arith.constant 48 : index
    %156 = vector.load %arg18[%c0_120, %c48_121] : memref<64x64xf32, #tpu.memory_space<vmem>>, vector<64x16xf32>
    tpu.vector_store %arg18[%c0_120, %c48_121], %155 {strides = array<i32>} : memref<64x64xf32, #tpu.memory_space<vmem>>, vector<64x16xf32>,
    %c3_122 = arith.constant 3 : index
    %c0_123 = arith.constant 0 : index
    %c0_124 = arith.constant 0 : index
    %157 = vector.load %arg16[%c3_122, %c0_123, %c0_124] : memref<4x64x1xf32, #tpu.memory_space<vmem>>, vector<1x64x1xf32>
    %158 = vector.shape_cast %157 : vector<1x64x1xf32> to vector<64x1xf32>
    %159 = vector.shape_cast %135 : vector<64x1xf32> to vector<1x64x1xf32>
    tpu.vector_store %arg16[%c3_122, %c0_123, %c0_124], %159 {strides = array<i32>} : memref<4x64x1xf32, #tpu.memory_space<vmem>>, vector<1x64x1xf32>,
    %c1_i32 = arith.constant 1 : i32
    %160 = arith.cmpi eq, %arg2, %c1_i32 : i32
    %161 = arith.extui %160 : i1 to i32
    %c0_i32_125 = arith.constant 0 : i32
    %162 = arith.cmpi ne, %161, %c0_i32_125 : i32
    scf.if %162 {
      %c0_126 = arith.constant 0 : index
      %c0_127 = arith.constant 0 : index
      %c0_128 = arith.constant 0 : index
      %163 = vector.load %arg17[%c0_126, %c0_127, %c0_128] : memref<4x64x1xf32, #tpu.memory_space<vmem>>, vector<1x64x1xf32>
      %164 = vector.shape_cast %163 : vector<1x64x1xf32> to vector<64x1xf32>
      %165 = tpu.reciprocal %164 {approx = true} : vector<64x1xf32> -> vector<64x1xf32>
      %c0_129 = arith.constant 0 : index
      %c0_130 = arith.constant 0 : index
      %166 = vector.load %arg18[%c0_129, %c0_130] : memref<64x64xf32, #tpu.memory_space<vmem>>, vector<64x16xf32>
      %167 = vector.broadcast %165 : vector<64x1xf32> to vector<64x16xf32>
      %168 = arith.mulf %166, %167 : vector<64x16xf32>
      %c0_131 = arith.constant 0 : index
      %c0_132 = arith.constant 0 : index
      %169 = vector.load %arg18[%c0_131, %c0_132] : memref<64x64xf32, #tpu.memory_space<vmem>>, vector<64x16xf32>
      tpu.vector_store %arg18[%c0_131, %c0_132], %168 {strides = array<i32>} : memref<64x64xf32, #tpu.memory_space<vmem>>, vector<64x16xf32>,
      %c1_133 = arith.constant 1 : index
      %c0_134 = arith.constant 0 : index
      %c0_135 = arith.constant 0 : index
      %170 = vector.load %arg17[%c1_133, %c0_134, %c0_135] : memref<4x64x1xf32, #tpu.memory_space<vmem>>, vector<1x64x1xf32>
      %171 = vector.shape_cast %170 : vector<1x64x1xf32> to vector<64x1xf32>
      %172 = tpu.reciprocal %171 {approx = true} : vector<64x1xf32> -> vector<64x1xf32>
      %c0_136 = arith.constant 0 : index
      %c16_137 = arith.constant 16 : index
      %173 = vector.load %arg18[%c0_136, %c16_137] : memref<64x64xf32, #tpu.memory_space<vmem>>, vector<64x16xf32>
      %174 = vector.broadcast %172 : vector<64x1xf32> to vector<64x16xf32>
      %175 = arith.mulf %173, %174 : vector<64x16xf32>
      %c0_138 = arith.constant 0 : index
      %c16_139 = arith.constant 16 : index
      %176 = vector.load %arg18[%c0_138, %c16_139] : memref<64x64xf32, #tpu.memory_space<vmem>>, vector<64x16xf32>
      tpu.vector_store %arg18[%c0_138, %c16_139], %175 {strides = array<i32>} : memref<64x64xf32, #tpu.memory_space<vmem>>, vector<64x16xf32>,
      %c2_140 = arith.constant 2 : index
      %c0_141 = arith.constant 0 : index
      %c0_142 = arith.constant 0 : index
      %177 = vector.load %arg17[%c2_140, %c0_141, %c0_142] : memref<4x64x1xf32, #tpu.memory_space<vmem>>, vector<1x64x1xf32>
      %178 = vector.shape_cast %177 : vector<1x64x1xf32> to vector<64x1xf32>
      %179 = tpu.reciprocal %178 {approx = true} : vector<64x1xf32> -> vector<64x1xf32>
      %c0_143 = arith.constant 0 : index
      %c32_144 = arith.constant 32 : index
      %180 = vector.load %arg18[%c0_143, %c32_144] : memref<64x64xf32, #tpu.memory_space<vmem>>, vector<64x16xf32>
      %181 = vector.broadcast %179 : vector<64x1xf32> to vector<64x16xf32>
      %182 = arith.mulf %180, %181 : vector<64x16xf32>
      %c0_145 = arith.constant 0 : index
      %c32_146 = arith.constant 32 : index
      %183 = vector.load %arg18[%c0_145, %c32_146] : memref<64x64xf32, #tpu.memory_space<vmem>>, vector<64x16xf32>
      tpu.vector_store %arg18[%c0_145, %c32_146], %182 {strides = array<i32>} : memref<64x64xf32, #tpu.memory_space<vmem>>, vector<64x16xf32>,
      %c3_147 = arith.constant 3 : index
      %c0_148 = arith.constant 0 : index
      %c0_149 = arith.constant 0 : index
      %184 = vector.load %arg17[%c3_147, %c0_148, %c0_149] : memref<4x64x1xf32, #tpu.memory_space<vmem>>, vector<1x64x1xf32>
      %185 = vector.shape_cast %184 : vector<1x64x1xf32> to vector<64x1xf32>
      %186 = tpu.reciprocal %185 {approx = true} : vector<64x1xf32> -> vector<64x1xf32>
      %c0_150 = arith.constant 0 : index
      %c48_151 = arith.constant 48 : index
      %187 = vector.load %arg18[%c0_150, %c48_151] : memref<64x64xf32, #tpu.memory_space<vmem>>, vector<64x16xf32>
      %188 = vector.broadcast %186 : vector<64x1xf32> to vector<64x16xf32>
      %189 = arith.mulf %187, %188 : vector<64x16xf32>
      %c0_152 = arith.constant 0 : index
      %c48_153 = arith.constant 48 : index
      %190 = vector.load %arg18[%c0_152, %c48_153] : memref<64x64xf32, #tpu.memory_space<vmem>>, vector<64x16xf32>
      tpu.vector_store %arg18[%c0_152, %c48_153], %189 {strides = array<i32>} : memref<64x64xf32, #tpu.memory_space<vmem>>, vector<64x16xf32>,
      %c0_154 = arith.constant 0 : index
      %c0_155 = arith.constant 0 : index
      %191 = vector.load %arg18[%c0_154, %c0_155] : memref<64x64xf32, #tpu.memory_space<vmem>>, vector<64x64xf32>
      %c0_156 = arith.constant 0 : index
      %c0_157 = arith.constant 0 : index
      %192 = vector.load %arg10[%c0_156, %c0_157] : memref<64x64xf32, #tpu.memory_space<vmem>>, vector<64x64xf32>
      %cst_158 = arith.constant dense<0.000000e+00> : vector<64x64xf32>
      %193 = tpu.matmul %191, %192, %cst_158 {dimension_numbers = #tpu.dot_dimension_numbers<[1], [0], [0], [1], [0, 0, 1, 1], [], []>} : vector<64x64xf32>, vector<64x64xf32>, vector<64x64xf32> -> vector<64x64xf32>
      %c3_159 = arith.constant 3 : index
      %c0_160 = arith.constant 0 : index
      %194 = vector.load %arg11[%c3_159, %c0_160] : memref<4x64xf32, #tpu.memory_space<vmem>>, vector<1x64xf32>
      %195 = vector.broadcast %194 : vector<1x64xf32> to vector<64x64xf32>
      %196 = arith.addf %193, %195 : vector<64x64xf32>
      %c0_161 = arith.constant 0 : index
      %c0_162 = arith.constant 0 : index
      %c0_163 = arith.constant 0 : index
      %197 = vector.load %arg12[%c0_161, %c0_162, %c0_163] : memref<1x64x64xf32, #tpu.memory_space<vmem>>, vector<1x64x64xf32>
      %198 = vector.shape_cast %197 : vector<1x64x64xf32> to vector<64x64xf32>
      %199 = vector.shape_cast %196 : vector<64x64xf32> to vector<1x64x64xf32>
      tpu.vector_store %arg12[%c0_161, %c0_162, %c0_163], %199 {strides = array<i32>} : memref<1x64x64xf32, #tpu.memory_space<vmem>>, vector<1x64x64xf32>,
    } else {
    }
    return
  }
  func.func @transform_0(%arg0: i32, %arg1: i32, %arg2: i32) -> (i32, i32, i32) {
    %c0_i32 = arith.constant 0 : i32
    return %arg0, %arg1, %arg2 : i32, i32, i32
  }
  func.func @transform_1(%arg0: i32, %arg1: i32, %arg2: i32) -> (i32, i32, i32) {
    %c0_i32 = arith.constant 0 : i32
    %c0_i32_0 = arith.constant 0 : i32
    return %arg0, %arg1, %c0_i32 : i32, i32, i32
  }
  func.func @transform_2(%arg0: i32, %arg1: i32, %arg2: i32) -> (i32, i32, i32) {
    %c0_i32 = arith.constant 0 : i32
    %c0_i32_0 = arith.constant 0 : i32
    return %arg0, %arg2, %c0_i32 : i32, i32, i32
  }
  func.func @transform_3(%arg0: i32, %arg1: i32, %arg2: i32) -> (i32, i32, i32) {
    %c0_i32 = arith.constant 0 : i32
    %c0_i32_0 = arith.constant 0 : i32
    return %arg0, %arg2, %c0_i32 : i32, i32, i32
  }
  func.func @transform_4(%arg0: i32, %arg1: i32, %arg2: i32) -> (i32, i32) {
    %c0_i32 = arith.constant 0 : i32
    %c0_i32_0 = arith.constant 0 : i32
    %c0_i32_1 = arith.constant 0 : i32
    return %c0_i32, %c0_i32_0 : i32, i32
  }
  func.func @transform_5(%arg0: i32, %arg1: i32, %arg2: i32) -> (i32, i32) {
    %c0_i32 = arith.constant 0 : i32
    %c0_i32_0 = arith.constant 0 : i32
    %c0_i32_1 = arith.constant 0 : i32
    return %c0_i32, %c0_i32_0 : i32, i32
  }
  func.func @transform_6(%arg0: i32, %arg1: i32, %arg2: i32) -> (i32, i32) {
    %c0_i32 = arith.constant 0 : i32
    %c0_i32_0 = arith.constant 0 : i32
    %c0_i32_1 = arith.constant 0 : i32
    return %c0_i32, %c0_i32_0 : i32, i32
  }
  func.func @transform_7(%arg0: i32, %arg1: i32, %arg2: i32) -> (i32, i32) {
    %c0_i32 = arith.constant 0 : i32
    %c0_i32_0 = arith.constant 0 : i32
    %c0_i32_1 = arith.constant 0 : i32
    return %c0_i32, %c0_i32_0 : i32, i32
  }
  func.func @transform_8(%arg0: i32, %arg1: i32, %arg2: i32) -> (i32, i32) {
    %c0_i32 = arith.constant 0 : i32
    %c0_i32_0 = arith.constant 0 : i32
    %c0_i32_1 = arith.constant 0 : i32
    return %c0_i32, %c0_i32_0 : i32, i32
  }
  func.func @transform_9(%arg0: i32, %arg1: i32, %arg2: i32) -> (i32, i32, i32) {
    %c0_i32 = arith.constant 0 : i32
    %c0_i32_0 = arith.constant 0 : i32
    return %arg0, %arg1, %c0_i32 : i32, i32, i32
  }
}

</mosaic_0001>

<bundles_post_ra>
// kernel: tpu_custom_call.1
= control target key start
LH: loop header
LB: loop body
LE: loop exit
PB: predicated region body
PF: predicated region fallthrough
CT: control target
= control target key end

     0   :  { %s8226_s0 = inlined_call_operand.vmem [shape: s8[2,128,256], index: 0, kind: input, shape index: {}]   ;;  %s8227_s1 = inlined_call_operand.vmem [shape: f32[2,128,64], index: 1, kind: input, shape index: {}]   ;;  %s8228_s2 = inlined_call_operand.vmem [shape: f32[2,256,64], index: 2, kind: input, shape index: {}]   ;;  %s8229_s3 = inlined_call_operand.vmem [shape: f32[2,256,64], index: 3, kind: input, shape index: {}]   ;;  %s8230_s4 = inlined_call_operand.vmem [shape: f32[64,64], index: 4, kind: input, shape index: {}]   ;;  %s8231_s5 = inlined_call_operand.vmem [shape: f32[64,64], index: 5, kind: input, shape index: {}]   ;;  %s8232_s6 = inlined_call_operand.vmem [shape: f32[64,64], index: 6, kind: input, shape index: {}]   ;;  %s8233_s7 = inlined_call_operand.vmem [shape: f32[64,64], index: 7, kind: input, shape index: {}]   ;;  %s8234_s8 = inlined_call_operand.vmem [shape: f32[4,64], index: 8, kind: input, shape index: {}]   ;;  %s8235_s9 = inlined_call_operand.vmem [shape: f32[2,128,64], index: 9, kind: output, shape index: {}]  }
   0x1   :  { %8293 = sst [smem:[#allocation78_spill]] %s8226_s0 }
   0x2   :  { %s6036_s30 = smov 0   ;;  %s6038_s10 = smov 0  }
   0x3   :  { %s6040_s11 = smov 0   ;;  %s6042_s12 = smov 0  }
   0x4   :  { %s6044_s13 = smov 0   ;;  %s6046_s14 = smov 0  }
   0x5   :  { %s6048_s15 = smov 0   ;;  %s6050_s16 = smov 0  }
   0x6   :  { %s6052_s17 = smov 0  }
   0x7 LB: > { %8294 = sst [smem:[#allocation9_spill]] %s5966_s15  ;;  %s31_s18 = sadd.s32 1, %s5962_s14  ;;  %s5974_s17 = sphi %s6052_s17, %s19_s17   ;;  %s5970_s16 = sphi %s6050_s16, %s8479_s16   ;;  %s5966_s15 = sphi %s6048_s15, %s8478_s15   ;;  %s5962_s14 = sphi %s6046_s14, %s8483_s14   ;;  %s5958_s13 = sphi %s6044_s13, %s8476_s13   ;;  %s5954_s12 = sphi %s6042_s12, %s8475_s12   ;;  %s5950_s11 = sphi %s6040_s11, %s8482_s11   ;;  %s5946_s10 = sphi %s6038_s10, %s8481_s10   ;;  %s5942_s30 = sphi %s6036_s30, %s8480_s30  }
   0x8   : > { %8295 = sst [smem:[#allocation10_spill]] %s5970_s16  ;;  %p32_p0 = scmp.ge.s32.totalorder %s31_s18, 2 }
   0x9   : > { %s34_s19 = sadd.s32 1, %s5966_s15  ;;  %p56_p1 = scmp.ne.s32.totalorder %s5946_s10, %s5942_s30 }
   0xa   : > { %s8485_s19 = smov (!%p32_p0, %s34_s19), %s5966_s15  ;;  %p57_p2 = scmp.eq.s32.totalorder %s5974_s17, 0 }
   0xb   : > { %p36_p3 = scmp.ge.s32.totalorder %s8485_s19, 2  ;;  %s38_s20 = sadd.s32 1, %s5970_s16 }
   0xc   : > { %p6088_p4 = por %p57_p2, %p56_p1  ;;  %s8491_s18 = smov (%p32_p0, %s31_s18), 0 }
   0xd   : > { %s8487_s19 = smov (%p36_p3, %s8485_s19), 0  ;;  %s8489_s20 = smov (!%p36_p3, %s38_s20), %s5970_s16 }
   0xe   : > { %8297 = sst [smem:[#allocation11_spill]] %s8487_s19  ;;  %p40_p5 = scmp.ge.s32.totalorder %s8489_s20, 2 }
   0xf   : > { %8298 = sst [smem:[#allocation12_spill]] %s8491_s18  ;;  %s43_s22 = ssub.s32 %s5966_s15, %s8487_s19 }
  0x10   : > { %s8493_s20 = smov (%p40_p5, %s8489_s20), 0  ;;  %s45_s23 = ssub.s32 %s5962_s14, %s8491_s18 }
  0x11   : > { %8299 = sst [smem:[#allocation13_spill]] %s8493_s20  ;;  %s42_s24 = ssub.s32 %s5970_s16, %s8493_s20 }
  0x12   : > { %s44_s25 = sor.u32 %s43_s22, %s42_s24  ;;  %s49_s27 = sadd.s32 1, %s5946_s10 }
  0x13   : > { %s46_s26 = sor.u32 %s45_s23, %s44_s25  ;;  %p4661_p7 = scmp.ge.s32.totalorder %s5974_s17, 8 }
  0x14   : > { %p47_p6 = scmp.eq.s32.totalorder %s46_s26, 0 }
  0x15   : > { %314 = sbr.rel (%p4661_p7) target bundleno = 38 (0x26), region = 36 }
  0x16   : > { %s6107_s28 = scalar_select %p47_p6, %s5946_s10, %s49_s27  }
  0x18   : > { %8300 = sst [smem:[#allocation14_spill]] %s6107_s28 }
  0x1a   : > { %317 = sbr.rel (!%p6088_p4) target bundleno = 38 (0x26), region = 40  ;;  %s319_s29 = sand.u32 (%p6088_p4), 1, %s5946_s10  }
  0x1b   : > { %s4833_s19 = sshll.u32 (%p6088_p4), %s5966_s15, 2  ;;  %s4662_s18 = sshll.u32 (%p6088_p4), %s319_s29, 4 }
  0x1c   : > { %s324_s20 = sadd.s32 (%p6088_p4), %s5962_s14, %s4833_s19  ;;  %s4665_s22 = sshll.u32 (%p6088_p4), %s5970_s16, 3 }
  0x1d   : > { %s326_s23 = sadd.s32 (%p6088_p4), %s4665_s22, %s324_s20  ;;  %s8301_s0 = sld [smem:[#allocation78_spill]] (%p6088_p4) }
  0x1e   : > { %s4666_s24 = sshll.u32 (%p6088_p4), %s326_s23, 3  ;;  %s321_s28 = scalar_lea.vmem (%p6088_p4), [#allocation8], %s4662_s18 }
  0x23   : > { %s328_s27 = scalar_lea.vmem %s8301_s0, %s4666_s24 }
  0x24   : > { %v359_v0 = vld [vmem:[%s328_s27] sm:$0xff]  ;;  %v361_v1 = vld [vmem:[%s328_s27 + $0x10] sm:$0xff] }
  0x25   : > { %360 = vst [vmem:[%s321_s28] sm:$0xff] %v359_v0  ;;  %362 = vst [vmem:[%s321_s28 + $0x8] sm:$0xff] %v361_v1 }
  0x26 PF: > { %p4667_p8 = scmp.ge.s32.totalorder %s5974_s17, 1  ;;  %p406_p9 = scmp.lt.s32.totalorder %s5974_s17, 9 }
  0x28   : > { %p407_p10 = pnand %p4667_p8, %p406_p9 }
  0x2a   : > { %410 = sbr.rel (%p407_p10) target bundleno = 3481 (0xd99), region = 90 }
  0x2f   : > { %s413_s19 = sand.u32 1, %s5942_s30   ;;  %s4669_s20 = sshll.u32 %s5954_s12, 3 }
  0x30   : > { %s6123_s21 = sshll.u32 %s413_s19, 4  ;;  %p481_p11 = scmp.lt.s32.totalorder %s5958_s13, 1 }
  0x31   : > { %p483_p12 = scmp.lt.s32.totalorder %s4669_s20, 15  ;;  %s4672_s28 = sshll.u32 %s5950_s11, 4 }
  0x32   : > { %s8495_s13 = smov (!%p481_p11, %s5958_s13), 1  ;;  %p493_p13 = scmp.lt.s32.totalorder %s4672_s28, 31 }
  0x33   : > { %s8497_s20 = smov (!%p483_p12, %s4669_s20), 15  ;;  %s4670_s18 = sshll.u32 %s8495_s13, 4 }
  0x34   : > { %s486_s29 = sadd.s32 %s4670_s18, %s8497_s20  ;;  %s4673_s23 = sshll.u32 %s8495_s13, 5 }
  0x35   : > { %s4671_s22 = sshll.u32 %s486_s29, 3  ;;  %s8499_s28 = smov (!%p493_p13, %s4672_s28), 31 }
  0x36   : > { %s6131_s26 = scalar_lea.vmem %s8227_s1, %s4671_s22  ;;  %s6136_s27 = scalar_lea.vmem %s8235_s9, %s4671_s22 }
  0x37   : > { %s496_s19 = sadd.s32 %s4673_s23, %s8499_s28  ;;  %s415_s24 = scalar_lea.vmem [#allocation8], %s6123_s21 }
  0x38   : > { %s4674_s0 = sshll.u32 %s496_s19, 3  ;;  %p4681_p0 = scmp.ne.s32.totalorder %s5950_s11, 0 }
  0x39   : > { %s6141_s20 = scalar_lea.vmem %s8228_s2, %s4674_s0  ;;  %s6146_s29 = scalar_lea.vmem %s8229_s3, %s4674_s0 }
  0x3a   : > { %523 = sbr.rel (%p4681_p0) target bundleno = 285 (0x11d), region = 98 }
  0x3f   : > { %v539_v2 = vld [vmem:[%s8230_s4 + $0x38] sm:$0xff]  ;;  %v538_v3 = vld [vmem:[%s8230_s4 + $0x30] sm:$0xff]  ;;  %vm545_vm0 = vcmask 523264   ;;  %vm691_vm1 = vcmask 7168   ;;  %v5976_v4 = vmov 0.0   ;;  %v537_v5 = vld [vmem:[%s8230_s4 + $0x28] sm:$0xff] }
  0x40   : > { %5106 = vmatprep.subr.mxu0 %v539_v2  ;;  %5594 = vmatprep.subr.mxu1 %v539_v2  ;;  %724 = vst.msk [vmem:[#allocation6] sm:$0xff] %vm691_vm1, %v5976_v4  ;;  %725 = vst.msk [vmem:[#allocation6 + $0x8] sm:$0xff] %vm691_vm1, %v5976_v4  ;;  %v536_v6 = vld [vmem:[%s8230_s4 + $0x20] sm:$0xff]  ;;  %v535_v7 = vld [vmem:[%s8230_s4 + $0x18] sm:$0xff]  ;;  %v5977_v19 = vmov -inf  }
  0x41   : > { %726 = vst.msk [vmem:[#allocation6 + $0x10] sm:$0xff] %vm691_vm1, %v5976_v4  ;;  %727 = vst.msk [vmem:[#allocation6 + $0x18] sm:$0xff] %vm691_vm1, %v5976_v4  ;;  %5107 = vmatpush3.msra.mxu0 %v539_v2  ;;  %5602 = vmatpush3.msra.mxu1 %v539_v2  ;;  %v534_v8 = vld [vmem:[%s8230_s4 + $0x10] sm:$0xff]  ;;  %v533_v9 = vld [vmem:[%s8230_s4 + $0x8] sm:$0xff] }
  0x42   : > { %728 = vst.msk [vmem:[#allocation6 + $0x20] sm:$0xff] %vm691_vm1, %v5976_v4  ;;  %729 = vst.msk [vmem:[#allocation6 + $0x28] sm:$0xff] %vm691_vm1, %v5976_v4  ;;  %5108 = vmatprep.subr.mxu0 %v538_v3  ;;  %5595 = vmatprep.subr.mxu1 %v538_v3  ;;  %v532_v10 = vld [vmem:[%s8230_s4] sm:$0xff]  ;;  %v525_v13 = vld [vmem:[%s6131_s26 + $0x8] sm:$0xff] }
  0x43   : > { %730 = vst.msk [vmem:[#allocation6 + $0x30] sm:$0xff] %vm691_vm1, %v5976_v4  ;;  %731 = vst.msk [vmem:[#allocation6 + $0x38] sm:$0xff] %vm691_vm1, %v5976_v4  ;;  %5109 = vmatpush3.msra.mxu0 %v538_v3  ;;  %5603 = vmatpush3.msra.mxu1 %v538_v3  ;;  %v524_v11 = vld [vmem:[%s6131_s26] sm:$0xff]  ;;  %v529_v14 = vld [vmem:[%s6131_s26 + $0x28] sm:$0xff] }
  0x44   : > { %732 = vst.msk [vmem:[#allocation6 + $0x40] sm:$0xff] %vm691_vm1, %v5976_v4  ;;  %733 = vst.msk [vmem:[#allocation6 + $0x48] sm:$0xff] %vm691_vm1, %v5976_v4  ;;  %5110 = vmatprep.subr.mxu0 %v537_v5  ;;  %5596 = vmatprep.subr.mxu1 %v537_v5  ;;  %v528_v12 = vld [vmem:[%s6131_s26 + $0x20] sm:$0xff]  ;;  %v526_v15 = vld [vmem:[%s6131_s26 + $0x10] sm:$0xff] }
  0x45   : > { %734 = vst.msk [vmem:[#allocation6 + $0x50] sm:$0xff] %vm691_vm1, %v5976_v4  ;;  %735 = vst.msk [vmem:[#allocation6 + $0x58] sm:$0xff] %vm691_vm1, %v5976_v4  ;;  %5111 = vmatpush3.msra.mxu0 %v537_v5  ;;  %5604 = vmatpush3.msra.mxu1 %v537_v5  ;;  %v530_v16 = vld [vmem:[%s6131_s26 + $0x30] sm:$0xff]  ;;  %v527_v17 = vld [vmem:[%s6131_s26 + $0x18] sm:$0xff] }
  0x46   : > { %736 = vst.msk [vmem:[#allocation6 + $0x60] sm:$0xff] %vm691_vm1, %v5976_v4  ;;  %737 = vst.msk [vmem:[#allocation6 + $0x68] sm:$0xff] %vm691_vm1, %v5976_v4  ;;  %5112 = vmatprep.subr.mxu0 %v536_v6  ;;  %5597 = vmatprep.subr.mxu1 %v536_v6  ;;  %v531_v18 = vld [vmem:[%s6131_s26 + $0x38] sm:$0xff]  ;;  %v4682_v20 = vld [vmem:[%s8234_s8] ss:$0 sm:$0xff] }
  0x47   : > { %738 = vst.msk [vmem:[#allocation6 + $0x70] sm:$0xff] %vm691_vm1, %v5976_v4  ;;  %739 = vst.msk [vmem:[#allocation6 + $0x78] sm:$0xff] %vm691_vm1, %v5976_v4  ;;  %5113 = vmatpush3.msra.mxu0 %v536_v6  ;;  %5605 = vmatpush3.msra.mxu1 %v536_v6 }
  0x48   : > { %740 = vst.msk [vmem:[#allocation6 + $0x80] sm:$0xff] %vm691_vm1, %v5976_v4  ;;  %741 = vst.msk [vmem:[#allocation6 + $0x88] sm:$0xff] %vm691_vm1, %v5976_v4  ;;  %5114 = vmatprep.subr.mxu0 %v535_v7  ;;  %5598 = vmatprep.subr.mxu1 %v535_v7 }
  0x49   : > { %742 = vst.msk [vmem:[#allocation6 + $0x90] sm:$0xff] %vm691_vm1, %v5976_v4  ;;  %743 = vst.msk [vmem:[#allocation6 + $0x98] sm:$0xff] %vm691_vm1, %v5976_v4  ;;  %5115 = vmatpush3.msra.mxu0 %v535_v7  ;;  %5606 = vmatpush3.msra.mxu1 %v535_v7 }
  0x4a   : > { %744 = vst.msk [vmem:[#allocation6 + $0xa0] sm:$0xff] %vm691_vm1, %v5976_v4  ;;  %745 = vst.msk [vmem:[#allocation6 + $0xa8] sm:$0xff] %vm691_vm1, %v5976_v4  ;;  %5116 = vmatprep.subr.mxu0 %v534_v8  ;;  %5599 = vmatprep.subr.mxu1 %v534_v8 }
  0x4b   : > { %746 = vst.msk [vmem:[#allocation6 + $0xb0] sm:$0xff] %vm691_vm1, %v5976_v4  ;;  %747 = vst.msk [vmem:[#allocation6 + $0xb8] sm:$0xff] %vm691_vm1, %v5976_v4  ;;  %5117 = vmatpush3.msra.mxu0 %v534_v8  ;;  %5607 = vmatpush3.msra.mxu1 %v534_v8 }
  0x4c   : > { %748 = vst.msk [vmem:[#allocation6 + $0xc0] sm:$0xff] %vm691_vm1, %v5976_v4  ;;  %749 = vst.msk [vmem:[#allocation6 + $0xc8] sm:$0xff] %vm691_vm1, %v5976_v4  ;;  %5118 = vmatprep.subr.mxu0 %v533_v9  ;;  %5600 = vmatprep.subr.mxu1 %v533_v9 }
  0x4d   : > { %750 = vst.msk [vmem:[#allocation6 + $0xd0] sm:$0xff] %vm691_vm1, %v5976_v4  ;;  %751 = vst.msk [vmem:[#allocation6 + $0xd8] sm:$0xff] %vm691_vm1, %v5976_v4  ;;  %5119 = vmatpush3.msra.mxu0 %v533_v9  ;;  %5608 = vmatpush3.msra.mxu1 %v533_v9 }
  0x4e   : > { %752 = vst.msk [vmem:[#allocation6 + $0xe0] sm:$0xff] %vm691_vm1, %v5976_v4  ;;  %753 = vst.msk [vmem:[#allocation6 + $0xe8] sm:$0xff] %vm691_vm1, %v5976_v4  ;;  %5120 = vmatprep.subr.mxu0 %v532_v10  ;;  %5601 = vmatprep.subr.mxu1 %v532_v10 }
  0x4f   : > { %754 = vst.msk [vmem:[#allocation6 + $0xf0] sm:$0xff] %vm691_vm1, %v5976_v4  ;;  %755 = vst.msk [vmem:[#allocation6 + $0xf8] sm:$0xff] %vm691_vm1, %v5976_v4  ;;  %5121 = vmatpush3.msra.mxu0 %v532_v10  ;;  %5609 = vmatpush3.msra.mxu1 %v532_v10 }
  0x50   : > { %756 = vst.msk [vmem:[#allocation7] sm:$0xff] %vm545_vm0, %v5976_v4  ;;  %757 = vst.msk [vmem:[#allocation7 + $0x8] sm:$0xff] %vm545_vm0, %v5976_v4  ;;  %5122 = vmatprep.mubr.msk.f32.mxu0 %vm545_vm0, %v524_v11  ;;  %5128 = vmatprep.mubr.msk.f32.mxu1 %vm545_vm0, %v528_v12 }
  0x51   : > { %758 = vst.msk [vmem:[#allocation7 + $0x10] sm:$0xff] %vm545_vm0, %v5976_v4  ;;  %759 = vst.msk [vmem:[#allocation7 + $0x18] sm:$0xff] %vm545_vm0, %v5976_v4  ;;  %5123 = vmatmul.mubr.msk.f32.vlgmr.msra.gmra.mxu0 %vm545_vm0, %v525_v13  ;;  %5129 = vmatmul.mubr.msk.f32.vlgmr.msra.gmra.mxu1 %vm545_vm0, %v529_v14 }
  0x52   : > { %760 = vst.msk [vmem:[#allocation7 + $0x20] sm:$0xff] %vm545_vm0, %v5976_v4  ;;  %761 = vst.msk [vmem:[#allocation7 + $0x28] sm:$0xff] %vm545_vm0, %v5976_v4  ;;  %5125 = vmatprep.mubr.msk.f32.mxu0 %vm545_vm0, %v526_v15  ;;  %5131 = vmatprep.mubr.msk.f32.mxu1 %vm545_vm0, %v530_v16 }
  0x53   : > { %762 = vst.msk [vmem:[#allocation7 + $0x30] sm:$0xff] %vm545_vm0, %v5976_v4  ;;  %763 = vst.msk [vmem:[#allocation7 + $0x38] sm:$0xff] %vm545_vm0, %v5976_v4 }
  0x54   : > { %692 = vst.msk [vmem:[#allocation5] sm:$0xff] %vm691_vm1, %v5977_v19  ;;  %693 = vst.msk [vmem:[#allocation5 + $0x8] sm:$0xff] %vm691_vm1, %v5977_v19 }
  0x55   : > { %5126 = vmatmul.mubr.msk.f32.gmra.mxu0 %vm545_vm0, %v527_v17  ;;  %5132 = vmatmul.mubr.msk.f32.gmra.mxu1 %vm545_vm0, %v531_v18  ;;  %694 = vst.msk [vmem:[#allocation5 + $0x10] sm:$0xff] %vm691_vm1, %v5977_v19  ;;  %695 = vst.msk [vmem:[#allocation5 + $0x18] sm:$0xff] %vm691_vm1, %v5977_v19 }
  0x56   : > { %696 = vst.msk [vmem:[#allocation5 + $0x20] sm:$0xff] %vm691_vm1, %v5977_v19  ;;  %697 = vst.msk [vmem:[#allocation5 + $0x28] sm:$0xff] %vm691_vm1, %v5977_v19 }
  0x57   : > { %698 = vst.msk [vmem:[#allocation5 + $0x30] sm:$0xff] %vm691_vm1, %v5977_v19  ;;  %699 = vst.msk [vmem:[#allocation5 + $0x38] sm:$0xff] %vm691_vm1, %v5977_v19 }
  0x58   : > { %700 = vst.msk [vmem:[#allocation5 + $0x40] sm:$0xff] %vm691_vm1, %v5977_v19  ;;  %701 = vst.msk [vmem:[#allocation5 + $0x48] sm:$0xff] %vm691_vm1, %v5977_v19 }
  0x59   : > { %702 = vst.msk [vmem:[#allocation5 + $0x50] sm:$0xff] %vm691_vm1, %v5977_v19  ;;  %703 = vst.msk [vmem:[#allocation5 + $0x58] sm:$0xff] %vm691_vm1, %v5977_v19 }
  0x5a   : > { %704 = vst.msk [vmem:[#allocation5 + $0x60] sm:$0xff] %vm691_vm1, %v5977_v19  ;;  %705 = vst.msk [vmem:[#allocation5 + $0x68] sm:$0xff] %vm691_vm1, %v5977_v19 }
  0x5b   : > { %706 = vst.msk [vmem:[#allocation5 + $0x70] sm:$0xff] %vm691_vm1, %v5977_v19  ;;  %707 = vst.msk [vmem:[#allocation5 + $0x78] sm:$0xff] %vm691_vm1, %v5977_v19 }
  0x5c   : > { %708 = vst.msk [vmem:[#allocation5 + $0x80] sm:$0xff] %vm691_vm1, %v5977_v19  ;;  %709 = vst.msk [vmem:[#allocation5 + $0x88] sm:$0xff] %vm691_vm1, %v5977_v19 }
  0x5d   : > { %710 = vst.msk [vmem:[#allocation5 + $0x90] sm:$0xff] %vm691_vm1, %v5977_v19  ;;  %711 = vst.msk [vmem:[#allocation5 + $0x98] sm:$0xff] %vm691_vm1, %v5977_v19 }
  0x5e   : > { %712 = vst.msk [vmem:[#allocation5 + $0xa0] sm:$0xff] %vm691_vm1, %v5977_v19  ;;  %713 = vst.msk [vmem:[#allocation5 + $0xa8] sm:$0xff] %vm691_vm1, %v5977_v19 }
  0x5f   : > { %714 = vst.msk [vmem:[#allocation5 + $0xb0] sm:$0xff] %vm691_vm1, %v5977_v19  ;;  %715 = vst.msk [vmem:[#allocation5 + $0xb8] sm:$0xff] %vm691_vm1, %v5977_v19 }
  0x60   : > { %716 = vst.msk [vmem:[#allocation5 + $0xc0] sm:$0xff] %vm691_vm1, %v5977_v19  ;;  %717 = vst.msk [vmem:[#allocation5 + $0xc8] sm:$0xff] %vm691_vm1, %v5977_v19 }
  0x61   : > { %718 = vst.msk [vmem:[#allocation5 + $0xd0] sm:$0xff] %vm691_vm1, %v5977_v19  ;;  %719 = vst.msk [vmem:[#allocation5 + $0xd8] sm:$0xff] %vm691_vm1, %v5977_v19 }
  0x62   : > { %720 = vst.msk [vmem:[#allocation5 + $0xe0] sm:$0xff] %vm691_vm1, %v5977_v19  ;;  %721 = vst.msk [vmem:[#allocation5 + $0xe8] sm:$0xff] %vm691_vm1, %v5977_v19 }
  0x63   : > { %722 = vst.msk [vmem:[#allocation5 + $0xf0] sm:$0xff] %vm691_vm1, %v5977_v19  ;;  %723 = vst.msk [vmem:[#allocation5 + $0xf8] sm:$0xff] %vm691_vm1, %v5977_v19 }
 0x111   : > { %v5124_v21 = vpop.f32.mrf.mxu0  ;;  %v5130_v22 = vpop.f32.mrf.mxu1 }
 0x112   : > { %v642_v23 = vadd.f32 %v5124_v21, %v4682_v20  ;;  %v662_v24 = vadd.f32 %v5130_v22, %v4682_v20 }
 0x113   : > { %v636_v25 = vpop.f32.mrf.mxu0  ;;  %v656_v26 = vpop.f32.mrf.mxu1 }
 0x114   : > { %v676_v27 = vmul.f32 0.125, %v642_v23  ;;  %v680_v28 = vmul.f32 0.125, %v662_v24  ;;  %v637_v29 = vadd.f32 %v4682_v20, %v636_v25  ;;  %v657_v30 = vadd.f32 %v4682_v20, %v656_v26 }
 0x115   : > { %v5127_v31 = vpop.f32.mrf.mxu0  ;;  %v5133_v32 = vpop.f32.mrf.mxu1 }
 0x116   : > { %684 = vst.msk [vmem:[#allocation2 + $0x8] sm:$0xff] %vm545_vm0, %v676_v27  ;;  %688 = vst.msk [vmem:[#allocation2 + $0x28] sm:$0xff] %vm545_vm0, %v680_v28  ;;  %v675_v33 = vmul.f32 0.125, %v637_v29  ;;  %v679_v34 = vmul.f32 0.125, %v657_v30  ;;  %v652_v35 = vadd.f32 %v5127_v31, %v4682_v20  ;;  %v672_v36 = vadd.f32 %v5133_v32, %v4682_v20 }
 0x117   : > { %v646_v37 = vpop.f32.mrf.mxu0  ;;  %v666_v38 = vpop.f32.mrf.mxu1 }
 0x118   : > { %683 = vst.msk [vmem:[#allocation2] sm:$0xff] %vm545_vm0, %v675_v33  ;;  %687 = vst.msk [vmem:[#allocation2 + $0x20] sm:$0xff] %vm545_vm0, %v679_v34  ;;  %v678_v39 = vmul.f32 0.125, %v652_v35  ;;  %v682_v40 = vmul.f32 0.125, %v672_v36  ;;  %v647_v41 = vadd.f32 %v4682_v20, %v646_v37  ;;  %v667_v42 = vadd.f32 %v4682_v20, %v666_v38 }
 0x11a   : > { %686 = vst.msk [vmem:[#allocation2 + $0x18] sm:$0xff] %vm545_vm0, %v678_v39  ;;  %690 = vst.msk [vmem:[#allocation2 + $0x38] sm:$0xff] %vm545_vm0, %v682_v40  ;;  %v677_v43 = vmul.f32 0.125, %v647_v41  ;;  %v681_v44 = vmul.f32 0.125, %v667_v42 }
 0x11c   : > { %685 = vst.msk [vmem:[#allocation2 + $0x10] sm:$0xff] %vm545_vm0, %v677_v43  ;;  %689 = vst.msk [vmem:[#allocation2 + $0x30] sm:$0xff] %vm545_vm0, %v681_v44 }
 0x11d PF: > { %v787_v45 = vld [vmem:[%s8231_s5 + $0x38] sm:$0xff]  ;;  %v786_v46 = vld [vmem:[%s8231_s5 + $0x30] sm:$0xff]  ;;  %vm817_vm2 = vcmask 523264   ;;  %v785_v47 = vld [vmem:[%s8231_s5 + $0x28] sm:$0xff]  ;;  %vm1291_vm3 = vcmask 130048   ;;  %vm1637_vm12 = vcmask 7168  }
 0x11e   : > { %5134 = vmatprep.subr.mxu0 %v787_v45  ;;  %v764_v48 = vld [vmem:[%s6141_s20] sm:$0xff]  ;;  %v783_v50 = vld [vmem:[%s8231_s5 + $0x18] sm:$0xff]  ;;  %v782_v51 = vld [vmem:[%s8231_s5 + $0x10] sm:$0xff]  ;;  %s5980_s25 = smov 96   ;;  %s5982_s22 = smov 16   ;;  %vm2555_vm13 = vcmask 261248  }
 0x11f   : > { %5135 = vmatpush3.msra.mxu0 %v787_v45  ;;  %5150 = vmatprep.mubr.msk.f32.mxu0 %vm817_vm2, %v764_v48  ;;  %v784_v49 = vld [vmem:[%s8231_s5 + $0x20] sm:$0xff]  ;;  %v781_v52 = vld [vmem:[%s8231_s5 + $0x8] sm:$0xff]  ;;  %v766_v55 = vld [vmem:[%s6141_s20 + $0x10] sm:$0xff]  ;;  %s5983_s28 = smov 32   ;;  %vm3280_vm14 = vcmask 392448   ;;  %s5984_s23 = smov 48  }
 0x120   : > { %5136 = vmatprep.subr.mxu0 %v786_v46  ;;  %v780_v53 = vld [vmem:[%s8231_s5] sm:$0xff]  ;;  %v765_v54 = vld [vmem:[%s6141_s20 + $0x8] sm:$0xff]  ;;  %v767_v56 = vld [vmem:[%s6141_s20 + $0x18] sm:$0xff]  ;;  %vm4005_vm15 = vcmask 523648   ;;  %p4821_p1 = scmp.ne.s32.totalorder %s5950_s11, 1 }
 0x121   : > { %5137 = vmatpush3.msra.mxu0 %v786_v46  ;;  %v768_v57 = vld [vmem:[%s6141_s20 + $0x20] sm:$0xff]  ;;  %v769_v58 = vld [vmem:[%s6141_s20 + $0x28] sm:$0xff]  ;;  %v770_v59 = vld [vmem:[%s6141_s20 + $0x30] sm:$0xff] }
 0x122   : > { %5138 = vmatprep.subr.mxu0 %v785_v47  ;;  %v771_v60 = vld [vmem:[%s6141_s20 + $0x38] sm:$0xff]  ;;  %v772_v61 = vld [vmem:[%s6141_s20 + $0x40] sm:$0xff]  ;;  %v773_v62 = vld [vmem:[%s6141_s20 + $0x48] sm:$0xff] }
 0x123   : > { %5139 = vmatpush3.msra.mxu0 %v785_v47  ;;  %v774_v63 = vld [vmem:[%s6141_s20 + $0x50] sm:$0xff]  ;;  %v775_v0 = vld [vmem:[%s6141_s20 + $0x58] sm:$0xff]  ;;  %v776_v1 = vld [vmem:[%s6141_s20 + $0x60] sm:$0xff] }
 0x124   : > { %5140 = vmatprep.subr.mxu0 %v784_v49  ;;  %v777_v2 = vld [vmem:[%s6141_s20 + $0x68] sm:$0xff]  ;;  %v778_v3 = vld [vmem:[%s6141_s20 + $0x70] sm:$0xff]  ;;  %v779_v4 = vld [vmem:[%s6141_s20 + $0x78] sm:$0xff]  ;;  %s5981_s20 = smov 80  }
 0x125   : > { %5141 = vmatpush3.msra.mxu0 %v784_v49  ;;  %v6329_v5 = vld [vmem:[#allocation2] sm:$0xff]  ;;  %v811_v6 = vld [vmem:[%s8232_s6 + $0x38] sm:$0xff]  ;;  %v810_v7 = vld [vmem:[%s8232_s6 + $0x30] sm:$0xff] }
 0x126   : > { %5142 = vmatprep.subr.mxu0 %v783_v50  ;;  %5174 = vmatprep.subr.mxu1 %v811_v6  ;;  %v809_v8 = vld [vmem:[%s8232_s6 + $0x28] sm:$0xff]  ;;  %v788_v9 = vld [vmem:[%s6146_s29] sm:$0xff]  ;;  %v807_v11 = vld [vmem:[%s8232_s6 + $0x18] sm:$0xff] }
 0x127   : > { %5143 = vmatpush3.msra.mxu0 %v783_v50  ;;  %5175 = vmatpush3.msra.mxu1 %v811_v6  ;;  %v808_v10 = vld [vmem:[%s8232_s6 + $0x20] sm:$0xff]  ;;  %v806_v12 = vld [vmem:[%s8232_s6 + $0x10] sm:$0xff]  ;;  %v805_v13 = vld [vmem:[%s8232_s6 + $0x8] sm:$0xff] }
 0x128   : > { %5144 = vmatprep.subr.mxu0 %v782_v51  ;;  %5176 = vmatprep.subr.mxu1 %v810_v7  ;;  %v6359_v14 = vld [vmem:[%s8234_s8 + $0x1] ss:$0 sm:$0xff]  ;;  %v789_v18 = vld [vmem:[%s6146_s29 + $0x8] sm:$0xff]  ;;  %v790_v20 = vld [vmem:[%s6146_s29 + $0x10] sm:$0xff] }
 0x129   : > { %5145 = vmatpush3.msra.mxu0 %v782_v51  ;;  %5190 = vmatprep.mubr.msk.f32.mxu1 %vm817_vm2, %v788_v9  ;;  %v804_v15 = vld [vmem:[%s8232_s6] sm:$0xff]  ;;  %v791_v24 = vld [vmem:[%s6146_s29 + $0x18] sm:$0xff]  ;;  %v793_v30 = vld [vmem:[%s6146_s29 + $0x28] sm:$0xff] }
 0x12a   : > { %5146 = vmatprep.subr.mxu0 %v781_v52  ;;  %5177 = vmatpush3.msra.mxu1 %v810_v7  ;;  %v792_v26 = vld [vmem:[%s6146_s29 + $0x20] sm:$0xff]  ;;  %v794_v32 = vld [vmem:[%s6146_s29 + $0x30] sm:$0xff]  ;;  %v795_v36 = vld [vmem:[%s6146_s29 + $0x38] sm:$0xff] }
 0x12b   : > { %5147 = vmatpush3.msra.mxu0 %v781_v52  ;;  %5178 = vmatprep.subr.mxu1 %v809_v8  ;;  %v796_v38 = vld [vmem:[%s6146_s29 + $0x40] sm:$0xff]  ;;  %v797_v42 = vld [vmem:[%s6146_s29 + $0x48] sm:$0xff]  ;;  %v798_v44 = vld [vmem:[%s6146_s29 + $0x50] sm:$0xff] }
 0x12c   : > { %5148 = vmatprep.subr.mxu0 %v780_v53  ;;  %5179 = vmatpush3.msra.mxu1 %v809_v8  ;;  %v799_v48 = vld [vmem:[%s6146_s29 + $0x58] sm:$0xff]  ;;  %v800_v50 = vld [vmem:[%s6146_s29 + $0x60] sm:$0xff] }
 0x12d   : > { %5149 = vmatpush3.msra.mxu0 %v780_v53  ;;  %5180 = vmatprep.subr.mxu1 %v808_v10 }
 0x12e   : > { %5151 = vmatmul.mubr.msk.f32.vlgmr.msra.gmra.mxu0 %vm817_vm2, %v765_v54  ;;  %5181 = vmatpush3.msra.mxu1 %v808_v10  ;;  %v801_v54 = vld [vmem:[%s6146_s29 + $0x68] sm:$0xff] }
 0x12f   : > { %5153 = vmatprep.mubr.msk.f32.mxu0 %vm817_vm2, %v766_v55  ;;  %5182 = vmatprep.subr.mxu1 %v807_v11 }
 0x130   : > { %5183 = vmatpush3.msra.mxu1 %v807_v11 }
 0x131   : > { %5184 = vmatprep.subr.mxu1 %v806_v12 }
 0x132   : > { %5154 = vmatmul.mubr.msk.f32.gmra.mxu0 %vm817_vm2, %v767_v56  ;;  %5185 = vmatpush3.msra.mxu1 %v806_v12  ;;  %v802_v56 = vld [vmem:[%s6146_s29 + $0x70] sm:$0xff] }
 0x133   : > { %5156 = vmatprep.mubr.msk.f32.mxu0 %vm817_vm2, %v768_v57  ;;  %5186 = vmatprep.subr.mxu1 %v805_v13 }
 0x134   : > { %5187 = vmatpush3.msra.mxu1 %v805_v13 }
 0x135   : > { %5188 = vmatprep.subr.mxu1 %v804_v15 }
 0x136   : > { %5157 = vmatmul.mubr.msk.f32.gmra.mxu0 %vm817_vm2, %v769_v58  ;;  %5189 = vmatpush3.msra.mxu1 %v804_v15 }
 0x137   : > { %5159 = vmatprep.mubr.msk.f32.mxu0 %vm817_vm2, %v770_v59  ;;  %5191 = vmatmul.mubr.msk.f32.vlgmr.msra.gmra.mxu1 %vm817_vm2, %v789_v18  ;;  %v6530_v18 = vld [vmem:[#allocation2 + $0x18] sm:$0xff] }
 0x138   : > { %5193 = vmatprep.mubr.msk.f32.mxu1 %vm817_vm2, %v790_v20  ;;  %v6538_v20 = vld [vmem:[#allocation2 + $0x28] sm:$0xff] }
 0x13a   : > { %5160 = vmatmul.mubr.msk.f32.gmra.mxu0 %vm817_vm2, %v771_v60  ;;  %v803_v60 = vld [vmem:[%s6146_s29 + $0x78] sm:$0xff] }
 0x13b   : > { %5162 = vmatprep.mubr.msk.f32.mxu0 %vm817_vm2, %v772_v61  ;;  %5194 = vmatmul.mubr.msk.f32.gmra.mxu1 %vm817_vm2, %v791_v24 }
 0x13c   : > { %5196 = vmatprep.mubr.msk.f32.mxu1 %vm817_vm2, %v792_v26 }
 0x13e   : > { %5163 = vmatmul.mubr.msk.f32.gmra.mxu0 %vm817_vm2, %v773_v62 }
 0x13f   : > { %5165 = vmatprep.mubr.msk.f32.mxu0 %vm817_vm2, %v774_v63  ;;  %5197 = vmatmul.mubr.msk.f32.gmra.mxu1 %vm817_vm2, %v793_v30 }
 0x140   : > { %5199 = vmatprep.mubr.msk.f32.mxu1 %vm817_vm2, %v794_v32 }
 0x142   : > { %5166 = vmatmul.mubr.msk.f32.gmra.mxu0 %vm817_vm2, %v775_v0 }
 0x143   : > { %5168 = vmatprep.mubr.msk.f32.mxu0 %vm817_vm2, %v776_v1  ;;  %5200 = vmatmul.mubr.msk.f32.gmra.mxu1 %vm817_vm2, %v795_v36 }
 0x144   : > { %5202 = vmatprep.mubr.msk.f32.mxu1 %vm817_vm2, %v796_v38 }
 0x146   : > { %5169 = vmatmul.mubr.msk.f32.gmra.mxu0 %vm817_vm2, %v777_v2 }
 0x147   : > { %5171 = vmatprep.mubr.msk.f32.mxu0 %vm817_vm2, %v778_v3  ;;  %5203 = vmatmul.mubr.msk.f32.gmra.mxu1 %vm817_vm2, %v797_v42 }
 0x148   : > { %5205 = vmatprep.mubr.msk.f32.mxu1 %vm817_vm2, %v798_v44 }
 0x14a   : > { %5172 = vmatmul.mubr.msk.f32.gmra.mxu0 %vm817_vm2, %v779_v4 }
 0x14b   : > { %5246 = vmatprep.mubr.msk.f32.mxu0 %vm1291_vm3, %v6329_v5  ;;  %5206 = vmatmul.mubr.msk.f32.gmra.mxu1 %vm817_vm2, %v799_v48 }
 0x14c   : > { %5208 = vmatprep.mubr.msk.f32.mxu1 %vm817_vm2, %v800_v50 }
 0x14f   : > { %5209 = vmatmul.mubr.msk.f32.gmra.mxu1 %vm817_vm2, %v801_v54 }
 0x150   : > { %5211 = vmatprep.mubr.msk.f32.mxu1 %vm817_vm2, %v802_v56 }
 0x153   : > { %5212 = vmatmul.mubr.msk.f32.gmra.mxu1 %vm817_vm2, %v803_v60 }
 0x1ee   : > { %v5152_v16 = vpop.f32.mrf.mxu0 }
 0x1ef   : > { %v938_v17 = vadd.f32 %v5152_v16, %v6359_v14  ;;  %v6522_v16 = vld [vmem:[#allocation2 + $0x8] sm:$0xff] }
 0x1f0   : > { %v932_v19 = vpop.f32.mrf.mxu0 }
 0x1f1   : > { %1012 = vst.msk [vmem:[#allocation3 + $0x8] sm:$0xff] %vm817_vm2, %v938_v17  ;;  %v933_v21 = vadd.f32 %v6359_v14, %v932_v19  ;;  %v6524_v17 = vld [vmem:[#allocation2 + $0x10] sm:$0xff]  ;;  %v6532_v19 = vld [vmem:[#allocation2 + $0x20] sm:$0xff] }
 0x1f2   : > { %v5155_v22 = vpop.f32.mrf.mxu0 }
 0x1f3   : > { %1011 = vst.msk [vmem:[#allocation3] sm:$0xff] %vm817_vm2, %v933_v21  ;;  %v948_v23 = vadd.f32 %v5155_v22, %v6359_v14  ;;  %v6540_v21 = vld [vmem:[#allocation2 + $0x30] sm:$0xff]  ;;  %v6546_v22 = vld [vmem:[#allocation2 + $0x38] sm:$0xff] }
 0x1f4   : > { %v942_v25 = vpop.f32.mrf.mxu0 }
 0x1f5   : > { %1014 = vst.msk [vmem:[#allocation3 + $0x18] sm:$0xff] %vm817_vm2, %v948_v23  ;;  %v943_v27 = vadd.f32 %v6359_v14, %v942_v25  ;;  %v1241_v23 = vld [vmem:[%s415_s24] sm:$0xff] }
 0x1f6   : > { %v5158_v28 = vpop.f32.mrf.mxu0  ;;  %v1243_v24 = vunpack.c.0.s8 %v1241_v23  ;;  %v1246_v25 = vunpack.c.3.s8 %v1241_v23  ;;  %v1244_v26 = vunpack.c.1.s8 %v1241_v23 }
 0x1f7   : > { %1013 = vst.msk [vmem:[#allocation3 + $0x10] sm:$0xff] %vm817_vm2, %v943_v27  ;;  %v958_v29 = vadd.f32 %v5158_v28, %v6359_v14  ;;  %v1245_v27 = vunpack.c.2.s8 %v1241_v23 }
 0x1f8   : > { %v952_v31 = vpop.f32.mrf.mxu0  ;;  %v6552_v28 = vcvt.s32.f32 %v1243_v24  ;;  %v6556_v30 = vcvt.s32.f32 %v1246_v25 }
 0x1f9   : > { %1016 = vst.msk [vmem:[#allocation3 + $0x28] sm:$0xff] %vm817_vm2, %v958_v29  ;;  %v953_v33 = vadd.f32 %v6359_v14, %v952_v31  ;;  %v1242_v29 = vld [vmem:[%s415_s24 + $0x8] sm:$0xff]  ;;  %v6558_v31 = vcvt.s32.f32 %v1244_v26  ;;  %v6560_v32 = vcvt.s32.f32 %v1245_v27  ;;  %s5979_s24 = smov 112  }
 0x1fa   : > { %v5161_v34 = vpop.f32.mrf.mxu0  ;;  %v6516_v15 = vld [vmem:[#allocation3] sm:$0xff]  ;;  %vm1259_vm4 = vcmp.eq.f32.partialorder %v6552_v28, 0.0  ;;  %vm1262_vm5 = vcmp.eq.f32.partialorder %v6556_v30, 0.0  ;;  %v1250_v42 = vunpack.c.3.s8 %v1242_v29 }
 0x1fb   : > { %1015 = vst.msk [vmem:[#allocation3 + $0x20] sm:$0xff] %vm817_vm2, %v953_v33  ;;  %v968_v35 = vadd.f32 %v5161_v34, %v6359_v14  ;;  %v1247_v34 = vunpack.c.0.s8 %v1242_v29  ;;  %vm1260_vm6 = vcmp.eq.f32.partialorder %v6558_v31, 0.0  ;;  %vm1261_vm7 = vcmp.eq.f32.partialorder %v6560_v32, 0.0 }
 0x1fc   : > { %v962_v37 = vpop.f32.mrf.mxu0  ;;  %v6498_v12 = vld [vmem:[#allocation3 + $0x18] sm:$0xff] }
 0x1fd   : > { %1018 = vst.msk [vmem:[#allocation3 + $0x38] sm:$0xff] %vm817_vm2, %v968_v35  ;;  %v963_v39 = vadd.f32 %v6359_v14, %v962_v37  ;;  %v1248_v35 = vunpack.c.1.s8 %v1242_v29 }
 0x1fe   : > { %v5164_v40 = vpop.f32.mrf.mxu0  ;;  %v6504_v13 = vld [vmem:[#allocation3 + $0x10] sm:$0xff] }
 0x1ff   : > { %1017 = vst.msk [vmem:[#allocation3 + $0x30] sm:$0xff] %vm817_vm2, %v963_v39  ;;  %v978_v41 = vadd.f32 %v5164_v40, %v6359_v14  ;;  %v6571_v39 = vcvt.s32.f32 %v1247_v34  ;;  %v6573_v40 = vcvt.s32.f32 %v1248_v35 }
 0x200   : > { %v972_v43 = vpop.f32.mrf.mxu0  ;;  %v6486_v10 = vld [vmem:[#allocation3 + $0x28] sm:$0xff] }
 0x201   : > { %1020 = vst.msk [vmem:[#allocation3 + $0x48] sm:$0xff] %vm817_vm2, %v978_v41  ;;  %v973_v45 = vadd.f32 %v6359_v14, %v972_v43  ;;  %8302 = vst [vmem:[#allocation15_spill] sm:$0xff] %v6571_v39  ;;  %v1249_v41 = vunpack.c.2.s8 %v1242_v29  ;;  %vm1263_vm8 = vcmp.eq.f32.partialorder %v6571_v39, 0.0  ;;  %vm1264_vm9 = vcmp.eq.f32.partialorder %v6573_v40, 0.0 }
 0x202   : > { %v5167_v46 = vpop.f32.mrf.mxu0  ;;  %v6492_v11 = vld [vmem:[#allocation3 + $0x20] sm:$0xff] }
 0x203   : > { %1019 = vst.msk [vmem:[#allocation3 + $0x40] sm:$0xff] %vm817_vm2, %v973_v45  ;;  %v988_v47 = vadd.f32 %v5167_v46, %v6359_v14  ;;  %v6591_v48 = vcvt.s32.f32 %v1249_v41 }
 0x204   : > { %v982_v49 = vpop.f32.mrf.mxu0  ;;  %v6474_v8 = vld [vmem:[#allocation3 + $0x38] sm:$0xff] }
 0x205   : > { %1022 = vst.msk [vmem:[#allocation3 + $0x58] sm:$0xff] %vm817_vm2, %v988_v47  ;;  %v983_v51 = vadd.f32 %v6359_v14, %v982_v49  ;;  %8303 = vst [vmem:[#allocation16_spill] sm:$0xff] %v6591_v48  ;;  %v6593_v49 = vcvt.s32.f32 %v1250_v42  ;;  %vm1265_vm10 = vcmp.eq.f32.partialorder %v6591_v48, 0.0 }
 0x206   : > { %v5170_v52 = vpop.f32.mrf.mxu0  ;;  %v6480_v9 = vld [vmem:[#allocation3 + $0x30] sm:$0xff] }
 0x207   : > { %1021 = vst.msk [vmem:[#allocation3 + $0x50] sm:$0xff] %vm817_vm2, %v983_v51  ;;  %v998_v53 = vadd.f32 %v5170_v52, %v6359_v14  ;;  %8304 = vst [vmem:[#allocation17_spill] sm:$0xff] %v6593_v49  ;;  %vm1266_vm11 = vcmp.eq.f32.partialorder %v6593_v49, 0.0 }
 0x208   : > { %v992_v55 = vpop.f32.mrf.mxu0  ;;  %v6462_v6 = vld [vmem:[#allocation3 + $0x48] sm:$0xff] }
 0x209   : > { %1024 = vst.msk [vmem:[#allocation3 + $0x68] sm:$0xff] %vm817_vm2, %v998_v53  ;;  %v993_v57 = vadd.f32 %v6359_v14, %v992_v55 }
 0x20a   : > { %v5173_v58 = vpop.f32.mrf.mxu0  ;;  %v6468_v7 = vld [vmem:[#allocation3 + $0x40] sm:$0xff] }
 0x20b   : > { %1023 = vst.msk [vmem:[#allocation3 + $0x60] sm:$0xff] %vm817_vm2, %v993_v57  ;;  %v1008_v59 = vadd.f32 %v5173_v58, %v6359_v14  ;;  %v5978_v57 = vmov 0   ;;  %v5192_v58 = vpop.f32.mrf.mxu1 }
 0x20c   : > { %v1002_v61 = vpop.f32.mrf.mxu0  ;;  %v6450_v3 = vld [vmem:[#allocation3 + $0x58] sm:$0xff]  ;;  %5708 = vset.pattern.permute.xlu0 %v5978_v57  ;;  %5709 = vset.pattern.permute.xlu1 %v5978_v57 }
 0x20d   : > { %1026 = vst.msk [vmem:[#allocation3 + $0x78] sm:$0xff] %vm817_vm2, %v1008_v59  ;;  %v1003_v62 = vadd.f32 %v6359_v14, %v1002_v61  ;;  %v6510_v14 = vld [vmem:[#allocation3 + $0x8] sm:$0xff]  ;;  %v4708_v59 = vld [vmem:[%s8234_s8 + $0x2] ss:$0 sm:$0xff]  ;;  %v1146_v61 = vpop.f32.mrf.mxu1 }
 0x20e   : > { %v6456_v4 = vld [vmem:[#allocation3 + $0x50] sm:$0xff]  ;;  %v1152_v60 = vadd.f32 %v5192_v58, %v4708_v59 }
 0x20f   : > { %1025 = vst.msk [vmem:[#allocation3 + $0x70] sm:$0xff] %vm817_vm2, %v1003_v62  ;;  %v1147_v62 = vadd.f32 %v4708_v59, %v1146_v61  ;;  %v5195_v23 = vpop.f32.mrf.mxu1 }
 0x210   : > { %v6438_v1 = vld [vmem:[#allocation3 + $0x68] sm:$0xff]  ;;  %1226 = vst.msk [vmem:[#allocation4 + $0x8] sm:$0xff] %vm817_vm2, %v1152_v60  ;;  %v1162_v24 = vadd.f32 %v5195_v23, %v4708_v59 }
 0x211   : > { %1225 = vst.msk [vmem:[#allocation4] sm:$0xff] %vm817_vm2, %v1147_v62  ;;  %v1156_v25 = vpop.f32.mrf.mxu1 }
 0x212   : > { %v6444_v2 = vld [vmem:[#allocation3 + $0x60] sm:$0xff]  ;;  %1228 = vst.msk [vmem:[#allocation4 + $0x18] sm:$0xff] %vm817_vm2, %v1162_v24  ;;  %v1157_v26 = vadd.f32 %v4708_v59, %v1156_v25 }
 0x213   : > { %v5198_v27 = vpop.f32.mrf.mxu1 }
 0x214   : > { %v6426_v63 = vld [vmem:[#allocation3 + $0x78] sm:$0xff]  ;;  %1227 = vst.msk [vmem:[#allocation4 + $0x10] sm:$0xff] %vm817_vm2, %v1157_v26  ;;  %v1172_v29 = vadd.f32 %v5198_v27, %v4708_v59 }
 0x215   : > { %5214 = vmatprep.subr.msk.mxu0 %vm1291_vm3, %v6426_v63 }
 0x216   : > { %5215 = vmatpush3.xpose.msk.msra.mxu0 %vm1291_vm3, %v6426_v63  ;;  %v6432_v0 = vld [vmem:[#allocation3 + $0x70] sm:$0xff]  ;;  %1230 = vst.msk [vmem:[#allocation4 + $0x28] sm:$0xff] %vm817_vm2, %v1172_v29 }
 0x217   : > { %5216 = vmatprep.subr.msk.mxu0 %vm1291_vm3, %v6432_v0 }
 0x21a   : > { %5217 = vmatpush3.xpose.msk.msra.mxu0 %vm1291_vm3, %v6432_v0 }
 0x21b   : > { %5218 = vmatprep.subr.msk.mxu0 %vm1291_vm3, %v6438_v1 }
 0x21e   : > { %5219 = vmatpush3.xpose.msk.msra.mxu0 %vm1291_vm3, %v6438_v1 }
 0x21f   : > { %5220 = vmatprep.subr.msk.mxu0 %vm1291_vm3, %v6444_v2 }
 0x222   : > { %5221 = vmatpush3.xpose.msk.msra.mxu0 %vm1291_vm3, %v6444_v2 }
 0x223   : > { %5222 = vmatprep.subr.msk.mxu0 %vm1291_vm3, %v6450_v3 }
 0x226   : > { %5223 = vmatpush3.xpose.msk.msra.mxu0 %vm1291_vm3, %v6450_v3 }
 0x227   : > { %5224 = vmatprep.subr.msk.mxu0 %vm1291_vm3, %v6456_v4 }
 0x22a   : > { %5225 = vmatpush3.xpose.msk.msra.mxu0 %vm1291_vm3, %v6456_v4 }
 0x22b   : > { %5226 = vmatprep.subr.msk.mxu0 %vm1291_vm3, %v6462_v6 }
 0x22e   : > { %5227 = vmatpush3.xpose.msk.msra.mxu0 %vm1291_vm3, %v6462_v6 }
 0x22f   : > { %5228 = vmatprep.subr.msk.mxu0 %vm1291_vm3, %v6468_v7 }
 0x232   : > { %5229 = vmatpush3.xpose.msk.msra.mxu0 %vm1291_vm3, %v6468_v7 }
 0x233   : > { %5230 = vmatprep.subr.msk.mxu0 %vm1291_vm3, %v6474_v8 }
 0x236   : > { %5231 = vmatpush3.xpose.msk.msra.mxu0 %vm1291_vm3, %v6474_v8 }
 0x237   : > { %5232 = vmatprep.subr.msk.mxu0 %vm1291_vm3, %v6480_v9 }
 0x23a   : > { %5233 = vmatpush3.xpose.msk.msra.mxu0 %vm1291_vm3, %v6480_v9 }
 0x23b   : > { %5234 = vmatprep.subr.msk.mxu0 %vm1291_vm3, %v6486_v10 }
 0x23e   : > { %5235 = vmatpush3.xpose.msk.msra.mxu0 %vm1291_vm3, %v6486_v10 }
 0x23f   : > { %5236 = vmatprep.subr.msk.mxu0 %vm1291_vm3, %v6492_v11 }
 0x242   : > { %5237 = vmatpush3.xpose.msk.msra.mxu0 %vm1291_vm3, %v6492_v11 }
 0x243   : > { %5238 = vmatprep.subr.msk.mxu0 %vm1291_vm3, %v6498_v12 }
 0x246   : > { %5239 = vmatpush3.xpose.msk.msra.mxu0 %vm1291_vm3, %v6498_v12 }
 0x247   : > { %5240 = vmatprep.subr.msk.mxu0 %vm1291_vm3, %v6504_v13 }
 0x24a   : > { %5241 = vmatpush3.xpose.msk.msra.mxu0 %vm1291_vm3, %v6504_v13 }
 0x24b   : > { %5242 = vmatprep.subr.msk.mxu0 %vm1291_vm3, %v6510_v14 }
 0x24e   : > { %5243 = vmatpush3.xpose.msk.msra.mxu0 %vm1291_vm3, %v6510_v14 }
 0x24f   : > { %5244 = vmatprep.subr.msk.mxu0 %vm1291_vm3, %v6516_v15 }
 0x252   : > { %5245 = vmatpush3.xpose.msk.msra.mxu0 %vm1291_vm3, %v6516_v15 }
 0x255   : > { %5247 = vmatmul.mubr.msk.f32.vlgmr.msra.gmra.mxu0 %vm1291_vm3, %v6522_v16 }
 0x256   : > { %5249 = vmatprep.mubr.msk.f32.mxu0 %vm1291_vm3, %v6524_v17 }
 0x259   : > { %5250 = vmatmul.mubr.msk.f32.gmra.mxu0 %vm1291_vm3, %v6530_v18 }
 0x25a   : > { %5252 = vmatprep.mubr.msk.f32.mxu0 %vm1291_vm3, %v6532_v19 }
 0x25d   : > { %5253 = vmatmul.mubr.msk.f32.gmra.mxu0 %vm1291_vm3, %v6538_v20 }
 0x25e   : > { %5255 = vmatprep.mubr.msk.f32.mxu0 %vm1291_vm3, %v6540_v21 }
 0x261   : > { %5256 = vmatmul.mubr.msk.f32.gmra.mxu0 %vm1291_vm3, %v6546_v22 }
 0x315   : > { %v5248_v33 = vpop.f32.mrf.mxu0 }
 0x316   : > { %v6582_v45 = vsel %vm1260_vm6, -1.25e+19, %v5248_v33  ;;  %v1166_v33 = vpop.f32.mrf.mxu1 }
 0x317   : > { %v1430_v36 = vpop.f32.mrf.mxu0  ;;  %v1167_v34 = vadd.f32 %v4708_v59, %v1166_v33 }
 0x318   : > { %v6566_v37 = vsel %vm1259_vm4, -1.25e+19, %v1430_v36  ;;  %v5201_v35 = vpop.f32.mrf.mxu1 }
 0x319   : > { %1485 = vmax.xlane.f32.xlu0 %v6566_v37  ;;  %v5251_v38 = vpop.f32.mrf.mxu0  ;;  %1229 = vst.msk [vmem:[#allocation4 + $0x20] sm:$0xff] %vm817_vm2, %v1167_v34  ;;  %v1182_v36 = vadd.f32 %v5201_v35, %v4708_v59 }
 0x31a   : > { %v6577_v43 = vsel %vm1262_vm5, -1.25e+19, %v5251_v38  ;;  %v1176_v38 = vpop.f32.mrf.mxu1 }
 0x31b   : > { %1491 = vmax.xlane.f32.xlu1 %v6577_v43  ;;  %v1440_v44 = vpop.f32.mrf.mxu0  ;;  %1232 = vst.msk [vmem:[#allocation4 + $0x38] sm:$0xff] %vm817_vm2, %v1182_v36  ;;  %v1177_v41 = vadd.f32 %v4708_v59, %v1176_v38 }
 0x31c   : > { %v6586_v46 = vsel %vm1261_vm7, -1.25e+19, %v1440_v44  ;;  %v5204_v42 = vpop.f32.mrf.mxu1 }
 0x31d   : > { %1487 = vmax.xlane.f32.xlu0 %v6582_v45  ;;  %v5254_v47 = vpop.f32.mrf.mxu0  ;;  %1231 = vst.msk [vmem:[#allocation4 + $0x30] sm:$0xff] %vm817_vm2, %v1177_v41  ;;  %v1192_v44 = vadd.f32 %v5204_v42, %v4708_v59 }
 0x31e   : > { %v6602_v52 = vsel %vm1264_vm9, -1.25e+19, %v5254_v47  ;;  %v1186_v47 = vpop.f32.mrf.mxu1 }
 0x31f   : > { %1489 = vmax.xlane.f32.xlu1 %v6586_v46  ;;  %v1450_v50 = vpop.f32.mrf.mxu0  ;;  %1234 = vst.msk [vmem:[#allocation4 + $0x48] sm:$0xff] %vm817_vm2, %v1192_v44 }
 0x320   : > { %v6598_v51 = vsel %vm1263_vm8, -1.25e+19, %v1450_v50  ;;  %v1187_v50 = vadd.f32 %v4708_v59, %v1186_v47  ;;  %v6675_v47 = vld [vmem:[#allocation4 + $0x28] sm:$0xff] }
 0x321   : > { %1493 = vmax.xlane.f32.xlu0 %v6598_v51  ;;  %v5257_v53 = vpop.f32.mrf.mxu0 }
 0x322   : > { %v6614_v56 = vsel %vm1266_vm11, -1.25e+19, %v5257_v53  ;;  %v5207_v53 = vpop.f32.mrf.mxu1  ;;  %1233 = vst.msk [vmem:[#allocation4 + $0x40] sm:$0xff] %vm817_vm2, %v1187_v50  ;;  %v6667_v42 = vld [vmem:[#allocation4 + $0x38] sm:$0xff]  ;;  %v6679_v50 = vld [vmem:[#allocation4 + $0x20] sm:$0xff] }
 0x323   : > { %v1460_v54 = vpop.f32.mrf.mxu0  ;;  %1495 = vmax.xlane.f32.xlu1 %v6602_v52  ;;  %8305 = vst [vmem:[#allocation18_spill] sm:$0xff] %v6679_v50  ;;  %v7353_v39 = vld [vmem:[#allocation4 + $0x38] sm:$0xff] }
 0x324   : > { %v6610_v55 = vsel %vm1265_vm10, -1.25e+19, %v1460_v54  ;;  %v1202_v54 = vadd.f32 %v5207_v53, %v4708_v59  ;;  %v1196_v57 = vpop.f32.mrf.mxu1  ;;  %v6671_v44 = vld [vmem:[#allocation4 + $0x30] sm:$0xff]  ;;  %v6683_v53 = vld [vmem:[#allocation4 + $0x18] sm:$0xff]  ;;  %8365 = vst [vmem:[#allocation70_spill] sm:$0xff] %v7353_v39 }
 0x325   : > { %1497 = vmax.xlane.f32.xlu0 %v6610_v55  ;;  %v1197_v58 = vadd.f32 %v4708_v59, %v1196_v57  ;;  %v6691_v57 = vld [vmem:[#allocation4 + $0x8] sm:$0xff] }
 0x326   : > { %1236 = vst.msk [vmem:[#allocation4 + $0x58] sm:$0xff] %vm817_vm2, %v1202_v54  ;;  %v5210_v60 = vpop.f32.mrf.mxu1  ;;  %v6659_v38 = vld [vmem:[#allocation4 + $0x48] sm:$0xff]  ;;  %v6687_v54 = vld [vmem:[#allocation4 + $0x10] sm:$0xff]  ;;  %8307 = vst [vmem:[#allocation20_spill] sm:$0xff] %v6691_v57 }
 0x327   : > { %1499 = vmax.xlane.f32.xlu1 %v6614_v56  ;;  %1235 = vst.msk [vmem:[#allocation4 + $0x50] sm:$0xff] %vm817_vm2, %v1197_v58  ;;  %v1212_v61 = vadd.f32 %v5210_v60, %v4708_v59  ;;  %8306 = vst [vmem:[#allocation19_spill] sm:$0xff] %v6687_v54  ;;  %v6695_v58 = vld [vmem:[#allocation4] sm:$0xff]  ;;  %v7345_v48 = vld [vmem:[#allocation4 + $0x48] sm:$0xff] }
 0x328   : > { %v1206_v62 = vpop.f32.mrf.mxu1  ;;  %8308 = vst [vmem:[#allocation21_spill] sm:$0xff] %v6695_v58  ;;  %v6701_v60 = vld [vmem:[#allocation5] sm:$0xff] }
 0x329   : > { %1238 = vst.msk [vmem:[#allocation4 + $0x68] sm:$0xff] %vm817_vm2, %v1212_v61  ;;  %v1207_v23 = vadd.f32 %v4708_v59, %v1206_v62  ;;  %v6663_v41 = vld [vmem:[#allocation4 + $0x40] sm:$0xff]  ;;  %8309 = vst [vmem:[#allocation22_spill] sm:$0xff] %v6701_v60  ;;  %v6703_v62 = vld [vmem:[#allocation5 + $0x18] sm:$0xff] }
 0x32a   : > { %v5213_v24 = vpop.f32.mrf.mxu1  ;;  %8310 = vst [vmem:[#allocation23_spill] sm:$0xff] %v6703_v62 }
 0x32b   : > { %1237 = vst.msk [vmem:[#allocation4 + $0x60] sm:$0xff] %vm817_vm2, %v1207_v23  ;;  %v1222_v25 = vadd.f32 %v5213_v24, %v4708_v59  ;;  %v6708_v24 = vld [vmem:[#allocation5 + $0x8] sm:$0xff] }
 0x32c   : > { %v1216_v26 = vpop.f32.mrf.mxu1  ;;  %8312 = vst [vmem:[#allocation25_spill] sm:$0xff] %v6708_v24 }
 0x32d   : > { %1240 = vst.msk [vmem:[#allocation4 + $0x78] sm:$0xff] %vm817_vm2, %v1222_v25  ;;  %v1217_v27 = vadd.f32 %v4708_v59, %v1216_v26  ;;  %v6652_v59 = vld [vmem:[#allocation4 + $0x58] sm:$0xff] }
 0x32e   : > { %v6655_v36 = vld [vmem:[#allocation4 + $0x50] sm:$0xff] }
 0x32f   : > { %1239 = vst.msk [vmem:[#allocation4 + $0x70] sm:$0xff] %vm817_vm2, %v1217_v27 }
 0x330   : > { %v6644_v34 = vld [vmem:[#allocation4 + $0x68] sm:$0xff] }
 0x332   : > { %v6647_v35 = vld [vmem:[#allocation4 + $0x60] sm:$0xff] }
 0x334   : > { %v6637_v29 = vld [vmem:[#allocation4 + $0x78] sm:$0xff] }
 0x335   : > { %5258 = vmatprep.subr.mxu1 %v6637_v29 }
 0x336   : > { %5259 = vmatpush3.msra.mxu1 %v6637_v29  ;;  %v6641_v33 = vld [vmem:[#allocation4 + $0x70] sm:$0xff] }
 0x337   : > { %5260 = vmatprep.subr.mxu1 %v6641_v33 }
 0x338   : > { %5261 = vmatpush3.msra.mxu1 %v6641_v33 }
 0x339   : > { %5262 = vmatprep.subr.mxu1 %v6644_v34 }
 0x33a   : > { %5263 = vmatpush3.msra.mxu1 %v6644_v34 }
 0x33b   : > { %5264 = vmatprep.subr.mxu1 %v6647_v35 }
 0x33c   : > { %5265 = vmatpush3.msra.mxu1 %v6647_v35 }
 0x33d   : > { %5266 = vmatprep.subr.mxu1 %v6652_v59 }
 0x33e   : > { %5267 = vmatpush3.msra.mxu1 %v6652_v59 }
 0x33f   : > { %5268 = vmatprep.subr.mxu1 %v6655_v36 }
 0x340   : > { %5269 = vmatpush3.msra.mxu1 %v6655_v36 }
 0x341   : > { %5270 = vmatprep.subr.mxu1 %v6659_v38 }
 0x342   : > { %5271 = vmatpush3.msra.mxu1 %v6659_v38 }
 0x343   : > { %5272 = vmatprep.subr.mxu1 %v6663_v41 }
 0x344   : > { %5273 = vmatpush3.msra.mxu1 %v6663_v41 }
 0x345   : > { %5274 = vmatprep.subr.mxu1 %v6667_v42 }
 0x346   : > { %5275 = vmatpush3.msra.mxu1 %v6667_v42 }
 0x347   : > { %5276 = vmatprep.subr.mxu1 %v6671_v44 }
 0x348   : > { %5277 = vmatpush3.msra.mxu1 %v6671_v44 }
 0x349   : > { %5278 = vmatprep.subr.mxu1 %v6675_v47 }
 0x34a   : > { %5279 = vmatpush3.msra.mxu1 %v6675_v47 }
 0x34b   : > { %5280 = vmatprep.subr.mxu1 %v6679_v50 }
 0x34c   : > { %5281 = vmatpush3.msra.mxu1 %v6679_v50  ;;  %v6747_v50 = vld [vmem:[#allocation5 + $0x30] sm:$0xff] }
 0x34d   : > { %5282 = vmatprep.subr.mxu1 %v6683_v53  ;;  %8317 = vst [vmem:[#allocation30_spill] sm:$0xff] %v6747_v50 }
 0x34e   : > { %5283 = vmatpush3.msra.mxu1 %v6683_v53 }
 0x34f   : > { %5284 = vmatprep.subr.mxu1 %v6687_v54 }
 0x350   : > { %5285 = vmatpush3.msra.mxu1 %v6687_v54  ;;  %v6718_v54 = vld [vmem:[#allocation5 + $0x10] sm:$0xff] }
 0x351   : > { %5286 = vmatprep.subr.mxu1 %v6691_v57  ;;  %8313 = vst [vmem:[#allocation26_spill] sm:$0xff] %v6718_v54 }
 0x352   : > { %5287 = vmatpush3.msra.mxu1 %v6691_v57  ;;  %v6738_v57 = vld [vmem:[#allocation5 + $0x28] sm:$0xff] }
 0x353   : > { %5288 = vmatprep.subr.mxu1 %v6695_v58  ;;  %8316 = vst [vmem:[#allocation29_spill] sm:$0xff] %v6738_v57 }
 0x354   : > { %5289 = vmatpush3.msra.mxu1 %v6695_v58 }
 0x3a2   : > { %v1486_v61 = vpop.xlane.xlu0 %1485 }
 0x3a3   : > { %v6706_v23 = vmax.f32 %v6701_v60, %v1486_v61  ;;  %v6727_v60 = vld [vmem:[#allocation5 + $0x20] sm:$0xff] }
 0x3a4   : > { %v1492_v25 = vpop.xlane.xlu1 %1491 }
 0x3a5   : > { %8311 = vst [vmem:[#allocation24_spill] sm:$0xff] %v6706_v23  ;;  %1839 = vst.msk [vmem:[#allocation5] sm:$0xff] %vm1637_vm12, %v6706_v23  ;;  %1535 = vperm.xlu0 %5708, %v6706_v23   ;;  %v6716_v27 = vmax.f32 %v6703_v62, %v1492_v25 }
 0x3a6   : > { %v1488_v58 = vpop.xlane.xlu0 %1487 }
 0x3a7   : > { %v6721_v61 = vmax.f32 %v6708_v24, %v1488_v58  ;;  %1842 = vst.msk [vmem:[#allocation5 + $0x18] sm:$0xff] %vm1637_vm12, %v6716_v27 }
 0x3a8   : > { %v1490_v26 = vpop.xlane.xlu1 %1489 }
 0x3a9   : > { %8314 = vst [vmem:[#allocation27_spill] sm:$0xff] %v6721_v61  ;;  %1840 = vst.msk [vmem:[#allocation5 + $0x8] sm:$0xff] %vm1637_vm12, %v6721_v61  ;;  %1540 = vperm.xlu1 %5709, %v6721_v61   ;;  %1550 = vperm.xlu0 %5708, %v6716_v27   ;;  %v6736_v58 = vmax.f32 %v6718_v54, %v1490_v26  ;;  %v6759_v54 = vld [vmem:[#allocation5 + $0x38] sm:$0xff] }
 0x3aa   : > { %v1494_v25 = vpop.xlane.xlu0 %1493  ;;  %8319 = vst [vmem:[#allocation32_spill] sm:$0xff] %v6759_v54 }
 0x3ab   : > { %8315 = vst [vmem:[#allocation28_spill] sm:$0xff] %v6736_v58  ;;  %1841 = vst.msk [vmem:[#allocation5 + $0x10] sm:$0xff] %vm1637_vm12, %v6736_v58  ;;  %v6745_v23 = vmax.f32 %v6727_v60, %v1494_v25 }
 0x3ac   : > { %v1496_v24 = vpop.xlane.xlu1 %1495 }
 0x3ad   : > { %1941 = vrot.lane.b32.xlu1 %v6426_v63, %s5979_s24  ;;  %1545 = vperm.xlu0 %5708, %v6736_v58   ;;  %1843 = vst.msk [vmem:[#allocation5 + $0x20] sm:$0xff] %vm1637_vm12, %v6745_v23  ;;  %v6757_v62 = vmax.f32 %v6738_v57, %v1496_v24 }
 0x3ae   : > { %v1498_v25 = vpop.xlane.xlu0 %1497 }
 0x3af   : > { %8318 = vst [vmem:[#allocation31_spill] sm:$0xff] %v6757_v62  ;;  %1844 = vst.msk [vmem:[#allocation5 + $0x28] sm:$0xff] %vm1637_vm12, %v6757_v62  ;;  %v6766_v63 = vmax.f32 %v6747_v50, %v1498_v25  ;;  %v7066_v25 = vld [vmem:[#allocation5 + $0x60] sm:$0xff] }
 0x3b0   : > { %v1500_v58 = vpop.xlane.xlu1 %1499 }
 0x3b1   : > { %8320 = vst [vmem:[#allocation33_spill] sm:$0xff] %v6766_v63  ;;  %1939 = vrot.lane.b32.xlu1 %v6432_v0, %s5979_s24  ;;  %1925 = vrot.lane.b32.xlu0 %v6474_v8, %s5979_s24  ;;  %1845 = vst.msk [vmem:[#allocation5 + $0x30] sm:$0xff] %vm1637_vm12, %v6766_v63  ;;  %v6777_v61 = vmax.f32 %v6759_v54, %v1500_v58 }
 0x3b3   : > { %8321 = vst [vmem:[#allocation34_spill] sm:$0xff] %v6777_v61  ;;  %1846 = vst.msk [vmem:[#allocation5 + $0x38] sm:$0xff] %vm1637_vm12, %v6777_v61 }
 0x3b5   : > { %1937 = vrot.lane.b32.xlu1 %v6438_v1, %s5979_s24  ;;  %1565 = vperm.xlu0 %5708, %v6766_v63  }
 0x3b9   : > { %1935 = vrot.lane.b32.xlu1 %v6444_v2, %s5979_s24  ;;  %1570 = vperm.xlu0 %5708, %v6777_v61  }
 0x3bd   : > { %1933 = vrot.lane.b32.xlu1 %v6450_v3, %s5979_s24  ;;  %1919 = vrot.lane.b32.xlu0 %v6492_v11, %s5979_s24 }
 0x3c1   : > { %1931 = vrot.lane.b32.xlu1 %v6456_v4, %s5979_s24  ;;  %1915 = vrot.lane.b32.xlu0 %v6504_v13, %s5979_s24 }
 0x3c5   : > { %1929 = vrot.lane.b32.xlu1 %v6462_v6, %s5979_s24  ;;  %1911 = vrot.lane.b32.xlu0 %v6516_v15, %s5979_s24 }
 0x3c9   : > { %1927 = vrot.lane.b32.xlu1 %v6468_v7, %s5979_s24  ;;  %1881 = vrot.lane.b32.xlu0 %v6522_v16, %s5979_s24 }
 0x3cd   : > { %1560 = vperm.xlu1 %5709, %v6757_v62   ;;  %1885 = vrot.lane.b32.xlu0 %v6530_v18, %s5979_s24 }
 0x3d1   : > { %1555 = vperm.xlu1 %5709, %v6745_v23   ;;  %1889 = vrot.lane.b32.xlu0 %v6538_v20, %s5979_s24 }
 0x3d5   : > { %1923 = vrot.lane.b32.xlu1 %v6480_v9, %s5979_s24  ;;  %1893 = vrot.lane.b32.xlu0 %v6546_v22, %s5979_s24 }
 0x3d9   : > { %1921 = vrot.lane.b32.xlu1 %v6486_v10, %s5979_s24  ;;  %2392 = vrot.lane.b32.xlu0 %v6637_v29, %s5979_s24 }
 0x3dd   : > { %1917 = vrot.lane.b32.xlu1 %v6498_v12, %s5979_s24 }
 0x3e1   : > { %1913 = vrot.lane.b32.xlu1 %v6510_v14, %s5979_s24 }
 0x3e5   : > { %1879 = vrot.lane.b32.xlu1 %v6329_v5, %s5979_s24 }
 0x3e9   : > { %1883 = vrot.lane.b32.xlu1 %v6524_v17, %s5979_s24 }
 0x3ed   : > { %1887 = vrot.lane.b32.xlu1 %v6532_v19, %s5979_s24 }
 0x3f1   : > { %1891 = vrot.lane.b32.xlu1 %v6540_v21, %s5979_s24 }
 0x3f5   : > { %2390 = vrot.lane.b32.xlu1 %v6641_v33, %s5979_s24 }
 0x3f9   : > { %2388 = vrot.lane.b32.xlu1 %v6644_v34, %s5979_s24 }
 0x420   : > { %v1536_v0 = vpop.permute.xlu0 %1535 }
 0x421   : > { %v1573_v1 = vsub.f32 %v6566_v37, %v1536_v0 }
 0x423   : > { %v1581_v2 = vmul.f32 1.442695, %v1573_v1 }
 0x424   : > { %v1541_v5 = vpop.permute.xlu1 %1540  ;;  %v1551_v3 = vpop.permute.xlu0 %1550 }
 0x425   : > { %5710 = vpow2.f32 %v1581_v2  ;;  %v1574_v4 = vsub.f32 %v6582_v45, %v1541_v5  ;;  %v1576_v7 = vsub.f32 %v6577_v43, %v1551_v3 }
 0x427   : > { %v1583_v6 = vmul.f32 1.442695, %v1574_v4  ;;  %v1587_v11 = vmul.f32 1.442695, %v1576_v7 }
 0x428   : > { %v1942_v8 = vpop.permute.xlu1 %1941  ;;  %v1546_v9 = vpop.permute.xlu0 %1545 }
 0x429   : > { %5712 = vpow2.f32 %v1583_v6  ;;  %v1575_v10 = vsub.f32 %v6586_v46, %v1546_v9  ;;  %5302 = vmatprep.subr.msk.mxu1 %vm1291_vm3, %v1942_v8 }
 0x42b   : > { %v1585_v12 = vmul.f32 1.442695, %v1575_v10 }
 0x42c   : > { %v1940_v13 = vpop.permute.xlu1 %1939  ;;  %v1926_v14 = vpop.permute.xlu0 %1925 }
 0x42d   : > { %5714 = vpow2.f32 %v1585_v12 }
 0x42e   : > { %5716 = vpow2.f32 %v1587_v11 }
 0x430   : > { %v1938_v15 = vpop.permute.xlu1 %1937  ;;  %v1566_v16 = vpop.permute.xlu0 %1565 }
 0x431   : > { %v1579_v6 = vsub.f32 %v6610_v55, %v1566_v16 }
 0x432   : > { %v6840_v17 = vpop.eup %5710 }
 0x433   : > { %5290 = vmatprep.mubr.f32.mxu1 %v6840_v17 }
 0x434   : > { %v1936_v18 = vpop.permute.xlu1 %1935  ;;  %v1571_v19 = vpop.permute.xlu0 %1570 }
 0x435   : > { %v1580_v10 = vsub.f32 %v6614_v56, %v1571_v19 }
 0x436   : > { %v6843_v20 = vpop.eup %5712 }
 0x437   : > { %5291 = vmatmul.mubr.f32.vlgmr.msra.gmra.mxu1 %v6843_v20 }
 0x438   : > { %5303 = vmatpush3.xpose.msk.msra.mxu1 %vm1291_vm3, %v1942_v8  ;;  %v1934_v21 = vpop.permute.xlu1 %1933  ;;  %v6847_v22 = vpop.permute.xlu0 %1919 }
 0x439   : > { %5304 = vmatprep.subr.msk.mxu1 %vm1291_vm3, %v1940_v13 }
 0x43a   : > { %v6850_v37 = vpop.eup %5714 }
 0x43b   : > { %5293 = vmatprep.mubr.f32.mxu1 %v6850_v37  ;;  %v6853_v43 = vpop.eup %5716 }
 0x43c   : > { %5305 = vmatpush3.xpose.msk.msra.mxu1 %vm1291_vm3, %v1940_v13  ;;  %v1932_v45 = vpop.permute.xlu1 %1931  ;;  %v6856_v46 = vpop.permute.xlu0 %1915  ;;  %v1593_v13 = vmul.f32 1.442695, %v1579_v6 }
 0x43d   : > { %5294 = vmatmul.mubr.f32.gmra.mxu1 %v6853_v43  ;;  %5306 = vmatprep.subr.msk.mxu1 %vm1291_vm3, %v1938_v15 }
 0x440   : > { %5307 = vmatpush3.xpose.msk.msra.mxu1 %vm1291_vm3, %v1938_v15  ;;  %v1930_v58 = vpop.permute.xlu1 %1929  ;;  %v6861_v0 = vpop.permute.xlu0 %1911 }
 0x441   : > { %5308 = vmatprep.subr.msk.mxu1 %vm1291_vm3, %v1936_v18 }
 0x444   : > { %5309 = vmatpush3.xpose.msk.msra.mxu1 %vm1291_vm3, %v1936_v18  ;;  %v1928_v1 = vpop.permute.xlu1 %1927  ;;  %v6865_v2 = vpop.permute.xlu0 %1881 }
 0x445   : > { %5310 = vmatprep.subr.msk.mxu1 %vm1291_vm3, %v1934_v21 }
 0x448   : > { %5311 = vmatpush3.xpose.msk.msra.mxu1 %vm1291_vm3, %v1934_v21  ;;  %v1561_v5 = vpop.permute.xlu1 %1560  ;;  %v6869_v3 = vpop.permute.xlu0 %1885 }
 0x449   : > { %5312 = vmatprep.subr.msk.mxu1 %vm1291_vm3, %v1932_v45  ;;  %v1578_v4 = vsub.f32 %v6602_v52, %v1561_v5  ;;  %v1595_v52 = vmul.f32 1.442695, %v1580_v10 }
 0x44b   : > { %v1591_v11 = vmul.f32 1.442695, %v1578_v4 }
 0x44c   : > { %5313 = vmatpush3.xpose.msk.msra.mxu1 %vm1291_vm3, %v1932_v45  ;;  %v1556_v7 = vpop.permute.xlu1 %1555  ;;  %v1890_v8 = vpop.permute.xlu0 %1889 }
 0x44d   : > { %v1577_v9 = vsub.f32 %v6598_v51, %v1556_v7  ;;  %5314 = vmatprep.subr.msk.mxu1 %vm1291_vm3, %v1930_v58 }
 0x44f   : > { %v1589_v12 = vmul.f32 1.442695, %v1577_v9 }
 0x450   : > { %5315 = vmatpush3.xpose.msk.msra.mxu1 %vm1291_vm3, %v1930_v58  ;;  %v1924_v15 = vpop.permute.xlu1 %1923  ;;  %v1894_v18 = vpop.permute.xlu0 %1893 }
 0x451   : > { %5718 = vpow2.f32 %v1589_v12  ;;  %5316 = vmatprep.subr.msk.mxu1 %vm1291_vm3, %v1928_v1 }
 0x452   : > { %5720 = vpow2.f32 %v1591_v11 }
 0x453   : > { %5722 = vpow2.f32 %v1593_v13 }
 0x454   : > { %5317 = vmatpush3.xpose.msk.msra.mxu1 %vm1291_vm3, %v1928_v1  ;;  %v1922_v51 = vpop.permute.xlu1 %1921  ;;  %v2393_v55 = vpop.permute.xlu0 %2392  ;;  %5724 = vpow2.f32 %v1595_v52 }
 0x455   : > { %5318 = vmatprep.subr.msk.mxu1 %vm1291_vm3, %v1926_v14  ;;  %5346 = vmatprep.subr.mxu0 %v2393_v55 }
 0x456   : > { %5347 = vmatpush3.msra.mxu0 %v2393_v55 }
 0x458   : > { %5319 = vmatpush3.xpose.msk.msra.mxu1 %vm1291_vm3, %v1926_v14  ;;  %v1918_v56 = vpop.permute.xlu1 %1917 }
 0x459   : > { %5320 = vmatprep.subr.msk.mxu1 %vm1291_vm3, %v1924_v15 }
 0x45c   : > { %5321 = vmatpush3.xpose.msk.msra.mxu1 %vm1291_vm3, %v1924_v15  ;;  %v1914_v16 = vpop.permute.xlu1 %1913 }
 0x45d   : > { %5322 = vmatprep.subr.msk.mxu1 %vm1291_vm3, %v1922_v51 }
 0x45e   : > { %v6886_v19 = vpop.eup %5718 }
 0x45f   : > { %5296 = vmatprep.mubr.f32.mxu1 %v6886_v19  ;;  %v6889_v21 = vpop.eup %5720 }
 0x460   : > { %5323 = vmatpush3.xpose.msk.msra.mxu1 %vm1291_vm3, %v1922_v51  ;;  %v1880_v45 = vpop.permute.xlu1 %1879  ;;  %v6892_v58 = vpop.eup %5722 }
 0x461   : > { %5297 = vmatmul.mubr.f32.gmra.mxu1 %v6889_v21  ;;  %5324 = vmatprep.subr.msk.mxu1 %vm1291_vm3, %v6847_v22  ;;  %v6898_v14 = vpop.eup %5724 }
 0x462   : > { %5299 = vmatprep.mubr.f32.mxu1 %v6892_v58 }
 0x464   : > { %5325 = vmatpush3.xpose.msk.msra.mxu1 %vm1291_vm3, %v6847_v22  ;;  %v1884_v1 = vpop.permute.xlu1 %1883 }
 0x465   : > { %5300 = vmatmul.mubr.f32.gmra.mxu1 %v6898_v14  ;;  %5326 = vmatprep.subr.msk.mxu1 %vm1291_vm3, %v1918_v56 }
 0x466   : > { %5334 = vmatprep.mubr.msk.f32.mxu1 %vm1291_vm3, %v1880_v45 }
 0x468   : > { %5327 = vmatpush3.xpose.msk.msra.mxu1 %vm1291_vm3, %v1918_v56  ;;  %v1888_v5 = vpop.permute.xlu1 %1887 }
 0x469   : > { %5328 = vmatprep.subr.msk.mxu1 %vm1291_vm3, %v6856_v46 }
 0x46c   : > { %5329 = vmatpush3.xpose.msk.msra.mxu1 %vm1291_vm3, %v6856_v46  ;;  %v1892_v4 = vpop.permute.xlu1 %1891 }
 0x46d   : > { %5330 = vmatprep.subr.msk.mxu1 %vm1291_vm3, %v1914_v16 }
 0x470   : > { %5331 = vmatpush3.xpose.msk.msra.mxu1 %vm1291_vm3, %v1914_v16  ;;  %v2391_v22 = vpop.permute.xlu1 %2390 }
 0x471   : > { %5332 = vmatprep.subr.msk.mxu1 %vm1291_vm3, %v6861_v0  ;;  %5348 = vmatprep.subr.mxu0 %v2391_v22 }
 0x472   : > { %5349 = vmatpush3.msra.mxu0 %v2391_v22  ;;  %v6985_v22 = vld [vmem:[#allocation5 + $0x48] sm:$0xff] }
 0x473   : > { %8330 = vst [vmem:[#allocation43_spill] sm:$0xff] %v6985_v22 }
 0x474   : > { %5333 = vmatpush3.xpose.msk.msra.mxu1 %vm1291_vm3, %v6861_v0  ;;  %v2389_v6 = vpop.permute.xlu1 %2388 }
 0x475   : > { %5350 = vmatprep.subr.mxu0 %v2389_v6 }
 0x476   : > { %5351 = vmatpush3.msra.mxu0 %v2389_v6 }
 0x477   : > { %5335 = vmatmul.mubr.msk.f32.vlgmr.msra.gmra.mxu1 %vm1291_vm3, %v6865_v2 }
 0x478   : > { %5337 = vmatprep.mubr.msk.f32.mxu1 %vm1291_vm3, %v1884_v1 }
 0x47b   : > { %5338 = vmatmul.mubr.msk.f32.gmra.mxu1 %vm1291_vm3, %v6869_v3 }
 0x47c   : > { %5340 = vmatprep.mubr.msk.f32.mxu1 %vm1291_vm3, %v1888_v5 }
 0x47f   : > { %5341 = vmatmul.mubr.msk.f32.gmra.mxu1 %vm1291_vm3, %v1890_v8 }
 0x480   : > { %5343 = vmatprep.mubr.msk.f32.mxu1 %vm1291_vm3, %v1892_v4 }
 0x483   : > { %5344 = vmatmul.mubr.msk.f32.gmra.mxu1 %vm1291_vm3, %v1894_v18 }
 0x4f7   : > { %v6925_v46 = vpop.f32.mrf.mxu1 }
 0x4f8   : > { %8322 = vst [vmem:[#allocation35_spill] sm:$0xff] %v6925_v46  ;;  %v7085_v46 = vld [vmem:[#allocation5 + $0x70] sm:$0xff] }
 0x4f9   : > { %v6927_v0 = vpop.f32.mrf.mxu1  ;;  %8345 = vst [vmem:[#allocation50_spill] sm:$0xff] %v7085_v46 }
 0x4fa   : > { %8323 = vst [vmem:[#allocation36_spill] sm:$0xff] %v6927_v0  ;;  %v7171_v0 = vld [vmem:[#allocation2 + $0x30] sm:$0xff] }
 0x4fd   : > { %v6929_v7 = vpop.f32.mrf.mxu1 }
 0x4fe   : > { %8324 = vst [vmem:[#allocation37_spill] sm:$0xff] %v6929_v7  ;;  %v7165_v7 = vld [vmem:[#allocation2 + $0x18] sm:$0xff] }
 0x4ff   : > { %v6931_v2 = vpop.f32.mrf.mxu1 }
 0x500   : > { %8325 = vst [vmem:[#allocation38_spill] sm:$0xff] %v6931_v2  ;;  %v7094_v2 = vld [vmem:[#allocation5 + $0x78] sm:$0xff] }
 0x501   : > { %8347 = vst [vmem:[#allocation52_spill] sm:$0xff] %v7094_v2 }
 0x521   : > { %v6933_v9 = vpop.f32.mrf.mxu1 }
 0x522   : > { %8326 = vst [vmem:[#allocation39_spill] sm:$0xff] %v6933_v9 }
 0x523   : > { %v6935_v10 = vpop.f32.mrf.mxu1 }
 0x524   : > { %8327 = vst [vmem:[#allocation40_spill] sm:$0xff] %v6935_v10 }
 0x525   : > { %v6937_v3 = vpop.f32.mrf.mxu1 }
 0x526   : > { %8328 = vst [vmem:[#allocation41_spill] sm:$0xff] %v6937_v3 }
 0x527   : > { %v6939_v11 = vpop.f32.mrf.mxu1 }
 0x528   : > { %8329 = vst [vmem:[#allocation42_spill] sm:$0xff] %v6939_v11  ;;  %v7075_v11 = vld [vmem:[#allocation5 + $0x68] sm:$0xff] }
 0x529   : > { %8343 = vst [vmem:[#allocation48_spill] sm:$0xff] %v7075_v11 }
 0x537   : > { %v5336_v8 = vpop.f32.mrf.mxu1 }
 0x538   : > { %v6943_v12 = vsel %vm1260_vm6, -1.25e+19, %v5336_v8  ;;  %v6987_v8 = vld [vmem:[#allocation5 + $0x40] sm:$0xff] }
 0x539   : > { %2115 = vmax.xlane.f32.xlu0 %v6943_v12  ;;  %v2057_v13 = vpop.f32.mrf.mxu1  ;;  %8331 = vst [vmem:[#allocation44_spill] sm:$0xff] %v6987_v8 }
 0x53a   : > { %v6948_v15 = vsel %vm1259_vm4, -1.25e+19, %v2057_v13 }
 0x53b   : > { %2113 = vmax.xlane.f32.xlu1 %v6948_v15  ;;  %v5339_v18 = vpop.f32.mrf.mxu1 }
 0x53c   : > { %v6961_v45 = vsel %vm1262_vm5, -1.25e+19, %v5339_v18 }
 0x53d   : > { %v2067_v52 = vpop.f32.mrf.mxu1 }
 0x53e   : > { %v6957_v56 = vsel %vm1261_vm7, -1.25e+19, %v2067_v52 }
 0x53f   : > { %v5342_v51 = vpop.f32.mrf.mxu1 }
 0x540   : > { %v6971_v1 = vsel %vm1264_vm9, -1.25e+19, %v5342_v51 }
 0x541   : > { %v2077_v55 = vpop.f32.mrf.mxu1 }
 0x543   : > { %v5345_v16 = vpop.f32.mrf.mxu1 }
 0x544   : > { %v6981_v4 = vsel %vm1266_vm11, -1.25e+19, %v5345_v16 }
 0x54c   : > { %2384 = vrot.lane.b32.xlu1 %v6652_v59, %s5979_s24  ;;  %v6966_v59 = vsel %vm1263_vm8, -1.25e+19, %v2077_v55 }
 0x54f   : > { %2386 = vrot.lane.b32.xlu0 %v6647_v35, %s5979_s24  ;;  %v2087_v35 = vpop.f32.mrf.mxu1 }
 0x550   : > { %v6976_v5 = vsel %vm1265_vm10, -1.25e+19, %v2087_v35 }
 0x56e   : > { %2117 = vmax.xlane.f32.xlu0 %v6957_v56 }
 0x570   : > { %2119 = vmax.xlane.f32.xlu1 %v6961_v45 }
 0x572   : > { %2121 = vmax.xlane.f32.xlu0 %v6966_v59 }
 0x574   : > { %2123 = vmax.xlane.f32.xlu1 %v6971_v1 }
 0x576   : > { %2125 = vmax.xlane.f32.xlu0 %v6976_v5 }
 0x578   : > { %2127 = vmax.xlane.f32.xlu1 %v6981_v4 }
 0x5c2   : > { %v2116_v6 = vpop.xlane.xlu0 %2115 }
 0x5c3   : > { %v6990_v13 = vmax.f32 %v6985_v22, %v2116_v6  ;;  %v7025_v6 = vld [vmem:[#allocation3 + $0x78] sm:$0xff] }
 0x5c4   : > { %v2114_v18 = vpop.xlane.xlu1 %2113 }
 0x5c5   : > { %8332 = vst [vmem:[#allocation45_spill] sm:$0xff] %v6990_v13  ;;  %2565 = vst.msk [vmem:[#allocation5 + $0x48] sm:$0xff] %vm1637_vm12, %v6990_v13  ;;  %v6997_v51 = vmax.f32 %v6987_v8, %v2114_v18  ;;  %2168 = vperm.xlu1 %5709, %v6990_v13   ;;  %v7043_v18 = vld [vmem:[#allocation3 + $0x60] sm:$0xff] }
 0x5c6   : > { %v2387_v55 = vpop.permute.xlu0 %2386  ;;  %v7163_v8 = vld [vmem:[#allocation2 + $0x20] sm:$0xff] }
 0x5c7   : > { %8333 = vst [vmem:[#allocation46_spill] sm:$0xff] %v6997_v51  ;;  %2564 = vst.msk [vmem:[#allocation5 + $0x40] sm:$0xff] %vm1637_vm12, %v6997_v51  ;;  %2163 = vperm.xlu0 %5708, %v6997_v51   ;;  %5352 = vmatprep.subr.mxu0 %v2387_v55  ;;  %v7131_v51 = vld [vmem:[#allocation3 + $0x18] sm:$0xff] }
 0x5c8   : > { %v2385_v35 = vpop.permute.xlu1 %2384  ;;  %5353 = vmatpush3.msra.mxu0 %v2387_v55  ;;  %v7047_v55 = vld [vmem:[#allocation3 + $0x48] sm:$0xff] }
 0x5c9   : > { %2380 = vrot.lane.b32.xlu1 %v6659_v38, %s5979_s24  ;;  %5354 = vmatprep.subr.mxu0 %v2385_v35  ;;  %v8334_v38 = vld [vmem:[#allocation18_spill] sm:$0xff] }
 0x5ca   : > { %5355 = vmatpush3.msra.mxu0 %v2385_v35  ;;  %v7051_v35 = vld [vmem:[#allocation3 + $0x50] sm:$0xff] }
 0x5cb   : > { %2382 = vrot.lane.b32.xlu0 %v6655_v36, %s5979_s24  ;;  %v8335_v36 = vld [vmem:[#allocation20_spill] sm:$0xff] }
 0x5cd   : > { %2376 = vrot.lane.b32.xlu1 %v6667_v42, %s5979_s24  ;;  %v8336_v42 = vld [vmem:[#allocation19_spill] sm:$0xff] }
 0x5cf   : > { %2378 = vrot.lane.b32.xlu0 %v6663_v41, %s5979_s24  ;;  %v8337_v41 = vld [vmem:[#allocation21_spill] sm:$0xff] }
 0x5d0   : > { %8341 = vst [vmem:[#allocation21_spill] sm:$0xff] %v7066_v25 }
 0x5d1   : > { %2372 = vrot.lane.b32.xlu1 %v6675_v47, %s5979_s24  ;;  %v7035_v47 = vld [vmem:[#allocation3 + $0x70] sm:$0xff] }
 0x5d3   : > { %2374 = vrot.lane.b32.xlu0 %v6671_v44, %s5979_s24  ;;  %v7031_v44 = vld [vmem:[#allocation3 + $0x68] sm:$0xff] }
 0x5d5   : > { %2368 = vrot.lane.b32.xlu1 %v6683_v53, %s5979_s24  ;;  %v7039_v53 = vld [vmem:[#allocation3 + $0x58] sm:$0xff] }
 0x5d7   : > { %2370 = vrot.lane.b32.xlu0 %v8334_v38, %s5979_s24  ;;  %v7055_v38 = vld [vmem:[#allocation3 + $0x40] sm:$0xff] }
 0x5d9   : > { %2364 = vrot.lane.b32.xlu1 %v8335_v36, %s5979_s24  ;;  %v7059_v36 = vld [vmem:[#allocation5 + $0x50] sm:$0xff] }
 0x5da   : > { %8338 = vst [vmem:[#allocation18_spill] sm:$0xff] %v7059_v36 }
 0x5db   : > { %2366 = vrot.lane.b32.xlu0 %v8336_v42, %s5979_s24  ;;  %v7061_v42 = vld [vmem:[#allocation5 + $0x58] sm:$0xff] }
 0x5dc   : > { %8339 = vst [vmem:[#allocation20_spill] sm:$0xff] %v7061_v42 }
 0x5dd   : > { %2666 = vrot.lane.b32.xlu1 %v7025_v6, %s5980_s25 }
 0x5df   : > { %2362 = vrot.lane.b32.xlu0 %v8337_v41, %s5979_s24 }
 0x5e1   : > { %2662 = vrot.lane.b32.xlu1 %v7031_v44, %s5980_s25 }
 0x5e3   : > { %2664 = vrot.lane.b32.xlu0 %v7035_v47, %s5980_s25 }
 0x5e5   : > { %2658 = vrot.lane.b32.xlu1 %v7039_v53, %s5980_s25 }
 0x5e7   : > { %2660 = vrot.lane.b32.xlu0 %v7043_v18, %s5980_s25 }
 0x5e9   : > { %2654 = vrot.lane.b32.xlu1 %v7047_v55, %s5980_s25 }
 0x5eb   : > { %2656 = vrot.lane.b32.xlu0 %v7051_v35, %s5980_s25 }
 0x5ed   : > { %2652 = vrot.lane.b32.xlu1 %v7055_v38, %s5980_s25 }
 0x5f7   : > { %v2118_v41 = vpop.xlane.xlu0 %2117 }
 0x5f8   : > { %v7064_v16 = vmax.f32 %v7059_v36, %v2118_v41  ;;  %v7112_v36 = vld [vmem:[#allocation3 + $0x38] sm:$0xff] }
 0x5f9   : > { %v2120_v52 = vpop.xlane.xlu1 %2119 }
 0x5fa   : > { %8340 = vst [vmem:[#allocation19_spill] sm:$0xff] %v7064_v16  ;;  %v7069_v24 = vmax.f32 %v7061_v42, %v2120_v52  ;;  %2566 = vst.msk [vmem:[#allocation5 + $0x50] sm:$0xff] %vm1637_vm12, %v7064_v16 }
 0x5fb   : > { %v2122_v10 = vpop.xlane.xlu0 %2121 }
 0x5fc   : > { %8342 = vst [vmem:[#allocation47_spill] sm:$0xff] %v7069_v24  ;;  %2567 = vst.msk [vmem:[#allocation5 + $0x58] sm:$0xff] %vm1637_vm12, %v7069_v24  ;;  %2178 = vperm.xlu0 %5708, %v7069_v24   ;;  %v7083_v52 = vmax.f32 %v7066_v25, %v2122_v10  ;;  %v7133_v25 = vld [vmem:[#allocation3 + $0x20] sm:$0xff] }
 0x5fd   : > { %v2124_v41 = vpop.xlane.xlu1 %2123 }
 0x5fe   : > { %8344 = vst [vmem:[#allocation49_spill] sm:$0xff] %v7083_v52  ;;  %v7088_v26 = vmax.f32 %v7075_v11, %v2124_v41  ;;  %2568 = vst.msk [vmem:[#allocation5 + $0x60] sm:$0xff] %vm1637_vm12, %v7083_v52  ;;  %v7179_v11 = vld [vmem:[#allocation2 + $0x38] sm:$0xff] }
 0x5ff   : > { %v2126_v9 = vpop.xlane.xlu0 %2125 }
 0x600   : > { %8346 = vst [vmem:[#allocation51_spill] sm:$0xff] %v7088_v26  ;;  %2569 = vst.msk [vmem:[#allocation5 + $0x68] sm:$0xff] %vm1637_vm12, %v7088_v26  ;;  %2188 = vperm.xlu1 %5709, %v7088_v26   ;;  %2173 = vperm.xlu0 %5708, %v7064_v16   ;;  %v7103_v10 = vmax.f32 %v7085_v46, %v2126_v9  ;;  %v7121_v9 = vld [vmem:[#allocation3 + $0x30] sm:$0xff]  ;;  %v7149_v46 = vld [vmem:[#allocation3] sm:$0xff] }
 0x601   : > { %v2128_v41 = vpop.xlane.xlu1 %2127  ;;  %v7157_v16 = vld [vmem:[#allocation2 + $0x8] sm:$0xff] }
 0x602   : > { %8348 = vst [vmem:[#allocation53_spill] sm:$0xff] %v7103_v10  ;;  %v7106_v3 = vmax.f32 %v7094_v2, %v2128_v41  ;;  %2570 = vst.msk [vmem:[#allocation5 + $0x70] sm:$0xff] %vm1637_vm12, %v7103_v10  ;;  %v7126_v41 = vld [vmem:[#allocation3 + $0x28] sm:$0xff] }
 0x603   : > { %v7139_v2 = vld [vmem:[#allocation3 + $0x8] sm:$0xff] }
 0x604   : > { %8349 = vst [vmem:[#allocation54_spill] sm:$0xff] %v7106_v3  ;;  %2571 = vst.msk [vmem:[#allocation5 + $0x78] sm:$0xff] %vm1637_vm12, %v7106_v3  ;;  %2650 = vrot.lane.b32.xlu0 %v7112_v36, %s5980_s25  ;;  %2183 = vperm.xlu1 %5709, %v7083_v52   ;;  %v7155_v52 = vld [vmem:[#allocation2 + $0x10] sm:$0xff]  ;;  %v7173_v26 = vld [vmem:[#allocation2 + $0x28] sm:$0xff] }
 0x608   : > { %2648 = vrot.lane.b32.xlu1 %v7121_v9, %s5980_s25  ;;  %2193 = vperm.xlu0 %5708, %v7103_v10   ;;  %v7141_v10 = vld [vmem:[#allocation3 + $0x10] sm:$0xff] }
 0x60c   : > { %2646 = vrot.lane.b32.xlu1 %v7126_v41, %s5980_s25  ;;  %2198 = vperm.xlu0 %5708, %v7106_v3   ;;  %v7147_v3 = vld [vmem:[#allocation2] sm:$0xff] }
 0x610   : > { %2642 = vrot.lane.b32.xlu1 %v7131_v51, %s5980_s25  ;;  %2644 = vrot.lane.b32.xlu0 %v7133_v25, %s5980_s25 }
 0x614   : > { %2638 = vrot.lane.b32.xlu1 %v7139_v2, %s5980_s25  ;;  %2640 = vrot.lane.b32.xlu0 %v7141_v10, %s5980_s25 }
 0x618   : > { %2604 = vrot.lane.b32.xlu1 %v7147_v3, %s5980_s25  ;;  %2636 = vrot.lane.b32.xlu0 %v7149_v46, %s5980_s25 }
 0x61c   : > { %2608 = vrot.lane.b32.xlu1 %v7155_v52, %s5980_s25  ;;  %2606 = vrot.lane.b32.xlu0 %v7157_v16, %s5980_s25 }
 0x620   : > { %2612 = vrot.lane.b32.xlu1 %v7163_v8, %s5980_s25  ;;  %2610 = vrot.lane.b32.xlu0 %v7165_v7, %s5980_s25 }
 0x624   : > { %2616 = vrot.lane.b32.xlu1 %v7171_v0, %s5980_s25  ;;  %2614 = vrot.lane.b32.xlu0 %v7173_v26, %s5980_s25 }
 0x628   : > { %3115 = vrot.lane.b32.xlu1 %v6641_v33, %s5980_s25  ;;  %2618 = vrot.lane.b32.xlu0 %v7179_v11, %s5980_s25 }
 0x62c   : > { %3113 = vrot.lane.b32.xlu1 %v6644_v34, %s5980_s25  ;;  %3117 = vrot.lane.b32.xlu0 %v6637_v29, %s5980_s25 }
 0x640   : > { %v2169_v24 = vpop.permute.xlu1 %2168 }
 0x641   : > { %v2202_v63 = vsub.f32 %v6943_v12, %v2169_v24 }
 0x642   : > { %v2164_v42 = vpop.permute.xlu0 %2163 }
 0x643   : > { %v2201_v13 = vsub.f32 %v6948_v15, %v2164_v42  ;;  %v2211_v34 = vmul.f32 1.442695, %v2202_v63 }
 0x644   : > { %v2381_v22 = vpop.permute.xlu1 %2380 }
 0x645   : > { %v2209_v61 = vmul.f32 1.442695, %v2201_v13 }
 0x646   : > { %v2383_v54 = vpop.permute.xlu0 %2382 }
 0x647   : > { %5726 = vpow2.f32 %v2209_v61  ;;  %5356 = vmatprep.subr.mxu0 %v2383_v54 }
 0x648   : > { %v2377_v33 = vpop.permute.xlu1 %2376  ;;  %5357 = vmatpush3.msra.mxu0 %v2383_v54  ;;  %5728 = vpow2.f32 %v2211_v34 }
 0x649   : > { %5358 = vmatprep.subr.mxu0 %v2381_v22 }
 0x64a   : > { %5359 = vmatpush3.msra.mxu0 %v2381_v22  ;;  %v2379_v50 = vpop.permute.xlu0 %2378 }
 0x64b   : > { %5360 = vmatprep.subr.mxu0 %v2379_v50 }
 0x64c   : > { %v2373_v62 = vpop.permute.xlu1 %2372  ;;  %5361 = vmatpush3.msra.mxu0 %v2379_v50 }
 0x64d   : > { %5362 = vmatprep.subr.mxu0 %v2377_v33 }
 0x64e   : > { %5363 = vmatpush3.msra.mxu0 %v2377_v33  ;;  %v2375_v29 = vpop.permute.xlu0 %2374 }
 0x64f   : > { %5364 = vmatprep.subr.mxu0 %v2375_v29 }
 0x650   : > { %v2369_v15 = vpop.permute.xlu1 %2368  ;;  %5365 = vmatpush3.msra.mxu0 %v2375_v29 }
 0x651   : > { %5366 = vmatprep.subr.mxu0 %v2373_v62 }
 0x652   : > { %5367 = vmatpush3.msra.mxu0 %v2373_v62  ;;  %v2371_v61 = vpop.permute.xlu0 %2370 }
 0x653   : > { %5368 = vmatprep.subr.mxu0 %v2371_v61 }
 0x654   : > { %v7191_v24 = vpop.eup %5726  ;;  %5369 = vmatpush3.msra.mxu0 %v2371_v61  ;;  %v2365_v54 = vpop.permute.xlu1 %2364 }
 0x655   : > { %5370 = vmatprep.subr.mxu0 %v2369_v15  ;;  %5378 = vmatprep.mubr.f32.mxu0 %v7191_v24  ;;  %v7194_v12 = vpop.eup %5728 }
 0x656   : > { %5371 = vmatpush3.msra.mxu0 %v2369_v15  ;;  %v2367_v50 = vpop.permute.xlu0 %2366 }
 0x657   : > { %5372 = vmatprep.subr.mxu0 %v2367_v50 }
 0x658   : > { %5373 = vmatpush3.msra.mxu0 %v2367_v50  ;;  %v2667_v62 = vpop.permute.xlu1 %2666 }
 0x659   : > { %5374 = vmatprep.subr.mxu0 %v2365_v54 }
 0x65a   : > { %5375 = vmatpush3.msra.mxu0 %v2365_v54  ;;  %v2363_v63 = vpop.permute.xlu0 %2362 }
 0x65b   : > { %5376 = vmatprep.subr.mxu0 %v2363_v63 }
 0x65c   : > { %5377 = vmatpush3.msra.mxu0 %v2363_v63  ;;  %v2663_v13 = vpop.permute.xlu1 %2662 }
 0x65d   : > { %5379 = vmatmul.mubr.f32.vlgmr.msra.gmra.mxu0 %v7194_v12  ;;  %5390 = vmatprep.subr.msk.mxu0 %vm1291_vm3, %v2667_v62 }
 0x65e   : > { %5391 = vmatpush3.xpose.msk.msra.mxu0 %vm1291_vm3, %v2667_v62  ;;  %v2665_v22 = vpop.permute.xlu0 %2664 }
 0x65f   : > { %5392 = vmatprep.subr.msk.mxu0 %vm1291_vm3, %v2665_v22 }
 0x660   : > { %v2659_v33 = vpop.permute.xlu1 %2658 }
 0x662   : > { %5393 = vmatpush3.xpose.msk.msra.mxu0 %vm1291_vm3, %v2665_v22  ;;  %v2661_v42 = vpop.permute.xlu0 %2660 }
 0x663   : > { %5394 = vmatprep.subr.msk.mxu0 %vm1291_vm3, %v2663_v13 }
 0x664   : > { %v2655_v29 = vpop.permute.xlu1 %2654 }
 0x666   : > { %5395 = vmatpush3.xpose.msk.msra.mxu0 %vm1291_vm3, %v2663_v13  ;;  %v2657_v34 = vpop.permute.xlu0 %2656 }
 0x667   : > { %5396 = vmatprep.subr.msk.mxu0 %vm1291_vm3, %v2661_v42 }
 0x668   : > { %v2653_v15 = vpop.permute.xlu1 %2652 }
 0x66a   : > { %5397 = vmatpush3.xpose.msk.msra.mxu0 %vm1291_vm3, %v2661_v42 }
 0x66b   : > { %5398 = vmatprep.subr.msk.mxu0 %vm1291_vm3, %v2659_v33 }
 0x66e   : > { %5399 = vmatpush3.xpose.msk.msra.mxu0 %vm1291_vm3, %v2659_v33 }
 0x66f   : > { %5400 = vmatprep.subr.msk.mxu0 %vm1291_vm3, %v2657_v34 }
 0x672   : > { %5401 = vmatpush3.xpose.msk.msra.mxu0 %vm1291_vm3, %v2657_v34 }
 0x673   : > { %5402 = vmatprep.subr.msk.mxu0 %vm1291_vm3, %v2655_v29 }
 0x676   : > { %5403 = vmatpush3.xpose.msk.msra.mxu0 %vm1291_vm3, %v2655_v29 }
 0x677   : > { %5404 = vmatprep.subr.msk.mxu0 %vm1291_vm3, %v2653_v15  ;;  %v2179_v61 = vpop.permute.xlu0 %2178 }
 0x678   : > { %v2204_v54 = vsub.f32 %v6961_v45, %v2179_v61 }
 0x67a   : > { %5405 = vmatpush3.xpose.msk.msra.mxu0 %vm1291_vm3, %v2653_v15  ;;  %v2215_v22 = vmul.f32 1.442695, %v2204_v54 }
 0x67b   : > { %v2189_v50 = vpop.permute.xlu1 %2188  ;;  %v2174_v63 = vpop.permute.xlu0 %2173 }
 0x67c   : > { %v2203_v62 = vsub.f32 %v6957_v56, %v2174_v63  ;;  %v2206_v13 = vsub.f32 %v6971_v1, %v2189_v50 }
 0x67e   : > { %v2213_v42 = vmul.f32 1.442695, %v2203_v62  ;;  %v2219_v45 = vmul.f32 1.442695, %v2206_v13 }
 0x67f   : > { %v2184_v33 = vpop.permute.xlu1 %2183  ;;  %v2651_v34 = vpop.permute.xlu0 %2650 }
 0x680   : > { %v2205_v57 = vsub.f32 %v6966_v59, %v2184_v33  ;;  %5406 = vmatprep.subr.msk.mxu0 %vm1291_vm3, %v2651_v34  ;;  %5730 = vpow2.f32 %v2213_v42 }
 0x681   : > { %5407 = vmatpush3.xpose.msk.msra.mxu0 %vm1291_vm3, %v2651_v34  ;;  %5732 = vpow2.f32 %v2215_v22 }
 0x682   : > { %v2217_v29 = vmul.f32 1.442695, %v2205_v57 }
 0x683   : > { %v2649_v15 = vpop.permute.xlu1 %2648  ;;  %v2194_v61 = vpop.permute.xlu0 %2193 }
 0x684   : > { %5734 = vpow2.f32 %v2217_v29  ;;  %v2207_v56 = vsub.f32 %v6976_v5, %v2194_v61  ;;  %5408 = vmatprep.subr.msk.mxu0 %vm1291_vm3, %v2649_v15 }
 0x685   : > { %5409 = vmatpush3.xpose.msk.msra.mxu0 %vm1291_vm3, %v2649_v15  ;;  %5736 = vpow2.f32 %v2219_v45 }
 0x686   : > { %v2221_v1 = vmul.f32 1.442695, %v2207_v56 }
 0x687   : > { %v2647_v59 = vpop.permute.xlu1 %2646  ;;  %v2199_v54 = vpop.permute.xlu0 %2198 }
 0x688   : > { %5738 = vpow2.f32 %v2221_v1  ;;  %v2208_v50 = vsub.f32 %v6981_v4, %v2199_v54  ;;  %5410 = vmatprep.subr.msk.mxu0 %vm1291_vm3, %v2647_v59 }
 0x689   : > { %5411 = vmatpush3.xpose.msk.msra.mxu0 %vm1291_vm3, %v2647_v59 }
 0x68a   : > { %v2223_v57 = vmul.f32 1.442695, %v2208_v50 }
 0x68b   : > { %v2643_v63 = vpop.permute.xlu1 %2642  ;;  %v2645_v62 = vpop.permute.xlu0 %2644 }
 0x68c   : > { %5740 = vpow2.f32 %v2223_v57  ;;  %5412 = vmatprep.subr.msk.mxu0 %vm1291_vm3, %v2645_v62 }
 0x68d   : > { %5413 = vmatpush3.xpose.msk.msra.mxu0 %vm1291_vm3, %v2645_v62  ;;  %v7227_v5 = vpop.eup %5730 }
 0x68e   : > { %5414 = vmatprep.subr.msk.mxu0 %vm1291_vm3, %v2643_v63  ;;  %v7230_v22 = vpop.eup %5732  ;;  %5381 = vmatprep.mubr.f32.mxu0 %v7227_v5 }
 0x68f   : > { %v2639_v4 = vpop.permute.xlu1 %2638  ;;  %v2641_v13 = vpop.permute.xlu0 %2640  ;;  %5382 = vmatmul.mubr.f32.gmra.mxu0 %v7230_v22 }
 0x691   : > { %v7234_v42 = vpop.eup %5734  ;;  %5415 = vmatpush3.xpose.msk.msra.mxu0 %vm1291_vm3, %v2643_v63 }
 0x692   : > { %5384 = vmatprep.mubr.f32.mxu0 %v7234_v42  ;;  %5416 = vmatprep.subr.msk.mxu0 %vm1291_vm3, %v2641_v13  ;;  %v7239_v33 = vpop.eup %5736 }
 0x693   : > { %v2605_v34 = vpop.permute.xlu1 %2604  ;;  %v2637_v45 = vpop.permute.xlu0 %2636  ;;  %5385 = vmatmul.mubr.f32.gmra.mxu0 %v7239_v33 }
 0x695   : > { %v7242_v29 = vpop.eup %5738  ;;  %5417 = vmatpush3.xpose.msk.msra.mxu0 %vm1291_vm3, %v2641_v13 }
 0x696   : > { %5387 = vmatprep.mubr.f32.mxu0 %v7242_v29  ;;  %5418 = vmatprep.subr.msk.mxu0 %vm1291_vm3, %v2639_v4 }
 0x697   : > { %v2609_v15 = vpop.permute.xlu1 %2608  ;;  %v2607_v61 = vpop.permute.xlu0 %2606 }
 0x699   : > { %v7247_v56 = vpop.eup %5740  ;;  %5419 = vmatpush3.xpose.msk.msra.mxu0 %vm1291_vm3, %v2639_v4 }
 0x69a   : > { %8350 = vst [vmem:[#allocation55_spill] sm:$0xff] %v7247_v56  ;;  %5388 = vmatmul.mubr.f32.gmra.mxu0 %v7247_v56  ;;  %5420 = vmatprep.subr.msk.mxu0 %vm1291_vm3, %v2637_v45 }
 0x69b   : > { %v2613_v1 = vpop.permute.xlu1 %2612  ;;  %v2611_v59 = vpop.permute.xlu0 %2610  ;;  %5422 = vmatprep.mubr.msk.f32.mxu0 %vm1291_vm3, %v2605_v34 }
 0x69d   : > { %5421 = vmatpush3.xpose.msk.msra.mxu0 %vm1291_vm3, %v2637_v45 }
 0x69f   : > { %v2617_v54 = vpop.permute.xlu1 %2616  ;;  %v2615_v50 = vpop.permute.xlu0 %2614 }
 0x6a0   : > { %5423 = vmatmul.mubr.msk.f32.vlgmr.msra.gmra.mxu0 %vm1291_vm3, %v2607_v61 }
 0x6a1   : > { %5425 = vmatprep.mubr.msk.f32.mxu0 %vm1291_vm3, %v2609_v15 }
 0x6a3   : > { %v2619_v57 = vpop.permute.xlu0 %2618  ;;  %v3116_v63 = vpop.permute.xlu1 %3115 }
 0x6a4   : > { %5426 = vmatmul.mubr.msk.f32.gmra.mxu0 %vm1291_vm3, %v2611_v59 }
 0x6a5   : > { %5428 = vmatprep.mubr.msk.f32.mxu0 %vm1291_vm3, %v2613_v1 }
 0x6a7   : > { %v3118_v62 = vpop.permute.xlu0 %3117  ;;  %v3114_v4 = vpop.permute.xlu1 %3113 }
 0x6a8   : > { %5434 = vmatprep.subr.mxu1 %v3118_v62  ;;  %5429 = vmatmul.mubr.msk.f32.gmra.mxu0 %vm1291_vm3, %v2615_v50 }
 0x6a9   : > { %5435 = vmatpush3.msra.mxu1 %v3118_v62  ;;  %5431 = vmatprep.mubr.msk.f32.mxu0 %vm1291_vm3, %v2617_v54 }
 0x6aa   : > { %5436 = vmatprep.subr.mxu1 %v3116_v63 }
 0x6ab   : > { %5437 = vmatpush3.msra.mxu1 %v3116_v63 }
 0x6ac   : > { %5438 = vmatprep.subr.mxu1 %v3114_v4  ;;  %5432 = vmatmul.mubr.msk.f32.gmra.mxu0 %vm1291_vm3, %v2619_v57 }
 0x6ad   : > { %5439 = vmatpush3.msra.mxu1 %v3114_v4  ;;  %v7287_v4 = vld [vmem:[#allocation4 + $0x58] sm:$0xff] }
 0x6ae   : > { %8359 = vst [vmem:[#allocation64_spill] sm:$0xff] %v7287_v4 }
 0x71d   : > { %v7261_v13 = vpop.f32.mrf.mxu0 }
 0x71e   : > { %8351 = vst [vmem:[#allocation56_spill] sm:$0xff] %v7261_v13 }
 0x71f   : > { %v7263_v34 = vpop.f32.mrf.mxu0 }
 0x720   : > { %8352 = vst [vmem:[#allocation57_spill] sm:$0xff] %v7263_v34 }
 0x74f   : > { %v7265_v45 = vpop.f32.mrf.mxu0 }
 0x750   : > { %8353 = vst [vmem:[#allocation58_spill] sm:$0xff] %v7265_v45 }
 0x751   : > { %v7267_v15 = vpop.f32.mrf.mxu0 }
 0x752   : > { %8354 = vst [vmem:[#allocation59_spill] sm:$0xff] %v7267_v15 }
 0x753   : > { %v7269_v61 = vpop.f32.mrf.mxu0 }
 0x754   : > { %8355 = vst [vmem:[#allocation60_spill] sm:$0xff] %v7269_v61 }
 0x755   : > { %v7271_v1 = vpop.f32.mrf.mxu0 }
 0x756   : > { %8356 = vst [vmem:[#allocation61_spill] sm:$0xff] %v7271_v1 }
 0x75a   : > { %v7273_v59 = vpop.f32.mrf.mxu0 }
 0x75b   : > { %8357 = vst [vmem:[#allocation62_spill] sm:$0xff] %v7273_v59  ;;  %v7291_v59 = vld [vmem:[#allocation4 + $0x60] sm:$0xff] }
 0x75c   : > { %v7275_v54 = vpop.f32.mrf.mxu0  ;;  %8360 = vst [vmem:[#allocation65_spill] sm:$0xff] %v7291_v59 }
 0x75d   : > { %8358 = vst [vmem:[#allocation63_spill] sm:$0xff] %v7275_v54 }
 0x760   : > { %v5424_v50 = vpop.f32.mrf.mxu0 }
 0x761   : > { %v7279_v57 = vsel %vm1260_vm6, -1.25e+19, %v5424_v50 }
 0x762   : > { %2840 = vmax.xlane.f32.xlu0 %v7279_v57  ;;  %v2782_v63 = vpop.f32.mrf.mxu0 }
 0x763   : > { %v7284_v62 = vsel %vm1259_vm4, -1.25e+19, %v2782_v63 }
 0x764   : > { %2838 = vmax.xlane.f32.xlu1 %v7284_v62  ;;  %v5427_v50 = vpop.f32.mrf.mxu0 }
 0x765   : > { %v7301_v1 = vsel %vm1262_vm5, -1.25e+19, %v5427_v50 }
 0x766   : > { %v2792_v61 = vpop.f32.mrf.mxu0 }
 0x767   : > { %v7297_v63 = vsel %vm1261_vm7, -1.25e+19, %v2792_v61 }
 0x768   : > { %v5430_v45 = vpop.f32.mrf.mxu0 }
 0x76a   : > { %v2802_v13 = vpop.f32.mrf.mxu0 }
 0x76b   : > { %v7306_v15 = vsel %vm1263_vm8, -1.25e+19, %v2802_v13  ;;  %v7325_v13 = vld [vmem:[#allocation5 + $0x88] sm:$0xff] }
 0x76c   : > { %v5433_v54 = vpop.f32.mrf.mxu0  ;;  %8361 = vst [vmem:[#allocation66_spill] sm:$0xff] %v7325_v13 }
 0x76d   : > { %v7321_v50 = vsel %vm1266_vm11, -1.25e+19, %v5433_v54 }
 0x76e   : > { %v2812_v34 = vpop.f32.mrf.mxu0 }
 0x76f   : > { %v7316_v61 = vsel %vm1265_vm10, -1.25e+19, %v2812_v34 }
 0x775   : > { %3109 = vrot.lane.b32.xlu1 %v7287_v4, %s5980_s25  ;;  %v7311_v4 = vsel %vm1264_vm9, -1.25e+19, %v5430_v45 }
 0x778   : > { %3111 = vrot.lane.b32.xlu0 %v7291_v59, %s5980_s25  ;;  %v7327_v59 = vld [vmem:[#allocation5 + $0x80] sm:$0xff] }
 0x779   : > { %8362 = vst [vmem:[#allocation67_spill] sm:$0xff] %v7327_v59 }
 0x797   : > { %2842 = vmax.xlane.f32.xlu0 %v7297_v63 }
 0x799   : > { %2844 = vmax.xlane.f32.xlu1 %v7301_v1 }
 0x79b   : > { %2846 = vmax.xlane.f32.xlu0 %v7306_v15 }
 0x79d   : > { %2848 = vmax.xlane.f32.xlu1 %v7311_v4 }
 0x79f   : > { %2850 = vmax.xlane.f32.xlu0 %v7316_v61 }
 0x7a1   : > { %2852 = vmax.xlane.f32.xlu1 %v7321_v50 }
 0x7eb   : > { %v2841_v45 = vpop.xlane.xlu0 %2840 }
 0x7ec   : > { %v7330_v56 = vmax.f32 %v7325_v13, %v2841_v45  ;;  %v3056_v13 = vld [vmem:[#allocation4 + $0x8] sm:$0xff] }
 0x7ed   : > { %v2839_v34 = vpop.xlane.xlu1 %2838 }
 0x7ee   : > { %8363 = vst [vmem:[#allocation68_spill] sm:$0xff] %v7330_v56  ;;  %3290 = vst.msk [vmem:[#allocation5 + $0x88] sm:$0xff] %vm1637_vm12, %v7330_v56  ;;  %v7337_v54 = vmax.f32 %v7327_v59, %v2839_v34  ;;  %2893 = vperm.xlu1 %5709, %v7330_v56   ;;  %v7349_v34 = vld [vmem:[#allocation4 + $0x50] sm:$0xff]  ;;  %v3058_v59 = vld [vmem:[#allocation4 + $0x18] sm:$0xff] }
 0x7ef   : > { %v3112_v49 = vpop.permute.xlu0 %3111  ;;  %v7370_v56 = vld [vmem:[#allocation4 + $0x20] sm:$0xff] }
 0x7f0   : > { %8364 = vst [vmem:[#allocation69_spill] sm:$0xff] %v7337_v54  ;;  %3289 = vst.msk [vmem:[#allocation5 + $0x80] sm:$0xff] %vm1637_vm12, %v7337_v54  ;;  %2888 = vperm.xlu0 %5708, %v7337_v54   ;;  %5440 = vmatprep.subr.mxu1 %v3112_v49  ;;  %v7357_v54 = vld [vmem:[#allocation4 + $0x40] sm:$0xff] }
 0x7f1   : > { %v3110_v45 = vpop.permute.xlu1 %3109  ;;  %5441 = vmatpush3.msra.mxu1 %v3112_v49  ;;  %v7361_v49 = vld [vmem:[#allocation4 + $0x28] sm:$0xff] }
 0x7f2   : > { %3105 = vrot.lane.b32.xlu1 %v7345_v48, %s5980_s25  ;;  %5442 = vmatprep.subr.mxu1 %v3110_v45  ;;  %8366 = vst [vmem:[#allocation71_spill] sm:$0xff] %v7361_v49 }
 0x7f3   : > { %5443 = vmatpush3.msra.mxu1 %v3110_v45  ;;  %v7365_v45 = vld [vmem:[#allocation4 + $0x30] sm:$0xff] }
 0x7f4   : > { %3107 = vrot.lane.b32.xlu0 %v7349_v34, %s5980_s25 }
 0x7f6   : > { %3101 = vrot.lane.b32.xlu1 %v7353_v39, %s5980_s25  ;;  %v7375_v39 = vld [vmem:[#allocation4 + $0x10] sm:$0xff] }
 0x7f7   : > { %8367 = vst [vmem:[#allocation72_spill] sm:$0xff] %v7375_v39 }
 0x7f8   : > { %3103 = vrot.lane.b32.xlu0 %v7357_v54, %s5980_s25 }
 0x7fa   : > { %3097 = vrot.lane.b32.xlu1 %v7361_v49, %s5980_s25  ;;  %v7381_v49 = vld [vmem:[#allocation4] sm:$0xff] }
 0x7fb   : > { %8368 = vst [vmem:[#allocation73_spill] sm:$0xff] %v7381_v49 }
 0x7fc   : > { %3099 = vrot.lane.b32.xlu0 %v7365_v45, %s5980_s25 }
 0x7fe   : > { %3093 = vrot.lane.b32.xlu1 %v3058_v59, %s5980_s25 }
 0x800   : > { %3095 = vrot.lane.b32.xlu0 %v7370_v56, %s5980_s25 }
 0x802   : > { %3089 = vrot.lane.b32.xlu1 %v3056_v13, %s5980_s25  ;;  %v7406_v13 = vld [vmem:[#allocation5 + $0xa0] sm:$0xff] }
 0x803   : > { %8371 = vst [vmem:[#allocation76_spill] sm:$0xff] %v7406_v13 }
 0x804   : > { %3091 = vrot.lane.b32.xlu0 %v7375_v39, %s5980_s25  ;;  %v7425_v39 = vld [vmem:[#allocation5 + $0xb0] sm:$0xff] }
 0x806   : > { %3391 = vrot.lane.b32.xlu1 %v7025_v6, %s5981_s20  ;;  %v7399_v6 = vld [vmem:[#allocation5 + $0x90] sm:$0xff] }
 0x807   : > { %8369 = vst [vmem:[#allocation74_spill] sm:$0xff] %v7399_v6 }
 0x808   : > { %3087 = vrot.lane.b32.xlu0 %v7381_v49, %s5980_s25  ;;  %v7434_v49 = vld [vmem:[#allocation5 + $0xb8] sm:$0xff] }
 0x80a   : > { %3387 = vrot.lane.b32.xlu1 %v7031_v44, %s5981_s20  ;;  %v7401_v44 = vld [vmem:[#allocation5 + $0x98] sm:$0xff] }
 0x80b   : > { %8370 = vst [vmem:[#allocation75_spill] sm:$0xff] %v7401_v44 }
 0x80c   : > { %3389 = vrot.lane.b32.xlu0 %v7035_v47, %s5981_s20 }
 0x80e   : > { %3383 = vrot.lane.b32.xlu1 %v7039_v53, %s5981_s20 }
 0x810   : > { %3385 = vrot.lane.b32.xlu0 %v7043_v18, %s5981_s20 }
 0x812   : > { %3379 = vrot.lane.b32.xlu1 %v7047_v55, %s5981_s20 }
 0x814   : > { %3381 = vrot.lane.b32.xlu0 %v7051_v35, %s5981_s20  ;;  %v7415_v35 = vld [vmem:[#allocation5 + $0xa8] sm:$0xff] }
 0x816   : > { %3377 = vrot.lane.b32.xlu1 %v7055_v38, %s5981_s20 }
 0x820   : > { %v2843_v47 = vpop.xlane.xlu0 %2842 }
 0x821   : > { %v7404_v59 = vmax.f32 %v7399_v6, %v2843_v47 }
 0x822   : > { %v2845_v53 = vpop.xlane.xlu1 %2844 }
 0x823   : > { %v7409_v18 = vmax.f32 %v7401_v44, %v2845_v53  ;;  %3291 = vst.msk [vmem:[#allocation5 + $0x90] sm:$0xff] %vm1637_vm12, %v7404_v59 }
 0x824   : > { %v2847_v38 = vpop.xlane.xlu0 %2846 }
 0x825   : > { %8372 = vst [vmem:[#allocation77_spill] sm:$0xff] %v7409_v18  ;;  %3292 = vst.msk [vmem:[#allocation5 + $0x98] sm:$0xff] %vm1637_vm12, %v7409_v18  ;;  %2903 = vperm.xlu0 %5708, %v7409_v18   ;;  %v7423_v47 = vmax.f32 %v7406_v13, %v2847_v38 }
 0x826   : > { %v2849_v53 = vpop.xlane.xlu1 %2848 }
 0x827   : > { %v7428_v55 = vmax.f32 %v7415_v35, %v2849_v53  ;;  %3293 = vst.msk [vmem:[#allocation5 + $0xa0] sm:$0xff] %vm1637_vm12, %v7423_v47 }
 0x828   : > { %v2851_v44 = vpop.xlane.xlu0 %2850 }
 0x829   : > { %3294 = vst.msk [vmem:[#allocation5 + $0xa8] sm:$0xff] %vm1637_vm12, %v7428_v55  ;;  %2913 = vperm.xlu1 %5709, %v7428_v55   ;;  %2898 = vperm.xlu0 %5708, %v7404_v59   ;;  %v7443_v38 = vmax.f32 %v7425_v39, %v2851_v44 }
 0x82a   : > { %v2853_v53 = vpop.xlane.xlu1 %2852 }
 0x82b   : > { %v7446_v6 = vmax.f32 %v7434_v49, %v2853_v53  ;;  %3295 = vst.msk [vmem:[#allocation5 + $0xb0] sm:$0xff] %vm1637_vm12, %v7443_v38 }
 0x82d   : > { %3296 = vst.msk [vmem:[#allocation5 + $0xb8] sm:$0xff] %vm1637_vm12, %v7446_v6  ;;  %3375 = vrot.lane.b32.xlu0 %v7112_v36, %s5981_s20  ;;  %2908 = vperm.xlu1 %5709, %v7423_v47  }
 0x831   : > { %3373 = vrot.lane.b32.xlu1 %v7121_v9, %s5981_s20  ;;  %2918 = vperm.xlu0 %5708, %v7443_v38  }
 0x835   : > { %3371 = vrot.lane.b32.xlu1 %v7126_v41, %s5981_s20  ;;  %2923 = vperm.xlu0 %5708, %v7446_v6  }
 0x839   : > { %3367 = vrot.lane.b32.xlu1 %v7131_v51, %s5981_s20  ;;  %3369 = vrot.lane.b32.xlu0 %v7133_v25, %s5981_s20 }
 0x83d   : > { %3363 = vrot.lane.b32.xlu1 %v7139_v2, %s5981_s20  ;;  %3365 = vrot.lane.b32.xlu0 %v7141_v10, %s5981_s20 }
 0x841   : > { %3329 = vrot.lane.b32.xlu1 %v7147_v3, %s5981_s20  ;;  %3361 = vrot.lane.b32.xlu0 %v7149_v46, %s5981_s20 }
 0x845   : > { %3333 = vrot.lane.b32.xlu1 %v7155_v52, %s5981_s20  ;;  %3331 = vrot.lane.b32.xlu0 %v7157_v16, %s5981_s20  ;;  %v8373_v52 = vld [vmem:[#allocation22_spill] sm:$0xff] }
 0x849   : > { %3337 = vrot.lane.b32.xlu1 %v7163_v8, %s5981_s20  ;;  %3335 = vrot.lane.b32.xlu0 %v7165_v7, %s5981_s20 }
 0x84d   : > { %3341 = vrot.lane.b32.xlu1 %v7171_v0, %s5981_s20  ;;  %3339 = vrot.lane.b32.xlu0 %v7173_v26, %s5981_s20 }
 0x851   : > { %3343 = vrot.lane.b32.xlu0 %v7179_v11, %s5981_s20 }
 0x869   : > { %v2894_v25 = vpop.permute.xlu1 %2893 }
 0x86a   : > { %v2927_v8 = vsub.f32 %v7279_v57, %v2894_v25 }
 0x86b   : > { %v2889_v46 = vpop.permute.xlu0 %2888 }
 0x86c   : > { %v2926_v2 = vsub.f32 %v7284_v62, %v2889_v46  ;;  %v2936_v7 = vmul.f32 1.442695, %v2927_v8 }
 0x86d   : > { %v3106_v3 = vpop.permute.xlu1 %3105 }
 0x86e   : > { %v2934_v51 = vmul.f32 1.442695, %v2926_v2 }
 0x86f   : > { %v3108_v16 = vpop.permute.xlu0 %3107 }
 0x870   : > { %5742 = vpow2.f32 %v2934_v51  ;;  %1615 = vadd.xlane.f32.xlu0 %v6843_v20  ;;  %5444 = vmatprep.subr.mxu1 %v3108_v16 }
 0x871   : > { %v3102_v0 = vpop.permute.xlu1 %3101  ;;  %1613 = vadd.xlane.f32.xlu1 %v6840_v17  ;;  %5445 = vmatpush3.msra.mxu1 %v3108_v16  ;;  %5744 = vpow2.f32 %v2936_v7 }
 0x872   : > { %5446 = vmatprep.subr.mxu1 %v3106_v3 }
 0x873   : > { %5447 = vmatpush3.msra.mxu1 %v3106_v3  ;;  %v3104_v26 = vpop.permute.xlu0 %3103 }
 0x874   : > { %1617 = vadd.xlane.f32.xlu0 %v6850_v37  ;;  %5448 = vmatprep.subr.mxu1 %v3104_v26 }
 0x875   : > { %v3098_v11 = vpop.permute.xlu1 %3097  ;;  %1619 = vadd.xlane.f32.xlu1 %v6853_v43  ;;  %5449 = vmatpush3.msra.mxu1 %v3104_v26 }
 0x876   : > { %5450 = vmatprep.subr.mxu1 %v3102_v0 }
 0x877   : > { %5451 = vmatpush3.msra.mxu1 %v3102_v0  ;;  %v3100_v36 = vpop.permute.xlu0 %3099 }
 0x878   : > { %1621 = vadd.xlane.f32.xlu0 %v6886_v19  ;;  %5452 = vmatprep.subr.mxu1 %v3100_v36 }
 0x879   : > { %v3094_v17 = vpop.permute.xlu1 %3093  ;;  %1623 = vadd.xlane.f32.xlu1 %v6889_v21  ;;  %5453 = vmatpush3.msra.mxu1 %v3100_v36  ;;  %v8374_v21 = vld [vmem:[#allocation24_spill] sm:$0xff] }
 0x87a   : > { %5454 = vmatprep.subr.mxu1 %v3098_v11  ;;  %v8375_v10 = vsub.f32 %v8373_v52, %v8374_v21 }
 0x87b   : > { %5455 = vmatpush3.msra.mxu1 %v3098_v11  ;;  %v3096_v20 = vpop.permute.xlu0 %3095 }
 0x87c   : > { %1625 = vadd.xlane.f32.xlu0 %v6892_v58  ;;  %5456 = vmatprep.subr.mxu1 %v3096_v20  ;;  %v1517_v9 = vmul.f32 1.442695, %v8375_v10 }
 0x87d   : > { %v7500_v37 = vpop.eup %5742  ;;  %1627 = vadd.xlane.f32.xlu1 %v6898_v14  ;;  %5457 = vmatpush3.msra.mxu1 %v3096_v20  ;;  %v3090_v43 = vpop.permute.xlu1 %3089  ;;  %v8376_v14 = vld [vmem:[#allocation23_spill] sm:$0xff] }
 0x87e   : > { %5458 = vmatprep.subr.mxu1 %v3094_v17  ;;  %5466 = vmatprep.mubr.f32.mxu1 %v7500_v37  ;;  %5746 = vpow2.f32 %v1517_v9  ;;  %v8377_v41 = vsub.f32 %v8376_v14, %v6716_v27  ;;  %v7511_v62 = vpop.eup %5744 }
 0x87f   : > { %5459 = vmatpush3.msra.mxu1 %v3094_v17  ;;  %v3092_v19 = vpop.permute.xlu0 %3091 }
 0x880   : > { %5460 = vmatprep.subr.mxu1 %v3092_v19  ;;  %v1523_v57 = vmul.f32 1.442695, %v8377_v41 }
 0x881   : > { %2244 = vadd.xlane.f32.xlu1 %v7194_v12  ;;  %5461 = vmatpush3.msra.mxu1 %v3092_v19  ;;  %v3392_v44 = vpop.permute.xlu1 %3391 }
 0x882   : > { %5462 = vmatprep.subr.mxu1 %v3090_v43  ;;  %5748 = vpow2.f32 %v1523_v57 }
 0x883   : > { %5463 = vmatpush3.msra.mxu1 %v3090_v43  ;;  %v3088_v58 = vpop.permute.xlu0 %3087 }
 0x884   : > { %5464 = vmatprep.subr.mxu1 %v3088_v58 }
 0x885   : > { %2248 = vadd.xlane.f32.xlu1 %v7230_v22  ;;  %5465 = vmatpush3.msra.mxu1 %v3088_v58  ;;  %v3388_v27 = vpop.permute.xlu1 %3387 }
 0x886   : > { %5467 = vmatmul.mubr.f32.vlgmr.msra.gmra.mxu1 %v7511_v62  ;;  %5478 = vmatprep.subr.msk.mxu1 %vm1291_vm3, %v3392_v44 }
 0x887   : > { %5479 = vmatpush3.xpose.msk.msra.mxu1 %vm1291_vm3, %v3392_v44  ;;  %v3390_v12 = vpop.permute.xlu0 %3389 }
 0x888   : > { %5480 = vmatprep.subr.msk.mxu1 %vm1291_vm3, %v3390_v12 }
 0x889   : > { %2252 = vadd.xlane.f32.xlu1 %v7239_v33  ;;  %v3384_v25 = vpop.permute.xlu1 %3383 }
 0x88b   : > { %5481 = vmatpush3.xpose.msk.msra.mxu1 %vm1291_vm3, %v3390_v12  ;;  %v3386_v53 = vpop.permute.xlu0 %3385  ;;  %v7523_v22 = vpop.eup %5746 }
 0x88c   : > { %5482 = vmatprep.subr.msk.mxu1 %vm1291_vm3, %v3388_v27 }
 0x88d   : > { %v3380_v2 = vpop.permute.xlu1 %3379 }
 0x88f   : > { %5483 = vmatpush3.xpose.msk.msra.mxu1 %vm1291_vm3, %v3388_v27  ;;  %v7528_v33 = vpop.eup %5748  ;;  %v3382_v46 = vpop.permute.xlu0 %3381 }
 0x890   : > { %5484 = vmatprep.subr.msk.mxu1 %vm1291_vm3, %v3386_v53 }
 0x891   : > { %v3378_v3 = vpop.permute.xlu1 %3377 }
 0x892   : > { %1656 = vperm.xlu0 %5708, %v7523_v22  }
 0x893   : > { %5485 = vmatpush3.xpose.msk.msra.mxu1 %vm1291_vm3, %v3386_v53 }
 0x894   : > { %5486 = vmatprep.subr.msk.mxu1 %vm1291_vm3, %v3384_v25 }
 0x896   : > { %1671 = vperm.xlu0 %5708, %v7528_v33  }
 0x897   : > { %5487 = vmatpush3.xpose.msk.msra.mxu1 %vm1291_vm3, %v3384_v25 }
 0x898   : > { %5488 = vmatprep.subr.msk.mxu1 %vm1291_vm3, %v3382_v46 }
 0x89b   : > { %5489 = vmatpush3.xpose.msk.msra.mxu1 %vm1291_vm3, %v3382_v46 }
 0x89c   : > { %5490 = vmatprep.subr.msk.mxu1 %vm1291_vm3, %v3380_v2 }
 0x89f   : > { %5491 = vmatpush3.xpose.msk.msra.mxu1 %vm1291_vm3, %v3380_v2 }
 0x8a0   : > { %5492 = vmatprep.subr.msk.mxu1 %vm1291_vm3, %v3378_v3  ;;  %v2904_v51 = vpop.permute.xlu0 %2903 }
 0x8a1   : > { %v2929_v16 = vsub.f32 %v7301_v1, %v2904_v51 }
 0x8a3   : > { %5493 = vmatpush3.xpose.msk.msra.mxu1 %vm1291_vm3, %v3378_v3  ;;  %v2940_v7 = vmul.f32 1.442695, %v2929_v16 }
 0x8a4   : > { %v2914_v8 = vpop.permute.xlu1 %2913  ;;  %v2899_v0 = vpop.permute.xlu0 %2898 }
 0x8a5   : > { %v2928_v26 = vsub.f32 %v7297_v63, %v2899_v0  ;;  %v2931_v11 = vsub.f32 %v7311_v4, %v2914_v8  ;;  %v8378_v8 = vld [vmem:[#allocation25_spill] sm:$0xff]  ;;  %v8379_v0 = vld [vmem:[#allocation27_spill] sm:$0xff] }
 0x8a7   : > { %v2938_v36 = vmul.f32 1.442695, %v2928_v26  ;;  %v2944_v1 = vmul.f32 1.442695, %v2931_v11  ;;  %v8380_v26 = vsub.f32 %v8378_v8, %v8379_v0  ;;  %v8381_v11 = vld [vmem:[#allocation26_spill] sm:$0xff] }
 0x8a8   : > { %v2909_v17 = vpop.permute.xlu1 %2908  ;;  %v3376_v20 = vpop.permute.xlu0 %3375 }
 0x8a9   : > { %v2930_v43 = vsub.f32 %v7306_v15, %v2909_v17  ;;  %5494 = vmatprep.subr.msk.mxu1 %vm1291_vm3, %v3376_v20  ;;  %5750 = vpow2.f32 %v2938_v36  ;;  %v8382_v36 = vld [vmem:[#allocation28_spill] sm:$0xff] }
 0x8aa   : > { %5495 = vmatpush3.xpose.msk.msra.mxu1 %vm1291_vm3, %v3376_v20  ;;  %5752 = vpow2.f32 %v2940_v7  ;;  %v1519_v7 = vmul.f32 1.442695, %v8380_v26  ;;  %v8383_v17 = vsub.f32 %v8381_v11, %v8382_v36 }
 0x8ab   : > { %v2942_v19 = vmul.f32 1.442695, %v2930_v43  ;;  %v8384_v43 = vsub.f32 %v6727_v60, %v6745_v23  ;;  %v8394_v60 = vld [vmem:[#allocation43_spill] sm:$0xff]  ;;  %v8395_v23 = vld [vmem:[#allocation45_spill] sm:$0xff] }
 0x8ac   : > { %v3374_v52 = vpop.permute.xlu1 %3373  ;;  %v2919_v21 = vpop.permute.xlu0 %2918  ;;  %v1521_v20 = vmul.f32 1.442695, %v8383_v17  ;;  %v1600_v17 = vld [vmem:[#allocation6 + $0x18] sm:$0xff] }
 0x8ad   : > { %5754 = vpow2.f32 %v2942_v19  ;;  %v2932_v63 = vsub.f32 %v7316_v61, %v2919_v21  ;;  %5496 = vmatprep.subr.msk.mxu1 %vm1291_vm3, %v3374_v52  ;;  %v8385_v19 = vld [vmem:[#allocation29_spill] sm:$0xff] }
 0x8ae   : > { %5497 = vmatpush3.xpose.msk.msra.mxu1 %vm1291_vm3, %v3374_v52  ;;  %5756 = vpow2.f32 %v2944_v1  ;;  %v1525_v1 = vmul.f32 1.442695, %v8384_v43  ;;  %v8386_v52 = vld [vmem:[#allocation31_spill] sm:$0xff] }
 0x8af   : > { %v2946_v4 = vmul.f32 1.442695, %v2932_v63  ;;  %v8387_v21 = vsub.f32 %v8385_v19, %v8386_v52  ;;  %v8400_v19 = vld [vmem:[#allocation48_spill] sm:$0xff]  ;;  %v8401_v52 = vld [vmem:[#allocation51_spill] sm:$0xff] }
 0x8b0   : > { %v3372_v15 = vpop.permute.xlu1 %3371  ;;  %v2924_v10 = vpop.permute.xlu0 %2923 }
 0x8b1   : > { %5758 = vpow2.f32 %v2946_v4  ;;  %v2933_v9 = vsub.f32 %v7321_v50, %v2924_v10  ;;  %5498 = vmatprep.subr.msk.mxu1 %vm1291_vm3, %v3372_v15  ;;  %v1527_v63 = vmul.f32 1.442695, %v8387_v21  ;;  %v8388_v4 = vld [vmem:[#allocation30_spill] sm:$0xff]  ;;  %v8402_v21 = vsub.f32 %v8400_v19, %v8401_v52 }
 0x8b2   : > { %5499 = vmatpush3.xpose.msk.msra.mxu1 %vm1291_vm3, %v3372_v15  ;;  %v8389_v15 = vld [vmem:[#allocation33_spill] sm:$0xff]  ;;  %v2229_v19 = vld [vmem:[#allocation6 + $0x58] sm:$0xff] }
 0x8b3   : > { %v2948_v58 = vmul.f32 1.442695, %v2933_v9  ;;  %v8390_v10 = vsub.f32 %v8388_v4, %v8389_v15  ;;  %v1601_v15 = vld [vmem:[#allocation6 + $0x20] sm:$0xff] }
 0x8b4   : > { %v3368_v14 = vpop.permute.xlu1 %3367  ;;  %v3370_v41 = vpop.permute.xlu0 %3369 }
 0x8b5   : > { %5760 = vpow2.f32 %v2948_v58  ;;  %2242 = vadd.xlane.f32.xlu0 %v7191_v24  ;;  %5500 = vmatprep.subr.msk.mxu1 %vm1291_vm3, %v3370_v41  ;;  %v1529_v9 = vmul.f32 1.442695, %v8390_v10  ;;  %v8391_v58 = vld [vmem:[#allocation32_spill] sm:$0xff] }
 0x8b6   : > { %5501 = vmatpush3.xpose.msk.msra.mxu1 %vm1291_vm3, %v3370_v41  ;;  %v7553_v61 = vpop.eup %5750  ;;  %5762 = vpow2.f32 %v1519_v7  ;;  %v1599_v7 = vld [vmem:[#allocation6 + $0x10] sm:$0xff] }
 0x8b7   : > { %5502 = vmatprep.subr.msk.mxu1 %vm1291_vm3, %v3368_v14  ;;  %v7556_v57 = vpop.eup %5752  ;;  %5469 = vmatprep.mubr.f32.mxu1 %v7553_v61  ;;  %5764 = vpow2.f32 %v1521_v20 }
 0x8b8   : > { %v3366_v50 = vpop.permute.xlu0 %3365  ;;  %v3364_v44 = vpop.permute.xlu1 %3363  ;;  %5470 = vmatmul.mubr.f32.gmra.mxu1 %v7556_v57  ;;  %5766 = vpow2.f32 %v1525_v1 }
 0x8b9   : > { %2246 = vadd.xlane.f32.xlu0 %v7227_v5  ;;  %5768 = vpow2.f32 %v1527_v63  ;;  %v2155_v63 = vmul.f32 1.442695, %v8402_v21  ;;  %v1646_v21 = vld [vmem:[#allocation7] sm:$0xff] }
 0x8ba   : > { %v7561_v12 = vpop.eup %5754  ;;  %5503 = vmatpush3.xpose.msk.msra.mxu1 %vm1291_vm3, %v3368_v14  ;;  %v8392_v14 = vld [vmem:[#allocation34_spill] sm:$0xff]  ;;  %5770 = vpow2.f32 %v1529_v9 }
 0x8bb   : > { %5472 = vmatprep.mubr.f32.mxu1 %v7561_v12  ;;  %5504 = vmatprep.subr.msk.mxu1 %vm1291_vm3, %v3366_v50  ;;  %v7566_v24 = vpop.eup %5756  ;;  %v8393_v41 = vsub.f32 %v8391_v58, %v8392_v14  ;;  %v1602_v14 = vld [vmem:[#allocation6 + $0x28] sm:$0xff] }
 0x8bc   : > { %v3362_v27 = vpop.permute.xlu0 %3361  ;;  %5473 = vmatmul.mubr.f32.gmra.mxu1 %v7566_v24  ;;  %v3330_v53 = vpop.permute.xlu1 %3329 }
 0x8bd   : > { %2250 = vadd.xlane.f32.xlu0 %v7234_v42 }
 0x8be   : > { %v7570_v25 = vpop.eup %5758  ;;  %5505 = vmatpush3.xpose.msk.msra.mxu1 %vm1291_vm3, %v3366_v50  ;;  %v1531_v50 = vmul.f32 1.442695, %v8393_v41 }
 0x8bf   : > { %5475 = vmatprep.mubr.f32.mxu1 %v7570_v25  ;;  %5506 = vmatprep.subr.msk.mxu1 %vm1291_vm3, %v3364_v44 }
 0x8c0   : > { %v3332_v5 = vpop.permute.xlu0 %3331  ;;  %v3334_v42 = vpop.permute.xlu1 %3333  ;;  %5772 = vpow2.f32 %v1531_v50 }
 0x8c1   : > { %2254 = vadd.xlane.f32.xlu0 %v7242_v29 }
 0x8c2   : > { %v7576_v46 = vpop.eup %5760  ;;  %5507 = vmatpush3.xpose.msk.msra.mxu1 %vm1291_vm3, %v3364_v44 }
 0x8c3   : > { %5476 = vmatmul.mubr.f32.gmra.mxu1 %v7576_v46  ;;  %5508 = vmatprep.subr.msk.mxu1 %vm1291_vm3, %v3362_v27  ;;  %v7608_v44 = vpop.eup %5762 }
 0x8c4   : > { %5510 = vmatprep.mubr.msk.f32.mxu1 %vm1291_vm3, %v3330_v53  ;;  %v3336_v2 = vpop.permute.xlu0 %3335  ;;  %v3338_v3 = vpop.permute.xlu1 %3337 }
 0x8c6   : > { %5509 = vmatpush3.xpose.msk.msra.mxu1 %vm1291_vm3, %v3362_v27  ;;  %v8396_v27 = vsub.f32 %v8394_v60, %v8395_v23 }
 0x8c8   : > { %v3340_v29 = vpop.permute.xlu0 %3339  ;;  %v3342_v51 = vpop.permute.xlu1 %3341  ;;  %v2147_v53 = vmul.f32 1.442695, %v8396_v27 }
 0x8c9   : > { %5511 = vmatmul.mubr.msk.f32.vlgmr.msra.gmra.mxu1 %vm1291_vm3, %v3332_v5  ;;  %v1598_v5 = vld [vmem:[#allocation6 + $0x8] sm:$0xff] }
 0x8ca   : > { %5513 = vmatprep.mubr.msk.f32.mxu1 %vm1291_vm3, %v3334_v42  ;;  %v1597_v42 = vld [vmem:[#allocation6] sm:$0xff]  ;;  %5774 = vpow2.f32 %v2147_v53 }
 0x8cb   : > { %v1605_v26 = vmul.f32 %v7523_v22, %v1597_v42  ;;  %v1608_v22 = vmul.f32 %v7528_v33, %v1600_v17  ;;  %v1603_v33 = vld [vmem:[#allocation6 + $0x30] sm:$0xff] }
 0x8cc   : > { %v3344_v16 = vpop.permute.xlu0 %3343 }
 0x8cd   : > { %5514 = vmatmul.mubr.msk.f32.gmra.mxu1 %vm1291_vm3, %v3336_v2  ;;  %v1606_v2 = vmul.f32 %v7608_v44, %v1598_v5 }
 0x8ce   : > { %5516 = vmatprep.mubr.msk.f32.mxu1 %vm1291_vm3, %v3338_v3  ;;  %v7614_v3 = vpop.eup %5764 }
 0x8cf   : > { %v1607_v43 = vmul.f32 %v7614_v3, %v1599_v7  ;;  %v7622_v1 = vpop.eup %5766 }
 0x8d0   : > { %v7629_v10 = vpop.eup %5768  ;;  %v1609_v50 = vmul.f32 %v7622_v1, %v1601_v15 }
 0x8d1   : > { %5517 = vmatmul.mubr.msk.f32.gmra.mxu1 %vm1291_vm3, %v3340_v29  ;;  %v8397_v29 = vld [vmem:[#allocation20_spill] sm:$0xff]  ;;  %v7633_v60 = vpop.eup %5770  ;;  %v1610_v27 = vmul.f32 %v7629_v10, %v1602_v14 }
 0x8d2   : > { %5519 = vmatprep.mubr.msk.f32.mxu1 %vm1291_vm3, %v3342_v51  ;;  %v8398_v51 = vld [vmem:[#allocation47_spill] sm:$0xff]  ;;  %v7637_v53 = vpop.eup %5772 }
 0x8d5   : > { %5520 = vmatmul.mubr.msk.f32.gmra.mxu1 %vm1291_vm3, %v3344_v16  ;;  %v8399_v16 = vsub.f32 %v8397_v29, %v8398_v51  ;;  %v1611_v51 = vmul.f32 %v7633_v60, %v1603_v33 }
 0x8d7   : > { %v2151_v8 = vmul.f32 1.442695, %v8399_v16 }
 0x8d9   : > { %5776 = vpow2.f32 %v2151_v8 }
 0x8da   : > { %5778 = vpow2.f32 %v2155_v63 }
 0x8f9   : > { %v1616_v0 = vpop.xlane.xlu0 %1615 }
 0x8fa   : > { %v1630_v11 = vadd.f32 %v1616_v0, %v1606_v2  ;;  %v1614_v36 = vpop.xlane.xlu1 %1613  ;;  %v1604_v2 = vld [vmem:[#allocation6 + $0x38] sm:$0xff]  ;;  %v7643_v0 = vpop.eup %5774 }
 0x8fb   : > { %v1629_v20 = vadd.f32 %v1614_v36, %v1605_v26  ;;  %v1612_v8 = vmul.f32 %v7637_v53, %v1604_v2 }
 0x8fc   : > { %1639 = vst.msk [vmem:[#allocation6 + $0x8] sm:$0xff] %vm1637_vm12, %v1630_v11  ;;  %v2227_v11 = vld [vmem:[#allocation6 + $0x48] sm:$0xff] }
 0x8fd   : > { %1638 = vst.msk [vmem:[#allocation6] sm:$0xff] %vm1637_vm12, %v1629_v20  ;;  %v1618_v4 = vpop.xlane.xlu0 %1617  ;;  %v2235_v17 = vmul.f32 %v7643_v0, %v2227_v11  ;;  %v7648_v20 = vpop.eup %5776  ;;  %v8408_v11 = vld [vmem:[#allocation18_spill] sm:$0xff] }
 0x8fe   : > { %v1631_v9 = vadd.f32 %v1618_v4, %v1607_v43  ;;  %v1620_v58 = vpop.xlane.xlu1 %1619  ;;  %v2237_v4 = vmul.f32 %v7648_v20, %v2229_v19  ;;  %v8411_v19 = vld [vmem:[#allocation21_spill] sm:$0xff] }
 0x8ff   : > { %v1632_v41 = vadd.f32 %v1620_v58, %v1608_v22  ;;  %v7652_v22 = vpop.eup %5778  ;;  %v2231_v58 = vld [vmem:[#allocation6 + $0x68] sm:$0xff] }
 0x900   : > { %1640 = vst.msk [vmem:[#allocation6 + $0x10] sm:$0xff] %vm1637_vm12, %v1631_v9  ;;  %v2239_v33 = vmul.f32 %v7652_v22, %v2231_v58 }
 0x901   : > { %1641 = vst.msk [vmem:[#allocation6 + $0x18] sm:$0xff] %vm1637_vm12, %v1632_v41  ;;  %v1622_v23 = vpop.xlane.xlu0 %1621  ;;  %v1649_v41 = vld [vmem:[#allocation7 + $0x18] sm:$0xff] }
 0x902   : > { %v1633_v5 = vadd.f32 %v1622_v23, %v1609_v50  ;;  %v1624_v42 = vpop.xlane.xlu1 %1623  ;;  %v8403_v50 = vld [vmem:[#allocation36_spill] sm:$0xff] }
 0x903   : > { %v1634_v29 = vadd.f32 %v1624_v42, %v1610_v27 }
 0x904   : > { %1642 = vst.msk [vmem:[#allocation6 + $0x20] sm:$0xff] %vm1637_vm12, %v1633_v5 }
 0x905   : > { %1643 = vst.msk [vmem:[#allocation6 + $0x28] sm:$0xff] %vm1637_vm12, %v1634_v29  ;;  %v1626_v16 = vpop.xlane.xlu0 %1625  ;;  %v8404_v29 = vld [vmem:[#allocation37_spill] sm:$0xff] }
 0x906   : > { %v1635_v26 = vadd.f32 %v1626_v16, %v1611_v51  ;;  %v1628_v7 = vpop.xlane.xlu1 %1627  ;;  %v8405_v16 = vld [vmem:[#allocation44_spill] sm:$0xff] }
 0x907   : > { %v1636_v36 = vadd.f32 %v1628_v7, %v1612_v8  ;;  %v8406_v8 = vld [vmem:[#allocation46_spill] sm:$0xff] }
 0x908   : > { %1644 = vst.msk [vmem:[#allocation6 + $0x30] sm:$0xff] %vm1637_vm12, %v1635_v26  ;;  %v8407_v26 = vsub.f32 %v8405_v16, %v8406_v8 }
 0x909   : > { %1645 = vst.msk [vmem:[#allocation6 + $0x38] sm:$0xff] %vm1637_vm12, %v1636_v36  ;;  %v8409_v36 = vld [vmem:[#allocation19_spill] sm:$0xff] }
 0x90a   : > { %v2245_v43 = vpop.xlane.xlu1 %2244  ;;  %v2145_v7 = vmul.f32 1.442695, %v8407_v26 }
 0x90b   : > { %v2259_v52 = vadd.f32 %v2245_v43, %v2235_v17  ;;  %v8410_v17 = vsub.f32 %v8408_v11, %v8409_v36  ;;  %v2232_v11 = vld [vmem:[#allocation6 + $0x70] sm:$0xff] }
 0x90c   : > { %5780 = vpow2.f32 %v2145_v7 }
 0x90d   : > { %2267 = vst.msk [vmem:[#allocation6 + $0x48] sm:$0xff] %vm1637_vm12, %v2259_v52  ;;  %v1657_v63 = vpop.permute.xlu0 %1656  ;;  %v2149_v43 = vmul.f32 1.442695, %v8410_v17  ;;  %v8412_v52 = vld [vmem:[#allocation49_spill] sm:$0xff] }
 0x90e   : > { %v1694_v15 = vmul.f32 %v1657_v63, %v1646_v21  ;;  %v2249_v9 = vpop.xlane.xlu1 %2248  ;;  %v8413_v21 = vsub.f32 %v8411_v19, %v8412_v52 }
 0x90f   : > { %v2261_v14 = vadd.f32 %v2249_v9, %v2237_v4  ;;  %5782 = vpow2.f32 %v2149_v43  ;;  %v8414_v4 = vld [vmem:[#allocation50_spill] sm:$0xff] }
 0x910   : > { %v1823_v23 = vadd.f32 %v8403_v50, %v1694_v15  ;;  %v2153_v63 = vmul.f32 1.442695, %v8413_v21  ;;  %v8415_v15 = vld [vmem:[#allocation53_spill] sm:$0xff] }
 0x911   : > { %2269 = vst.msk [vmem:[#allocation6 + $0x58] sm:$0xff] %vm1637_vm12, %v2261_v14  ;;  %v1672_v27 = vpop.permute.xlu0 %1671  ;;  %v8416_v9 = vsub.f32 %v8414_v4, %v8415_v15 }
 0x912   : > { %1831 = vst.msk [vmem:[#allocation7] sm:$0xff] %vm1291_vm3, %v1823_v23  ;;  %v1697_v5 = vmul.f32 %v1672_v27, %v1649_v41  ;;  %v2253_v42 = vpop.xlane.xlu1 %2252  ;;  %5784 = vpow2.f32 %v2153_v63  ;;  %v2226_v41 = vld [vmem:[#allocation6 + $0x40] sm:$0xff] }
 0x913   : > { %v2263_v2 = vadd.f32 %v2253_v42, %v2239_v33  ;;  %v2157_v58 = vmul.f32 1.442695, %v8416_v9  ;;  %v2228_v33 = vld [vmem:[#allocation6 + $0x50] sm:$0xff] }
 0x914   : > { %v1826_v51 = vadd.f32 %v8404_v29, %v1697_v5 }
 0x915   : > { %2271 = vst.msk [vmem:[#allocation6 + $0x68] sm:$0xff] %vm1637_vm12, %v2263_v2  ;;  %5786 = vpow2.f32 %v2157_v58 }
 0x916   : > { %1834 = vst.msk [vmem:[#allocation7 + $0x18] sm:$0xff] %vm1291_vm3, %v1826_v51  ;;  %v2230_v51 = vld [vmem:[#allocation6 + $0x60] sm:$0xff] }
 0x919   : > { %v7673_v14 = vpop.eup %5780 }
 0x91a   : > { %v2234_v50 = vmul.f32 %v7673_v14, %v2226_v41 }
 0x91c   : > { %v7676_v23 = vpop.eup %5782 }
 0x91d   : > { %v2236_v42 = vmul.f32 %v7676_v23, %v2228_v33 }
 0x91f   : > { %v7680_v2 = vpop.eup %5784 }
 0x920   : > { %v2238_v8 = vmul.f32 %v7680_v2, %v2230_v51 }
 0x922   : > { %v7684_v26 = vpop.eup %5786 }
 0x923   : > { %v2240_v17 = vmul.f32 %v7684_v26, %v2232_v11 }
 0x93e   : > { %v2243_v27 = vpop.xlane.xlu0 %2242 }
 0x93f   : > { %v2258_v5 = vadd.f32 %v2243_v27, %v2234_v50 }
 0x941   : > { %2266 = vst.msk [vmem:[#allocation6 + $0x40] sm:$0xff] %vm1637_vm12, %v2258_v5 }
 0x942   : > { %v2247_v29 = vpop.xlane.xlu0 %2246 }
 0x943   : > { %v2260_v16 = vadd.f32 %v2247_v29, %v2236_v42 }
 0x945   : > { %2268 = vst.msk [vmem:[#allocation6 + $0x50] sm:$0xff] %vm1637_vm12, %v2260_v16 }
 0x946   : > { %v2251_v7 = vpop.xlane.xlu0 %2250  ;;  %v7689_v52 = vpop.f32.mrf.mxu1 }
 0x947   : > { %v2262_v36 = vadd.f32 %v2251_v7, %v2238_v8  ;;  %v8434_v7 = vld [vmem:[#allocation54_spill] sm:$0xff] }
 0x948   : > { %v7691_v21 = vpop.f32.mrf.mxu1 }
 0x949   : > { %2270 = vst.msk [vmem:[#allocation6 + $0x60] sm:$0xff] %vm1637_vm12, %v2262_v36 }
 0x94a   : > { %v2255_v43 = vpop.xlane.xlu0 %2254 }
 0x94b   : > { %v2264_v19 = vadd.f32 %v2255_v43, %v2240_v17 }
 0x94d   : > { %2272 = vst.msk [vmem:[#allocation6 + $0x70] sm:$0xff] %vm1637_vm12, %v2264_v19  ;;  %v8422_v19 = vld [vmem:[#allocation55_spill] sm:$0xff] }
 0x978   : > { %v7693_v63 = vpop.f32.mrf.mxu1 }
 0x97a   : > { %v7695_v4 = vpop.f32.mrf.mxu1 }
 0x97c   : > { %v7697_v15 = vpop.f32.mrf.mxu1 }
 0x97d   : > { %8417 = vst [vmem:[#allocation22_spill] sm:$0xff] %v7697_v15 }
 0x97e   : > { %v7699_v9 = vpop.f32.mrf.mxu1 }
 0x983   : > { %v7701_v58 = vpop.f32.mrf.mxu1 }
 0x984   : > { %8418 = vst [vmem:[#allocation24_spill] sm:$0xff] %v7701_v58  ;;  %v8437_v58 = vld [vmem:[#allocation39_spill] sm:$0xff] }
 0x985   : > { %v7703_v41 = vpop.f32.mrf.mxu1 }
 0x989   : > { %v5512_v50 = vpop.f32.mrf.mxu1 }
 0x98a   : > { %v7707_v27 = vsel %vm1260_vm6, -1.25e+19, %v5512_v50  ;;  %v3795_v50 = vld [vmem:[#allocation4 + $0x78] sm:$0xff] }
 0x98b   : > { %3565 = vmax.xlane.f32.xlu0 %v7707_v27  ;;  %v3507_v33 = vpop.f32.mrf.mxu1 }
 0x98c   : > { %v7712_v5 = vsel %vm1259_vm4, -1.25e+19, %v3507_v33  ;;  %v3794_v33 = vld [vmem:[#allocation4 + $0x70] sm:$0xff] }
 0x98d   : > { %3563 = vmax.xlane.f32.xlu1 %v7712_v5  ;;  %v5515_v42 = vpop.f32.mrf.mxu1 }
 0x98e   : > { %v7717_v29 = vsel %vm1262_vm5, -1.25e+19, %v5515_v42  ;;  %v8423_v42 = vld [vmem:[#allocation65_spill] sm:$0xff] }
 0x98f   : > { %v3517_v51 = vpop.f32.mrf.mxu1 }
 0x990   : > { %v7721_v31 = vsel %vm1261_vm7, -1.25e+19, %v3517_v51  ;;  %v8424_v51 = vld [vmem:[#allocation64_spill] sm:$0xff] }
 0x991   : > { %3569 = vmax.xlane.f32.xlu1 %v7717_v29  ;;  %3567 = vmax.xlane.f32.xlu0 %v7721_v31  ;;  %v5518_v16 = vpop.f32.mrf.mxu1 }
 0x992   : > { %v7727_v28 = vsel %vm1264_vm9, -1.25e+19, %v5518_v16  ;;  %v3793_v16 = vld [vmem:[#allocation4 + $0x68] sm:$0xff] }
 0x993   : > { %v3527_v8 = vpop.f32.mrf.mxu1 }
 0x994   : > { %v7731_v30 = vsel %vm1263_vm8, -1.25e+19, %v3527_v8  ;;  %v8432_v8 = vld [vmem:[#allocation63_spill] sm:$0xff] }
 0x995   : > { %3573 = vmax.xlane.f32.xlu1 %v7727_v28  ;;  %3571 = vmax.xlane.f32.xlu0 %v7731_v30  ;;  %v5521_v32 = vpop.f32.mrf.mxu1 }
 0x996   : > { %v7737_v36 = vsel %vm1266_vm11, -1.25e+19, %v5521_v32 }
 0x997   : > { %v3537_v17 = vpop.f32.mrf.mxu1 }
 0x998   : > { %v7741_v40 = vsel %vm1265_vm10, -1.25e+19, %v3537_v17  ;;  %v7786_v17 = vld [vmem:[#allocation5 + $0xc8] sm:$0xff] }
 0x999   : > { %3577 = vmax.xlane.f32.xlu1 %v7737_v36  ;;  %3575 = vmax.xlane.f32.xlu0 %v7741_v40 }
 0x99d   : > { %2256 = vadd.xlane.f32.xlu1 %v8422_v19  ;;  %v7788_v19 = vld [vmem:[#allocation5 + $0xc0] sm:$0xff] }
 0x9ae   : > { %3842 = vrot.lane.b32.xlu1 %v3795_v50, %s5981_s20 }
 0x9af   : > { %1681 = vperm.xlu0 %5708, %v7629_v10   ;;  %v8425_v10 = vld [vmem:[#allocation70_spill] sm:$0xff] }
 0x9b2   : > { %3840 = vrot.lane.b32.xlu1 %v3794_v33, %s5981_s20 }
 0x9b3   : > { %1691 = vperm.xlu0 %5708, %v7637_v53   ;;  %v8426_v53 = vld [vmem:[#allocation71_spill] sm:$0xff] }
 0x9b6   : > { %3836 = vrot.lane.b32.xlu1 %v8423_v42, %s5981_s20 }
 0x9b7   : > { %2284 = vperm.xlu0 %5708, %v7673_v14   ;;  %v8430_v14 = vld [vmem:[#allocation59_spill] sm:$0xff] }
 0x9ba   : > { %3834 = vrot.lane.b32.xlu1 %v8424_v51, %s5981_s20  ;;  %v7802_v51 = vld [vmem:[#allocation5 + $0xd8] sm:$0xff] }
 0x9bb   : > { %3838 = vrot.lane.b32.xlu0 %v3793_v16, %s5981_s20  ;;  %v7804_v16 = vld [vmem:[#allocation5 + $0xd0] sm:$0xff] }
 0x9be   : > { %3832 = vrot.lane.b32.xlu1 %v7349_v34, %s5981_s20  ;;  %v8427_v34 = vld [vmem:[#allocation72_spill] sm:$0xff] }
 0x9c2   : > { %3830 = vrot.lane.b32.xlu1 %v7345_v48, %s5981_s20  ;;  %v8428_v48 = vld [vmem:[#allocation73_spill] sm:$0xff] }
 0x9c6   : > { %3828 = vrot.lane.b32.xlu1 %v7357_v54, %s5981_s20  ;;  %v8429_v54 = vld [vmem:[#allocation57_spill] sm:$0xff] }
 0x9ca   : > { %3826 = vrot.lane.b32.xlu1 %v8425_v10, %s5981_s20 }
 0x9ce   : > { %3824 = vrot.lane.b32.xlu1 %v7365_v45, %s5981_s20  ;;  %v8431_v45 = vld [vmem:[#allocation61_spill] sm:$0xff] }
 0x9d2   : > { %3822 = vrot.lane.b32.xlu1 %v8426_v53, %s5981_s20 }
 0x9d6   : > { %3820 = vrot.lane.b32.xlu1 %v7370_v56, %s5981_s20  ;;  %v8433_v56 = vld [vmem:[#allocation52_spill] sm:$0xff] }
 0x9d7   : > { %v8435_v32 = vsub.f32 %v8433_v56, %v8434_v7 }
 0x9d9   : > { %v2159_v11 = vmul.f32 1.442695, %v8435_v32 }
 0x9da   : > { %3816 = vrot.lane.b32.xlu1 %v8427_v34, %s5981_s20 }
 0x9db   : > { %5788 = vpow2.f32 %v2159_v11  ;;  %v7838_v11 = vld [vmem:[#allocation5 + $0xf8] sm:$0xff] }
 0x9dc   : > { %8436 = vst [vmem:[#allocation23_spill] sm:$0xff] %v7838_v11 }
 0x9de   : > { %3812 = vrot.lane.b32.xlu1 %v8428_v48, %s5981_s20 }
 0x9e2   : > { %2523 = vrot.lane.b32.xlu1 %v8429_v54, %s5982_s22  ;;  %v7818_v54 = vld [vmem:[#allocation5 + $0xe8] sm:$0xff] }
 0x9e6   : > { %2527 = vrot.lane.b32.xlu1 %v8430_v14, %s5982_s22  ;;  %v7820_v14 = vld [vmem:[#allocation5 + $0xe0] sm:$0xff] }
 0x9ea   : > { %2531 = vrot.lane.b32.xlu1 %v8431_v45, %s5982_s22 }
 0x9ee   : > { %2535 = vrot.lane.b32.xlu1 %v8432_v8, %s5982_s22 }
 0xa12   : > { %2967 = vadd.xlane.f32.xlu1 %v7500_v37 }
 0xa14   : > { %v3566_v43 = vpop.xlane.xlu0 %3565 }
 0xa15   : > { %v7791_v50 = vmax.f32 %v7786_v17, %v3566_v43  ;;  %v7840_v43 = vld [vmem:[#allocation5 + $0xf0] sm:$0xff] }
 0xa16   : > { %v3564_v33 = vpop.xlane.xlu1 %3563  ;;  %2973 = vadd.xlane.f32.xlu1 %v7556_v57 }
 0xa17   : > { %4015 = vst.msk [vmem:[#allocation5 + $0xc8] sm:$0xff] %vm1637_vm12, %v7791_v50  ;;  %v7799_v37 = vmax.f32 %v7788_v19, %v3564_v33  ;;  %3618 = vperm.xlu0 %5708, %v7791_v50  }
 0xa19   : > { %4014 = vst.msk [vmem:[#allocation5 + $0xc0] sm:$0xff] %vm1637_vm12, %v7799_v37 }
 0xa1a   : > { %v3570_v57 = vpop.xlane.xlu1 %3569  ;;  %2977 = vadd.xlane.f32.xlu1 %v7566_v24  ;;  %v3568_v53 = vpop.xlane.xlu0 %3567 }
 0xa1b   : > { %v7812_v34 = vmax.f32 %v7802_v51, %v3570_v57  ;;  %3613 = vperm.xlu0 %5708, %v7799_v37   ;;  %v7816_v48 = vmax.f32 %v7804_v16, %v3568_v53  ;;  %v7850_v57 = vpop.eup %5788 }
 0xa1d   : > { %4017 = vst.msk [vmem:[#allocation5 + $0xd8] sm:$0xff] %vm1637_vm12, %v7812_v34  ;;  %4016 = vst.msk [vmem:[#allocation5 + $0xd0] sm:$0xff] %vm1637_vm12, %v7816_v48 }
 0xa1e   : > { %v3574_v8 = vpop.xlane.xlu1 %3573  ;;  %2981 = vadd.xlane.f32.xlu1 %v7576_v46  ;;  %v3572_v56 = vpop.xlane.xlu0 %3571 }
 0xa1f   : > { %v7832_v7 = vmax.f32 %v7818_v54, %v3574_v8  ;;  %3628 = vperm.xlu0 %5708, %v7812_v34   ;;  %v7836_v32 = vmax.f32 %v7820_v14, %v3572_v56  ;;  %v2233_v8 = vld [vmem:[#allocation6 + $0x78] sm:$0xff] }
 0xa20   : > { %v2241_v18 = vmul.f32 %v7850_v57, %v2233_v8  ;;  %v1653_v8 = vld [vmem:[#allocation7 + $0x38] sm:$0xff] }
 0xa21   : > { %4019 = vst.msk [vmem:[#allocation5 + $0xe8] sm:$0xff] %vm1637_vm12, %v7832_v7  ;;  %4018 = vst.msk [vmem:[#allocation5 + $0xe0] sm:$0xff] %vm1637_vm12, %v7836_v32 }
 0xa22   : > { %v3578_v53 = vpop.xlane.xlu1 %3577  ;;  %v3576_v56 = vpop.xlane.xlu0 %3575 }
 0xa23   : > { %v7853_v45 = vmax.f32 %v7838_v11, %v3578_v53  ;;  %3623 = vperm.xlu0 %5708, %v7816_v48   ;;  %v7857_v33 = vmax.f32 %v7840_v43, %v3576_v56  ;;  %v1651_v56 = vld [vmem:[#allocation7 + $0x28] sm:$0xff] }
 0xa25   : > { %4021 = vst.msk [vmem:[#allocation5 + $0xf8] sm:$0xff] %vm1637_vm12, %v7853_v45  ;;  %4020 = vst.msk [vmem:[#allocation5 + $0xf0] sm:$0xff] %vm1637_vm12, %v7857_v33 }
 0xa26   : > { %v2257_v53 = vpop.xlane.xlu1 %2256 }
 0xa27   : > { %v2265_v24 = vadd.f32 %v2257_v53, %v2241_v18  ;;  %3638 = vperm.xlu0 %5708, %v7832_v7  }
 0xa29   : > { %2273 = vst.msk [vmem:[#allocation6 + $0x78] sm:$0xff] %vm1637_vm12, %v2265_v24  ;;  %v8438_v24 = vld [vmem:[#allocation41_spill] sm:$0xff] }
 0xa2a   : > { %v3843_v42 = vpop.permute.xlu1 %3842  ;;  %v1682_v10 = vpop.permute.xlu0 %1681 }
 0xa2b   : > { %v1699_v13 = vmul.f32 %v1682_v10, %v1651_v56  ;;  %5522 = vmatprep.subr.mxu0 %v3843_v42  ;;  %3633 = vperm.xlu0 %5708, %v7836_v32  }
 0xa2c   : > { %5523 = vmatpush3.msra.mxu0 %v3843_v42  ;;  %v8440_v42 = vld [vmem:[#allocation68_spill] sm:$0xff] }
 0xa2d   : > { %v1828_v46 = vadd.f32 %v8437_v58, %v1699_v13 }
 0xa2e   : > { %v3841_v11 = vpop.permute.xlu1 %3840  ;;  %v1692_v15 = vpop.permute.xlu0 %1691 }
 0xa2f   : > { %1836 = vst.msk [vmem:[#allocation7 + $0x28] sm:$0xff] %vm1291_vm3, %v1828_v46  ;;  %v1701_v18 = vmul.f32 %v1692_v15, %v1653_v8  ;;  %1661 = vperm.xlu1 %5709, %v7608_v44   ;;  %5524 = vmatprep.subr.mxu0 %v3841_v11  ;;  %v3783_v44 = vld [vmem:[#allocation4 + $0x18] sm:$0xff] }
 0xa30   : > { %3648 = vperm.xlu0 %5708, %v7853_v45   ;;  %5525 = vmatpush3.msra.mxu0 %v3841_v11  ;;  %v8439_v15 = vld [vmem:[#allocation66_spill] sm:$0xff] }
 0xa31   : > { %v1830_v10 = vadd.f32 %v8438_v24, %v1701_v18  ;;  %v8441_v11 = vsub.f32 %v8439_v15, %v8440_v42 }
 0xa32   : > { %v3837_v53 = vpop.permute.xlu1 %3836  ;;  %v7876_v56 = vpop.permute.xlu0 %2284 }
 0xa33   : > { %1838 = vst.msk [vmem:[#allocation7 + $0x38] sm:$0xff] %vm1291_vm3, %v1830_v10  ;;  %1666 = vperm.xlu1 %5709, %v7614_v3   ;;  %v2872_v46 = vmul.f32 1.442695, %v8441_v11  ;;  %v3781_v3 = vld [vmem:[#allocation4 + $0x8] sm:$0xff] }
 0xa34   : > { %3643 = vperm.xlu0 %5708, %v7857_v33  }
 0xa35   : > { %5790 = vpow2.f32 %v2872_v46  ;;  %v8450_v46 = vld [vmem:[#allocation62_spill] sm:$0xff] }
 0xa36   : > { %v3835_v13 = vpop.permute.xlu1 %3834  ;;  %v3839_v58 = vpop.permute.xlu0 %3838 }
 0xa37   : > { %1676 = vperm.xlu1 %5709, %v7622_v1   ;;  %5526 = vmatprep.subr.mxu0 %v3839_v58  ;;  %v8442_v1 = vld [vmem:[#allocation74_spill] sm:$0xff] }
 0xa38   : > { %3818 = vrot.lane.b32.xlu0 %v3783_v44, %s5981_s20  ;;  %5527 = vmatpush3.msra.mxu0 %v3839_v58  ;;  %v8443_v18 = vsub.f32 %v8442_v1, %v7404_v59  ;;  %v8447_v59 = vld [vmem:[#allocation58_spill] sm:$0xff] }
 0xa39   : > { %5528 = vmatprep.subr.mxu0 %v3837_v53 }
 0xa3a   : > { %v3833_v8 = vpop.permute.xlu1 %3832  ;;  %5529 = vmatpush3.msra.mxu0 %v3837_v53  ;;  %v2874_v24 = vmul.f32 1.442695, %v8443_v18  ;;  %v8444_v53 = vld [vmem:[#allocation56_spill] sm:$0xff]  ;;  %v8451_v18 = vsub.f32 %v7786_v17, %v7791_v50  ;;  %v8453_v17 = vsub.f32 %v7820_v14, %v7836_v32  ;;  %v8456_v14 = vld [vmem:[#allocation69_spill] sm:$0xff] }
 0xa3b   : > { %1686 = vperm.xlu1 %5709, %v7633_v60   ;;  %5530 = vmatprep.subr.mxu0 %v3835_v13  ;;  %v8445_v60 = vld [vmem:[#allocation76_spill] sm:$0xff] }
 0xa3c   : > { %3814 = vrot.lane.b32.xlu0 %v3781_v3, %s5981_s20  ;;  %5531 = vmatpush3.msra.mxu0 %v3835_v13  ;;  %5792 = vpow2.f32 %v2874_v24  ;;  %v8446_v58 = vsub.f32 %v8445_v60, %v7423_v47  ;;  %v8449_v47 = vld [vmem:[#allocation60_spill] sm:$0xff]  ;;  %v3597_v24 = vmul.f32 1.442695, %v8451_v18  ;;  %v8452_v60 = vsub.f32 %v7804_v16, %v7816_v48 }
 0xa3d   : > { %5532 = vmatprep.subr.mxu0 %v3833_v8  ;;  %v3603_v50 = vmul.f32 1.442695, %v8453_v17  ;;  %v2956_v17 = vld [vmem:[#allocation6 + $0xa8] sm:$0xff] }
 0xa3e   : > { %v3831_v10 = vpop.permute.xlu1 %3830  ;;  %5533 = vmatpush3.msra.mxu0 %v3833_v8  ;;  %v2878_v13 = vmul.f32 1.442695, %v8446_v58  ;;  %v3599_v58 = vmul.f32 1.442695, %v8452_v60  ;;  %v2954_v60 = vld [vmem:[#allocation6 + $0x98] sm:$0xff] }
 0xa3f   : > { %2294 = vperm.xlu1 %5709, %v7676_v23   ;;  %5534 = vmatprep.subr.mxu0 %v3831_v10  ;;  %v8448_v23 = vsub.f32 %v7425_v39, %v7443_v38 }
 0xa40   : > { %2525 = vrot.lane.b32.xlu0 %v8444_v53, %s5982_s22  ;;  %5535 = vmatpush3.msra.mxu0 %v3831_v10  ;;  %5794 = vpow2.f32 %v2878_v13  ;;  %v2274_v53 = vld [vmem:[#allocation7] sm:$0xff] }
 0xa41   : > { %v2882_v15 = vmul.f32 1.442695, %v8448_v23  ;;  %v2322_v13 = vmul.f32 %v7876_v56, %v2274_v53 }
 0xa42   : > { %v3829_v44 = vpop.permute.xlu1 %3828 }
 0xa43   : > { %2304 = vperm.xlu1 %5709, %v7680_v2   ;;  %5536 = vmatprep.subr.mxu0 %v3829_v44  ;;  %5796 = vpow2.f32 %v2882_v15  ;;  %v7906_v2 = vpop.eup %5790 }
 0xa44   : > { %2529 = vrot.lane.b32.xlu0 %v8447_v59, %s5982_s22  ;;  %5537 = vmatpush3.msra.mxu0 %v3829_v44  ;;  %5798 = vpow2.f32 %v3597_v24 }
 0xa45   : > { %5800 = vpow2.f32 %v3599_v58 }
 0xa46   : > { %v3827_v42 = vpop.permute.xlu1 %3826  ;;  %5802 = vpow2.f32 %v3603_v50 }
 0xa47   : > { %2314 = vperm.xlu1 %5709, %v7684_v26   ;;  %5538 = vmatprep.subr.mxu0 %v3827_v42 }
 0xa48   : > { %2533 = vrot.lane.b32.xlu0 %v8449_v47, %s5982_s22  ;;  %5539 = vmatpush3.msra.mxu0 %v3827_v42  ;;  %v8462_v47 = vsub.f32 %v7434_v49, %v7446_v6 }
 0xa49   : > { %v7911_v39 = vpop.eup %5792 }
 0xa4a   : > { %v3825_v11 = vpop.permute.xlu1 %3824 }
 0xa4b   : > { %3014 = vperm.xlu1 %5709, %v7906_v2   ;;  %5540 = vmatprep.subr.mxu0 %v3825_v11 }
 0xa4c   : > { %2537 = vrot.lane.b32.xlu0 %v8450_v46, %s5982_s22  ;;  %5541 = vmatpush3.msra.mxu0 %v3825_v11  ;;  %v2884_v11 = vmul.f32 1.442695, %v8462_v47 }
 0xa4d   : > { %v7914_v26 = vpop.eup %5794 }
 0xa4e   : > { %v3823_v38 = vpop.permute.xlu1 %3822 }
 0xa4f   : > { %3019 = vperm.xlu1 %5709, %v7911_v39   ;;  %5542 = vmatprep.subr.mxu0 %v3823_v38 }
 0xa50   : > { %5543 = vmatpush3.msra.mxu0 %v3823_v38  ;;  %v7917_v3 = vpop.eup %5796 }
 0xa52   : > { %v3821_v8 = vpop.permute.xlu1 %3820 }
 0xa53   : > { %3029 = vperm.xlu1 %5709, %v7914_v26   ;;  %5544 = vmatprep.subr.mxu0 %v3821_v8 }
 0xa54   : > { %5545 = vmatpush3.msra.mxu0 %v3821_v8 }
 0xa56   : > { %v7919_v1 = vpop.permute.xlu1 %3816 }
 0xa57   : > { %3039 = vperm.xlu1 %5709, %v7917_v3  }
 0xa5a   : > { %v7925_v10 = vpop.permute.xlu1 %3812 }
 0xa5b   : > { %3248 = vrot.lane.b32.xlu1 %v7691_v21, %s5983_s28  ;;  %v8454_v21 = vsub.f32 %v7840_v43, %v7857_v33  ;;  %v8459_v33 = vld [vmem:[#allocation77_spill] sm:$0xff] }
 0xa5d   : > { %v3607_v16 = vmul.f32 1.442695, %v8454_v21 }
 0xa5e   : > { %v2524_v44 = vpop.permute.xlu1 %2523 }
 0xa5f   : > { %v2547_v59 = vadd.f32 %v2524_v44, %v2322_v13  ;;  %3252 = vrot.lane.b32.xlu1 %v7695_v4, %s5983_s28  ;;  %5804 = vpow2.f32 %v3607_v16  ;;  %v7946_v4 = vpop.eup %5798 }
 0xa60   : > { %v7950_v48 = vpop.eup %5800 }
 0xa61   : > { %2556 = vst.msk [vmem:[#allocation7] sm:$0xff] %vm2555_vm13, %v2547_v59 }
 0xa62   : > { %v7968_v15 = vpop.permute.xlu1 %2527 }
 0xa63   : > { %3256 = vrot.lane.b32.xlu1 %v7699_v9, %s5983_s28  ;;  %v7954_v9 = vpop.eup %5802 }
 0xa66   : > { %v7974_v42 = vpop.permute.xlu1 %2531 }
 0xa67   : > { %3260 = vrot.lane.b32.xlu1 %v7703_v41, %s5983_s28 }
 0xa6a   : > { %v7981_v8 = vpop.permute.xlu1 %2535 }
 0xa6b   : > { %2969 = vadd.xlane.f32.xlu0 %v7511_v62  ;;  %3739 = vperm.xlu1 %5709, %v7946_v4   ;;  %v8455_v62 = vld [vmem:[#allocation67_spill] sm:$0xff] }
 0xa6c   : > { %v7958_v41 = vpop.eup %5804  ;;  %v8457_v32 = vsub.f32 %v8455_v62, %v8456_v14  ;;  %v2958_v14 = vld [vmem:[#allocation6 + $0xb8] sm:$0xff] }
 0xa6e   : > { %v2870_v43 = vmul.f32 1.442695, %v8457_v32 }
 0xa6f   : > { %2971 = vadd.xlane.f32.xlu0 %v7553_v61  ;;  %3744 = vperm.xlu1 %5709, %v7950_v48   ;;  %v8458_v61 = vld [vmem:[#allocation75_spill] sm:$0xff] }
 0xa70   : > { %5806 = vpow2.f32 %v2870_v43  ;;  %v8460_v56 = vsub.f32 %v8458_v61, %v8459_v33 }
 0xa72   : > { %v2876_v23 = vmul.f32 1.442695, %v8460_v56 }
 0xa73   : > { %2975 = vadd.xlane.f32.xlu0 %v7561_v12  ;;  %3754 = vperm.xlu1 %5709, %v7954_v9   ;;  %v8461_v12 = vsub.f32 %v7415_v35, %v7428_v55  ;;  %v2951_v35 = vld [vmem:[#allocation6 + $0x80] sm:$0xff] }
 0xa74   : > { %5808 = vpow2.f32 %v2876_v23 }
 0xa77   : > { %2979 = vadd.xlane.f32.xlu0 %v7570_v25  ;;  %3764 = vperm.xlu1 %5709, %v7958_v41   ;;  %v2880_v25 = vmul.f32 1.442695, %v8461_v12 }
 0xa79   : > { %5810 = vpow2.f32 %v2880_v25 }
 0xa7a   : > { %5812 = vpow2.f32 %v2884_v11 }
 0xa8d   : > { %2289 = vperm.xlu0 %5708, %v7643_v0   ;;  %v5807_v0 = vpop.eup %5806 }
 0xa8e   : > { %v2959_v24 = vmul.f32 %v5807_v0, %v2951_v35  ;;  %v5809_v53 = vpop.eup %5808 }
 0xa8f   : > { %v2962_v44 = vmul.f32 %v5809_v53, %v2954_v60 }
 0xa91   : > { %2299 = vperm.xlu0 %5708, %v7648_v20  }
 0xa92   : > { %v3619_v46 = vpop.permute.xlu0 %3618 }
 0xa93   : > { %v3652_v61 = vsub.f32 %v7707_v27, %v3619_v46 }
 0xa95   : > { %2309 = vperm.xlu0 %5708, %v7652_v22  }
 0xa96   : > { %v3614_v38 = vpop.permute.xlu0 %3613 }
 0xa97   : > { %v3651_v55 = vsub.f32 %v7712_v5, %v3614_v38  ;;  %v5811_v5 = vpop.eup %5810  ;;  %v1647_v38 = vld [vmem:[#allocation7 + $0x8] sm:$0xff] }
 0xa98   : > { %v2964_v21 = vmul.f32 %v5811_v5, %v2956_v17 }
 0xa99   : > { %v3659_v18 = vmul.f32 1.442695, %v3651_v55  ;;  %2319 = vperm.xlu0 %5708, %v7850_v57  }
 0xa9a   : > { %v3629_v20 = vpop.permute.xlu0 %3628 }
 0xa9b   : > { %5814 = vpow2.f32 %v3659_v18  ;;  %v3654_v49 = vsub.f32 %v7717_v29, %v3629_v20  ;;  %v2968_v6 = vpop.xlane.xlu1 %2967  ;;  %v5813_v29 = vpop.eup %5812 }
 0xa9c   : > { %v2983_v22 = vadd.f32 %v2968_v6, %v2959_v24  ;;  %v2966_v56 = vmul.f32 %v5813_v29, %v2958_v14 }
 0xa9d   : > { %v3665_v58 = vmul.f32 1.442695, %v3654_v49  ;;  %3009 = vperm.xlu0 %5708, %v5807_v0   ;;  %v3661_v0 = vmul.f32 1.442695, %v3652_v61 }
 0xa9e   : > { %2991 = vst.msk [vmem:[#allocation6 + $0x80] sm:$0xff] %vm1637_vm12, %v2983_v22  ;;  %v3624_v13 = vpop.permute.xlu0 %3623 }
 0xa9f   : > { %5816 = vpow2.f32 %v3665_v58  ;;  %v2974_v59 = vpop.xlane.xlu1 %2973  ;;  %v3653_v23 = vsub.f32 %v7721_v31, %v3624_v13  ;;  %v1650_v58 = vld [vmem:[#allocation7 + $0x20] sm:$0xff]  ;;  %v8467_v13 = vld [vmem:[#allocation38_spill] sm:$0xff] }
 0xaa0   : > { %v2986_v57 = vadd.f32 %v2974_v59, %v2962_v44 }
 0xaa1   : > { %3024 = vperm.xlu0 %5708, %v5809_v53   ;;  %v3663_v27 = vmul.f32 1.442695, %v3653_v23  ;;  %v8465_v53 = vld [vmem:[#allocation35_spill] sm:$0xff] }
 0xaa2   : > { %2994 = vst.msk [vmem:[#allocation6 + $0x98] sm:$0xff] %vm1637_vm12, %v2986_v57  ;;  %v3639_v50 = vpop.permute.xlu0 %3638 }
 0xaa3   : > { %v3656_v16 = vsub.f32 %v7727_v28, %v3639_v50  ;;  %v2978_v62 = vpop.xlane.xlu1 %2977  ;;  %v8463_v28 = vsub.f32 %v7788_v19, %v7799_v37  ;;  %v1648_v19 = vld [vmem:[#allocation7 + $0x10] sm:$0xff]  ;;  %v8464_v37 = vsub.f32 %v7802_v51, %v7812_v34  ;;  %v8466_v51 = vsub.f32 %v7818_v54, %v7832_v7  ;;  %v8468_v50 = vld [vmem:[#allocation22_spill] sm:$0xff]  ;;  %v8470_v7 = vld [vmem:[#allocation23_spill] sm:$0xff] }
 0xaa4   : > { %v2988_v32 = vadd.f32 %v2978_v62, %v2964_v21  ;;  %v8469_v21 = vld [vmem:[#allocation40_spill] sm:$0xff] }
 0xaa5   : > { %v3669_v43 = vmul.f32 1.442695, %v3656_v16  ;;  %3034 = vperm.xlu0 %5708, %v5811_v5   ;;  %v3595_v11 = vmul.f32 1.442695, %v8463_v28  ;;  %v3601_v24 = vmul.f32 1.442695, %v8464_v37 }
 0xaa6   : > { %2996 = vst.msk [vmem:[#allocation6 + $0xa8] sm:$0xff] %vm1637_vm12, %v2988_v32  ;;  %v3634_v33 = vpop.permute.xlu0 %3633  ;;  %v3605_v34 = vmul.f32 1.442695, %v8466_v51 }
 0xaa7   : > { %5818 = vpow2.f32 %v3669_v43  ;;  %v2982_v12 = vpop.xlane.xlu1 %2981  ;;  %v3655_v46 = vsub.f32 %v7731_v30, %v3634_v33  ;;  %v8472_v43 = vld [vmem:[#allocation24_spill] sm:$0xff]  ;;  %v8473_v33 = vld [vmem:[#allocation42_spill] sm:$0xff] }
 0xaa8   : > { %v5815_v25 = vpop.eup %5814  ;;  %v2990_v47 = vadd.f32 %v2982_v12, %v2966_v56  ;;  %5820 = vpow2.f32 %v3595_v11 }
 0xaa9   : > { %3044 = vperm.xlu0 %5708, %v5813_v29   ;;  %3692 = vadd.xlane.f32.xlu1 %v5815_v25  ;;  %5822 = vpow2.f32 %v3661_v0  ;;  %v3667_v6 = vmul.f32 1.442695, %v3655_v46  ;;  %v8471_v29 = vsub.f32 %v8470_v7, %v7853_v45 }
 0xaaa   : > { %2998 = vst.msk [vmem:[#allocation6 + $0xb8] sm:$0xff] %vm1637_vm12, %v2990_v47  ;;  %5554 = vmatprep.mubr.f32.mxu0 %v5815_v25  ;;  %5824 = vpow2.f32 %v3663_v27 }
 0xaab   : > { %v3649_v55 = vpop.permute.xlu0 %3648  ;;  %v1662_v31 = vpop.permute.xlu1 %1661  ;;  %v3609_v16 = vmul.f32 1.442695, %v8471_v29 }
 0xaac   : > { %v7997_v35 = vpop.eup %5816  ;;  %v3658_v18 = vsub.f32 %v7737_v36, %v3649_v55  ;;  %v1695_v20 = vmul.f32 %v1662_v31, %v1647_v38 }
 0xaad   : > { %3250 = vrot.lane.b32.xlu0 %v7689_v52, %s5983_s28  ;;  %3698 = vadd.xlane.f32.xlu1 %v7997_v35 }
 0xaae   : > { %v3673_v30 = vmul.f32 1.442695, %v3658_v18  ;;  %v1824_v49 = vadd.f32 %v8465_v53, %v1695_v20 }
 0xaaf   : > { %v3644_v60 = vpop.permute.xlu0 %3643  ;;  %v1667_v36 = vpop.permute.xlu1 %1666 }
 0xab0   : > { %5826 = vpow2.f32 %v3673_v30  ;;  %1832 = vst.msk [vmem:[#allocation7 + $0x8] sm:$0xff] %vm1291_vm3, %v1824_v49  ;;  %v3657_v52 = vsub.f32 %v7741_v40, %v3644_v60  ;;  %v1696_v22 = vmul.f32 %v1667_v36, %v1648_v19 }
 0xab1   : > { %3254 = vrot.lane.b32.xlu0 %v7693_v63, %s5983_s28  ;;  %5828 = vpow2.f32 %v3601_v24  ;;  %v1652_v63 = vld [vmem:[#allocation7 + $0x30] sm:$0xff] }
 0xab2   : > { %v1825_v44 = vadd.f32 %v8467_v13, %v1696_v22  ;;  %5830 = vpow2.f32 %v3667_v6  ;;  %v3671_v5 = vmul.f32 1.442695, %v3657_v52 }
 0xab3   : > { %v3819_v59 = vpop.permute.xlu0 %3818  ;;  %v1677_v17 = vpop.permute.xlu1 %1676  ;;  %5832 = vpow2.f32 %v3605_v34 }
 0xab4   : > { %v5819_v57 = vpop.eup %5818  ;;  %1833 = vst.msk [vmem:[#allocation7 + $0x10] sm:$0xff] %vm1291_vm3, %v1825_v44  ;;  %v1698_v40 = vmul.f32 %v1677_v17, %v1650_v58  ;;  %5546 = vmatprep.subr.mxu0 %v3819_v59  ;;  %5834 = vpow2.f32 %v3671_v5 }
 0xab5   : > { %3258 = vrot.lane.b32.xlu0 %v8468_v50, %s5983_s28  ;;  %5547 = vmatpush3.msra.mxu0 %v3819_v59  ;;  %v8027_v61 = vpop.eup %5820  ;;  %5836 = vpow2.f32 %v3609_v16  ;;  %v2955_v16 = vld [vmem:[#allocation6 + $0xa0] sm:$0xff] }
 0xab6   : > { %v1827_v54 = vadd.f32 %v8469_v21, %v1698_v40  ;;  %3702 = vadd.xlane.f32.xlu1 %v5819_v57  ;;  %5548 = vmatprep.subr.mxu0 %v7919_v1  ;;  %v5823_v45 = vpop.eup %5822  ;;  %v2952_v40 = vld [vmem:[#allocation6 + $0x88] sm:$0xff]  ;;  %v2953_v21 = vld [vmem:[#allocation6 + $0x90] sm:$0xff] }
 0xab7   : > { %5549 = vmatpush3.msra.mxu0 %v7919_v1  ;;  %v3815_v62 = vpop.permute.xlu0 %3814  ;;  %v1687_v14 = vpop.permute.xlu1 %1686  ;;  %v2960_v50 = vmul.f32 %v7906_v2, %v2952_v40  ;;  %v2961_v7 = vmul.f32 %v7911_v39, %v2953_v21  ;;  %v3679_v21 = vld [vmem:[#allocation6 + $0xd8] sm:$0xff] }
 0xab8   : > { %1835 = vst.msk [vmem:[#allocation7 + $0x20] sm:$0xff] %vm1291_vm3, %v1827_v54  ;;  %v1700_v32 = vmul.f32 %v1687_v14, %v1652_v63  ;;  %5550 = vmatprep.subr.mxu0 %v3815_v62  ;;  %v5825_v12 = vpop.eup %5824  ;;  %v2963_v14 = vmul.f32 %v7914_v26, %v2955_v16 }
 0xab9   : > { %3262 = vrot.lane.b32.xlu0 %v8472_v43, %s5983_s28  ;;  %5551 = vmatpush3.msra.mxu0 %v3815_v62  ;;  %v2957_v43 = vld [vmem:[#allocation6 + $0xb0] sm:$0xff] }
 0xaba   : > { %v1829_v56 = vadd.f32 %v8473_v33, %v1700_v32  ;;  %5552 = vmatprep.subr.mxu0 %v7925_v10  ;;  %v2965_v2 = vmul.f32 %v7917_v3, %v2957_v43 }
 0xabb   : > { %5553 = vmatpush3.msra.mxu0 %v7925_v10  ;;  %v2276_v1 = vld [vmem:[#allocation7 + $0x10] sm:$0xff]  ;;  %v2295_v23 = vpop.permute.xlu1 %2294  ;;  %v2526_v52 = vpop.permute.xlu0 %2525 }
 0xabc   : > { %1837 = vst.msk [vmem:[#allocation7 + $0x30] sm:$0xff] %vm1291_vm3, %v1829_v56  ;;  %v2324_v25 = vmul.f32 %v2295_v23, %v2276_v1  ;;  %5555 = vmatmul.mubr.f32.vlgmr.msra.gmra.mxu0 %v5823_v45  ;;  %v2275_v1 = vld [vmem:[#allocation7 + $0x8] sm:$0xff] }
 0xabd   : > { %v5827_v47 = vpop.eup %5826  ;;  %3734 = vperm.xlu0 %5708, %v8027_v61   ;;  %5557 = vmatprep.mubr.f32.mxu0 %v5825_v12 }
 0xabe   : > { %v2549_v28 = vadd.f32 %v7968_v15, %v2324_v25  ;;  %3706 = vadd.xlane.f32.xlu1 %v5827_v47  ;;  %v8035_v11 = vpop.eup %5828  ;;  %v2277_v25 = vld [vmem:[#allocation7 + $0x18] sm:$0xff] }
 0xabf   : > { %v2278_v38 = vld [vmem:[#allocation7 + $0x20] sm:$0xff]  ;;  %v2305_v0 = vpop.permute.xlu1 %2304  ;;  %v5831_v27 = vpop.eup %5830 }
 0xac0   : > { %2558 = vst.msk [vmem:[#allocation7 + $0x10] sm:$0xff] %vm2555_vm13, %v2549_v28  ;;  %v2326_v10 = vmul.f32 %v2305_v0, %v2278_v38  ;;  %5558 = vmatmul.mubr.f32.gmra.mxu0 %v7997_v35  ;;  %v8041_v55 = vpop.eup %5832  ;;  %v2530_v5 = vpop.permute.xlu0 %2529  ;;  %v2279_v38 = vld [vmem:[#allocation7 + $0x28] sm:$0xff] }
 0xac1   : > { %3749 = vperm.xlu0 %5708, %v8035_v11   ;;  %5560 = vmatprep.mubr.f32.mxu0 %v5831_v27  ;;  %v5835_v18 = vpop.eup %5834 }
 0xac2   : > { %v2551_v46 = vadd.f32 %v7974_v42, %v2326_v10  ;;  %v8048_v37 = vpop.eup %5836  ;;  %v2281_v10 = vld [vmem:[#allocation7 + $0x38] sm:$0xff] }
 0xac3   : > { %v2280_v31 = vld [vmem:[#allocation7 + $0x30] sm:$0xff]  ;;  %v2315_v15 = vpop.permute.xlu1 %2314 }
 0xac4   : > { %2560 = vst.msk [vmem:[#allocation7 + $0x20] sm:$0xff] %vm2555_vm13, %v2551_v46  ;;  %v2328_v20 = vmul.f32 %v2315_v15, %v2280_v31  ;;  %5561 = vmatmul.mubr.f32.gmra.mxu0 %v5819_v57  ;;  %v2534_v17 = vpop.permute.xlu0 %2533 }
 0xac5   : > { %3759 = vperm.xlu0 %5708, %v8041_v55   ;;  %5563 = vmatprep.mubr.f32.mxu0 %v5835_v18 }
 0xac6   : > { %v2553_v19 = vadd.f32 %v7981_v8, %v2328_v20 }
 0xac7   : > { %v8046_v35 = vpop.permute.xlu1 %3014  ;;  %v3001_v49 = vld [vmem:[#allocation7 + $0x10] sm:$0xff] }
 0xac8   : > { %2562 = vst.msk [vmem:[#allocation7 + $0x30] sm:$0xff] %vm2555_vm13, %v2553_v19  ;;  %5564 = vmatmul.mubr.f32.gmra.mxu0 %v5827_v47  ;;  %v2538_v57 = vpop.permute.xlu0 %2537 }
 0xac9   : > { %3769 = vperm.xlu0 %5708, %v8048_v37  }
 0xacb   : > { %v3020_v42 = vpop.permute.xlu1 %3019  ;;  %v3003_v8 = vld [vmem:[#allocation7 + $0x20] sm:$0xff] }
 0xacc   : > { %v3049_v6 = vmul.f32 %v3020_v42, %v3001_v49 }
 0xacf   : > { %v3030_v24 = vpop.permute.xlu1 %3029  ;;  %v3005_v34 = vld [vmem:[#allocation7 + $0x30] sm:$0xff] }
 0xad0   : > { %v3051_v22 = vmul.f32 %v3030_v24, %v3003_v8 }
 0xad3   : > { %v3040_v30 = vpop.permute.xlu1 %3039 }
 0xad4   : > { %v3053_v13 = vmul.f32 %v3040_v30, %v3005_v34 }
 0xad7   : > { %v8052_v53 = vpop.permute.xlu1 %3248 }
 0xadb   : > { %v3253_v60 = vpop.permute.xlu1 %3252 }
 0xadc   : > { %v3274_v36 = vadd.f32 %v3253_v60, %v3049_v6 }
 0xade   : > { %3283 = vst.msk [vmem:[#allocation7 + $0x10] sm:$0xff] %vm3280_vm14, %v3274_v36 }
 0xadf   : > { %v3257_v58 = vpop.permute.xlu1 %3256 }
 0xae0   : > { %v3276_v51 = vadd.f32 %v3257_v58, %v3051_v22 }
 0xae2   : > { %3285 = vst.msk [vmem:[#allocation7 + $0x20] sm:$0xff] %vm3280_vm14, %v3276_v51 }
 0xae3   : > { %v3261_v44 = vpop.permute.xlu1 %3260 }
 0xae4   : > { %v3278_v59 = vadd.f32 %v3261_v44, %v3053_v13 }
 0xae6   : > { %3287 = vst.msk [vmem:[#allocation7 + $0x30] sm:$0xff] %vm3280_vm14, %v3278_v59  ;;  %v3676_v59 = vld [vmem:[#allocation6 + $0xc0] sm:$0xff] }
 0xae7   : > { %v8070_v24 = vpop.permute.xlu1 %3739 }
 0xae8   : > { %3694 = vadd.xlane.f32.xlu0 %v5823_v45 }
 0xaeb   : > { %v8073_v6 = vpop.permute.xlu1 %3744 }
 0xaec   : > { %3696 = vadd.xlane.f32.xlu0 %v5825_v12 }
 0xaf0   : > { %3700 = vadd.xlane.f32.xlu0 %v5831_v27 }
 0xaf4   : > { %3704 = vadd.xlane.f32.xlu0 %v5835_v18  ;;  %v2970_v63 = vpop.xlane.xlu0 %2969  ;;  %v2999_v18 = vld [vmem:[#allocation7] sm:$0xff] }
 0xaf5   : > { %v2984_v54 = vadd.f32 %v2970_v63, %v2960_v50 }
 0xaf7   : > { %2992 = vst.msk [vmem:[#allocation6 + $0x88] sm:$0xff] %vm1637_vm12, %v2984_v54 }
 0xaf8   : > { %v2972_v29 = vpop.xlane.xlu0 %2971 }
 0xaf9   : > { %v2985_v62 = vadd.f32 %v2972_v29, %v2961_v7 }
 0xafb   : > { %2993 = vst.msk [vmem:[#allocation6 + $0x90] sm:$0xff] %vm1637_vm12, %v2985_v62  ;;  %v3687_v62 = vmul.f32 %v8035_v11, %v3679_v21 }
 0xafc   : > { %v2976_v32 = vpop.xlane.xlu0 %2975 }
 0xafd   : > { %v2987_v33 = vadd.f32 %v2976_v32, %v2963_v14 }
 0xaff   : > { %2995 = vst.msk [vmem:[#allocation6 + $0xa0] sm:$0xff] %vm1637_vm12, %v2987_v33 }
 0xb00   : > { %v2980_v56 = vpop.xlane.xlu0 %2979 }
 0xb01   : > { %v2989_v45 = vadd.f32 %v2980_v56, %v2965_v2  ;;  %v3683_v56 = vld [vmem:[#allocation6 + $0xf8] sm:$0xff] }
 0xb03   : > { %2997 = vst.msk [vmem:[#allocation6 + $0xb0] sm:$0xff] %vm1637_vm12, %v2989_v45  ;;  %v3691_v45 = vmul.f32 %v8048_v37, %v3683_v56 }
 0xb08   : > { %v2290_v39 = vpop.permute.xlu0 %2289 }
 0xb09   : > { %v2323_v23 = vmul.f32 %v2290_v39, %v2275_v1 }
 0xb0b   : > { %v2548_v12 = vadd.f32 %v2526_v52, %v2323_v23  ;;  %v8076_v52 = vpop.permute.xlu1 %3754 }
 0xb0c   : > { %v2300_v47 = vpop.permute.xlu0 %2299 }
 0xb0d   : > { %2557 = vst.msk [vmem:[#allocation7 + $0x8] sm:$0xff] %vm2555_vm13, %v2548_v12  ;;  %v2325_v26 = vmul.f32 %v2300_v47, %v2277_v25  ;;  %v3677_v47 = vld [vmem:[#allocation6 + $0xc8] sm:$0xff] }
 0xb0f   : > { %v2550_v28 = vadd.f32 %v2530_v5, %v2325_v26  ;;  %v8079_v44 = vpop.permute.xlu1 %3764  ;;  %v3685_v26 = vmul.f32 %v7946_v4, %v3677_v47 }
 0xb10   : > { %v2310_v0 = vpop.permute.xlu0 %2309 }
 0xb11   : > { %2559 = vst.msk [vmem:[#allocation7 + $0x18] sm:$0xff] %vm2555_vm13, %v2550_v28  ;;  %v2327_v27 = vmul.f32 %v2310_v0, %v2279_v38  ;;  %v3678_v28 = vld [vmem:[#allocation6 + $0xd0] sm:$0xff] }
 0xb12   : > { %v3686_v0 = vmul.f32 %v7950_v48, %v3678_v28 }
 0xb13   : > { %v2552_v3 = vadd.f32 %v2534_v17, %v2327_v27  ;;  %v3680_v27 = vld [vmem:[#allocation6 + $0xe0] sm:$0xff] }
 0xb14   : > { %v2320_v46 = vpop.permute.xlu0 %2319  ;;  %v3000_v36 = vld [vmem:[#allocation7 + $0x8] sm:$0xff] }
 0xb15   : > { %2561 = vst.msk [vmem:[#allocation7 + $0x28] sm:$0xff] %vm2555_vm13, %v2552_v3  ;;  %v2329_v31 = vmul.f32 %v2320_v46, %v2281_v10  ;;  %v3048_v8 = vmul.f32 %v8046_v35, %v3000_v36  ;;  %v3684_v35 = vmul.f32 %v8027_v61, %v3676_v59  ;;  %v3681_v61 = vld [vmem:[#allocation6 + $0xe8] sm:$0xff]  ;;  %v3688_v10 = vmul.f32 %v7954_v9, %v3680_v27 }
 0xb16   : > { %v3689_v43 = vmul.f32 %v8041_v55, %v3681_v61  ;;  %v3730_v61 = vld [vmem:[#allocation7 + $0x30] sm:$0xff] }
 0xb17   : > { %v2554_v15 = vadd.f32 %v2538_v57, %v2329_v31  ;;  %v3682_v31 = vld [vmem:[#allocation6 + $0xf0] sm:$0xff] }
 0xb18   : > { %v3010_v20 = vpop.permute.xlu0 %3009  ;;  %v3002_v51 = vld [vmem:[#allocation7 + $0x18] sm:$0xff] }
 0xb19   : > { %2563 = vst.msk [vmem:[#allocation7 + $0x38] sm:$0xff] %vm2555_vm13, %v2554_v15  ;;  %v3047_v19 = vmul.f32 %v3010_v20, %v2999_v18  ;;  %v3690_v18 = vmul.f32 %v7958_v41, %v3682_v31 }
 0xb1b   : > { %v3272_v42 = vadd.f32 %v8052_v53, %v3047_v19 }
 0xb1c   : > { %v3025_v30 = vpop.permute.xlu0 %3024  ;;  %v3004_v5 = vld [vmem:[#allocation7 + $0x28] sm:$0xff] }
 0xb1d   : > { %3281 = vst.msk [vmem:[#allocation7] sm:$0xff] %vm3280_vm14, %v3272_v42  ;;  %v3050_v34 = vmul.f32 %v3025_v30, %v3002_v51 }
 0xb20   : > { %v3035_v49 = vpop.permute.xlu0 %3034  ;;  %v3006_v50 = vld [vmem:[#allocation7 + $0x38] sm:$0xff] }
 0xb21   : > { %v3052_v17 = vmul.f32 %v3035_v49, %v3004_v5 }
 0xb24   : > { %v3045_v60 = vpop.permute.xlu0 %3044 }
 0xb25   : > { %v3054_v54 = vmul.f32 %v3045_v60, %v3006_v50 }
 0xb28   : > { %v3251_v22 = vpop.permute.xlu0 %3250 }
 0xb29   : > { %v3273_v58 = vadd.f32 %v3251_v22, %v3048_v8  ;;  %v3724_v22 = vld [vmem:[#allocation7] sm:$0xff] }
 0xb2b   : > { %3282 = vst.msk [vmem:[#allocation7 + $0x8] sm:$0xff] %vm3280_vm14, %v3273_v58 }
 0xb2c   : > { %v3255_v53 = vpop.permute.xlu0 %3254 }
 0xb2d   : > { %v3275_v13 = vadd.f32 %v3255_v53, %v3050_v34 }
 0xb2f   : > { %3284 = vst.msk [vmem:[#allocation7 + $0x18] sm:$0xff] %vm3280_vm14, %v3275_v13 }
 0xb30   : > { %v3259_v57 = vpop.permute.xlu0 %3258 }
 0xb31   : > { %v3277_v40 = vadd.f32 %v3259_v57, %v3052_v17  ;;  %v3726_v17 = vld [vmem:[#allocation7 + $0x10] sm:$0xff] }
 0xb32   : > { %v3693_v63 = vpop.xlane.xlu1 %3692  ;;  %v3725_v41 = vld [vmem:[#allocation7 + $0x8] sm:$0xff] }
 0xb33   : > { %3286 = vst.msk [vmem:[#allocation7 + $0x28] sm:$0xff] %vm3280_vm14, %v3277_v40  ;;  %v3708_v7 = vadd.f32 %v3693_v63, %v3684_v35  ;;  %v3773_v8 = vmul.f32 %v8070_v24, %v3725_v41  ;;  %v3774_v40 = vmul.f32 %v8073_v6, %v3726_v17 }
 0xb34   : > { %v3263_v29 = vpop.permute.xlu0 %3262 }
 0xb35   : > { %3716 = vst.msk [vmem:[#allocation6 + $0xc0] sm:$0xff] %vm1637_vm12, %v3708_v7  ;;  %v3279_v16 = vadd.f32 %v3263_v29, %v3054_v54  ;;  %v3728_v54 = vld [vmem:[#allocation7 + $0x20] sm:$0xff] }
 0xb36   : > { %v3699_v14 = vpop.xlane.xlu1 %3698  ;;  %v3727_v53 = vld [vmem:[#allocation7 + $0x18] sm:$0xff]  ;;  %v3776_v29 = vmul.f32 %v8076_v52, %v3728_v54 }
 0xb37   : > { %3288 = vst.msk [vmem:[#allocation7 + $0x38] sm:$0xff] %vm3280_vm14, %v3279_v16  ;;  %v3711_v32 = vadd.f32 %v3699_v14, %v3687_v62 }
 0xb38   : > { %v3735_v11 = vpop.permute.xlu0 %3734 }
 0xb39   : > { %3719 = vst.msk [vmem:[#allocation6 + $0xd8] sm:$0xff] %vm1637_vm12, %v3711_v32  ;;  %v3772_v51 = vmul.f32 %v3735_v11, %v3724_v22 }
 0xb3a   : > { %v3729_v50 = vld [vmem:[#allocation7 + $0x28] sm:$0xff] }
 0xb3c   : > { %v3750_v23 = vpop.permute.xlu0 %3749 }
 0xb3d   : > { %v3775_v5 = vmul.f32 %v3750_v23, %v3727_v53 }
 0xb3e   : > { %v3731_v62 = vld [vmem:[#allocation7 + $0x38] sm:$0xff] }
 0xb3f   : > { %v3703_v33 = vpop.xlane.xlu1 %3702 }
 0xb40   : > { %v3713_v2 = vadd.f32 %v3703_v33, %v3689_v43  ;;  %v3760_v12 = vpop.permute.xlu0 %3759  ;;  %v3778_v33 = vmul.f32 %v8079_v44, %v3730_v61 }
 0xb41   : > { %v3777_v63 = vmul.f32 %v3760_v12, %v3729_v50 }
 0xb42   : > { %3721 = vst.msk [vmem:[#allocation6 + $0xe8] sm:$0xff] %vm1637_vm12, %v3713_v2 }
 0xb44   : > { %v8092_v25 = vpop.permute.xlu0 %3769 }
 0xb45   : > { %v3779_v6 = vmul.f32 %v8092_v25, %v3731_v62 }
 0xb47   : > { %v3707_v1 = vpop.xlane.xlu1 %3706 }
 0xb48   : > { %v3715_v39 = vadd.f32 %v3707_v1, %v3691_v45 }
 0xb4a   : > { %3723 = vst.msk [vmem:[#allocation6 + $0xf8] sm:$0xff] %vm1637_vm12, %v3715_v39 }
 0xb71   : > { %v3695_v55 = vpop.xlane.xlu0 %3694 }
 0xb72   : > { %v3709_v38 = vadd.f32 %v3695_v55, %v3685_v26 }
 0xb74   : > { %3717 = vst.msk [vmem:[#allocation6 + $0xc8] sm:$0xff] %vm1637_vm12, %v3709_v38 }
 0xb75   : > { %v3697_v37 = vpop.xlane.xlu0 %3696 }
 0xb76   : > { %v3710_v3 = vadd.f32 %v3697_v37, %v3686_v0 }
 0xb78   : > { %3718 = vst.msk [vmem:[#allocation6 + $0xd0] sm:$0xff] %vm1637_vm12, %v3710_v3 }
 0xb79   : > { %v3701_v46 = vpop.xlane.xlu0 %3700 }
 0xb7a   : > { %v3712_v15 = vadd.f32 %v3701_v46, %v3688_v10 }
 0xb7c   : > { %3720 = vst.msk [vmem:[#allocation6 + $0xe0] sm:$0xff] %vm1637_vm12, %v3712_v15  ;;  %v5556_v4 = vpop.f32.mrf.mxu0 }
 0xb7d   : > { %3975 = vrot.lane.b32.xlu0 %v5556_v4, %s5984_s23  ;;  %v3705_v20 = vpop.xlane.xlu0 %3704 }
 0xb7e   : > { %v3714_v19 = vadd.f32 %v3705_v20, %v3690_v18  ;;  %v3926_v48 = vpop.f32.mrf.mxu0 }
 0xb7f   : > { %3973 = vrot.lane.b32.xlu1 %v3926_v48, %s5984_s23 }
 0xb80   : > { %3722 = vst.msk [vmem:[#allocation6 + $0xf0] sm:$0xff] %vm1637_vm12, %v3714_v19  ;;  %v5559_v42 = vpop.f32.mrf.mxu0 }
 0xb81   : > { %3979 = vrot.lane.b32.xlu0 %v5559_v42, %s5984_s23 }
 0xb82   : > { %v3936_v30 = vpop.f32.mrf.mxu0 }
 0xb83   : > { %3977 = vrot.lane.b32.xlu1 %v3936_v30, %s5984_s23 }
 0xb84   : > { %v5562_v9 = vpop.f32.mrf.mxu0 }
 0xb85   : > { %3983 = vrot.lane.b32.xlu0 %v5562_v9, %s5984_s23 }
 0xb86   : > { %v3946_v49 = vpop.f32.mrf.mxu0 }
 0xb87   : > { %3981 = vrot.lane.b32.xlu1 %v3946_v49, %s5984_s23 }
 0xb88   : > { %v5565_v60 = vpop.f32.mrf.mxu0 }
 0xb89   : > { %3987 = vrot.lane.b32.xlu0 %v5565_v60, %s5984_s23 }
 0xb8a   : > { %v3956_v36 = vpop.f32.mrf.mxu0 }
 0xb8b   : > { %3985 = vrot.lane.b32.xlu1 %v3956_v36, %s5984_s23 }
 0xbef   : > { %v3976_v58 = vpop.permute.xlu0 %3975 }
 0xbf0   : > { %v3998_v34 = vadd.f32 %v3976_v58, %v3773_v8 }
 0xbf1   : > { %v3974_v13 = vpop.permute.xlu1 %3973 }
 0xbf2   : > { %4007 = vst.msk [vmem:[#allocation7 + $0x8] sm:$0xff] %vm4005_vm15, %v3998_v34  ;;  %v3997_v59 = vadd.f32 %v3974_v13, %v3772_v51 }
 0xbf3   : > { %v3980_v57 = vpop.permute.xlu0 %3979 }
 0xbf4   : > { %4006 = vst.msk [vmem:[#allocation7] sm:$0xff] %vm4005_vm15, %v3997_v59  ;;  %v4000_v35 = vadd.f32 %v3980_v57, %v3775_v5 }
 0xbf5   : > { %v3978_v24 = vpop.permute.xlu1 %3977 }
 0xbf6   : > { %4009 = vst.msk [vmem:[#allocation7 + $0x18] sm:$0xff] %vm4005_vm15, %v4000_v35  ;;  %v3999_v21 = vadd.f32 %v3978_v24, %v3774_v40 }
 0xbf7   : > { %v3984_v7 = vpop.permute.xlu0 %3983 }
 0xbf8   : > { %4008 = vst.msk [vmem:[#allocation7 + $0x10] sm:$0xff] %vm4005_vm15, %v3999_v21  ;;  %v4002_v16 = vadd.f32 %v3984_v7, %v3777_v63 }
 0xbf9   : > { %v3982_v14 = vpop.permute.xlu1 %3981 }
 0xbfa   : > { %4011 = vst.msk [vmem:[#allocation7 + $0x28] sm:$0xff] %vm4005_vm15, %v4002_v16  ;;  %v4001_v32 = vadd.f32 %v3982_v14, %v3776_v29 }
 0xbfb   : > { %v3988_v43 = vpop.permute.xlu0 %3987 }
 0xbfc   : > { %4010 = vst.msk [vmem:[#allocation7 + $0x20] sm:$0xff] %vm4005_vm15, %v4001_v32  ;;  %v4004_v2 = vadd.f32 %v3988_v43, %v3779_v6  ;;  %4025 = sbr.rel (%p4821_p1) target bundleno = 3481 (0xd99), region = 102 }
 0xbfd   : > { %v3986_v56 = vpop.permute.xlu1 %3985 }
 0xbfe   : > { %4013 = vst.msk [vmem:[#allocation7 + $0x38] sm:$0xff] %vm4005_vm15, %v4004_v2  ;;  %v4003_v52 = vadd.f32 %v3986_v56, %v3778_v33 }
 0xc00   : > { %4012 = vst.msk [vmem:[#allocation7 + $0x30] sm:$0xff] %vm4005_vm15, %v4003_v52 }
 0xc01   : > { %v4027_v45 = vld [vmem:[#allocation6 + $0x8] sm:$0xff]  ;;  %v4026_v1 = vld [vmem:[#allocation6] sm:$0xff]  ;;  %v5985_v11 = vmov 0   ;;  %v4032_v23 = vld [vmem:[#allocation6 + $0x30] sm:$0xff] }
 0xc02   : > { %v4031_v39 = vld [vmem:[#allocation6 + $0x28] sm:$0xff]  ;;  %5839 = vset.pattern.permute.xlu1 %v5985_v11  ;;  %5838 = vset.pattern.permute.xlu0 %v5985_v11  ;;  %5840 = vrcp.f32 %v4027_v45  ;;  %v4030_v44 = vld [vmem:[#allocation6 + $0x20] sm:$0xff]  ;;  %v4028_v12 = vld [vmem:[#allocation6 + $0x10] sm:$0xff] }
 0xc03   : > { %5842 = vrcp.f32 %v4026_v1  ;;  %v4033_v25 = vld [vmem:[#allocation6 + $0x38] sm:$0xff]  ;;  %v4110_v26 = vld [vmem:[#allocation6 + $0x60] sm:$0xff]  ;;  %v4111_v37 = vld [vmem:[#allocation6 + $0x68] sm:$0xff] }
 0xc04   : > { %5844 = vrcp.f32 %v4031_v39  ;;  %v4029_v47 = vld [vmem:[#allocation6 + $0x18] sm:$0xff]  ;;  %v4106_v55 = vld [vmem:[#allocation6 + $0x40] sm:$0xff]  ;;  %v4107_v3 = vld [vmem:[#allocation6 + $0x48] sm:$0xff] }
 0xc05   : > { %5846 = vrcp.f32 %v4030_v44  ;;  %v4112_v46 = vld [vmem:[#allocation6 + $0x70] sm:$0xff]  ;;  %v4113_v18 = vld [vmem:[#allocation6 + $0x78] sm:$0xff]  ;;  %v4190_v42 = vld [vmem:[#allocation6 + $0xa0] sm:$0xff] }
 0xc06   : > { %5848 = vrcp.f32 %v4032_v23  ;;  %v4108_v15 = vld [vmem:[#allocation6 + $0x50] sm:$0xff]  ;;  %v4109_v19 = vld [vmem:[#allocation6 + $0x58] sm:$0xff]  ;;  %v4186_v9 = vld [vmem:[#allocation6 + $0x80] sm:$0xff] }
 0xc07   : > { %5850 = vrcp.f32 %v4028_v12  ;;  %v4191_v60 = vld [vmem:[#allocation6 + $0xa8] sm:$0xff]  ;;  %v4192_v22 = vld [vmem:[#allocation6 + $0xb0] sm:$0xff]  ;;  %v4193_v53 = vld [vmem:[#allocation6 + $0xb8] sm:$0xff] }
 0xc08   : > { %5852 = vrcp.f32 %v4033_v25  ;;  %v4187_v41 = vld [vmem:[#allocation6 + $0x88] sm:$0xff]  ;;  %v4188_v51 = vld [vmem:[#allocation6 + $0x90] sm:$0xff]  ;;  %v4189_v5 = vld [vmem:[#allocation6 + $0x98] sm:$0xff] }
 0xc09   : > { %5854 = vrcp.f32 %v4029_v47  ;;  %v4270_v17 = vld [vmem:[#allocation6 + $0xe0] sm:$0xff]  ;;  %v4271_v50 = vld [vmem:[#allocation6 + $0xe8] sm:$0xff]  ;;  %v4272_v54 = vld [vmem:[#allocation6 + $0xf0] sm:$0xff] }
 0xc0a   : > { %5856 = vrcp.f32 %v4110_v26  ;;  %v4266_v40 = vld [vmem:[#allocation6 + $0xc0] sm:$0xff]  ;;  %v4267_v63 = vld [vmem:[#allocation6 + $0xc8] sm:$0xff]  ;;  %v4268_v29 = vld [vmem:[#allocation6 + $0xd0] sm:$0xff] }
 0xc0b   : > { %5858 = vrcp.f32 %v4106_v55  ;;  %v4273_v62 = vld [vmem:[#allocation6 + $0xf8] sm:$0xff]  ;;  %v4360_v61 = vld [vmem:[%s8233_s7 + $0x30] sm:$0xff]  ;;  %v4359_v2 = vld [vmem:[%s8233_s7 + $0x28] sm:$0xff] }
 0xc0c   : > { %5860 = vrcp.f32 %v4111_v37  ;;  %v4269_v6 = vld [vmem:[#allocation6 + $0xd8] sm:$0xff]  ;;  %v4358_v56 = vld [vmem:[%s8233_s7 + $0x20] sm:$0xff]  ;;  %v4356_v11 = vld [vmem:[%s8233_s7 + $0x10] sm:$0xff] }
 0xc0d   : > { %5862 = vrcp.f32 %v4107_v3  ;;  %v4361_v32 = vld [vmem:[%s8233_s7 + $0x38] sm:$0xff]  ;;  %v4355_v23 = vld [vmem:[%s8233_s7 + $0x8] sm:$0xff]  ;;  %v4354_v47 = vld [vmem:[%s8233_s7] sm:$0xff] }
 0xc0e   : > { %5864 = vrcp.f32 %v4112_v46  ;;  %5566 = vmatprep.subr.mxu0 %v4361_v32  ;;  %5610 = vmatprep.subr.mxu1 %v4361_v32  ;;  %v4357_v1 = vld [vmem:[%s8233_s7 + $0x18] sm:$0xff]  ;;  %v4043_v26 = vld [vmem:[#allocation7 + $0x8] sm:$0xff]  ;;  %v4042_v55 = vld [vmem:[#allocation7] sm:$0xff] }
 0xc0f   : > { %v5841_v28 = vpop.eup %5840  ;;  %5866 = vrcp.f32 %v4108_v15  ;;  %5567 = vmatpush3.msra.mxu0 %v4361_v32  ;;  %5618 = vmatpush3.msra.mxu1 %v4361_v32  ;;  %v4046_v3 = vld [vmem:[#allocation7 + $0x20] sm:$0xff] }
 0xc10   : > { %v5843_v38 = vpop.eup %5842  ;;  %4057 = vperm.xlu1 %5839, %v5841_v28   ;;  %5868 = vrcp.f32 %v4113_v18  ;;  %5568 = vmatprep.subr.mxu0 %v4360_v61  ;;  %v4044_v18 = vld [vmem:[#allocation7 + $0x10] sm:$0xff] }
 0xc11   : > { %v5845_v0 = vpop.eup %5844  ;;  %4052 = vperm.xlu0 %5838, %v5843_v38   ;;  %5870 = vrcp.f32 %v4109_v19  ;;  %5611 = vmatprep.subr.mxu1 %v4360_v61 }
 0xc12   : > { %v5847_v27 = vpop.eup %5846  ;;  %5872 = vrcp.f32 %v4190_v42  ;;  %5569 = vmatpush3.msra.mxu0 %v4360_v61  ;;  %5619 = vmatpush3.msra.mxu1 %v4360_v61 }
 0xc13   : > { %v5849_v10 = vpop.eup %5848  ;;  %5874 = vrcp.f32 %v4186_v9  ;;  %5570 = vmatprep.subr.mxu0 %v4359_v2  ;;  %5612 = vmatprep.subr.mxu1 %v4359_v2  ;;  %v4045_v9 = vld [vmem:[#allocation7 + $0x18] sm:$0xff] }
 0xc14   : > { %4077 = vperm.xlu1 %5839, %v5845_v0   ;;  %v5851_v31 = vpop.eup %5850  ;;  %5876 = vrcp.f32 %v4191_v60  ;;  %5571 = vmatpush3.msra.mxu0 %v4359_v2 }
 0xc15   : > { %4072 = vperm.xlu0 %5838, %v5847_v27   ;;  %v5853_v4 = vpop.eup %5852  ;;  %5878 = vrcp.f32 %v4187_v41  ;;  %5620 = vmatpush3.msra.mxu1 %v4359_v2  ;;  %v4047_v27 = vld [vmem:[#allocation7 + $0x28] sm:$0xff] }
 0xc16   : > { %v5855_v20 = vpop.eup %5854  ;;  %5880 = vrcp.f32 %v4192_v22  ;;  %5572 = vmatprep.subr.mxu0 %v4358_v56  ;;  %5613 = vmatprep.subr.mxu1 %v4358_v56 }
 0xc17   : > { %v5857_v48 = vpop.eup %5856  ;;  %5882 = vrcp.f32 %v4188_v51  ;;  %5573 = vmatpush3.msra.mxu0 %v4358_v56  ;;  %5621 = vmatpush3.msra.mxu1 %v4358_v56 }
 0xc18   : > { %4082 = vperm.xlu1 %5839, %v5849_v10   ;;  %v5859_v30 = vpop.eup %5858  ;;  %5884 = vrcp.f32 %v4193_v53  ;;  %5574 = vmatprep.subr.mxu0 %v4357_v1 }
 0xc19   : > { %4062 = vperm.xlu0 %5838, %v5851_v31   ;;  %v5861_v49 = vpop.eup %5860  ;;  %5886 = vrcp.f32 %v4189_v5  ;;  %5614 = vmatprep.subr.mxu1 %v4357_v1 }
 0xc1a   : > { %v5863_v36 = vpop.eup %5862  ;;  %5888 = vrcp.f32 %v4270_v17  ;;  %5575 = vmatpush3.msra.mxu0 %v4357_v1  ;;  %5622 = vmatpush3.msra.mxu1 %v4357_v1 }
 0xc1b   : > { %v5865_v8 = vpop.eup %5864  ;;  %5890 = vrcp.f32 %v4266_v40  ;;  %5576 = vmatprep.subr.mxu0 %v4356_v11  ;;  %5615 = vmatprep.subr.mxu1 %v4356_v11 }
 0xc1c   : > { %4087 = vperm.xlu1 %5839, %v5853_v4   ;;  %v5867_v58 = vpop.eup %5866  ;;  %5892 = vrcp.f32 %v4271_v50  ;;  %5577 = vmatpush3.msra.mxu0 %v4356_v11  ;;  %v4048_v4 = vld [vmem:[#allocation7 + $0x30] sm:$0xff] }
 0xc1d   : > { %4067 = vperm.xlu0 %5838, %v5855_v20   ;;  %v5869_v34 = vpop.eup %5868  ;;  %5894 = vrcp.f32 %v4267_v63  ;;  %5623 = vmatpush3.msra.mxu1 %v4356_v11 }
 0xc1e   : > { %v5871_v13 = vpop.eup %5870  ;;  %5896 = vrcp.f32 %v4272_v54  ;;  %5578 = vmatprep.subr.mxu0 %v4355_v23  ;;  %5616 = vmatprep.subr.mxu1 %v4355_v23 }
 0xc1f   : > { %v5873_v59 = vpop.eup %5872  ;;  %5898 = vrcp.f32 %v4268_v29  ;;  %5579 = vmatpush3.msra.mxu0 %v4355_v23  ;;  %5624 = vmatpush3.msra.mxu1 %v4355_v23 }
 0xc20   : > { %4152 = vperm.xlu1 %5839, %v5857_v48   ;;  %v5875_v57 = vpop.eup %5874  ;;  %5900 = vrcp.f32 %v4273_v62  ;;  %5580 = vmatprep.subr.mxu0 %v4354_v47 }
 0xc21   : > { %4132 = vperm.xlu0 %5838, %v5859_v30   ;;  %v5877_v35 = vpop.eup %5876  ;;  %5902 = vrcp.f32 %v4269_v6  ;;  %5617 = vmatprep.subr.mxu1 %v4354_v47  ;;  %v4049_v30 = vld [vmem:[#allocation7 + $0x38] sm:$0xff] }
 0xc22   : > { %v5879_v24 = vpop.eup %5878  ;;  %5581 = vmatpush3.msra.mxu0 %v4354_v47  ;;  %5625 = vmatpush3.msra.mxu1 %v4354_v47 }
 0xc23   : > { %v5881_v21 = vpop.eup %5880 }
 0xc24   : > { %4157 = vperm.xlu1 %5839, %v5861_v49   ;;  %v5883_v7 = vpop.eup %5882 }
 0xc25   : > { %4137 = vperm.xlu0 %5838, %v5863_v36   ;;  %v5885_v16 = vpop.eup %5884 }
 0xc26   : > { %v5887_v14 = vpop.eup %5886 }
 0xc27   : > { %v5889_v43 = vpop.eup %5888 }
 0xc28   : > { %4162 = vperm.xlu1 %5839, %v5865_v8   ;;  %v5891_v33 = vpop.eup %5890 }
 0xc29   : > { %4142 = vperm.xlu0 %5838, %v5867_v58   ;;  %v5893_v52 = vpop.eup %5892 }
 0xc2a   : > { %v5895_v45 = vpop.eup %5894 }
 0xc2b   : > { %v5897_v39 = vpop.eup %5896 }
 0xc2c   : > { %4167 = vperm.xlu1 %5839, %v5869_v34   ;;  %v5899_v44 = vpop.eup %5898 }
 0xc2d   : > { %4147 = vperm.xlu0 %5838, %v5871_v13   ;;  %v5901_v12 = vpop.eup %5900 }
 0xc2e   : > { %v5903_v25 = vpop.eup %5902 }
 0xc30   : > { %4232 = vperm.xlu1 %5839, %v5873_v59  }
 0xc31   : > { %4212 = vperm.xlu0 %5838, %v5875_v57  }
 0xc34   : > { %4237 = vperm.xlu1 %5839, %v5877_v35  }
 0xc35   : > { %4217 = vperm.xlu0 %5838, %v5879_v24  }
 0xc38   : > { %4242 = vperm.xlu1 %5839, %v5881_v21  }
 0xc39   : > { %4222 = vperm.xlu0 %5838, %v5883_v7  }
 0xc3c   : > { %4247 = vperm.xlu1 %5839, %v5885_v16  }
 0xc3d   : > { %4227 = vperm.xlu0 %5838, %v5887_v14  }
 0xc40   : > { %4312 = vperm.xlu1 %5839, %v5889_v43  }
 0xc41   : > { %4292 = vperm.xlu0 %5838, %v5891_v33  }
 0xc44   : > { %4317 = vperm.xlu1 %5839, %v5893_v52  }
 0xc45   : > { %4297 = vperm.xlu0 %5838, %v5895_v45  }
 0xc48   : > { %4322 = vperm.xlu1 %5839, %v5897_v39  }
 0xc49   : > { %4302 = vperm.xlu0 %5838, %v5899_v44  }
 0xc4c   : > { %4327 = vperm.xlu1 %5839, %v5901_v12  }
 0xc4d   : > { %4307 = vperm.xlu0 %5838, %v5903_v25  }
 0xc8b   : > { %v4058_v28 = vpop.permute.xlu1 %4057 }
 0xc8c   : > { %v4091_v38 = vmul.f32 %v4058_v28, %v4043_v26  ;;  %v4053_v0 = vpop.permute.xlu0 %4052 }
 0xc8d   : > { %v4090_v37 = vmul.f32 %v4053_v0, %v4042_v55 }
 0xc8e   : > { %4099 = vst.msk [vmem:[#allocation7 + $0x8] sm:$0xff] %vm1291_vm3, %v4091_v38 }
 0xc8f   : > { %4098 = vst.msk [vmem:[#allocation7] sm:$0xff] %vm1291_vm3, %v4090_v37  ;;  %v4078_v10 = vpop.permute.xlu1 %4077 }
 0xc90   : > { %v4095_v46 = vmul.f32 %v4078_v10, %v4047_v27  ;;  %v4073_v31 = vpop.permute.xlu0 %4072 }
 0xc91   : > { %v4094_v15 = vmul.f32 %v4073_v31, %v4046_v3 }
 0xc92   : > { %4103 = vst.msk [vmem:[#allocation7 + $0x28] sm:$0xff] %vm1291_vm3, %v4095_v46 }
 0xc93   : > { %4102 = vst.msk [vmem:[#allocation7 + $0x20] sm:$0xff] %vm1291_vm3, %v4094_v15  ;;  %v4083_v20 = vpop.permute.xlu1 %4082 }
 0xc94   : > { %v4096_v19 = vmul.f32 %v4083_v20, %v4048_v4  ;;  %v4063_v48 = vpop.permute.xlu0 %4062 }
 0xc95   : > { %v4092_v42 = vmul.f32 %v4063_v48, %v4044_v18  ;;  %v4123_v17 = vld [vmem:[#allocation7 + $0x8] sm:$0xff] }
 0xc96   : > { %4104 = vst.msk [vmem:[#allocation7 + $0x30] sm:$0xff] %vm1291_vm3, %v4096_v19  ;;  %v4122_v51 = vld [vmem:[#allocation7] sm:$0xff] }
 0xc97   : > { %4100 = vst.msk [vmem:[#allocation7 + $0x10] sm:$0xff] %vm1291_vm3, %v4092_v42  ;;  %v4088_v49 = vpop.permute.xlu1 %4087 }
 0xc98   : > { %v4097_v60 = vmul.f32 %v4088_v49, %v4049_v30  ;;  %v4068_v36 = vpop.permute.xlu0 %4067 }
 0xc99   : > { %v4093_v41 = vmul.f32 %v4068_v36, %v4045_v9  ;;  %v4127_v13 = vld [vmem:[#allocation7 + $0x28] sm:$0xff] }
 0xc9a   : > { %4105 = vst.msk [vmem:[#allocation7 + $0x38] sm:$0xff] %vm1291_vm3, %v4097_v60  ;;  %v4126_v22 = vld [vmem:[#allocation7 + $0x20] sm:$0xff] }
 0xc9b   : > { %4101 = vst.msk [vmem:[#allocation7 + $0x18] sm:$0xff] %vm1291_vm3, %v4093_v41  ;;  %v4153_v8 = vpop.permute.xlu1 %4152 }
 0xc9c   : > { %v4174_v58 = vmul.f32 %v4153_v8, %v4126_v22  ;;  %v4133_v34 = vpop.permute.xlu0 %4132 }
 0xc9d   : > { %v4170_v53 = vmul.f32 %v4133_v34, %v4122_v51  ;;  %v4128_v35 = vld [vmem:[#allocation7 + $0x30] sm:$0xff] }
 0xc9e   : > { %4182 = vst.msk [vmem:[#allocation7 + $0x20] sm:$0xff] %vm2555_vm13, %v4174_v58  ;;  %v4124_v63 = vld [vmem:[#allocation7 + $0x10] sm:$0xff] }
 0xc9f   : > { %4178 = vst.msk [vmem:[#allocation7] sm:$0xff] %vm2555_vm13, %v4170_v53  ;;  %v4158_v5 = vpop.permute.xlu1 %4157 }
 0xca0   : > { %v4175_v59 = vmul.f32 %v4158_v5, %v4127_v13  ;;  %v4138_v57 = vpop.permute.xlu0 %4137 }
 0xca1   : > { %v4171_v40 = vmul.f32 %v4138_v57, %v4123_v17  ;;  %v4129_v7 = vld [vmem:[#allocation7 + $0x38] sm:$0xff] }
 0xca2   : > { %4183 = vst.msk [vmem:[#allocation7 + $0x28] sm:$0xff] %vm2555_vm13, %v4175_v59  ;;  %v4125_v62 = vld [vmem:[#allocation7 + $0x18] sm:$0xff] }
 0xca3   : > { %4179 = vst.msk [vmem:[#allocation7 + $0x8] sm:$0xff] %vm2555_vm13, %v4171_v40  ;;  %v4163_v50 = vpop.permute.xlu1 %4162 }
 0xca4   : > { %v4176_v24 = vmul.f32 %v4163_v50, %v4128_v35  ;;  %v4143_v21 = vpop.permute.xlu0 %4142 }
 0xca5   : > { %v4172_v54 = vmul.f32 %v4143_v21, %v4124_v63  ;;  %v4206_v61 = vld [vmem:[#allocation7 + $0x20] sm:$0xff] }
 0xca6   : > { %4184 = vst.msk [vmem:[#allocation7 + $0x30] sm:$0xff] %vm2555_vm13, %v4176_v24  ;;  %v4202_v33 = vld [vmem:[#allocation7] sm:$0xff] }
 0xca7   : > { %4180 = vst.msk [vmem:[#allocation7 + $0x10] sm:$0xff] %vm2555_vm13, %v4172_v54  ;;  %v4168_v29 = vpop.permute.xlu1 %4167  ;;  %v4822_v21 = vld [vmem:[%s8234_s8 + $0x3] ss:$0 sm:$0xff] }
 0xca8   : > { %v4177_v16 = vmul.f32 %v4168_v29, %v4129_v7  ;;  %v4148_v14 = vpop.permute.xlu0 %4147 }
 0xca9   : > { %v4173_v6 = vmul.f32 %v4148_v14, %v4125_v62  ;;  %v4207_v52 = vld [vmem:[#allocation7 + $0x28] sm:$0xff] }
 0xcaa   : > { %4185 = vst.msk [vmem:[#allocation7 + $0x38] sm:$0xff] %vm2555_vm13, %v4177_v16  ;;  %v4203_v39 = vld [vmem:[#allocation7 + $0x8] sm:$0xff] }
 0xcab   : > { %4181 = vst.msk [vmem:[#allocation7 + $0x18] sm:$0xff] %vm2555_vm13, %v4173_v6  ;;  %v4233_v32 = vpop.permute.xlu1 %4232 }
 0xcac   : > { %v4254_v43 = vmul.f32 %v4233_v32, %v4206_v61  ;;  %v4213_v2 = vpop.permute.xlu0 %4212 }
 0xcad   : > { %v4250_v56 = vmul.f32 %v4213_v2, %v4202_v33  ;;  %v4208_v23 = vld [vmem:[#allocation7 + $0x30] sm:$0xff] }
 0xcae   : > { %4262 = vst.msk [vmem:[#allocation7 + $0x20] sm:$0xff] %vm3280_vm14, %v4254_v43  ;;  %v4204_v47 = vld [vmem:[#allocation7 + $0x10] sm:$0xff] }
 0xcaf   : > { %4258 = vst.msk [vmem:[#allocation7] sm:$0xff] %vm3280_vm14, %v4250_v56  ;;  %v4238_v45 = vpop.permute.xlu1 %4237 }
 0xcb0   : > { %v4255_v1 = vmul.f32 %v4238_v45, %v4207_v52  ;;  %v4218_v11 = vpop.permute.xlu0 %4217 }
 0xcb1   : > { %v4251_v44 = vmul.f32 %v4218_v11, %v4203_v39  ;;  %v4209_v28 = vld [vmem:[#allocation7 + $0x38] sm:$0xff] }
 0xcb2   : > { %4263 = vst.msk [vmem:[#allocation7 + $0x28] sm:$0xff] %vm3280_vm14, %v4255_v1  ;;  %v4205_v37 = vld [vmem:[#allocation7 + $0x18] sm:$0xff] }
 0xcb3   : > { %4259 = vst.msk [vmem:[#allocation7 + $0x8] sm:$0xff] %vm3280_vm14, %v4251_v44  ;;  %v4243_v12 = vpop.permute.xlu1 %4242 }
 0xcb4   : > { %v4256_v25 = vmul.f32 %v4243_v12, %v4208_v23  ;;  %v4223_v26 = vpop.permute.xlu0 %4222 }
 0xcb5   : > { %v4252_v55 = vmul.f32 %v4223_v26, %v4204_v47  ;;  %v4286_v46 = vld [vmem:[#allocation7 + $0x20] sm:$0xff] }
 0xcb6   : > { %4264 = vst.msk [vmem:[#allocation7 + $0x30] sm:$0xff] %vm3280_vm14, %v4256_v25  ;;  %v4282_v15 = vld [vmem:[#allocation7] sm:$0xff] }
 0xcb7   : > { %4260 = vst.msk [vmem:[#allocation7 + $0x10] sm:$0xff] %vm3280_vm14, %v4252_v55  ;;  %v4248_v38 = vpop.permute.xlu1 %4247 }
 0xcb8   : > { %v4257_v0 = vmul.f32 %v4248_v38, %v4209_v28  ;;  %v4228_v27 = vpop.permute.xlu0 %4227 }
 0xcb9   : > { %v4253_v3 = vmul.f32 %v4228_v27, %v4205_v37  ;;  %v4287_v20 = vld [vmem:[#allocation7 + $0x28] sm:$0xff] }
 0xcba   : > { %4265 = vst.msk [vmem:[#allocation7 + $0x38] sm:$0xff] %vm3280_vm14, %v4257_v0  ;;  %v4283_v42 = vld [vmem:[#allocation7 + $0x8] sm:$0xff] }
 0xcbb   : > { %4261 = vst.msk [vmem:[#allocation7 + $0x18] sm:$0xff] %vm3280_vm14, %v4253_v3  ;;  %v4313_v10 = vpop.permute.xlu1 %4312 }
 0xcbc   : > { %v4334_v31 = vmul.f32 %v4313_v10, %v4286_v46  ;;  %v4293_v4 = vpop.permute.xlu0 %4292 }
 0xcbd   : > { %v4330_v18 = vmul.f32 %v4293_v4, %v4282_v15  ;;  %v4288_v49 = vld [vmem:[#allocation7 + $0x30] sm:$0xff] }
 0xcbe   : > { %4342 = vst.msk [vmem:[#allocation7 + $0x20] sm:$0xff] %vm4005_vm15, %v4334_v31  ;;  %v4284_v41 = vld [vmem:[#allocation7 + $0x10] sm:$0xff] }
 0xcbf   : > { %4338 = vst.msk [vmem:[#allocation7] sm:$0xff] %vm4005_vm15, %v4330_v18  ;;  %v4318_v19 = vpop.permute.xlu1 %4317 }
 0xcc0   : > { %v4335_v48 = vmul.f32 %v4318_v19, %v4287_v20  ;;  %v4298_v30 = vpop.permute.xlu0 %4297 }
 0xcc1   : > { %v4331_v9 = vmul.f32 %v4298_v30, %v4283_v42  ;;  %v4289_v34 = vld [vmem:[#allocation7 + $0x38] sm:$0xff] }
 0xcc2   : > { %4343 = vst.msk [vmem:[#allocation7 + $0x28] sm:$0xff] %vm4005_vm15, %v4335_v48  ;;  %v4285_v5 = vld [vmem:[#allocation7 + $0x18] sm:$0xff] }
 0xcc3   : > { %4339 = vst.msk [vmem:[#allocation7 + $0x8] sm:$0xff] %vm4005_vm15, %v4331_v9  ;;  %v4323_v60 = vpop.permute.xlu1 %4322 }
 0xcc4   : > { %v4336_v36 = vmul.f32 %v4323_v60, %v4288_v49  ;;  %v4303_v8 = vpop.permute.xlu0 %4302 }
 0xcc5   : > { %v4332_v22 = vmul.f32 %v4303_v8, %v4284_v41  ;;  %v4350_v58 = vld [vmem:[#allocation7 + $0x20] sm:$0xff] }
 0xcc6   : > { %4344 = vst.msk [vmem:[#allocation7 + $0x30] sm:$0xff] %vm4005_vm15, %v4336_v36  ;;  %v4346_v51 = vld [vmem:[#allocation7] sm:$0xff]  ;;  %5588 = vmatprep.mubr.msk.f32.mxu1 %vm817_vm2, %v4350_v58 }
 0xcc7   : > { %4340 = vst.msk [vmem:[#allocation7 + $0x10] sm:$0xff] %vm4005_vm15, %v4332_v22  ;;  %5582 = vmatprep.mubr.msk.f32.mxu0 %vm817_vm2, %v4346_v51  ;;  %v4328_v53 = vpop.permute.xlu1 %4327 }
 0xcc8   : > { %v4337_v13 = vmul.f32 %v4328_v53, %v4289_v34  ;;  %v4308_v59 = vpop.permute.xlu0 %4307 }
 0xcc9   : > { %v4333_v17 = vmul.f32 %v4308_v59, %v4285_v5  ;;  %v4351_v57 = vld [vmem:[#allocation7 + $0x28] sm:$0xff] }
 0xcca   : > { %4345 = vst.msk [vmem:[#allocation7 + $0x38] sm:$0xff] %vm4005_vm15, %v4337_v13  ;;  %v4347_v40 = vld [vmem:[#allocation7 + $0x8] sm:$0xff]  ;;  %5589 = vmatmul.mubr.msk.f32.vlgmr.msra.gmra.mxu1 %vm817_vm2, %v4351_v57 }
 0xccb   : > { %4341 = vst.msk [vmem:[#allocation7 + $0x18] sm:$0xff] %vm4005_vm15, %v4333_v17  ;;  %5583 = vmatmul.mubr.msk.f32.vlgmr.msra.gmra.mxu0 %vm817_vm2, %v4347_v40 }
 0xccd   : > { %v4352_v35 = vld [vmem:[#allocation7 + $0x30] sm:$0xff] }
 0xcce   : > { %v4348_v50 = vld [vmem:[#allocation7 + $0x10] sm:$0xff]  ;;  %5591 = vmatprep.mubr.msk.f32.mxu1 %vm817_vm2, %v4352_v35 }
 0xccf   : > { %5585 = vmatprep.mubr.msk.f32.mxu0 %vm817_vm2, %v4348_v50 }
 0xcd1   : > { %v4353_v24 = vld [vmem:[#allocation7 + $0x38] sm:$0xff] }
 0xcd2   : > { %v4349_v63 = vld [vmem:[#allocation7 + $0x18] sm:$0xff]  ;;  %5592 = vmatmul.mubr.msk.f32.gmra.mxu1 %vm817_vm2, %v4353_v24 }
 0xcd3   : > { %5586 = vmatmul.mubr.msk.f32.gmra.mxu0 %vm817_vm2, %v4349_v63 }
 0xd8a   : > { %v5590_v54 = vpop.f32.mrf.mxu1 }
 0xd8b   : > { %v5584_v7 = vpop.f32.mrf.mxu0  ;;  %v4483_v29 = vadd.f32 %v5590_v54, %v4822_v21 }
 0xd8c   : > { %v4463_v16 = vadd.f32 %v5584_v7, %v4822_v21  ;;  %v4477_v62 = vpop.f32.mrf.mxu1 }
 0xd8d   : > { %4501 = vst.msk [vmem:[%s6136_s27 + $0x28] sm:$0xff] %vm817_vm2, %v4483_v29  ;;  %v4457_v14 = vpop.f32.mrf.mxu0  ;;  %v4478_v6 = vadd.f32 %v4822_v21, %v4477_v62 }
 0xd8e   : > { %4497 = vst.msk [vmem:[%s6136_s27 + $0x8] sm:$0xff] %vm817_vm2, %v4463_v16  ;;  %v4458_v32 = vadd.f32 %v4822_v21, %v4457_v14 }
 0xd8f   : > { %4500 = vst.msk [vmem:[%s6136_s27 + $0x20] sm:$0xff] %vm817_vm2, %v4478_v6 }
 0xd90   : > { %4496 = vst.msk [vmem:[%s6136_s27] sm:$0xff] %vm817_vm2, %v4458_v32 }
 0xd92   : > { %v5593_v61 = vpop.f32.mrf.mxu1 }
 0xd93   : > { %v5587_v43 = vpop.f32.mrf.mxu0  ;;  %v4493_v33 = vadd.f32 %v5593_v61, %v4822_v21 }
 0xd94   : > { %v4473_v2 = vadd.f32 %v5587_v43, %v4822_v21  ;;  %v4487_v56 = vpop.f32.mrf.mxu1 }
 0xd95   : > { %4503 = vst.msk [vmem:[%s6136_s27 + $0x38] sm:$0xff] %vm817_vm2, %v4493_v33  ;;  %v4467_v52 = vpop.f32.mrf.mxu0  ;;  %v4488_v45 = vadd.f32 %v4822_v21, %v4487_v56 }
 0xd96   : > { %4499 = vst.msk [vmem:[%s6136_s27 + $0x18] sm:$0xff] %vm817_vm2, %v4473_v2  ;;  %v4468_v1 = vadd.f32 %v4822_v21, %v4467_v52 }
 0xd97   : > { %4502 = vst.msk [vmem:[%s6136_s27 + $0x30] sm:$0xff] %vm817_vm2, %v4488_v45 }
 0xd98   : > { %4498 = vst.msk [vmem:[%s6136_s27 + $0x10] sm:$0xff] %vm817_vm2, %v4468_v1 }
 0xd99 PF: > { %s19_s17 = sadd.s32 1, %s5974_s17   ;;  %s8474_s11 = sld [smem:[#allocation14_spill]] }
 0xd9a   : > { %p16_p2 = scmp.ge.s32.totalorder %s19_s17, 10   ;;  %s8475_s12 = sld [smem:[#allocation9_spill]] }
 0xd9b   : > { %s8476_s13 = sld [smem:[#allocation10_spill]]  ;;  %s8480_s30 = smov %s5946_s10 }
 0xd9c   : > { %s8477_s26 = sld [smem:[#allocation12_spill]] }
 0xd9d   : > { %s8478_s15 = sld [smem:[#allocation11_spill]] }
 0xd9e   : > { %s8479_s16 = sld [smem:[#allocation13_spill]]  ;;  %18 = sbr.rel (!%p16_p2) target bundleno = 7 (0x7), region = 152 }
 0xd9f   : > { %s8481_s10 = smov %s8474_s11  ;;  %s8482_s11 = smov %s5962_s14 }
 0xda2   : > { %s8483_s14 = smov %s8477_s26 }

// kernel: tpu_custom_call.1
= control target key start
LH: loop header
LB: loop body
LE: loop exit
PB: predicated region body
PF: predicated region fallthrough
CT: control target
= control target key end

     0   :  { %s8226_s0 = inlined_call_operand.vmem [shape: s8[2,128,256], index: 0, kind: input, shape index: {}]   ;;  %s8227_s1 = inlined_call_operand.vmem [shape: f32[2,128,64], index: 1, kind: input, shape index: {}]   ;;  %s8228_s2 = inlined_call_operand.vmem [shape: f32[2,256,64], index: 2, kind: input, shape index: {}]   ;;  %s8229_s3 = inlined_call_operand.vmem [shape: f32[2,256,64], index: 3, kind: input, shape index: {}]   ;;  %s8230_s4 = inlined_call_operand.vmem [shape: f32[64,64], index: 4, kind: input, shape index: {}]   ;;  %s8231_s5 = inlined_call_operand.vmem [shape: f32[64,64], index: 5, kind: input, shape index: {}]   ;;  %s8232_s6 = inlined_call_operand.vmem [shape: f32[64,64], index: 6, kind: input, shape index: {}]   ;;  %s8233_s7 = inlined_call_operand.vmem [shape: f32[64,64], index: 7, kind: input, shape index: {}]   ;;  %s8234_s8 = inlined_call_operand.vmem [shape: f32[4,64], index: 8, kind: input, shape index: {}]   ;;  %s8235_s9 = inlined_call_operand.vmem [shape: f32[2,128,64], index: 9, kind: output, shape index: {}]  }
   0x1   :  { %8293 = sst [smem:[#allocation78_spill]] %s8226_s0 }
   0x2   :  { %s6036_s30 = smov 0   ;;  %s6038_s10 = smov 0  }
   0x3   :  { %s6040_s11 = smov 0   ;;  %s6042_s12 = smov 0  }
   0x4   :  { %s6044_s13 = smov 0   ;;  %s6046_s14 = smov 0  }
   0x5   :  { %s6048_s15 = smov 0   ;;  %s6050_s16 = smov 0  }
   0x6   :  { %s6052_s17 = smov 0  }
   0x7 LB: > { %8294 = sst [smem:[#allocation9_spill]] %s5966_s15  ;;  %s31_s18 = sadd.s32 1, %s5962_s14  ;;  %s5974_s17 = sphi %s6052_s17, %s19_s17   ;;  %s5970_s16 = sphi %s6050_s16, %s8479_s16   ;;  %s5966_s15 = sphi %s6048_s15, %s8478_s15   ;;  %s5962_s14 = sphi %s6046_s14, %s8483_s14   ;;  %s5958_s13 = sphi %s6044_s13, %s8476_s13   ;;  %s5954_s12 = sphi %s6042_s12, %s8475_s12   ;;  %s5950_s11 = sphi %s6040_s11, %s8482_s11   ;;  %s5946_s10 = sphi %s6038_s10, %s8481_s10   ;;  %s5942_s30 = sphi %s6036_s30, %s8480_s30  }
   0x8   : > { %8295 = sst [smem:[#allocation10_spill]] %s5970_s16  ;;  %p32_p0 = scmp.ge.s32.totalorder %s31_s18, 2 }
   0x9   : > { %s34_s19 = sadd.s32 1, %s5966_s15  ;;  %p56_p1 = scmp.ne.s32.totalorder %s5946_s10, %s5942_s30 }
   0xa   : > { %s8485_s19 = smov (!%p32_p0, %s34_s19), %s5966_s15  ;;  %p57_p2 = scmp.eq.s32.totalorder %s5974_s17, 0 }
   0xb   : > { %p36_p3 = scmp.ge.s32.totalorder %s8485_s19, 2  ;;  %s38_s20 = sadd.s32 1, %s5970_s16 }
   0xc   : > { %p6088_p4 = por %p57_p2, %p56_p1  ;;  %s8491_s18 = smov (%p32_p0, %s31_s18), 0 }
   0xd   : > { %s8487_s19 = smov (%p36_p3, %s8485_s19), 0  ;;  %s8489_s20 = smov (!%p36_p3, %s38_s20), %s5970_s16 }
   0xe   : > { %8297 = sst [smem:[#allocation11_spill]] %s8487_s19  ;;  %p40_p5 = scmp.ge.s32.totalorder %s8489_s20, 2 }
   0xf   : > { %8298 = sst [smem:[#allocation12_spill]] %s8491_s18  ;;  %s43_s22 = ssub.s32 %s5966_s15, %s8487_s19 }
  0x10   : > { %s8493_s20 = smov (%p40_p5, %s8489_s20), 0  ;;  %s45_s23 = ssub.s32 %s5962_s14, %s8491_s18 }
  0x11   : > { %8299 = sst [smem:[#allocation13_spill]] %s8493_s20  ;;  %s42_s24 = ssub.s32 %s5970_s16, %s8493_s20 }
  0x12   : > { %s44_s25 = sor.u32 %s43_s22, %s42_s24  ;;  %s49_s27 = sadd.s32 1, %s5946_s10 }
  0x13   : > { %s46_s26 = sor.u32 %s45_s23, %s44_s25  ;;  %p4661_p7 = scmp.ge.s32.totalorder %s5974_s17, 8 }
  0x14   : > { %p47_p6 = scmp.eq.s32.totalorder %s46_s26, 0 }
  0x15   : > { %314 = sbr.rel (%p4661_p7) target bundleno = 38 (0x26), region = 36 }
  0x16   : > { %s6107_s28 = scalar_select %p47_p6, %s5946_s10, %s49_s27  }
  0x18   : > { %8300 = sst [smem:[#allocation14_spill]] %s6107_s28 }
  0x1a   : > { %317 = sbr.rel (!%p6088_p4) target bundleno = 38 (0x26), region = 40  ;;  %s319_s29 = sand.u32 (%p6088_p4), 1, %s5946_s10  }
  0x1b   : > { %s4833_s19 = sshll.u32 (%p6088_p4), %s5966_s15, 2  ;;  %s4662_s18 = sshll.u32 (%p6088_p4), %s319_s29, 4 }
  0x1c   : > { %s324_s20 = sadd.s32 (%p6088_p4), %s5962_s14, %s4833_s19  ;;  %s4665_s22 = sshll.u32 (%p6088_p4), %s5970_s16, 3 }
  0x1d   : > { %s326_s23 = sadd.s32 (%p6088_p4), %s4665_s22, %s324_s20  ;;  %s8301_s0 = sld [smem:[#allocation78_spill]] (%p6088_p4) }
  0x1e   : > { %s4666_s24 = sshll.u32 (%p6088_p4), %s326_s23, 3  ;;  %s321_s28 = scalar_lea.vmem (%p6088_p4), [#allocation8], %s4662_s18 }
  0x23   : > { %s328_s27 = scalar_lea.vmem %s8301_s0, %s4666_s24 }
  0x24   : > { %v359_v0 = vld [vmem:[%s328_s27] sm:$0xff]  ;;  %v361_v1 = vld [vmem:[%s328_s27 + $0x10] sm:$0xff] }
  0x25   : > { %360 = vst [vmem:[%s321_s28] sm:$0xff] %v359_v0  ;;  %362 = vst [vmem:[%s321_s28 + $0x8] sm:$0xff] %v361_v1 }
  0x26 PF: > { %p4667_p8 = scmp.ge.s32.totalorder %s5974_s17, 1  ;;  %p406_p9 = scmp.lt.s32.totalorder %s5974_s17, 9 }
  0x28   : > { %p407_p10 = pnand %p4667_p8, %p406_p9 }
  0x2a   : > { %410 = sbr.rel (%p407_p10) target bundleno = 3481 (0xd99), region = 90 }
  0x2f   : > { %s413_s19 = sand.u32 1, %s5942_s30   ;;  %s4669_s20 = sshll.u32 %s5954_s12, 3 }
  0x30   : > { %s6123_s21 = sshll.u32 %s413_s19, 4  ;;  %p481_p11 = scmp.lt.s32.totalorder %s5958_s13, 1 }
  0x31   : > { %p483_p12 = scmp.lt.s32.totalorder %s4669_s20, 15  ;;  %s4672_s28 = sshll.u32 %s5950_s11, 4 }
  0x32   : > { %s8495_s13 = smov (!%p481_p11, %s5958_s13), 1  ;;  %p493_p13 = scmp.lt.s32.totalorder %s4672_s28, 31 }
  0x33   : > { %s8497_s20 = smov (!%p483_p12, %s4669_s20), 15  ;;  %s4670_s18 = sshll.u32 %s8495_s13, 4 }
  0x34   : > { %s486_s29 = sadd.s32 %s4670_s18, %s8497_s20  ;;  %s4673_s23 = sshll.u32 %s8495_s13, 5 }
  0x35   : > { %s4671_s22 = sshll.u32 %s486_s29, 3  ;;  %s8499_s28 = smov (!%p493_p13, %s4672_s28), 31 }
  0x36   : > { %s6131_s26 = scalar_lea.vmem %s8227_s1, %s4671_s22  ;;  %s6136_s27 = scalar_lea.vmem %s8235_s9, %s4671_s22 }
  0x37   : > { %s496_s19 = sadd.s32 %s4673_s23, %s8499_s28  ;;  %s415_s24 = scalar_lea.vmem [#allocation8], %s6123_s21 }
  0x38   : > { %s4674_s0 = sshll.u32 %s496_s19, 3  ;;  %p4681_p0 = scmp.ne.s32.totalorder %s5950_s11, 0 }
  0x39   : > { %s6141_s20 = scalar_lea.vmem %s8228_s2, %s4674_s0  ;;  %s6146_s29 = scalar_lea.vmem %s8229_s3, %s4674_s0 }
  0x3a   : > { %523 = sbr.rel (%p4681_p0) target bundleno = 285 (0x11d), region = 98 }
  0x3f   : > { %v539_v2 = vld [vmem:[%s8230_s4 + $0x38] sm:$0xff]  ;;  %v538_v3 = vld [vmem:[%s8230_s4 + $0x30] sm:$0xff]  ;;  %vm545_vm0 = vcmask 523264   ;;  %vm691_vm1 = vcmask 7168   ;;  %v5976_v4 = vmov 0.0   ;;  %v537_v5 = vld [vmem:[%s8230_s4 + $0x28] sm:$0xff] }
  0x40   : > { %5106 = vmatprep.subr.mxu0 %v539_v2  ;;  %5594 = vmatprep.subr.mxu1 %v539_v2  ;;  %724 = vst.msk [vmem:[#allocation6] sm:$0xff] %vm691_vm1, %v5976_v4  ;;  %725 = vst.msk [vmem:[#allocation6 + $0x8] sm:$0xff] %vm691_vm1, %v5976_v4  ;;  %v536_v6 = vld [vmem:[%s8230_s4 + $0x20] sm:$0xff]  ;;  %v535_v7 = vld [vmem:[%s8230_s4 + $0x18] sm:$0xff]  ;;  %v5977_v19 = vmov -inf  }
  0x41   : > { %726 = vst.msk [vmem:[#allocation6 + $0x10] sm:$0xff] %vm691_vm1, %v5976_v4  ;;  %727 = vst.msk [vmem:[#allocation6 + $0x18] sm:$0xff] %vm691_vm1, %v5976_v4  ;;  %5107 = vmatpush3.msra.mxu0 %v539_v2  ;;  %5602 = vmatpush3.msra.mxu1 %v539_v2  ;;  %v534_v8 = vld [vmem:[%s8230_s4 + $0x10] sm:$0xff]  ;;  %v533_v9 = vld [vmem:[%s8230_s4 + $0x8] sm:$0xff] }
  0x42   : > { %728 = vst.msk [vmem:[#allocation6 + $0x20] sm:$0xff] %vm691_vm1, %v5976_v4  ;;  %729 = vst.msk [vmem:[#allocation6 + $0x28] sm:$0xff] %vm691_vm1, %v5976_v4  ;;  %5108 = vmatprep.subr.mxu0 %v538_v3  ;;  %5595 = vmatprep.subr.mxu1 %v538_v3  ;;  %v532_v10 = vld [vmem:[%s8230_s4] sm:$0xff]  ;;  %v525_v13 = vld [vmem:[%s6131_s26 + $0x8] sm:$0xff] }
  0x43   : > { %730 = vst.msk [vmem:[#allocation6 + $0x30] sm:$0xff] %vm691_vm1, %v5976_v4  ;;  %731 = vst.msk [vmem:[#allocation6 + $0x38] sm:$0xff] %vm691_vm1, %v5976_v4  ;;  %5109 = vmatpush3.msra.mxu0 %v538_v3  ;;  %5603 = vmatpush3.msra.mxu1 %v538_v3  ;;  %v524_v11 = vld [vmem:[%s6131_s26] sm:$0xff]  ;;  %v529_v14 = vld [vmem:[%s6131_s26 + $0x28] sm:$0xff] }
  0x44   : > { %732 = vst.msk [vmem:[#allocation6 + $0x40] sm:$0xff] %vm691_vm1, %v5976_v4  ;;  %733 = vst.msk [vmem:[#allocation6 + $0x48] sm:$0xff] %vm691_vm1, %v5976_v4  ;;  %5110 = vmatprep.subr.mxu0 %v537_v5  ;;  %5596 = vmatprep.subr.mxu1 %v537_v5  ;;  %v528_v12 = vld [vmem:[%s6131_s26 + $0x20] sm:$0xff]  ;;  %v526_v15 = vld [vmem:[%s6131_s26 + $0x10] sm:$0xff] }
  0x45   : > { %734 = vst.msk [vmem:[#allocation6 + $0x50] sm:$0xff] %vm691_vm1, %v5976_v4  ;;  %735 = vst.msk [vmem:[#allocation6 + $0x58] sm:$0xff] %vm691_vm1, %v5976_v4  ;;  %5111 = vmatpush3.msra.mxu0 %v537_v5  ;;  %5604 = vmatpush3.msra.mxu1 %v537_v5  ;;  %v530_v16 = vld [vmem:[%s6131_s26 + $0x30] sm:$0xff]  ;;  %v527_v17 = vld [vmem:[%s6131_s26 + $0x18] sm:$0xff] }
  0x46   : > { %736 = vst.msk [vmem:[#allocation6 + $0x60] sm:$0xff] %vm691_vm1, %v5976_v4  ;;  %737 = vst.msk [vmem:[#allocation6 + $0x68] sm:$0xff] %vm691_vm1, %v5976_v4  ;;  %5112 = vmatprep.subr.mxu0 %v536_v6  ;;  %5597 = vmatprep.subr.mxu1 %v536_v6  ;;  %v531_v18 = vld [vmem:[%s6131_s26 + $0x38] sm:$0xff]  ;;  %v4682_v20 = vld [vmem:[%s8234_s8] ss:$0 sm:$0xff] }
  0x47   : > { %738 = vst.msk [vmem:[#allocation6 + $0x70] sm:$0xff] %vm691_vm1, %v5976_v4  ;;  %739 = vst.msk [vmem:[#allocation6 + $0x78] sm:$0xff] %vm691_vm1, %v5976_v4  ;;  %5113 = vmatpush3.msra.mxu0 %v536_v6  ;;  %5605 = vmatpush3.msra.mxu1 %v536_v6 }
  0x48   : > { %740 = vst.msk [vmem:[#allocation6 + $0x80] sm:$0xff] %vm691_vm1, %v5976_v4  ;;  %741 = vst.msk [vmem:[#allocation6 + $0x88] sm:$0xff] %vm691_vm1, %v5976_v4  ;;  %5114 = vmatprep.subr.mxu0 %v535_v7  ;;  %5598 = vmatprep.subr.mxu1 %v535_v7 }
  0x49   : > { %742 = vst.msk [vmem:[#allocation6 + $0x90] sm:$0xff] %vm691_vm1, %v5976_v4  ;;  %743 = vst.msk [vmem:[#allocation6 + $0x98] sm:$0xff] %vm691_vm1, %v5976_v4  ;;  %5115 = vmatpush3.msra.mxu0 %v535_v7  ;;  %5606 = vmatpush3.msra.mxu1 %v535_v7 }
  0x4a   : > { %744 = vst.msk [vmem:[#allocation6 + $0xa0] sm:$0xff] %vm691_vm1, %v5976_v4  ;;  %745 = vst.msk [vmem:[#allocation6 + $0xa8] sm:$0xff] %vm691_vm1, %v5976_v4  ;;  %5116 = vmatprep.subr.mxu0 %v534_v8  ;;  %5599 = vmatprep.subr.mxu1 %v534_v8 }
  0x4b   : > { %746 = vst.msk [vmem:[#allocation6 + $0xb0] sm:$0xff] %vm691_vm1, %v5976_v4  ;;  %747 = vst.msk [vmem:[#allocation6 + $0xb8] sm:$0xff] %vm691_vm1, %v5976_v4  ;;  %5117 = vmatpush3.msra.mxu0 %v534_v8  ;;  %5607 = vmatpush3.msra.mxu1 %v534_v8 }
  0x4c   : > { %748 = vst.msk [vmem:[#allocation6 + $0xc0] sm:$0xff] %vm691_vm1, %v5976_v4  ;;  %749 = vst.msk [vmem:[#allocation6 + $0xc8] sm:$0xff] %vm691_vm1, %v5976_v4  ;;  %5118 = vmatprep.subr.mxu0 %v533_v9  ;;  %5600 = vmatprep.subr.mxu1 %v533_v9 }
  0x4d   : > { %750 = vst.msk [vmem:[#allocation6 + $0xd0] sm:$0xff] %vm691_vm1, %v5976_v4  ;;  %751 = vst.msk [vmem:[#allocation6 + $0xd8] sm:$0xff] %vm691_vm1, %v5976_v4  ;;  %5119 = vmatpush3.msra.mxu0 %v533_v9  ;;  %5608 = vmatpush3.msra.mxu1 %v533_v9 }
  0x4e   : > { %752 = vst.msk [vmem:[#allocation6 + $0xe0] sm:$0xff] %vm691_vm1, %v5976_v4  ;;  %753 = vst.msk [vmem:[#allocation6 + $0xe8] sm:$0xff] %vm691_vm1, %v5976_v4  ;;  %5120 = vmatprep.subr.mxu0 %v532_v10  ;;  %5601 = vmatprep.subr.mxu1 %v532_v10 }
  0x4f   : > { %754 = vst.msk [vmem:[#allocation6 + $0xf0] sm:$0xff] %vm691_vm1, %v5976_v4  ;;  %755 = vst.msk [vmem:[#allocation6 + $0xf8] sm:$0xff] %vm691_vm1, %v5976_v4  ;;  %5121 = vmatpush3.msra.mxu0 %v532_v10  ;;  %5609 = vmatpush3.msra.mxu1 %v532_v10 }
  0x50   : > { %756 = vst.msk [vmem:[#allocation7] sm:$0xff] %vm545_vm0, %v5976_v4  ;;  %757 = vst.msk [vmem:[#allocation7 + $0x8] sm:$0xff] %vm545_vm0, %v5976_v4  ;;  %5122 = vmatprep.mubr.msk.f32.mxu0 %vm545_vm0, %v524_v11  ;;  %5128 = vmatprep.mubr.msk.f32.mxu1 %vm545_vm0, %v528_v12 }
  0x51   : > { %758 = vst.msk [vmem:[#allocation7 + $0x10] sm:$0xff] %vm545_vm0, %v5976_v4  ;;  %759 = vst.msk [vmem:[#allocation7 + $0x18] sm:$0xff] %vm545_vm0, %v5976_v4  ;;  %5123 = vmatmul.mubr.msk.f32.vlgmr.msra.gmra.mxu0 %vm545_vm0, %v525_v13  ;;  %5129 = vmatmul.mubr.msk.f32.vlgmr.msra.gmra.mxu1 %vm545_vm0, %v529_v14 }
  0x52   : > { %760 = vst.msk [vmem:[#allocation7 + $0x20] sm:$0xff] %vm545_vm0, %v5976_v4  ;;  %761 = vst.msk [vmem:[#allocation7 + $0x28] sm:$0xff] %vm545_vm0, %v5976_v4  ;;  %5125 = vmatprep.mubr.msk.f32.mxu0 %vm545_vm0, %v526_v15  ;;  %5131 = vmatprep.mubr.msk.f32.mxu1 %vm545_vm0, %v530_v16 }
  0x53   : > { %762 = vst.msk [vmem:[#allocation7 + $0x30] sm:$0xff] %vm545_vm0, %v5976_v4  ;;  %763 = vst.msk [vmem:[#allocation7 + $0x38] sm:$0xff] %vm545_vm0, %v5976_v4 }
  0x54   : > { %692 = vst.msk [vmem:[#allocation5] sm:$0xff] %vm691_vm1, %v5977_v19  ;;  %693 = vst.msk [vmem:[#allocation5 + $0x8] sm:$0xff] %vm691_vm1, %v5977_v19 }
  0x55   : > { %5126 = vmatmul.mubr.msk.f32.gmra.mxu0 %vm545_vm0, %v527_v17  ;;  %5132 = vmatmul.mubr.msk.f32.gmra.mxu1 %vm545_vm0, %v531_v18  ;;  %694 = vst.msk [vmem:[#allocation5 + $0x10] sm:$0xff] %vm691_vm1, %v5977_v19  ;;  %695 = vst.msk [vmem:[#allocation5 + $0x18] sm:$0xff] %vm691_vm1, %v5977_v19 }
  0x56   : > { %696 = vst.msk [vmem:[#allocation5 + $0x20] sm:$0xff] %vm691_vm1, %v5977_v19  ;;  %697 = vst.msk [vmem:[#allocation5 + $0x28] sm:$0xff] %vm691_vm1, %v5977_v19 }
  0x57   : > { %698 = vst.msk [vmem:[#allocation5 + $0x30] sm:$0xff] %vm691_vm1, %v5977_v19  ;;  %699 = vst.msk [vmem:[#allocation5 + $0x38] sm:$0xff] %vm691_vm1, %v5977_v19 }
  0x58   : > { %700 = vst.msk [vmem:[#allocation5 + $0x40] sm:$0xff] %vm691_vm1, %v5977_v19  ;;  %701 = vst.msk [vmem:[#allocation5 + $0x48] sm:$0xff] %vm691_vm1, %v5977_v19 }
  0x59   : > { %702 = vst.msk [vmem:[#allocation5 + $0x50] sm:$0xff] %vm691_vm1, %v5977_v19  ;;  %703 = vst.msk [vmem:[#allocation5 + $0x58] sm:$0xff] %vm691_vm1, %v5977_v19 }
  0x5a   : > { %704 = vst.msk [vmem:[#allocation5 + $0x60] sm:$0xff] %vm691_vm1, %v5977_v19  ;;  %705 = vst.msk [vmem:[#allocation5 + $0x68] sm:$0xff] %vm691_vm1, %v5977_v19 }
  0x5b   : > { %706 = vst.msk [vmem:[#allocation5 + $0x70] sm:$0xff] %vm691_vm1, %v5977_v19  ;;  %707 = vst.msk [vmem:[#allocation5 + $0x78] sm:$0xff] %vm691_vm1, %v5977_v19 }
  0x5c   : > { %708 = vst.msk [vmem:[#allocation5 + $0x80] sm:$0xff] %vm691_vm1, %v5977_v19  ;;  %709 = vst.msk [vmem:[#allocation5 + $0x88] sm:$0xff] %vm691_vm1, %v5977_v19 }
  0x5d   : > { %710 = vst.msk [vmem:[#allocation5 + $0x90] sm:$0xff] %vm691_vm1, %v5977_v19  ;;  %711 = vst.msk [vmem:[#allocation5 + $0x98] sm:$0xff] %vm691_vm1, %v5977_v19 }
  0x5e   : > { %712 = vst.msk [vmem:[#allocation5 + $0xa0] sm:$0xff] %vm691_vm1, %v5977_v19  ;;  %713 = vst.msk [vmem:[#allocation5 + $0xa8] sm:$0xff] %vm691_vm1, %v5977_v19 }
  0x5f   : > { %714 = vst.msk [vmem:[#allocation5 + $0xb0] sm:$0xff] %vm691_vm1, %v5977_v19  ;;  %715 = vst.msk [vmem:[#allocation5 + $0xb8] sm:$0xff] %vm691_vm1, %v5977_v19 }
  0x60   : > { %716 = vst.msk [vmem:[#allocation5 + $0xc0] sm:$0xff] %vm691_vm1, %v5977_v19  ;;  %717 = vst.msk [vmem:[#allocation5 + $0xc8] sm:$0xff] %vm691_vm1, %v5977_v19 }
  0x61   : > { %718 = vst.msk [vmem:[#allocation5 + $0xd0] sm:$0xff] %vm691_vm1, %v5977_v19  ;;  %719 = vst.msk [vmem:[#allocation5 + $0xd8] sm:$0xff] %vm691_vm1, %v5977_v19 }
  0x62   : > { %720 = vst.msk [vmem:[#allocation5 + $0xe0] sm:$0xff] %vm691_vm1, %v5977_v19  ;;  %721 = vst.msk [vmem:[#allocation5 + $0xe8] sm:$0xff] %vm691_vm1, %v5977_v19 }
  0x63   : > { %722 = vst.msk [vmem:[#allocation5 + $0xf0] sm:$0xff] %vm691_vm1, %v5977_v19  ;;  %723 = vst.msk [vmem:[#allocation5 + $0xf8] sm:$0xff] %vm691_vm1, %v5977_v19 }
 0x111   : > { %v5124_v21 = vpop.f32.mrf.mxu0  ;;  %v5130_v22 = vpop.f32.mrf.mxu1 }
 0x112   : > { %v642_v23 = vadd.f32 %v5124_v21, %v4682_v20  ;;  %v662_v24 = vadd.f32 %v5130_v22, %v4682_v20 }
 0x113   : > { %v636_v25 = vpop.f32.mrf.mxu0  ;;  %v656_v26 = vpop.f32.mrf.mxu1 }
 0x114   : > { %v676_v27 = vmul.f32 0.125, %v642_v23  ;;  %v680_v28 = vmul.f32 0.125, %v662_v24  ;;  %v637_v29 = vadd.f32 %v4682_v20, %v636_v25  ;;  %v657_v30 = vadd.f32 %v4682_v20, %v656_v26 }
 0x115   : > { %v5127_v31 = vpop.f32.mrf.mxu0  ;;  %v5133_v32 = vpop.f32.mrf.mxu1 }
 0x116   : > { %684 = vst.msk [vmem:[#allocation2 + $0x8] sm:$0xff] %vm545_vm0, %v676_v27  ;;  %688 = vst.msk [vmem:[#allocation2 + $0x28] sm:$0xff] %vm545_vm0, %v680_v28  ;;  %v675_v33 = vmul.f32 0.125, %v637_v29  ;;  %v679_v34 = vmul.f32 0.125, %v657_v30  ;;  %v652_v35 = vadd.f32 %v5127_v31, %v4682_v20  ;;  %v672_v36 = vadd.f32 %v5133_v32, %v4682_v20 }
 0x117   : > { %v646_v37 = vpop.f32.mrf.mxu0  ;;  %v666_v38 = vpop.f32.mrf.mxu1 }
 0x118   : > { %683 = vst.msk [vmem:[#allocation2] sm:$0xff] %vm545_vm0, %v675_v33  ;;  %687 = vst.msk [vmem:[#allocation2 + $0x20] sm:$0xff] %vm545_vm0, %v679_v34  ;;  %v678_v39 = vmul.f32 0.125, %v652_v35  ;;  %v682_v40 = vmul.f32 0.125, %v672_v36  ;;  %v647_v41 = vadd.f32 %v4682_v20, %v646_v37  ;;  %v667_v42 = vadd.f32 %v4682_v20, %v666_v38 }
 0x11a   : > { %686 = vst.msk [vmem:[#allocation2 + $0x18] sm:$0xff] %vm545_vm0, %v678_v39  ;;  %690 = vst.msk [vmem:[#allocation2 + $0x38] sm:$0xff] %vm545_vm0, %v682_v40  ;;  %v677_v43 = vmul.f32 0.125, %v647_v41  ;;  %v681_v44 = vmul.f32 0.125, %v667_v42 }
 0x11c   : > { %685 = vst.msk [vmem:[#allocation2 + $0x10] sm:$0xff] %vm545_vm0, %v677_v43  ;;  %689 = vst.msk [vmem:[#allocation2 + $0x30] sm:$0xff] %vm545_vm0, %v681_v44 }
 0x11d PF: > { %v787_v45 = vld [vmem:[%s8231_s5 + $0x38] sm:$0xff]  ;;  %v786_v46 = vld [vmem:[%s8231_s5 + $0x30] sm:$0xff]  ;;  %vm817_vm2 = vcmask 523264   ;;  %v785_v47 = vld [vmem:[%s8231_s5 + $0x28] sm:$0xff]  ;;  %vm1291_vm3 = vcmask 130048   ;;  %vm1637_vm12 = vcmask 7168  }
 0x11e   : > { %5134 = vmatprep.subr.mxu0 %v787_v45  ;;  %v764_v48 = vld [vmem:[%s6141_s20] sm:$0xff]  ;;  %v783_v50 = vld [vmem:[%s8231_s5 + $0x18] sm:$0xff]  ;;  %v782_v51 = vld [vmem:[%s8231_s5 + $0x10] sm:$0xff]  ;;  %s5980_s25 = smov 96   ;;  %s5982_s22 = smov 16   ;;  %vm2555_vm13 = vcmask 261248  }
 0x11f   : > { %5135 = vmatpush3.msra.mxu0 %v787_v45  ;;  %5150 = vmatprep.mubr.msk.f32.mxu0 %vm817_vm2, %v764_v48  ;;  %v784_v49 = vld [vmem:[%s8231_s5 + $0x20] sm:$0xff]  ;;  %v781_v52 = vld [vmem:[%s8231_s5 + $0x8] sm:$0xff]  ;;  %v766_v55 = vld [vmem:[%s6141_s20 + $0x10] sm:$0xff]  ;;  %s5983_s28 = smov 32   ;;  %vm3280_vm14 = vcmask 392448   ;;  %s5984_s23 = smov 48  }
 0x120   : > { %5136 = vmatprep.subr.mxu0 %v786_v46  ;;  %v780_v53 = vld [vmem:[%s8231_s5] sm:$0xff]  ;;  %v765_v54 = vld [vmem:[%s6141_s20 + $0x8] sm:$0xff]  ;;  %v767_v56 = vld [vmem:[%s6141_s20 + $0x18] sm:$0xff]  ;;  %vm4005_vm15 = vcmask 523648   ;;  %p4821_p1 = scmp.ne.s32.totalorder %s5950_s11, 1 }
 0x121   : > { %5137 = vmatpush3.msra.mxu0 %v786_v46  ;;  %v768_v57 = vld [vmem:[%s6141_s20 + $0x20] sm:$0xff]  ;;  %v769_v58 = vld [vmem:[%s6141_s20 + $0x28] sm:$0xff]  ;;  %v770_v59 = vld [vmem:[%s6141_s20 + $0x30] sm:$0xff] }
 0x122   : > { %5138 = vmatprep.subr.mxu0 %v785_v47  ;;  %v771_v60 = vld [vmem:[%s6141_s20 + $0x38] sm:$0xff]  ;;  %v772_v61 = vld [vmem:[%s6141_s20 + $0x40] sm:$0xff]  ;;  %v773_v62 = vld [vmem:[%s6141_s20 + $0x48] sm:$0xff] }
 0x123   : > { %5139 = vmatpush3.msra.mxu0 %v785_v47  ;;  %v774_v63 = vld [vmem:[%s6141_s20 + $0x50] sm:$0xff]  ;;  %v775_v0 = vld [vmem:[%s6141_s20 + $0x58] sm:$0xff]  ;;  %v776_v1 = vld [vmem:[%s6141_s20 + $0x60] sm:$0xff] }
 0x124   : > { %5140 = vmatprep.subr.mxu0 %v784_v49  ;;  %v777_v2 = vld [vmem:[%s6141_s20 + $0x68] sm:$0xff]  ;;  %v778_v3 = vld [vmem:[%s6141_s20 + $0x70] sm:$0xff]  ;;  %v779_v4 = vld [vmem:[%s6141_s20 + $0x78] sm:$0xff]  ;;  %s5981_s20 = smov 80  }
 0x125   : > { %5141 = vmatpush3.msra.mxu0 %v784_v49  ;;  %v6329_v5 = vld [vmem:[#allocation2] sm:$0xff]  ;;  %v811_v6 = vld [vmem:[%s8232_s6 + $0x38] sm:$0xff]  ;;  %v810_v7 = vld [vmem:[%s8232_s6 + $0x30] sm:$0xff] }
 0x126   : > { %5142 = vmatprep.subr.mxu0 %v783_v50  ;;  %5174 = vmatprep.subr.mxu1 %v811_v6  ;;  %v809_v8 = vld [vmem:[%s8232_s6 + $0x28] sm:$0xff]  ;;  %v788_v9 = vld [vmem:[%s6146_s29] sm:$0xff]  ;;  %v807_v11 = vld [vmem:[%s8232_s6 + $0x18] sm:$0xff] }
 0x127   : > { %5143 = vmatpush3.msra.mxu0 %v783_v50  ;;  %5175 = vmatpush3.msra.mxu1 %v811_v6  ;;  %v808_v10 = vld [vmem:[%s8232_s6 + $0x20] sm:$0xff]  ;;  %v806_v12 = vld [vmem:[%s8232_s6 + $0x10] sm:$0xff]  ;;  %v805_v13 = vld [vmem:[%s8232_s6 + $0x8] sm:$0xff] }
 0x128   : > { %5144 = vmatprep.subr.mxu0 %v782_v51  ;;  %5176 = vmatprep.subr.mxu1 %v810_v7  ;;  %v6359_v14 = vld [vmem:[%s8234_s8 + $0x1] ss:$0 sm:$0xff]  ;;  %v789_v18 = vld [vmem:[%s6146_s29 + $0x8] sm:$0xff]  ;;  %v790_v20 = vld [vmem:[%s6146_s29 + $0x10] sm:$0xff] }
 0x129   : > { %5145 = vmatpush3.msra.mxu0 %v782_v51  ;;  %5190 = vmatprep.mubr.msk.f32.mxu1 %vm817_vm2, %v788_v9  ;;  %v804_v15 = vld [vmem:[%s8232_s6] sm:$0xff]  ;;  %v791_v24 = vld [vmem:[%s6146_s29 + $0x18] sm:$0xff]  ;;  %v793_v30 = vld [vmem:[%s6146_s29 + $0x28] sm:$0xff] }
 0x12a   : > { %5146 = vmatprep.subr.mxu0 %v781_v52  ;;  %5177 = vmatpush3.msra.mxu1 %v810_v7  ;;  %v792_v26 = vld [vmem:[%s6146_s29 + $0x20] sm:$0xff]  ;;  %v794_v32 = vld [vmem:[%s6146_s29 + $0x30] sm:$0xff]  ;;  %v795_v36 = vld [vmem:[%s6146_s29 + $0x38] sm:$0xff] }
 0x12b   : > { %5147 = vmatpush3.msra.mxu0 %v781_v52  ;;  %5178 = vmatprep.subr.mxu1 %v809_v8  ;;  %v796_v38 = vld [vmem:[%s6146_s29 + $0x40] sm:$0xff]  ;;  %v797_v42 = vld [vmem:[%s6146_s29 + $0x48] sm:$0xff]  ;;  %v798_v44 = vld [vmem:[%s6146_s29 + $0x50] sm:$0xff] }
 0x12c   : > { %5148 = vmatprep.subr.mxu0 %v780_v53  ;;  %5179 = vmatpush3.msra.mxu1 %v809_v8  ;;  %v799_v48 = vld [vmem:[%s6146_s29 + $0x58] sm:$0xff]  ;;  %v800_v50 = vld [vmem:[%s6146_s29 + $0x60] sm:$0xff] }
 0x12d   : > { %5149 = vmatpush3.msra.mxu0 %v780_v53  ;;  %5180 = vmatprep.subr.mxu1 %v808_v10 }
 0x12e   : > { %5151 = vmatmul.mubr.msk.f32.vlgmr.msra.gmra.mxu0 %vm817_vm2, %v765_v54  ;;  %5181 = vmatpush3.msra.mxu1 %v808_v10  ;;  %v801_v54 = vld [vmem:[%s6146_s29 + $0x68] sm:$0xff] }
 0x12f   : > { %5153 = vmatprep.mubr.msk.f32.mxu0 %vm817_vm2, %v766_v55  ;;  %5182 = vmatprep.subr.mxu1 %v807_v11 }
 0x130   : > { %5183 = vmatpush3.msra.mxu1 %v807_v11 }
 0x131   : > { %5184 = vmatprep.subr.mxu1 %v806_v12 }
 0x132   : > { %5154 = vmatmul.mubr.msk.f32.gmra.mxu0 %vm817_vm2, %v767_v56  ;;  %5185 = vmatpush3.msra.mxu1 %v806_v12  ;;  %v802_v56 = vld [vmem:[%s6146_s29 + $0x70] sm:$0xff] }
 0x133   : > { %5156 = vmatprep.mubr.msk.f32.mxu0 %vm817_vm2, %v768_v57  ;;  %5186 = vmatprep.subr.mxu1 %v805_v13 }
 0x134   : > { %5187 = vmatpush3.msra.mxu1 %v805_v13 }
 0x135   : > { %5188 = vmatprep.subr.mxu1 %v804_v15 }
 0x136   : > { %5157 = vmatmul.mubr.msk.f32.gmra.mxu0 %vm817_vm2, %v769_v58  ;;  %5189 = vmatpush3.msra.mxu1 %v804_v15 }
 0x137   : > { %5159 = vmatprep.mubr.msk.f32.mxu0 %vm817_vm2, %v770_v59  ;;  %5191 = vmatmul.mubr.msk.f32.vlgmr.msra.gmra.mxu1 %vm817_vm2, %v789_v18  ;;  %v6530_v18 = vld [vmem:[#allocation2 + $0x18] sm:$0xff] }
 0x138   : > { %5193 = vmatprep.mubr.msk.f32.mxu1 %vm817_vm2, %v790_v20  ;;  %v6538_v20 = vld [vmem:[#allocation2 + $0x28] sm:$0xff] }
 0x13a   : > { %5160 = vmatmul.mubr.msk.f32.gmra.mxu0 %vm817_vm2, %v771_v60  ;;  %v803_v60 = vld [vmem:[%s6146_s29 + $0x78] sm:$0xff] }
 0x13b   : > { %5162 = vmatprep.mubr.msk.f32.mxu0 %vm817_vm2, %v772_v61  ;;  %5194 = vmatmul.mubr.msk.f32.gmra.mxu1 %vm817_vm2, %v791_v24 }
 0x13c   : > { %5196 = vmatprep.mubr.msk.f32.mxu1 %vm817_vm2, %v792_v26 }
 0x13e   : > { %5163 = vmatmul.mubr.msk.f32.gmra.mxu0 %vm817_vm2, %v773_v62 }
 0x13f   : > { %5165 = vmatprep.mubr.msk.f32.mxu0 %vm817_vm2, %v774_v63  ;;  %5197 = vmatmul.mubr.msk.f32.gmra.mxu1 %vm817_vm2, %v793_v30 }
 0x140   : > { %5199 = vmatprep.mubr.msk.f32.mxu1 %vm817_vm2, %v794_v32 }
 0x142   : > { %5166 = vmatmul.mubr.msk.f32.gmra.mxu0 %vm817_vm2, %v775_v0 }
 0x143   : > { %5168 = vmatprep.mubr.msk.f32.mxu0 %vm817_vm2, %v776_v1  ;;  %5200 = vmatmul.mubr.msk.f32.gmra.mxu1 %vm817_vm2, %v795_v36 }
 0x144   : > { %5202 = vmatprep.mubr.msk.f32.mxu1 %vm817_vm2, %v796_v38 }
 0x146   : > { %5169 = vmatmul.mubr.msk.f32.gmra.mxu0 %vm817_vm2, %v777_v2 }
 0x147   : > { %5171 = vmatprep.mubr.msk.f32.mxu0 %vm817_vm2, %v778_v3  ;;  %5203 = vmatmul.mubr.msk.f32.gmra.mxu1 %vm817_vm2, %v797_v42 }
 0x148   : > { %5205 = vmatprep.mubr.msk.f32.mxu1 %vm817_vm2, %v798_v44 }
 0x14a   : > { %5172 = vmatmul.mubr.msk.f32.gmra.mxu0 %vm817_vm2, %v779_v4 }
 0x14b   : > { %5246 = vmatprep.mubr.msk.f32.mxu0 %vm1291_vm3, %v6329_v5  ;;  %5206 = vmatmul.mubr.msk.f32.gmra.mxu1 %vm817_vm2, %v799_v48 }
 0x14c   : > { %5208 = vmatprep.mubr.msk.f32.mxu1 %vm817_vm2, %v800_v50 }
 0x14f   : > { %5209 = vmatmul.mubr.msk.f32.gmra.mxu1 %vm817_vm2, %v801_v54 }
 0x150   : > { %5211 = vmatprep.mubr.msk.f32.mxu1 %vm817_vm2, %v802_v56 }
 0x153   : > { %5212 = vmatmul.mubr.msk.f32.gmra.mxu1 %vm817_vm2, %v803_v60 }
 0x1ee   : > { %v5152_v16 = vpop.f32.mrf.mxu0 }
 0x1ef   : > { %v938_v17 = vadd.f32 %v5152_v16, %v6359_v14  ;;  %v6522_v16 = vld [vmem:[#allocation2 + $0x8] sm:$0xff] }
 0x1f0   : > { %v932_v19 = vpop.f32.mrf.mxu0 }
 0x1f1   : > { %1012 = vst.msk [vmem:[#allocation3 + $0x8] sm:$0xff] %vm817_vm2, %v938_v17  ;;  %v933_v21 = vadd.f32 %v6359_v14, %v932_v19  ;;  %v6524_v17 = vld [vmem:[#allocation2 + $0x10] sm:$0xff]  ;;  %v6532_v19 = vld [vmem:[#allocation2 + $0x20] sm:$0xff] }
 0x1f2   : > { %v5155_v22 = vpop.f32.mrf.mxu0 }
 0x1f3   : > { %1011 = vst.msk [vmem:[#allocation3] sm:$0xff] %vm817_vm2, %v933_v21  ;;  %v948_v23 = vadd.f32 %v5155_v22, %v6359_v14  ;;  %v6540_v21 = vld [vmem:[#allocation2 + $0x30] sm:$0xff]  ;;  %v6546_v22 = vld [vmem:[#allocation2 + $0x38] sm:$0xff] }
 0x1f4   : > { %v942_v25 = vpop.f32.mrf.mxu0 }
 0x1f5   : > { %1014 = vst.msk [vmem:[#allocation3 + $0x18] sm:$0xff] %vm817_vm2, %v948_v23  ;;  %v943_v27 = vadd.f32 %v6359_v14, %v942_v25  ;;  %v1241_v23 = vld [vmem:[%s415_s24] sm:$0xff] }
 0x1f6   : > { %v5158_v28 = vpop.f32.mrf.mxu0  ;;  %v1243_v24 = vunpack.c.0.s8 %v1241_v23  ;;  %v1246_v25 = vunpack.c.3.s8 %v1241_v23  ;;  %v1244_v26 = vunpack.c.1.s8 %v1241_v23 }
 0x1f7   : > { %1013 = vst.msk [vmem:[#allocation3 + $0x10] sm:$0xff] %vm817_vm2, %v943_v27  ;;  %v958_v29 = vadd.f32 %v5158_v28, %v6359_v14  ;;  %v1245_v27 = vunpack.c.2.s8 %v1241_v23 }
 0x1f8   : > { %v952_v31 = vpop.f32.mrf.mxu0  ;;  %v6552_v28 = vcvt.s32.f32 %v1243_v24  ;;  %v6556_v30 = vcvt.s32.f32 %v1246_v25 }
 0x1f9   : > { %1016 = vst.msk [vmem:[#allocation3 + $0x28] sm:$0xff] %vm817_vm2, %v958_v29  ;;  %v953_v33 = vadd.f32 %v6359_v14, %v952_v31  ;;  %v1242_v29 = vld [vmem:[%s415_s24 + $0x8] sm:$0xff]  ;;  %v6558_v31 = vcvt.s32.f32 %v1244_v26  ;;  %v6560_v32 = vcvt.s32.f32 %v1245_v27  ;;  %s5979_s24 = smov 112  }
 0x1fa   : > { %v5161_v34 = vpop.f32.mrf.mxu0  ;;  %v6516_v15 = vld [vmem:[#allocation3] sm:$0xff]  ;;  %vm1259_vm4 = vcmp.eq.f32.partialorder %v6552_v28, 0.0  ;;  %vm1262_vm5 = vcmp.eq.f32.partialorder %v6556_v30, 0.0  ;;  %v1250_v42 = vunpack.c.3.s8 %v1242_v29 }
 0x1fb   : > { %1015 = vst.msk [vmem:[#allocation3 + $0x20] sm:$0xff] %vm817_vm2, %v953_v33  ;;  %v968_v35 = vadd.f32 %v5161_v34, %v6359_v14  ;;  %v1247_v34 = vunpack.c.0.s8 %v1242_v29  ;;  %vm1260_vm6 = vcmp.eq.f32.partialorder %v6558_v31, 0.0  ;;  %vm1261_vm7 = vcmp.eq.f32.partialorder %v6560_v32, 0.0 }
 0x1fc   : > { %v962_v37 = vpop.f32.mrf.mxu0  ;;  %v6498_v12 = vld [vmem:[#allocation3 + $0x18] sm:$0xff] }
 0x1fd   : > { %1018 = vst.msk [vmem:[#allocation3 + $0x38] sm:$0xff] %vm817_vm2, %v968_v35  ;;  %v963_v39 = vadd.f32 %v6359_v14, %v962_v37  ;;  %v1248_v35 = vunpack.c.1.s8 %v1242_v29 }
 0x1fe   : > { %v5164_v40 = vpop.f32.mrf.mxu0  ;;  %v6504_v13 = vld [vmem:[#allocation3 + $0x10] sm:$0xff] }
 0x1ff   : > { %1017 = vst.msk [vmem:[#allocation3 + $0x30] sm:$0xff] %vm817_vm2, %v963_v39  ;;  %v978_v41 = vadd.f32 %v5164_v40, %v6359_v14  ;;  %v6571_v39 = vcvt.s32.f32 %v1247_v34  ;;  %v6573_v40 = vcvt.s32.f32 %v1248_v35 }
 0x200   : > { %v972_v43 = vpop.f32.mrf.mxu0  ;;  %v6486_v10 = vld [vmem:[#allocation3 + $0x28] sm:$0xff] }
 0x201   : > { %1020 = vst.msk [vmem:[#allocation3 + $0x48] sm:$0xff] %vm817_vm2, %v978_v41  ;;  %v973_v45 = vadd.f32 %v6359_v14, %v972_v43  ;;  %8302 = vst [vmem:[#allocation15_spill] sm:$0xff] %v6571_v39  ;;  %v1249_v41 = vunpack.c.2.s8 %v1242_v29  ;;  %vm1263_vm8 = vcmp.eq.f32.partialorder %v6571_v39, 0.0  ;;  %vm1264_vm9 = vcmp.eq.f32.partialorder %v6573_v40, 0.0 }
 0x202   : > { %v5167_v46 = vpop.f32.mrf.mxu0  ;;  %v6492_v11 = vld [vmem:[#allocation3 + $0x20] sm:$0xff] }
 0x203   : > { %1019 = vst.msk [vmem:[#allocation3 + $0x40] sm:$0xff] %vm817_vm2, %v973_v45  ;;  %v988_v47 = vadd.f32 %v5167_v46, %v6359_v14  ;;  %v6591_v48 = vcvt.s32.f32 %v1249_v41 }
 0x204   : > { %v982_v49 = vpop.f32.mrf.mxu0  ;;  %v6474_v8 = vld [vmem:[#allocation3 + $0x38] sm:$0xff] }
 0x205   : > { %1022 = vst.msk [vmem:[#allocation3 + $0x58] sm:$0xff] %vm817_vm2, %v988_v47  ;;  %v983_v51 = vadd.f32 %v6359_v14, %v982_v49  ;;  %8303 = vst [vmem:[#allocation16_spill] sm:$0xff] %v6591_v48  ;;  %v6593_v49 = vcvt.s32.f32 %v1250_v42  ;;  %vm1265_vm10 = vcmp.eq.f32.partialorder %v6591_v48, 0.0 }
 0x206   : > { %v5170_v52 = vpop.f32.mrf.mxu0  ;;  %v6480_v9 = vld [vmem:[#allocation3 + $0x30] sm:$0xff] }
 0x207   : > { %1021 = vst.msk [vmem:[#allocation3 + $0x50] sm:$0xff] %vm817_vm2, %v983_v51  ;;  %v998_v53 = vadd.f32 %v5170_v52, %v6359_v14  ;;  %8304 = vst [vmem:[#allocation17_spill] sm:$0xff] %v6593_v49  ;;  %vm1266_vm11 = vcmp.eq.f32.partialorder %v6593_v49, 0.0 }
 0x208   : > { %v992_v55 = vpop.f32.mrf.mxu0  ;;  %v6462_v6 = vld [vmem:[#allocation3 + $0x48] sm:$0xff] }
 0x209   : > { %1024 = vst.msk [vmem:[#allocation3 + $0x68] sm:$0xff] %vm817_vm2, %v998_v53  ;;  %v993_v57 = vadd.f32 %v6359_v14, %v992_v55 }
 0x20a   : > { %v5173_v58 = vpop.f32.mrf.mxu0  ;;  %v6468_v7 = vld [vmem:[#allocation3 + $0x40] sm:$0xff] }
 0x20b   : > { %1023 = vst.msk [vmem:[#allocation3 + $0x60] sm:$0xff] %vm817_vm2, %v993_v57  ;;  %v1008_v59 = vadd.f32 %v5173_v58, %v6359_v14  ;;  %v5978_v57 = vmov 0   ;;  %v5192_v58 = vpop.f32.mrf.mxu1 }
 0x20c   : > { %v1002_v61 = vpop.f32.mrf.mxu0  ;;  %v6450_v3 = vld [vmem:[#allocation3 + $0x58] sm:$0xff]  ;;  %5708 = vset.pattern.permute.xlu0 %v5978_v57  ;;  %5709 = vset.pattern.permute.xlu1 %v5978_v57 }
 0x20d   : > { %1026 = vst.msk [vmem:[#allocation3 + $0x78] sm:$0xff] %vm817_vm2, %v1008_v59  ;;  %v1003_v62 = vadd.f32 %v6359_v14, %v1002_v61  ;;  %v6510_v14 = vld [vmem:[#allocation3 + $0x8] sm:$0xff]  ;;  %v4708_v59 = vld [vmem:[%s8234_s8 + $0x2] ss:$0 sm:$0xff]  ;;  %v1146_v61 = vpop.f32.mrf.mxu1 }
 0x20e   : > { %v6456_v4 = vld [vmem:[#allocation3 + $0x50] sm:$0xff]  ;;  %v1152_v60 = vadd.f32 %v5192_v58, %v4708_v59 }
 0x20f   : > { %1025 = vst.msk [vmem:[#allocation3 + $0x70] sm:$0xff] %vm817_vm2, %v1003_v62  ;;  %v1147_v62 = vadd.f32 %v4708_v59, %v1146_v61  ;;  %v5195_v23 = vpop.f32.mrf.mxu1 }
 0x210   : > { %v6438_v1 = vld [vmem:[#allocation3 + $0x68] sm:$0xff]  ;;  %1226 = vst.msk [vmem:[#allocation4 + $0x8] sm:$0xff] %vm817_vm2, %v1152_v60  ;;  %v1162_v24 = vadd.f32 %v5195_v23, %v4708_v59 }
 0x211   : > { %1225 = vst.msk [vmem:[#allocation4] sm:$0xff] %vm817_vm2, %v1147_v62  ;;  %v1156_v25 = vpop.f32.mrf.mxu1 }
 0x212   : > { %v6444_v2 = vld [vmem:[#allocation3 + $0x60] sm:$0xff]  ;;  %1228 = vst.msk [vmem:[#allocation4 + $0x18] sm:$0xff] %vm817_vm2, %v1162_v24  ;;  %v1157_v26 = vadd.f32 %v4708_v59, %v1156_v25 }
 0x213   : > { %v5198_v27 = vpop.f32.mrf.mxu1 }
 0x214   : > { %v6426_v63 = vld [vmem:[#allocation3 + $0x78] sm:$0xff]  ;;  %1227 = vst.msk [vmem:[#allocation4 + $0x10] sm:$0xff] %vm817_vm2, %v1157_v26  ;;  %v1172_v29 = vadd.f32 %v5198_v27, %v4708_v59 }
 0x215   : > { %5214 = vmatprep.subr.msk.mxu0 %vm1291_vm3, %v6426_v63 }
 0x216   : > { %5215 = vmatpush3.xpose.msk.msra.mxu0 %vm1291_vm3, %v6426_v63  ;;  %v6432_v0 = vld [vmem:[#allocation3 + $0x70] sm:$0xff]  ;;  %1230 = vst.msk [vmem:[#allocation4 + $0x28] sm:$0xff] %vm817_vm2, %v1172_v29 }
 0x217   : > { %5216 = vmatprep.subr.msk.mxu0 %vm1291_vm3, %v6432_v0 }
 0x21a   : > { %5217 = vmatpush3.xpose.msk.msra.mxu0 %vm1291_vm3, %v6432_v0 }
 0x21b   : > { %5218 = vmatprep.subr.msk.mxu0 %vm1291_vm3, %v6438_v1 }
 0x21e   : > { %5219 = vmatpush3.xpose.msk.msra.mxu0 %vm1291_vm3, %v6438_v1 }
 0x21f   : > { %5220 = vmatprep.subr.msk.mxu0 %vm1291_vm3, %v6444_v2 }
 0x222   : > { %5221 = vmatpush3.xpose.msk.msra.mxu0 %vm1291_vm3, %v6444_v2 }
 0x223   : > { %5222 = vmatprep.subr.msk.mxu0 %vm1291_vm3, %v6450_v3 }
 0x226   : > { %5223 = vmatpush3.xpose.msk.msra.mxu0 %vm1291_vm3, %v6450_v3 }
 0x227   : > { %5224 = vmatprep.subr.msk.mxu0 %vm1291_vm3, %v6456_v4 }
 0x22a   : > { %5225 = vmatpush3.xpose.msk.msra.mxu0 %vm1291_vm3, %v6456_v4 }
 0x22b   : > { %5226 = vmatprep.subr.msk.mxu0 %vm1291_vm3, %v6462_v6 }
 0x22e   : > { %5227 = vmatpush3.xpose.msk.msra.mxu0 %vm1291_vm3, %v6462_v6 }
 0x22f   : > { %5228 = vmatprep.subr.msk.mxu0 %vm1291_vm3, %v6468_v7 }
 0x232   : > { %5229 = vmatpush3.xpose.msk.msra.mxu0 %vm1291_vm3, %v6468_v7 }
 0x233   : > { %5230 = vmatprep.subr.msk.mxu0 %vm1291_vm3, %v6474_v8 }
 0x236   : > { %5231 = vmatpush3.xpose.msk.msra.mxu0 %vm1291_vm3, %v6474_v8 }
 0x237   : > { %5232 = vmatprep.subr.msk.mxu0 %vm1291_vm3, %v6480_v9 }
 0x23a   : > { %5233 = vmatpush3.xpose.msk.msra.mxu0 %vm1291_vm3, %v6480_v9 }
 0x23b   : > { %5234 = vmatprep.subr.msk.mxu0 %vm1291_vm3, %v6486_v10 }
 0x23e   : > { %5235 = vmatpush3.xpose.msk.msra.mxu0 %vm1291_vm3, %v6486_v10 }
 0x23f   : > { %5236 = vmatprep.subr.msk.mxu0 %vm1291_vm3, %v6492_v11 }
 0x242   : > { %5237 = vmatpush3.xpose.msk.msra.mxu0 %vm1291_vm3, %v6492_v11 }
 0x243   : > { %5238 = vmatprep.subr.msk.mxu0 %vm1291_vm3, %v6498_v12 }
 0x246   : > { %5239 = vmatpush3.xpose.msk.msra.mxu0 %vm1291_vm3, %v6498_v12 }
 0x247   : > { %5240 = vmatprep.subr.msk.mxu0 %vm1291_vm3, %v6504_v13 }
 0x24a   : > { %5241 = vmatpush3.xpose.msk.msra.mxu0 %vm1291_vm3, %v6504_v13 }
 0x24b   : > { %5242 = vmatprep.subr.msk.mxu0 %vm1291_vm3, %v6510_v14 }
 0x24e   : > { %5243 = vmatpush3.xpose.msk.msra.mxu0 %vm1291_vm3, %v6510_v14 }
 0x24f   : > { %5244 = vmatprep.subr.msk.mxu0 %vm1291_vm3, %v6516_v15 }
 0x252   : > { %5245 = vmatpush3.xpose.msk.msra.mxu0 %vm1291_vm3, %v6516_v15 }
 0x255   : > { %5247 = vmatmul.mubr.msk.f32.vlgmr.msra.gmra.mxu0 %vm1291_vm3, %v6522_v16 }
 0x256   : > { %5249 = vmatprep.mubr.msk.f32.mxu0 %vm1291_vm3, %v6524_v17 }
 0x259   : > { %5250 = vmatmul.mubr.msk.f32.gmra.mxu0 %vm1291_vm3, %v6530_v18 }
 0x25a   : > { %5252 = vmatprep.mubr.msk.f32.mxu0 %vm1291_vm3, %v6532_v19 }
 0x25d   : > { %5253 = vmatmul.mubr.msk.f32.gmra.mxu0 %vm1291_vm3, %v6538_v20 }
 0x25e   : > { %5255 = vmatprep.mubr.msk.f32.mxu0 %vm1291_vm3, %v6540_v21 }
 0x261   : > { %5256 = vmatmul.mubr.msk.f32.gmra.mxu0 %vm1291_vm3, %v6546_v22 }
 0x315   : > { %v5248_v33 = vpop.f32.mrf.mxu0 }
 0x316   : > { %v6582_v45 = vsel %vm1260_vm6, -1.25e+19, %v5248_v33  ;;  %v1166_v33 = vpop.f32.mrf.mxu1 }
 0x317   : > { %v1430_v36 = vpop.f32.mrf.mxu0  ;;  %v1167_v34 = vadd.f32 %v4708_v59, %v1166_v33 }
 0x318   : > { %v6566_v37 = vsel %vm1259_vm4, -1.25e+19, %v1430_v36  ;;  %v5201_v35 = vpop.f32.mrf.mxu1 }
 0x319   : > { %1485 = vmax.xlane.f32.xlu0 %v6566_v37  ;;  %v5251_v38 = vpop.f32.mrf.mxu0  ;;  %1229 = vst.msk [vmem:[#allocation4 + $0x20] sm:$0xff] %vm817_vm2, %v1167_v34  ;;  %v1182_v36 = vadd.f32 %v5201_v35, %v4708_v59 }
 0x31a   : > { %v6577_v43 = vsel %vm1262_vm5, -1.25e+19, %v5251_v38  ;;  %v1176_v38 = vpop.f32.mrf.mxu1 }
 0x31b   : > { %1491 = vmax.xlane.f32.xlu1 %v6577_v43  ;;  %v1440_v44 = vpop.f32.mrf.mxu0  ;;  %1232 = vst.msk [vmem:[#allocation4 + $0x38] sm:$0xff] %vm817_vm2, %v1182_v36  ;;  %v1177_v41 = vadd.f32 %v4708_v59, %v1176_v38 }
 0x31c   : > { %v6586_v46 = vsel %vm1261_vm7, -1.25e+19, %v1440_v44  ;;  %v5204_v42 = vpop.f32.mrf.mxu1 }
 0x31d   : > { %1487 = vmax.xlane.f32.xlu0 %v6582_v45  ;;  %v5254_v47 = vpop.f32.mrf.mxu0  ;;  %1231 = vst.msk [vmem:[#allocation4 + $0x30] sm:$0xff] %vm817_vm2, %v1177_v41  ;;  %v1192_v44 = vadd.f32 %v5204_v42, %v4708_v59 }
 0x31e   : > { %v6602_v52 = vsel %vm1264_vm9, -1.25e+19, %v5254_v47  ;;  %v1186_v47 = vpop.f32.mrf.mxu1 }
 0x31f   : > { %1489 = vmax.xlane.f32.xlu1 %v6586_v46  ;;  %v1450_v50 = vpop.f32.mrf.mxu0  ;;  %1234 = vst.msk [vmem:[#allocation4 + $0x48] sm:$0xff] %vm817_vm2, %v1192_v44 }
 0x320   : > { %v6598_v51 = vsel %vm1263_vm8, -1.25e+19, %v1450_v50  ;;  %v1187_v50 = vadd.f32 %v4708_v59, %v1186_v47  ;;  %v6675_v47 = vld [vmem:[#allocation4 + $0x28] sm:$0xff] }
 0x321   : > { %1493 = vmax.xlane.f32.xlu0 %v6598_v51  ;;  %v5257_v53 = vpop.f32.mrf.mxu0 }
 0x322   : > { %v6614_v56 = vsel %vm1266_vm11, -1.25e+19, %v5257_v53  ;;  %v5207_v53 = vpop.f32.mrf.mxu1  ;;  %1233 = vst.msk [vmem:[#allocation4 + $0x40] sm:$0xff] %vm817_vm2, %v1187_v50  ;;  %v6667_v42 = vld [vmem:[#allocation4 + $0x38] sm:$0xff]  ;;  %v6679_v50 = vld [vmem:[#allocation4 + $0x20] sm:$0xff] }
 0x323   : > { %v1460_v54 = vpop.f32.mrf.mxu0  ;;  %1495 = vmax.xlane.f32.xlu1 %v6602_v52  ;;  %8305 = vst [vmem:[#allocation18_spill] sm:$0xff] %v6679_v50  ;;  %v7353_v39 = vld [vmem:[#allocation4 + $0x38] sm:$0xff] }
 0x324   : > { %v6610_v55 = vsel %vm1265_vm10, -1.25e+19, %v1460_v54  ;;  %v1202_v54 = vadd.f32 %v5207_v53, %v4708_v59  ;;  %v1196_v57 = vpop.f32.mrf.mxu1  ;;  %v6671_v44 = vld [vmem:[#allocation4 + $0x30] sm:$0xff]  ;;  %v6683_v53 = vld [vmem:[#allocation4 + $0x18] sm:$0xff]  ;;  %8365 = vst [vmem:[#allocation70_spill] sm:$0xff] %v7353_v39 }
 0x325   : > { %1497 = vmax.xlane.f32.xlu0 %v6610_v55  ;;  %v1197_v58 = vadd.f32 %v4708_v59, %v1196_v57  ;;  %v6691_v57 = vld [vmem:[#allocation4 + $0x8] sm:$0xff] }
 0x326   : > { %1236 = vst.msk [vmem:[#allocation4 + $0x58] sm:$0xff] %vm817_vm2, %v1202_v54  ;;  %v5210_v60 = vpop.f32.mrf.mxu1  ;;  %v6659_v38 = vld [vmem:[#allocation4 + $0x48] sm:$0xff]  ;;  %v6687_v54 = vld [vmem:[#allocation4 + $0x10] sm:$0xff]  ;;  %8307 = vst [vmem:[#allocation20_spill] sm:$0xff] %v6691_v57 }
 0x327   : > { %1499 = vmax.xlane.f32.xlu1 %v6614_v56  ;;  %1235 = vst.msk [vmem:[#allocation4 + $0x50] sm:$0xff] %vm817_vm2, %v1197_v58  ;;  %v1212_v61 = vadd.f32 %v5210_v60, %v4708_v59  ;;  %8306 = vst [vmem:[#allocation19_spill] sm:$0xff] %v6687_v54  ;;  %v6695_v58 = vld [vmem:[#allocation4] sm:$0xff]  ;;  %v7345_v48 = vld [vmem:[#allocation4 + $0x48] sm:$0xff] }
 0x328   : > { %v1206_v62 = vpop.f32.mrf.mxu1  ;;  %8308 = vst [vmem:[#allocation21_spill] sm:$0xff] %v6695_v58  ;;  %v6701_v60 = vld [vmem:[#allocation5] sm:$0xff] }
 0x329   : > { %1238 = vst.msk [vmem:[#allocation4 + $0x68] sm:$0xff] %vm817_vm2, %v1212_v61  ;;  %v1207_v23 = vadd.f32 %v4708_v59, %v1206_v62  ;;  %v6663_v41 = vld [vmem:[#allocation4 + $0x40] sm:$0xff]  ;;  %8309 = vst [vmem:[#allocation22_spill] sm:$0xff] %v6701_v60  ;;  %v6703_v62 = vld [vmem:[#allocation5 + $0x18] sm:$0xff] }
 0x32a   : > { %v5213_v24 = vpop.f32.mrf.mxu1  ;;  %8310 = vst [vmem:[#allocation23_spill] sm:$0xff] %v6703_v62 }
 0x32b   : > { %1237 = vst.msk [vmem:[#allocation4 + $0x60] sm:$0xff] %vm817_vm2, %v1207_v23  ;;  %v1222_v25 = vadd.f32 %v5213_v24, %v4708_v59  ;;  %v6708_v24 = vld [vmem:[#allocation5 + $0x8] sm:$0xff] }
 0x32c   : > { %v1216_v26 = vpop.f32.mrf.mxu1  ;;  %8312 = vst [vmem:[#allocation25_spill] sm:$0xff] %v6708_v24 }
 0x32d   : > { %1240 = vst.msk [vmem:[#allocation4 + $0x78] sm:$0xff] %vm817_vm2, %v1222_v25  ;;  %v1217_v27 = vadd.f32 %v4708_v59, %v1216_v26  ;;  %v6652_v59 = vld [vmem:[#allocation4 + $0x58] sm:$0xff] }
 0x32e   : > { %v6655_v36 = vld [vmem:[#allocation4 + $0x50] sm:$0xff] }
 0x32f   : > { %1239 = vst.msk [vmem:[#allocation4 + $0x70] sm:$0xff] %vm817_vm2, %v1217_v27 }
 0x330   : > { %v6644_v34 = vld [vmem:[#allocation4 + $0x68] sm:$0xff] }
 0x332   : > { %v6647_v35 = vld [vmem:[#allocation4 + $0x60] sm:$0xff] }
 0x334   : > { %v6637_v29 = vld [vmem:[#allocation4 + $0x78] sm:$0xff] }
 0x335   : > { %5258 = vmatprep.subr.mxu1 %v6637_v29 }
 0x336   : > { %5259 = vmatpush3.msra.mxu1 %v6637_v29  ;;  %v6641_v33 = vld [vmem:[#allocation4 + $0x70] sm:$0xff] }
 0x337   : > { %5260 = vmatprep.subr.mxu1 %v6641_v33 }
 0x338   : > { %5261 = vmatpush3.msra.mxu1 %v6641_v33 }
 0x339   : > { %5262 = vmatprep.subr.mxu1 %v6644_v34 }
 0x33a   : > { %5263 = vmatpush3.msra.mxu1 %v6644_v34 }
 0x33b   : > { %5264 = vmatprep.subr.mxu1 %v6647_v35 }
 0x33c   : > { %5265 = vmatpush3.msra.mxu1 %v6647_v35 }
 0x33d   : > { %5266 = vmatprep.subr.mxu1 %v6652_v59 }
 0x33e   : > { %5267 = vmatpush3.msra.mxu1 %v6652_v59 }
 0x33f   : > { %5268 = vmatprep.subr.mxu1 %v6655_v36 }
 0x340   : > { %5269 = vmatpush3.msra.mxu1 %v6655_v36 }
 0x341   : > { %5270 = vmatprep.subr.mxu1 %v6659_v38 }
 0x342   : > { %5271 = vmatpush3.msra.mxu1 %v6659_v38 }
 0x343   : > { %5272 = vmatprep.subr.mxu1 %v6663_v41 }
 0x344   : > { %5273 = vmatpush3.msra.mxu1 %v6663_v41 }
 0x345   : > { %5274 = vmatprep.subr.mxu1 %v6667_v42 }
 0x346   : > { %5275 = vmatpush3.msra.mxu1 %v6667_v42 }
 0x347   : > { %5276 = vmatprep.subr.mxu1 %v6671_v44 }
 0x348   : > { %5277 = vmatpush3.msra.mxu1 %v6671_v44 }
 0x349   : > { %5278 = vmatprep.subr.mxu1 %v6675_v47 }
 0x34a   : > { %5279 = vmatpush3.msra.mxu1 %v6675_v47 }
 0x34b   : > { %5280 = vmatprep.subr.mxu1 %v6679_v50 }
 0x34c   : > { %5281 = vmatpush3.msra.mxu1 %v6679_v50  ;;  %v6747_v50 = vld [vmem:[#allocation5 + $0x30] sm:$0xff] }
 0x34d   : > { %5282 = vmatprep.subr.mxu1 %v6683_v53  ;;  %8317 = vst [vmem:[#allocation30_spill] sm:$0xff] %v6747_v50 }
 0x34e   : > { %5283 = vmatpush3.msra.mxu1 %v6683_v53 }
 0x34f   : > { %5284 = vmatprep.subr.mxu1 %v6687_v54 }
 0x350   : > { %5285 = vmatpush3.msra.mxu1 %v6687_v54  ;;  %v6718_v54 = vld [vmem:[#allocation5 + $0x10] sm:$0xff] }
 0x351   : > { %5286 = vmatprep.subr.mxu1 %v6691_v57  ;;  %8313 = vst [vmem:[#allocation26_spill] sm:$0xff] %v6718_v54 }
 0x352   : > { %5287 = vmatpush3.msra.mxu1 %v6691_v57  ;;  %v6738_v57 = vld [vmem:[#allocation5 + $0x28] sm:$0xff] }
 0x353   : > { %5288 = vmatprep.subr.mxu1 %v6695_v58  ;;  %8316 = vst [vmem:[#allocation29_spill] sm:$0xff] %v6738_v57 }
 0x354   : > { %5289 = vmatpush3.msra.mxu1 %v6695_v58 }
 0x3a2   : > { %v1486_v61 = vpop.xlane.xlu0 %1485 }
 0x3a3   : > { %v6706_v23 = vmax.f32 %v6701_v60, %v1486_v61  ;;  %v6727_v60 = vld [vmem:[#allocation5 + $0x20] sm:$0xff] }
 0x3a4   : > { %v1492_v25 = vpop.xlane.xlu1 %1491 }
 0x3a5   : > { %8311 = vst [vmem:[#allocation24_spill] sm:$0xff] %v6706_v23  ;;  %1839 = vst.msk [vmem:[#allocation5] sm:$0xff] %vm1637_vm12, %v6706_v23  ;;  %1535 = vperm.xlu0 %5708, %v6706_v23   ;;  %v6716_v27 = vmax.f32 %v6703_v62, %v1492_v25 }
 0x3a6   : > { %v1488_v58 = vpop.xlane.xlu0 %1487 }
 0x3a7   : > { %v6721_v61 = vmax.f32 %v6708_v24, %v1488_v58  ;;  %1842 = vst.msk [vmem:[#allocation5 + $0x18] sm:$0xff] %vm1637_vm12, %v6716_v27 }
 0x3a8   : > { %v1490_v26 = vpop.xlane.xlu1 %1489 }
 0x3a9   : > { %8314 = vst [vmem:[#allocation27_spill] sm:$0xff] %v6721_v61  ;;  %1840 = vst.msk [vmem:[#allocation5 + $0x8] sm:$0xff] %vm1637_vm12, %v6721_v61  ;;  %1540 = vperm.xlu1 %5709, %v6721_v61   ;;  %1550 = vperm.xlu0 %5708, %v6716_v27   ;;  %v6736_v58 = vmax.f32 %v6718_v54, %v1490_v26  ;;  %v6759_v54 = vld [vmem:[#allocation5 + $0x38] sm:$0xff] }
 0x3aa   : > { %v1494_v25 = vpop.xlane.xlu0 %1493  ;;  %8319 = vst [vmem:[#allocation32_spill] sm:$0xff] %v6759_v54 }
 0x3ab   : > { %8315 = vst [vmem:[#allocation28_spill] sm:$0xff] %v6736_v58  ;;  %1841 = vst.msk [vmem:[#allocation5 + $0x10] sm:$0xff] %vm1637_vm12, %v6736_v58  ;;  %v6745_v23 = vmax.f32 %v6727_v60, %v1494_v25 }
 0x3ac   : > { %v1496_v24 = vpop.xlane.xlu1 %1495 }
 0x3ad   : > { %1941 = vrot.lane.b32.xlu1 %v6426_v63, %s5979_s24  ;;  %1545 = vperm.xlu0 %5708, %v6736_v58   ;;  %1843 = vst.msk [vmem:[#allocation5 + $0x20] sm:$0xff] %vm1637_vm12, %v6745_v23  ;;  %v6757_v62 = vmax.f32 %v6738_v57, %v1496_v24 }
 0x3ae   : > { %v1498_v25 = vpop.xlane.xlu0 %1497 }
 0x3af   : > { %8318 = vst [vmem:[#allocation31_spill] sm:$0xff] %v6757_v62  ;;  %1844 = vst.msk [vmem:[#allocation5 + $0x28] sm:$0xff] %vm1637_vm12, %v6757_v62  ;;  %v6766_v63 = vmax.f32 %v6747_v50, %v1498_v25  ;;  %v7066_v25 = vld [vmem:[#allocation5 + $0x60] sm:$0xff] }
 0x3b0   : > { %v1500_v58 = vpop.xlane.xlu1 %1499 }
 0x3b1   : > { %8320 = vst [vmem:[#allocation33_spill] sm:$0xff] %v6766_v63  ;;  %1939 = vrot.lane.b32.xlu1 %v6432_v0, %s5979_s24  ;;  %1925 = vrot.lane.b32.xlu0 %v6474_v8, %s5979_s24  ;;  %1845 = vst.msk [vmem:[#allocation5 + $0x30] sm:$0xff] %vm1637_vm12, %v6766_v63  ;;  %v6777_v61 = vmax.f32 %v6759_v54, %v1500_v58 }
 0x3b3   : > { %8321 = vst [vmem:[#allocation34_spill] sm:$0xff] %v6777_v61  ;;  %1846 = vst.msk [vmem:[#allocation5 + $0x38] sm:$0xff] %vm1637_vm12, %v6777_v61 }
 0x3b5   : > { %1937 = vrot.lane.b32.xlu1 %v6438_v1, %s5979_s24  ;;  %1565 = vperm.xlu0 %5708, %v6766_v63  }
 0x3b9   : > { %1935 = vrot.lane.b32.xlu1 %v6444_v2, %s5979_s24  ;;  %1570 = vperm.xlu0 %5708, %v6777_v61  }
 0x3bd   : > { %1933 = vrot.lane.b32.xlu1 %v6450_v3, %s5979_s24  ;;  %1919 = vrot.lane.b32.xlu0 %v6492_v11, %s5979_s24 }
 0x3c1   : > { %1931 = vrot.lane.b32.xlu1 %v6456_v4, %s5979_s24  ;;  %1915 = vrot.lane.b32.xlu0 %v6504_v13, %s5979_s24 }
 0x3c5   : > { %1929 = vrot.lane.b32.xlu1 %v6462_v6, %s5979_s24  ;;  %1911 = vrot.lane.b32.xlu0 %v6516_v15, %s5979_s24 }
 0x3c9   : > { %1927 = vrot.lane.b32.xlu1 %v6468_v7, %s5979_s24  ;;  %1881 = vrot.lane.b32.xlu0 %v6522_v16, %s5979_s24 }
 0x3cd   : > { %1560 = vperm.xlu1 %5709, %v6757_v62   ;;  %1885 = vrot.lane.b32.xlu0 %v6530_v18, %s5979_s24 }
 0x3d1   : > { %1555 = vperm.xlu1 %5709, %v6745_v23   ;;  %1889 = vrot.lane.b32.xlu0 %v6538_v20, %s5979_s24 }
 0x3d5   : > { %1923 = vrot.lane.b32.xlu1 %v6480_v9, %s5979_s24  ;;  %1893 = vrot.lane.b32.xlu0 %v6546_v22, %s5979_s24 }
 0x3d9   : > { %1921 = vrot.lane.b32.xlu1 %v6486_v10, %s5979_s24  ;;  %2392 = vrot.lane.b32.xlu0 %v6637_v29, %s5979_s24 }
 0x3dd   : > { %1917 = vrot.lane.b32.xlu1 %v6498_v12, %s5979_s24 }
 0x3e1   : > { %1913 = vrot.lane.b32.xlu1 %v6510_v14, %s5979_s24 }
 0x3e5   : > { %1879 = vrot.lane.b32.xlu1 %v6329_v5, %s5979_s24 }
 0x3e9   : > { %1883 = vrot.lane.b32.xlu1 %v6524_v17, %s5979_s24 }
 0x3ed   : > { %1887 = vrot.lane.b32.xlu1 %v6532_v19, %s5979_s24 }
 0x3f1   : > { %1891 = vrot.lane.b32.xlu1 %v6540_v21, %s5979_s24 }
 0x3f5   : > { %2390 = vrot.lane.b32.xlu1 %v6641_v33, %s5979_s24 }
 0x3f9   : > { %2388 = vrot.lane.b32.xlu1 %v6644_v34, %s5979_s24 }
 0x420   : > { %v1536_v0 = vpop.permute.xlu0 %1535 }
 0x421   : > { %v1573_v1 = vsub.f32 %v6566_v37, %v1536_v0 }
 0x423   : > { %v1581_v2 = vmul.f32 1.442695, %v1573_v1 }
 0x424   : > { %v1541_v5 = vpop.permute.xlu1 %1540  ;;  %v1551_v3 = vpop.permute.xlu0 %1550 }
 0x425   : > { %5710 = vpow2.f32 %v1581_v2  ;;  %v1574_v4 = vsub.f32 %v6582_v45, %v1541_v5  ;;  %v1576_v7 = vsub.f32 %v6577_v43, %v1551_v3 }
 0x427   : > { %v1583_v6 = vmul.f32 1.442695, %v1574_v4  ;;  %v1587_v11 = vmul.f32 1.442695, %v1576_v7 }
 0x428   : > { %v1942_v8 = vpop.permute.xlu1 %1941  ;;  %v1546_v9 = vpop.permute.xlu0 %1545 }
 0x429   : > { %5712 = vpow2.f32 %v1583_v6  ;;  %v1575_v10 = vsub.f32 %v6586_v46, %v1546_v9  ;;  %5302 = vmatprep.subr.msk.mxu1 %vm1291_vm3, %v1942_v8 }
 0x42b   : > { %v1585_v12 = vmul.f32 1.442695, %v1575_v10 }
 0x42c   : > { %v1940_v13 = vpop.permute.xlu1 %1939  ;;  %v1926_v14 = vpop.permute.xlu0 %1925 }
 0x42d   : > { %5714 = vpow2.f32 %v1585_v12 }
 0x42e   : > { %5716 = vpow2.f32 %v1587_v11 }
 0x430   : > { %v1938_v15 = vpop.permute.xlu1 %1937  ;;  %v1566_v16 = vpop.permute.xlu0 %1565 }
 0x431   : > { %v1579_v6 = vsub.f32 %v6610_v55, %v1566_v16 }
 0x432   : > { %v6840_v17 = vpop.eup %5710 }
 0x433   : > { %5290 = vmatprep.mubr.f32.mxu1 %v6840_v17 }
 0x434   : > { %v1936_v18 = vpop.permute.xlu1 %1935  ;;  %v1571_v19 = vpop.permute.xlu0 %1570 }
 0x435   : > { %v1580_v10 = vsub.f32 %v6614_v56, %v1571_v19 }
 0x436   : > { %v6843_v20 = vpop.eup %5712 }
 0x437   : > { %5291 = vmatmul.mubr.f32.vlgmr.msra.gmra.mxu1 %v6843_v20 }
 0x438   : > { %5303 = vmatpush3.xpose.msk.msra.mxu1 %vm1291_vm3, %v1942_v8  ;;  %v1934_v21 = vpop.permute.xlu1 %1933  ;;  %v6847_v22 = vpop.permute.xlu0 %1919 }
 0x439   : > { %5304 = vmatprep.subr.msk.mxu1 %vm1291_vm3, %v1940_v13 }
 0x43a   : > { %v6850_v37 = vpop.eup %5714 }
 0x43b   : > { %5293 = vmatprep.mubr.f32.mxu1 %v6850_v37  ;;  %v6853_v43 = vpop.eup %5716 }
 0x43c   : > { %5305 = vmatpush3.xpose.msk.msra.mxu1 %vm1291_vm3, %v1940_v13  ;;  %v1932_v45 = vpop.permute.xlu1 %1931  ;;  %v6856_v46 = vpop.permute.xlu0 %1915  ;;  %v1593_v13 = vmul.f32 1.442695, %v1579_v6 }
 0x43d   : > { %5294 = vmatmul.mubr.f32.gmra.mxu1 %v6853_v43  ;;  %5306 = vmatprep.subr.msk.mxu1 %vm1291_vm3, %v1938_v15 }
 0x440   : > { %5307 = vmatpush3.xpose.msk.msra.mxu1 %vm1291_vm3, %v1938_v15  ;;  %v1930_v58 = vpop.permute.xlu1 %1929  ;;  %v6861_v0 = vpop.permute.xlu0 %1911 }
 0x441   : > { %5308 = vmatprep.subr.msk.mxu1 %vm1291_vm3, %v1936_v18 }
 0x444   : > { %5309 = vmatpush3.xpose.msk.msra.mxu1 %vm1291_vm3, %v1936_v18  ;;  %v1928_v1 = vpop.permute.xlu1 %1927  ;;  %v6865_v2 = vpop.permute.xlu0 %1881 }
 0x445   : > { %5310 = vmatprep.subr.msk.mxu1 %vm1291_vm3, %v1934_v21 }
 0x448   : > { %5311 = vmatpush3.xpose.msk.msra.mxu1 %vm1291_vm3, %v1934_v21  ;;  %v1561_v5 = vpop.permute.xlu1 %1560  ;;  %v6869_v3 = vpop.permute.xlu0 %1885 }
 0x449   : > { %5312 = vmatprep.subr.msk.mxu1 %vm1291_vm3, %v1932_v45  ;;  %v1578_v4 = vsub.f32 %v6602_v52, %v1561_v5  ;;  %v1595_v52 = vmul.f32 1.442695, %v1580_v10 }
 0x44b   : > { %v1591_v11 = vmul.f32 1.442695, %v1578_v4 }
 0x44c   : > { %5313 = vmatpush3.xpose.msk.msra.mxu1 %vm1291_vm3, %v1932_v45  ;;  %v1556_v7 = vpop.permute.xlu1 %1555  ;;  %v1890_v8 = vpop.permute.xlu0 %1889 }
 0x44d   : > { %v1577_v9 = vsub.f32 %v6598_v51, %v1556_v7  ;;  %5314 = vmatprep.subr.msk.mxu1 %vm1291_vm3, %v1930_v58 }
 0x44f   : > { %v1589_v12 = vmul.f32 1.442695, %v1577_v9 }
 0x450   : > { %5315 = vmatpush3.xpose.msk.msra.mxu1 %vm1291_vm3, %v1930_v58  ;;  %v1924_v15 = vpop.permute.xlu1 %1923  ;;  %v1894_v18 = vpop.permute.xlu0 %1893 }
 0x451   : > { %5718 = vpow2.f32 %v1589_v12  ;;  %5316 = vmatprep.subr.msk.mxu1 %vm1291_vm3, %v1928_v1 }
 0x452   : > { %5720 = vpow2.f32 %v1591_v11 }
 0x453   : > { %5722 = vpow2.f32 %v1593_v13 }
 0x454   : > { %5317 = vmatpush3.xpose.msk.msra.mxu1 %vm1291_vm3, %v1928_v1  ;;  %v1922_v51 = vpop.permute.xlu1 %1921  ;;  %v2393_v55 = vpop.permute.xlu0 %2392  ;;  %5724 = vpow2.f32 %v1595_v52 }
 0x455   : > { %5318 = vmatprep.subr.msk.mxu1 %vm1291_vm3, %v1926_v14  ;;  %5346 = vmatprep.subr.mxu0 %v2393_v55 }
 0x456   : > { %5347 = vmatpush3.msra.mxu0 %v2393_v55 }
 0x458   : > { %5319 = vmatpush3.xpose.msk.msra.mxu1 %vm1291_vm3, %v1926_v14  ;;  %v1918_v56 = vpop.permute.xlu1 %1917 }
 0x459   : > { %5320 = vmatprep.subr.msk.mxu1 %vm1291_vm3, %v1924_v15 }
 0x45c   : > { %5321 = vmatpush3.xpose.msk.msra.mxu1 %vm1291_vm3, %v1924_v15  ;;  %v1914_v16 = vpop.permute.xlu1 %1913 }
 0x45d   : > { %5322 = vmatprep.subr.msk.mxu1 %vm1291_vm3, %v1922_v51 }
 0x45e   : > { %v6886_v19 = vpop.eup %5718 }
 0x45f   : > { %5296 = vmatprep.mubr.f32.mxu1 %v6886_v19  ;;  %v6889_v21 = vpop.eup %5720 }
 0x460   : > { %5323 = vmatpush3.xpose.msk.msra.mxu1 %vm1291_vm3, %v1922_v51  ;;  %v1880_v45 = vpop.permute.xlu1 %1879  ;;  %v6892_v58 = vpop.eup %5722 }
 0x461   : > { %5297 = vmatmul.mubr.f32.gmra.mxu1 %v6889_v21  ;;  %5324 = vmatprep.subr.msk.mxu1 %vm1291_vm3, %v6847_v22  ;;  %v6898_v14 = vpop.eup %5724 }
 0x462   : > { %5299 = vmatprep.mubr.f32.mxu1 %v6892_v58 }
 0x464   : > { %5325 = vmatpush3.xpose.msk.msra.mxu1 %vm1291_vm3, %v6847_v22  ;;  %v1884_v1 = vpop.permute.xlu1 %1883 }
 0x465   : > { %5300 = vmatmul.mubr.f32.gmra.mxu1 %v6898_v14  ;;  %5326 = vmatprep.subr.msk.mxu1 %vm1291_vm3, %v1918_v56 }
 0x466   : > { %5334 = vmatprep.mubr.msk.f32.mxu1 %vm1291_vm3, %v1880_v45 }
 0x468   : > { %5327 = vmatpush3.xpose.msk.msra.mxu1 %vm1291_vm3, %v1918_v56  ;;  %v1888_v5 = vpop.permute.xlu1 %1887 }
 0x469   : > { %5328 = vmatprep.subr.msk.mxu1 %vm1291_vm3, %v6856_v46 }
 0x46c   : > { %5329 = vmatpush3.xpose.msk.msra.mxu1 %vm1291_vm3, %v6856_v46  ;;  %v1892_v4 = vpop.permute.xlu1 %1891 }
 0x46d   : > { %5330 = vmatprep.subr.msk.mxu1 %vm1291_vm3, %v1914_v16 }
 0x470   : > { %5331 = vmatpush3.xpose.msk.msra.mxu1 %vm1291_vm3, %v1914_v16  ;;  %v2391_v22 = vpop.permute.xlu1 %2390 }
 0x471   : > { %5332 = vmatprep.subr.msk.mxu1 %vm1291_vm3, %v6861_v0  ;;  %5348 = vmatprep.subr.mxu0 %v2391_v22 }
 0x472   : > { %5349 = vmatpush3.msra.mxu0 %v2391_v22  ;;  %v6985_v22 = vld [vmem:[#allocation5 + $0x48] sm:$0xff] }
 0x473   : > { %8330 = vst [vmem:[#allocation43_spill] sm:$0xff] %v6985_v22 }
 0x474   : > { %5333 = vmatpush3.xpose.msk.msra.mxu1 %vm1291_vm3, %v6861_v0  ;;  %v2389_v6 = vpop.permute.xlu1 %2388 }
 0x475   : > { %5350 = vmatprep.subr.mxu0 %v2389_v6 }
 0x476   : > { %5351 = vmatpush3.msra.mxu0 %v2389_v6 }
 0x477   : > { %5335 = vmatmul.mubr.msk.f32.vlgmr.msra.gmra.mxu1 %vm1291_vm3, %v6865_v2 }
 0x478   : > { %5337 = vmatprep.mubr.msk.f32.mxu1 %vm1291_vm3, %v1884_v1 }
 0x47b   : > { %5338 = vmatmul.mubr.msk.f32.gmra.mxu1 %vm1291_vm3, %v6869_v3 }
 0x47c   : > { %5340 = vmatprep.mubr.msk.f32.mxu1 %vm1291_vm3, %v1888_v5 }
 0x47f   : > { %5341 = vmatmul.mubr.msk.f32.gmra.mxu1 %vm1291_vm3, %v1890_v8 }
 0x480   : > { %5343 = vmatprep.mubr.msk.f32.mxu1 %vm1291_vm3, %v1892_v4 }
 0x483   : > { %5344 = vmatmul.mubr.msk.f32.gmra.mxu1 %vm1291_vm3, %v1894_v18 }
 0x4f7   : > { %v6925_v46 = vpop.f32.mrf.mxu1 }
 0x4f8   : > { %8322 = vst [vmem:[#allocation35_spill] sm:$0xff] %v6925_v46  ;;  %v7085_v46 = vld [vmem:[#allocation5 + $0x70] sm:$0xff] }
 0x4f9   : > { %v6927_v0 = vpop.f32.mrf.mxu1  ;;  %8345 = vst [vmem:[#allocation50_spill] sm:$0xff] %v7085_v46 }
 0x4fa   : > { %8323 = vst [vmem:[#allocation36_spill] sm:$0xff] %v6927_v0  ;;  %v7171_v0 = vld [vmem:[#allocation2 + $0x30] sm:$0xff] }
 0x4fd   : > { %v6929_v7 = vpop.f32.mrf.mxu1 }
 0x4fe   : > { %8324 = vst [vmem:[#allocation37_spill] sm:$0xff] %v6929_v7  ;;  %v7165_v7 = vld [vmem:[#allocation2 + $0x18] sm:$0xff] }
 0x4ff   : > { %v6931_v2 = vpop.f32.mrf.mxu1 }
 0x500   : > { %8325 = vst [vmem:[#allocation38_spill] sm:$0xff] %v6931_v2  ;;  %v7094_v2 = vld [vmem:[#allocation5 + $0x78] sm:$0xff] }
 0x501   : > { %8347 = vst [vmem:[#allocation52_spill] sm:$0xff] %v7094_v2 }
 0x521   : > { %v6933_v9 = vpop.f32.mrf.mxu1 }
 0x522   : > { %8326 = vst [vmem:[#allocation39_spill] sm:$0xff] %v6933_v9 }
 0x523   : > { %v6935_v10 = vpop.f32.mrf.mxu1 }
 0x524   : > { %8327 = vst [vmem:[#allocation40_spill] sm:$0xff] %v6935_v10 }
 0x525   : > { %v6937_v3 = vpop.f32.mrf.mxu1 }
 0x526   : > { %8328 = vst [vmem:[#allocation41_spill] sm:$0xff] %v6937_v3 }
 0x527   : > { %v6939_v11 = vpop.f32.mrf.mxu1 }
 0x528   : > { %8329 = vst [vmem:[#allocation42_spill] sm:$0xff] %v6939_v11  ;;  %v7075_v11 = vld [vmem:[#allocation5 + $0x68] sm:$0xff] }
 0x529   : > { %8343 = vst [vmem:[#allocation48_spill] sm:$0xff] %v7075_v11 }
 0x537   : > { %v5336_v8 = vpop.f32.mrf.mxu1 }
 0x538   : > { %v6943_v12 = vsel %vm1260_vm6, -1.25e+19, %v5336_v8  ;;  %v6987_v8 = vld [vmem:[#allocation5 + $0x40] sm:$0xff] }
 0x539   : > { %2115 = vmax.xlane.f32.xlu0 %v6943_v12  ;;  %v2057_v13 = vpop.f32.mrf.mxu1  ;;  %8331 = vst [vmem:[#allocation44_spill] sm:$0xff] %v6987_v8 }
 0x53a   : > { %v6948_v15 = vsel %vm1259_vm4, -1.25e+19, %v2057_v13 }
 0x53b   : > { %2113 = vmax.xlane.f32.xlu1 %v6948_v15  ;;  %v5339_v18 = vpop.f32.mrf.mxu1 }
 0x53c   : > { %v6961_v45 = vsel %vm1262_vm5, -1.25e+19, %v5339_v18 }
 0x53d   : > { %v2067_v52 = vpop.f32.mrf.mxu1 }
 0x53e   : > { %v6957_v56 = vsel %vm1261_vm7, -1.25e+19, %v2067_v52 }
 0x53f   : > { %v5342_v51 = vpop.f32.mrf.mxu1 }
 0x540   : > { %v6971_v1 = vsel %vm1264_vm9, -1.25e+19, %v5342_v51 }
 0x541   : > { %v2077_v55 = vpop.f32.mrf.mxu1 }
 0x543   : > { %v5345_v16 = vpop.f32.mrf.mxu1 }
 0x544   : > { %v6981_v4 = vsel %vm1266_vm11, -1.25e+19, %v5345_v16 }
 0x54c   : > { %2384 = vrot.lane.b32.xlu1 %v6652_v59, %s5979_s24  ;;  %v6966_v59 = vsel %vm1263_vm8, -1.25e+19, %v2077_v55 }
 0x54f   : > { %2386 = vrot.lane.b32.xlu0 %v6647_v35, %s5979_s24  ;;  %v2087_v35 = vpop.f32.mrf.mxu1 }
 0x550   : > { %v6976_v5 = vsel %vm1265_vm10, -1.25e+19, %v2087_v35 }
 0x56e   : > { %2117 = vmax.xlane.f32.xlu0 %v6957_v56 }
 0x570   : > { %2119 = vmax.xlane.f32.xlu1 %v6961_v45 }
 0x572   : > { %2121 = vmax.xlane.f32.xlu0 %v6966_v59 }
 0x574   : > { %2123 = vmax.xlane.f32.xlu1 %v6971_v1 }
 0x576   : > { %2125 = vmax.xlane.f32.xlu0 %v6976_v5 }
 0x578   : > { %2127 = vmax.xlane.f32.xlu1 %v6981_v4 }
 0x5c2   : > { %v2116_v6 = vpop.xlane.xlu0 %2115 }
 0x5c3   : > { %v6990_v13 = vmax.f32 %v6985_v22, %v2116_v6  ;;  %v7025_v6 = vld [vmem:[#allocation3 + $0x78] sm:$0xff] }
 0x5c4   : > { %v2114_v18 = vpop.xlane.xlu1 %2113 }
 0x5c5   : > { %8332 = vst [vmem:[#allocation45_spill] sm:$0xff] %v6990_v13  ;;  %2565 = vst.msk [vmem:[#allocation5 + $0x48] sm:$0xff] %vm1637_vm12, %v6990_v13  ;;  %v6997_v51 = vmax.f32 %v6987_v8, %v2114_v18  ;;  %2168 = vperm.xlu1 %5709, %v6990_v13   ;;  %v7043_v18 = vld [vmem:[#allocation3 + $0x60] sm:$0xff] }
 0x5c6   : > { %v2387_v55 = vpop.permute.xlu0 %2386  ;;  %v7163_v8 = vld [vmem:[#allocation2 + $0x20] sm:$0xff] }
 0x5c7   : > { %8333 = vst [vmem:[#allocation46_spill] sm:$0xff] %v6997_v51  ;;  %2564 = vst.msk [vmem:[#allocation5 + $0x40] sm:$0xff] %vm1637_vm12, %v6997_v51  ;;  %2163 = vperm.xlu0 %5708, %v6997_v51   ;;  %5352 = vmatprep.subr.mxu0 %v2387_v55  ;;  %v7131_v51 = vld [vmem:[#allocation3 + $0x18] sm:$0xff] }
 0x5c8   : > { %v2385_v35 = vpop.permute.xlu1 %2384  ;;  %5353 = vmatpush3.msra.mxu0 %v2387_v55  ;;  %v7047_v55 = vld [vmem:[#allocation3 + $0x48] sm:$0xff] }
 0x5c9   : > { %2380 = vrot.lane.b32.xlu1 %v6659_v38, %s5979_s24  ;;  %5354 = vmatprep.subr.mxu0 %v2385_v35  ;;  %v8334_v38 = vld [vmem:[#allocation18_spill] sm:$0xff] }
 0x5ca   : > { %5355 = vmatpush3.msra.mxu0 %v2385_v35  ;;  %v7051_v35 = vld [vmem:[#allocation3 + $0x50] sm:$0xff] }
 0x5cb   : > { %2382 = vrot.lane.b32.xlu0 %v6655_v36, %s5979_s24  ;;  %v8335_v36 = vld [vmem:[#allocation20_spill] sm:$0xff] }
 0x5cd   : > { %2376 = vrot.lane.b32.xlu1 %v6667_v42, %s5979_s24  ;;  %v8336_v42 = vld [vmem:[#allocation19_spill] sm:$0xff] }
 0x5cf   : > { %2378 = vrot.lane.b32.xlu0 %v6663_v41, %s5979_s24  ;;  %v8337_v41 = vld [vmem:[#allocation21_spill] sm:$0xff] }
 0x5d0   : > { %8341 = vst [vmem:[#allocation21_spill] sm:$0xff] %v7066_v25 }
 0x5d1   : > { %2372 = vrot.lane.b32.xlu1 %v6675_v47, %s5979_s24  ;;  %v7035_v47 = vld [vmem:[#allocation3 + $0x70] sm:$0xff] }
 0x5d3   : > { %2374 = vrot.lane.b32.xlu0 %v6671_v44, %s5979_s24  ;;  %v7031_v44 = vld [vmem:[#allocation3 + $0x68] sm:$0xff] }
 0x5d5   : > { %2368 = vrot.lane.b32.xlu1 %v6683_v53, %s5979_s24  ;;  %v7039_v53 = vld [vmem:[#allocation3 + $0x58] sm:$0xff] }
 0x5d7   : > { %2370 = vrot.lane.b32.xlu0 %v8334_v38, %s5979_s24  ;;  %v7055_v38 = vld [vmem:[#allocation3 + $0x40] sm:$0xff] }
 0x5d9   : > { %2364 = vrot.lane.b32.xlu1 %v8335_v36, %s5979_s24  ;;  %v7059_v36 = vld [vmem:[#allocation5 + $0x50] sm:$0xff] }
 0x5da   : > { %8338 = vst [vmem:[#allocation18_spill] sm:$0xff] %v7059_v36 }
 0x5db   : > { %2366 = vrot.lane.b32.xlu0 %v8336_v42, %s5979_s24  ;;  %v7061_v42 = vld [vmem:[#allocation5 + $0x58] sm:$0xff] }
 0x5dc   : > { %8339 = vst [vmem:[#allocation20_spill] sm:$0xff] %v7061_v42 }
 0x5dd   : > { %2666 = vrot.lane.b32.xlu1 %v7025_v6, %s5980_s25 }
 0x5df   : > { %2362 = vrot.lane.b32.xlu0 %v8337_v41, %s5979_s24 }
 0x5e1   : > { %2662 = vrot.lane.b32.xlu1 %v7031_v44, %s5980_s25 }
 0x5e3   : > { %2664 = vrot.lane.b32.xlu0 %v7035_v47, %s5980_s25 }
 0x5e5   : > { %2658 = vrot.lane.b32.xlu1 %v7039_v53, %s5980_s25 }
 0x5e7   : > { %2660 = vrot.lane.b32.xlu0 %v7043_v18, %s5980_s25 }
 0x5e9   : > { %2654 = vrot.lane.b32.xlu1 %v7047_v55, %s5980_s25 }
 0x5eb   : > { %2656 = vrot.lane.b32.xlu0 %v7051_v35, %s5980_s25 }
 0x5ed   : > { %2652 = vrot.lane.b32.xlu1 %v7055_v38, %s5980_s25 }
 0x5f7   : > { %v2118_v41 = vpop.xlane.xlu0 %2117 }
 0x5f8   : > { %v7064_v16 = vmax.f32 %v7059_v36, %v2118_v41  ;;  %v7112_v36 = vld [vmem:[#allocation3 + $0x38] sm:$0xff] }
 0x5f9   : > { %v2120_v52 = vpop.xlane.xlu1 %2119 }
 0x5fa   : > { %8340 = vst [vmem:[#allocation19_spill] sm:$0xff] %v7064_v16  ;;  %v7069_v24 = vmax.f32 %v7061_v42, %v2120_v52  ;;  %2566 = vst.msk [vmem:[#allocation5 + $0x50] sm:$0xff] %vm1637_vm12, %v7064_v16 }
 0x5fb   : > { %v2122_v10 = vpop.xlane.xlu0 %2121 }
 0x5fc   : > { %8342 = vst [vmem:[#allocation47_spill] sm:$0xff] %v7069_v24  ;;  %2567 = vst.msk [vmem:[#allocation5 + $0x58] sm:$0xff] %vm1637_vm12, %v7069_v24  ;;  %2178 = vperm.xlu0 %5708, %v7069_v24   ;;  %v7083_v52 = vmax.f32 %v7066_v25, %v2122_v10  ;;  %v7133_v25 = vld [vmem:[#allocation3 + $0x20] sm:$0xff] }
 0x5fd   : > { %v2124_v41 = vpop.xlane.xlu1 %2123 }
 0x5fe   : > { %8344 = vst [vmem:[#allocation49_spill] sm:$0xff] %v7083_v52  ;;  %v7088_v26 = vmax.f32 %v7075_v11, %v2124_v41  ;;  %2568 = vst.msk [vmem:[#allocation5 + $0x60] sm:$0xff] %vm1637_vm12, %v7083_v52  ;;  %v7179_v11 = vld [vmem:[#allocation2 + $0x38] sm:$0xff] }
 0x5ff   : > { %v2126_v9 = vpop.xlane.xlu0 %2125 }
 0x600   : > { %8346 = vst [vmem:[#allocation51_spill] sm:$0xff] %v7088_v26  ;;  %2569 = vst.msk [vmem:[#allocation5 + $0x68] sm:$0xff] %vm1637_vm12, %v7088_v26  ;;  %2188 = vperm.xlu1 %5709, %v7088_v26   ;;  %2173 = vperm.xlu0 %5708, %v7064_v16   ;;  %v7103_v10 = vmax.f32 %v7085_v46, %v2126_v9  ;;  %v7121_v9 = vld [vmem:[#allocation3 + $0x30] sm:$0xff]  ;;  %v7149_v46 = vld [vmem:[#allocation3] sm:$0xff] }
 0x601   : > { %v2128_v41 = vpop.xlane.xlu1 %2127  ;;  %v7157_v16 = vld [vmem:[#allocation2 + $0x8] sm:$0xff] }
 0x602   : > { %8348 = vst [vmem:[#allocation53_spill] sm:$0xff] %v7103_v10  ;;  %v7106_v3 = vmax.f32 %v7094_v2, %v2128_v41  ;;  %2570 = vst.msk [vmem:[#allocation5 + $0x70] sm:$0xff] %vm1637_vm12, %v7103_v10  ;;  %v7126_v41 = vld [vmem:[#allocation3 + $0x28] sm:$0xff] }
 0x603   : > { %v7139_v2 = vld [vmem:[#allocation3 + $0x8] sm:$0xff] }
 0x604   : > { %8349 = vst [vmem:[#allocation54_spill] sm:$0xff] %v7106_v3  ;;  %2571 = vst.msk [vmem:[#allocation5 + $0x78] sm:$0xff] %vm1637_vm12, %v7106_v3  ;;  %2650 = vrot.lane.b32.xlu0 %v7112_v36, %s5980_s25  ;;  %2183 = vperm.xlu1 %5709, %v7083_v52   ;;  %v7155_v52 = vld [vmem:[#allocation2 + $0x10] sm:$0xff]  ;;  %v7173_v26 = vld [vmem:[#allocation2 + $0x28] sm:$0xff] }
 0x608   : > { %2648 = vrot.lane.b32.xlu1 %v7121_v9, %s5980_s25  ;;  %2193 = vperm.xlu0 %5708, %v7103_v10   ;;  %v7141_v10 = vld [vmem:[#allocation3 + $0x10] sm:$0xff] }
 0x60c   : > { %2646 = vrot.lane.b32.xlu1 %v7126_v41, %s5980_s25  ;;  %2198 = vperm.xlu0 %5708, %v7106_v3   ;;  %v7147_v3 = vld [vmem:[#allocation2] sm:$0xff] }
 0x610   : > { %2642 = vrot.lane.b32.xlu1 %v7131_v51, %s5980_s25  ;;  %2644 = vrot.lane.b32.xlu0 %v7133_v25, %s5980_s25 }
 0x614   : > { %2638 = vrot.lane.b32.xlu1 %v7139_v2, %s5980_s25  ;;  %2640 = vrot.lane.b32.xlu0 %v7141_v10, %s5980_s25 }
 0x618   : > { %2604 = vrot.lane.b32.xlu1 %v7147_v3, %s5980_s25  ;;  %2636 = vrot.lane.b32.xlu0 %v7149_v46, %s5980_s25 }
 0x61c   : > { %2608 = vrot.lane.b32.xlu1 %v7155_v52, %s5980_s25  ;;  %2606 = vrot.lane.b32.xlu0 %v7157_v16, %s5980_s25 }
 0x620   : > { %2612 = vrot.lane.b32.xlu1 %v7163_v8, %s5980_s25  ;;  %2610 = vrot.lane.b32.xlu0 %v7165_v7, %s5980_s25 }
 0x624   : > { %2616 = vrot.lane.b32.xlu1 %v7171_v0, %s5980_s25  ;;  %2614 = vrot.lane.b32.xlu0 %v7173_v26, %s5980_s25 }
 0x628   : > { %3115 = vrot.lane.b32.xlu1 %v6641_v33, %s5980_s25  ;;  %2618 = vrot.lane.b32.xlu0 %v7179_v11, %s5980_s25 }
 0x62c   : > { %3113 = vrot.lane.b32.xlu1 %v6644_v34, %s5980_s25  ;;  %3117 = vrot.lane.b32.xlu0 %v6637_v29, %s5980_s25 }
 0x640   : > { %v2169_v24 = vpop.permute.xlu1 %2168 }
 0x641   : > { %v2202_v63 = vsub.f32 %v6943_v12, %v2169_v24 }
 0x642   : > { %v2164_v42 = vpop.permute.xlu0 %2163 }
 0x643   : > { %v2201_v13 = vsub.f32 %v6948_v15, %v2164_v42  ;;  %v2211_v34 = vmul.f32 1.442695, %v2202_v63 }
 0x644   : > { %v2381_v22 = vpop.permute.xlu1 %2380 }
 0x645   : > { %v2209_v61 = vmul.f32 1.442695, %v2201_v13 }
 0x646   : > { %v2383_v54 = vpop.permute.xlu0 %2382 }
 0x647   : > { %5726 = vpow2.f32 %v2209_v61  ;;  %5356 = vmatprep.subr.mxu0 %v2383_v54 }
 0x648   : > { %v2377_v33 = vpop.permute.xlu1 %2376  ;;  %5357 = vmatpush3.msra.mxu0 %v2383_v54  ;;  %5728 = vpow2.f32 %v2211_v34 }
 0x649   : > { %5358 = vmatprep.subr.mxu0 %v2381_v22 }
 0x64a   : > { %5359 = vmatpush3.msra.mxu0 %v2381_v22  ;;  %v2379_v50 = vpop.permute.xlu0 %2378 }
 0x64b   : > { %5360 = vmatprep.subr.mxu0 %v2379_v50 }
 0x64c   : > { %v2373_v62 = vpop.permute.xlu1 %2372  ;;  %5361 = vmatpush3.msra.mxu0 %v2379_v50 }
 0x64d   : > { %5362 = vmatprep.subr.mxu0 %v2377_v33 }
 0x64e   : > { %5363 = vmatpush3.msra.mxu0 %v2377_v33  ;;  %v2375_v29 = vpop.permute.xlu0 %2374 }
 0x64f   : > { %5364 = vmatprep.subr.mxu0 %v2375_v29 }
 0x650   : > { %v2369_v15 = vpop.permute.xlu1 %2368  ;;  %5365 = vmatpush3.msra.mxu0 %v2375_v29 }
 0x651   : > { %5366 = vmatprep.subr.mxu0 %v2373_v62 }
 0x652   : > { %5367 = vmatpush3.msra.mxu0 %v2373_v62  ;;  %v2371_v61 = vpop.permute.xlu0 %2370 }
 0x653   : > { %5368 = vmatprep.subr.mxu0 %v2371_v61 }
 0x654   : > { %v7191_v24 = vpop.eup %5726  ;;  %5369 = vmatpush3.msra.mxu0 %v2371_v61  ;;  %v2365_v54 = vpop.permute.xlu1 %2364 }
 0x655   : > { %5370 = vmatprep.subr.mxu0 %v2369_v15  ;;  %5378 = vmatprep.mubr.f32.mxu0 %v7191_v24  ;;  %v7194_v12 = vpop.eup %5728 }
 0x656   : > { %5371 = vmatpush3.msra.mxu0 %v2369_v15  ;;  %v2367_v50 = vpop.permute.xlu0 %2366 }
 0x657   : > { %5372 = vmatprep.subr.mxu0 %v2367_v50 }
 0x658   : > { %5373 = vmatpush3.msra.mxu0 %v2367_v50  ;;  %v2667_v62 = vpop.permute.xlu1 %2666 }
 0x659   : > { %5374 = vmatprep.subr.mxu0 %v2365_v54 }
 0x65a   : > { %5375 = vmatpush3.msra.mxu0 %v2365_v54  ;;  %v2363_v63 = vpop.permute.xlu0 %2362 }
 0x65b   : > { %5376 = vmatprep.subr.mxu0 %v2363_v63 }
 0x65c   : > { %5377 = vmatpush3.msra.mxu0 %v2363_v63  ;;  %v2663_v13 = vpop.permute.xlu1 %2662 }
 0x65d   : > { %5379 = vmatmul.mubr.f32.vlgmr.msra.gmra.mxu0 %v7194_v12  ;;  %5390 = vmatprep.subr.msk.mxu0 %vm1291_vm3, %v2667_v62 }
 0x65e   : > { %5391 = vmatpush3.xpose.msk.msra.mxu0 %vm1291_vm3, %v2667_v62  ;;  %v2665_v22 = vpop.permute.xlu0 %2664 }
 0x65f   : > { %5392 = vmatprep.subr.msk.mxu0 %vm1291_vm3, %v2665_v22 }
 0x660   : > { %v2659_v33 = vpop.permute.xlu1 %2658 }
 0x662   : > { %5393 = vmatpush3.xpose.msk.msra.mxu0 %vm1291_vm3, %v2665_v22  ;;  %v2661_v42 = vpop.permute.xlu0 %2660 }
 0x663   : > { %5394 = vmatprep.subr.msk.mxu0 %vm1291_vm3, %v2663_v13 }
 0x664   : > { %v2655_v29 = vpop.permute.xlu1 %2654 }
 0x666   : > { %5395 = vmatpush3.xpose.msk.msra.mxu0 %vm1291_vm3, %v2663_v13  ;;  %v2657_v34 = vpop.permute.xlu0 %2656 }
 0x667   : > { %5396 = vmatprep.subr.msk.mxu0 %vm1291_vm3, %v2661_v42 }
 0x668   : > { %v2653_v15 = vpop.permute.xlu1 %2652 }
 0x66a   : > { %5397 = vmatpush3.xpose.msk.msra.mxu0 %vm1291_vm3, %v2661_v42 }
 0x66b   : > { %5398 = vmatprep.subr.msk.mxu0 %vm1291_vm3, %v2659_v33 }
 0x66e   : > { %5399 = vmatpush3.xpose.msk.msra.mxu0 %vm1291_vm3, %v2659_v33 }
 0x66f   : > { %5400 = vmatprep.subr.msk.mxu0 %vm1291_vm3, %v2657_v34 }
 0x672   : > { %5401 = vmatpush3.xpose.msk.msra.mxu0 %vm1291_vm3, %v2657_v34 }
 0x673   : > { %5402 = vmatprep.subr.msk.mxu0 %vm1291_vm3, %v2655_v29 }
 0x676   : > { %5403 = vmatpush3.xpose.msk.msra.mxu0 %vm1291_vm3, %v2655_v29 }
 0x677   : > { %5404 = vmatprep.subr.msk.mxu0 %vm1291_vm3, %v2653_v15  ;;  %v2179_v61 = vpop.permute.xlu0 %2178 }
 0x678   : > { %v2204_v54 = vsub.f32 %v6961_v45, %v2179_v61 }
 0x67a   : > { %5405 = vmatpush3.xpose.msk.msra.mxu0 %vm1291_vm3, %v2653_v15  ;;  %v2215_v22 = vmul.f32 1.442695, %v2204_v54 }
 0x67b   : > { %v2189_v50 = vpop.permute.xlu1 %2188  ;;  %v2174_v63 = vpop.permute.xlu0 %2173 }
 0x67c   : > { %v2203_v62 = vsub.f32 %v6957_v56, %v2174_v63  ;;  %v2206_v13 = vsub.f32 %v6971_v1, %v2189_v50 }
 0x67e   : > { %v2213_v42 = vmul.f32 1.442695, %v2203_v62  ;;  %v2219_v45 = vmul.f32 1.442695, %v2206_v13 }
 0x67f   : > { %v2184_v33 = vpop.permute.xlu1 %2183  ;;  %v2651_v34 = vpop.permute.xlu0 %2650 }
 0x680   : > { %v2205_v57 = vsub.f32 %v6966_v59, %v2184_v33  ;;  %5406 = vmatprep.subr.msk.mxu0 %vm1291_vm3, %v2651_v34  ;;  %5730 = vpow2.f32 %v2213_v42 }
 0x681   : > { %5407 = vmatpush3.xpose.msk.msra.mxu0 %vm1291_vm3, %v2651_v34  ;;  %5732 = vpow2.f32 %v2215_v22 }
 0x682   : > { %v2217_v29 = vmul.f32 1.442695, %v2205_v57 }
 0x683   : > { %v2649_v15 = vpop.permute.xlu1 %2648  ;;  %v2194_v61 = vpop.permute.xlu0 %2193 }
 0x684   : > { %5734 = vpow2.f32 %v2217_v29  ;;  %v2207_v56 = vsub.f32 %v6976_v5, %v2194_v61  ;;  %5408 = vmatprep.subr.msk.mxu0 %vm1291_vm3, %v2649_v15 }
 0x685   : > { %5409 = vmatpush3.xpose.msk.msra.mxu0 %vm1291_vm3, %v2649_v15  ;;  %5736 = vpow2.f32 %v2219_v45 }
 0x686   : > { %v2221_v1 = vmul.f32 1.442695, %v2207_v56 }
 0x687   : > { %v2647_v59 = vpop.permute.xlu1 %2646  ;;  %v2199_v54 = vpop.permute.xlu0 %2198 }
 0x688   : > { %5738 = vpow2.f32 %v2221_v1  ;;  %v2208_v50 = vsub.f32 %v6981_v4, %v2199_v54  ;;  %5410 = vmatprep.subr.msk.mxu0 %vm1291_vm3, %v2647_v59 }
 0x689   : > { %5411 = vmatpush3.xpose.msk.msra.mxu0 %vm1291_vm3, %v2647_v59 }
 0x68a   : > { %v2223_v57 = vmul.f32 1.442695, %v2208_v50 }
 0x68b   : > { %v2643_v63 = vpop.permute.xlu1 %2642  ;;  %v2645_v62 = vpop.permute.xlu0 %2644 }
 0x68c   : > { %5740 = vpow2.f32 %v2223_v57  ;;  %5412 = vmatprep.subr.msk.mxu0 %vm1291_vm3, %v2645_v62 }
 0x68d   : > { %5413 = vmatpush3.xpose.msk.msra.mxu0 %vm1291_vm3, %v2645_v62  ;;  %v7227_v5 = vpop.eup %5730 }
 0x68e   : > { %5414 = vmatprep.subr.msk.mxu0 %vm1291_vm3, %v2643_v63  ;;  %v7230_v22 = vpop.eup %5732  ;;  %5381 = vmatprep.mubr.f32.mxu0 %v7227_v5 }
 0x68f   : > { %v2639_v4 = vpop.permute.xlu1 %2638  ;;  %v2641_v13 = vpop.permute.xlu0 %2640  ;;  %5382 = vmatmul.mubr.f32.gmra.mxu0 %v7230_v22 }
 0x691   : > { %v7234_v42 = vpop.eup %5734  ;;  %5415 = vmatpush3.xpose.msk.msra.mxu0 %vm1291_vm3, %v2643_v63 }
 0x692   : > { %5384 = vmatprep.mubr.f32.mxu0 %v7234_v42  ;;  %5416 = vmatprep.subr.msk.mxu0 %vm1291_vm3, %v2641_v13  ;;  %v7239_v33 = vpop.eup %5736 }
 0x693   : > { %v2605_v34 = vpop.permute.xlu1 %2604  ;;  %v2637_v45 = vpop.permute.xlu0 %2636  ;;  %5385 = vmatmul.mubr.f32.gmra.mxu0 %v7239_v33 }
 0x695   : > { %v7242_v29 = vpop.eup %5738  ;;  %5417 = vmatpush3.xpose.msk.msra.mxu0 %vm1291_vm3, %v2641_v13 }
 0x696   : > { %5387 = vmatprep.mubr.f32.mxu0 %v7242_v29  ;;  %5418 = vmatprep.subr.msk.mxu0 %vm1291_vm3, %v2639_v4 }
 0x697   : > { %v2609_v15 = vpop.permute.xlu1 %2608  ;;  %v2607_v61 = vpop.permute.xlu0 %2606 }
 0x699   : > { %v7247_v56 = vpop.eup %5740  ;;  %5419 = vmatpush3.xpose.msk.msra.mxu0 %vm1291_vm3, %v2639_v4 }
 0x69a   : > { %8350 = vst [vmem:[#allocation55_spill] sm:$0xff] %v7247_v56  ;;  %5388 = vmatmul.mubr.f32.gmra.mxu0 %v7247_v56  ;;  %5420 = vmatprep.subr.msk.mxu0 %vm1291_vm3, %v2637_v45 }
 0x69b   : > { %v2613_v1 = vpop.permute.xlu1 %2612  ;;  %v2611_v59 = vpop.permute.xlu0 %2610  ;;  %5422 = vmatprep.mubr.msk.f32.mxu0 %vm1291_vm3, %v2605_v34 }
 0x69d   : > { %5421 = vmatpush3.xpose.msk.msra.mxu0 %vm1291_vm3, %v2637_v45 }
 0x69f   : > { %v2617_v54 = vpop.permute.xlu1 %2616  ;;  %v2615_v50 = vpop.permute.xlu0 %2614 }
 0x6a0   : > { %5423 = vmatmul.mubr.msk.f32.vlgmr.msra.gmra.mxu0 %vm1291_vm3, %v2607_v61 }
 0x6a1   : > { %5425 = vmatprep.mubr.msk.f32.mxu0 %vm1291_vm3, %v2609_v15 }
 0x6a3   : > { %v2619_v57 = vpop.permute.xlu0 %2618  ;;  %v3116_v63 = vpop.permute.xlu1 %3115 }
 0x6a4   : > { %5426 = vmatmul.mubr.msk.f32.gmra.mxu0 %vm1291_vm3, %v2611_v59 }
 0x6a5   : > { %5428 = vmatprep.mubr.msk.f32.mxu0 %vm1291_vm3, %v2613_v1 }
 0x6a7   : > { %v3118_v62 = vpop.permute.xlu0 %3117  ;;  %v3114_v4 = vpop.permute.xlu1 %3113 }
 0x6a8   : > { %5434 = vmatprep.subr.mxu1 %v3118_v62  ;;  %5429 = vmatmul.mubr.msk.f32.gmra.mxu0 %vm1291_vm3, %v2615_v50 }
 0x6a9   : > { %5435 = vmatpush3.msra.mxu1 %v3118_v62  ;;  %5431 = vmatprep.mubr.msk.f32.mxu0 %vm1291_vm3, %v2617_v54 }
 0x6aa   : > { %5436 = vmatprep.subr.mxu1 %v3116_v63 }
 0x6ab   : > { %5437 = vmatpush3.msra.mxu1 %v3116_v63 }
 0x6ac   : > { %5438 = vmatprep.subr.mxu1 %v3114_v4  ;;  %5432 = vmatmul.mubr.msk.f32.gmra.mxu0 %vm1291_vm3, %v2619_v57 }
 0x6ad   : > { %5439 = vmatpush3.msra.mxu1 %v3114_v4  ;;  %v7287_v4 = vld [vmem:[#allocation4 + $0x58] sm:$0xff] }
 0x6ae   : > { %8359 = vst [vmem:[#allocation64_spill] sm:$0xff] %v7287_v4 }
 0x71d   : > { %v7261_v13 = vpop.f32.mrf.mxu0 }
 0x71e   : > { %8351 = vst [vmem:[#allocation56_spill] sm:$0xff] %v7261_v13 }
 0x71f   : > { %v7263_v34 = vpop.f32.mrf.mxu0 }
 0x720   : > { %8352 = vst [vmem:[#allocation57_spill] sm:$0xff] %v7263_v34 }
 0x74f   : > { %v7265_v45 = vpop.f32.mrf.mxu0 }
 0x750   : > { %8353 = vst [vmem:[#allocation58_spill] sm:$0xff] %v7265_v45 }
 0x751   : > { %v7267_v15 = vpop.f32.mrf.mxu0 }
 0x752   : > { %8354 = vst [vmem:[#allocation59_spill] sm:$0xff] %v7267_v15 }
 0x753   : > { %v7269_v61 = vpop.f32.mrf.mxu0 }
 0x754   : > { %8355 = vst [vmem:[#allocation60_spill] sm:$0xff] %v7269_v61 }
 0x755   : > { %v7271_v1 = vpop.f32.mrf.mxu0 }
 0x756   : > { %8356 = vst [vmem:[#allocation61_spill] sm:$0xff] %v7271_v1 }
 0x75a   : > { %v7273_v59 = vpop.f32.mrf.mxu0 }
 0x75b   : > { %8357 = vst [vmem:[#allocation62_spill] sm:$0xff] %v7273_v59  ;;  %v7291_v59 = vld [vmem:[#allocation4 + $0x60] sm:$0xff] }
 0x75c   : > { %v7275_v54 = vpop.f32.mrf.mxu0  ;;  %8360 = vst [vmem:[#allocation65_spill] sm:$0xff] %v7291_v59 }
 0x75d   : > { %8358 = vst [vmem:[#allocation63_spill] sm:$0xff] %v7275_v54 }
 0x760   : > { %v5424_v50 = vpop.f32.mrf.mxu0 }
 0x761   : > { %v7279_v57 = vsel %vm1260_vm6, -1.25e+19, %v5424_v50 }
 0x762   : > { %2840 = vmax.xlane.f32.xlu0 %v7279_v57  ;;  %v2782_v63 = vpop.f32.mrf.mxu0 }
 0x763   : > { %v7284_v62 = vsel %vm1259_vm4, -1.25e+19, %v2782_v63 }
 0x764   : > { %2838 = vmax.xlane.f32.xlu1 %v7284_v62  ;;  %v5427_v50 = vpop.f32.mrf.mxu0 }
 0x765   : > { %v7301_v1 = vsel %vm1262_vm5, -1.25e+19, %v5427_v50 }
 0x766   : > { %v2792_v61 = vpop.f32.mrf.mxu0 }
 0x767   : > { %v7297_v63 = vsel %vm1261_vm7, -1.25e+19, %v2792_v61 }
 0x768   : > { %v5430_v45 = vpop.f32.mrf.mxu0 }
 0x76a   : > { %v2802_v13 = vpop.f32.mrf.mxu0 }
 0x76b   : > { %v7306_v15 = vsel %vm1263_vm8, -1.25e+19, %v2802_v13  ;;  %v7325_v13 = vld [vmem:[#allocation5 + $0x88] sm:$0xff] }
 0x76c   : > { %v5433_v54 = vpop.f32.mrf.mxu0  ;;  %8361 = vst [vmem:[#allocation66_spill] sm:$0xff] %v7325_v13 }
 0x76d   : > { %v7321_v50 = vsel %vm1266_vm11, -1.25e+19, %v5433_v54 }
 0x76e   : > { %v2812_v34 = vpop.f32.mrf.mxu0 }
 0x76f   : > { %v7316_v61 = vsel %vm1265_vm10, -1.25e+19, %v2812_v34 }
 0x775   : > { %3109 = vrot.lane.b32.xlu1 %v7287_v4, %s5980_s25  ;;  %v7311_v4 = vsel %vm1264_vm9, -1.25e+19, %v5430_v45 }
 0x778   : > { %3111 = vrot.lane.b32.xlu0 %v7291_v59, %s5980_s25  ;;  %v7327_v59 = vld [vmem:[#allocation5 + $0x80] sm:$0xff] }
 0x779   : > { %8362 = vst [vmem:[#allocation67_spill] sm:$0xff] %v7327_v59 }
 0x797   : > { %2842 = vmax.xlane.f32.xlu0 %v7297_v63 }
 0x799   : > { %2844 = vmax.xlane.f32.xlu1 %v7301_v1 }
 0x79b   : > { %2846 = vmax.xlane.f32.xlu0 %v7306_v15 }
 0x79d   : > { %2848 = vmax.xlane.f32.xlu1 %v7311_v4 }
 0x79f   : > { %2850 = vmax.xlane.f32.xlu0 %v7316_v61 }
 0x7a1   : > { %2852 = vmax.xlane.f32.xlu1 %v7321_v50 }
 0x7eb   : > { %v2841_v45 = vpop.xlane.xlu0 %2840 }
 0x7ec   : > { %v7330_v56 = vmax.f32 %v7325_v13, %v2841_v45  ;;  %v3056_v13 = vld [vmem:[#allocation4 + $0x8] sm:$0xff] }
 0x7ed   : > { %v2839_v34 = vpop.xlane.xlu1 %2838 }
 0x7ee   : > { %8363 = vst [vmem:[#allocation68_spill] sm:$0xff] %v7330_v56  ;;  %3290 = vst.msk [vmem:[#allocation5 + $0x88] sm:$0xff] %vm1637_vm12, %v7330_v56  ;;  %v7337_v54 = vmax.f32 %v7327_v59, %v2839_v34  ;;  %2893 = vperm.xlu1 %5709, %v7330_v56   ;;  %v7349_v34 = vld [vmem:[#allocation4 + $0x50] sm:$0xff]  ;;  %v3058_v59 = vld [vmem:[#allocation4 + $0x18] sm:$0xff] }
 0x7ef   : > { %v3112_v49 = vpop.permute.xlu0 %3111  ;;  %v7370_v56 = vld [vmem:[#allocation4 + $0x20] sm:$0xff] }
 0x7f0   : > { %8364 = vst [vmem:[#allocation69_spill] sm:$0xff] %v7337_v54  ;;  %3289 = vst.msk [vmem:[#allocation5 + $0x80] sm:$0xff] %vm1637_vm12, %v7337_v54  ;;  %2888 = vperm.xlu0 %5708, %v7337_v54   ;;  %5440 = vmatprep.subr.mxu1 %v3112_v49  ;;  %v7357_v54 = vld [vmem:[#allocation4 + $0x40] sm:$0xff] }
 0x7f1   : > { %v3110_v45 = vpop.permute.xlu1 %3109  ;;  %5441 = vmatpush3.msra.mxu1 %v3112_v49  ;;  %v7361_v49 = vld [vmem:[#allocation4 + $0x28] sm:$0xff] }
 0x7f2   : > { %3105 = vrot.lane.b32.xlu1 %v7345_v48, %s5980_s25  ;;  %5442 = vmatprep.subr.mxu1 %v3110_v45  ;;  %8366 = vst [vmem:[#allocation71_spill] sm:$0xff] %v7361_v49 }
 0x7f3   : > { %5443 = vmatpush3.msra.mxu1 %v3110_v45  ;;  %v7365_v45 = vld [vmem:[#allocation4 + $0x30] sm:$0xff] }
 0x7f4   : > { %3107 = vrot.lane.b32.xlu0 %v7349_v34, %s5980_s25 }
 0x7f6   : > { %3101 = vrot.lane.b32.xlu1 %v7353_v39, %s5980_s25  ;;  %v7375_v39 = vld [vmem:[#allocation4 + $0x10] sm:$0xff] }
 0x7f7   : > { %8367 = vst [vmem:[#allocation72_spill] sm:$0xff] %v7375_v39 }
 0x7f8   : > { %3103 = vrot.lane.b32.xlu0 %v7357_v54, %s5980_s25 }
 0x7fa   : > { %3097 = vrot.lane.b32.xlu1 %v7361_v49, %s5980_s25  ;;  %v7381_v49 = vld [vmem:[#allocation4] sm:$0xff] }
 0x7fb   : > { %8368 = vst [vmem:[#allocation73_spill] sm:$0xff] %v7381_v49 }
 0x7fc   : > { %3099 = vrot.lane.b32.xlu0 %v7365_v45, %s5980_s25 }
 0x7fe   : > { %3093 = vrot.lane.b32.xlu1 %v3058_v59, %s5980_s25 }
 0x800   : > { %3095 = vrot.lane.b32.xlu0 %v7370_v56, %s5980_s25 }
 0x802   : > { %3089 = vrot.lane.b32.xlu1 %v3056_v13, %s5980_s25  ;;  %v7406_v13 = vld [vmem:[#allocation5 + $0xa0] sm:$0xff] }
 0x803   : > { %8371 = vst [vmem:[#allocation76_spill] sm:$0xff] %v7406_v13 }
 0x804   : > { %3091 = vrot.lane.b32.xlu0 %v7375_v39, %s5980_s25  ;;  %v7425_v39 = vld [vmem:[#allocation5 + $0xb0] sm:$0xff] }
 0x806   : > { %3391 = vrot.lane.b32.xlu1 %v7025_v6, %s5981_s20  ;;  %v7399_v6 = vld [vmem:[#allocation5 + $0x90] sm:$0xff] }
 0x807   : > { %8369 = vst [vmem:[#allocation74_spill] sm:$0xff] %v7399_v6 }
 0x808   : > { %3087 = vrot.lane.b32.xlu0 %v7381_v49, %s5980_s25  ;;  %v7434_v49 = vld [vmem:[#allocation5 + $0xb8] sm:$0xff] }
 0x80a   : > { %3387 = vrot.lane.b32.xlu1 %v7031_v44, %s5981_s20  ;;  %v7401_v44 = vld [vmem:[#allocation5 + $0x98] sm:$0xff] }
 0x80b   : > { %8370 = vst [vmem:[#allocation75_spill] sm:$0xff] %v7401_v44 }
 0x80c   : > { %3389 = vrot.lane.b32.xlu0 %v7035_v47, %s5981_s20 }
 0x80e   : > { %3383 = vrot.lane.b32.xlu1 %v7039_v53, %s5981_s20 }
 0x810   : > { %3385 = vrot.lane.b32.xlu0 %v7043_v18, %s5981_s20 }
 0x812   : > { %3379 = vrot.lane.b32.xlu1 %v7047_v55, %s5981_s20 }
 0x814   : > { %3381 = vrot.lane.b32.xlu0 %v7051_v35, %s5981_s20  ;;  %v7415_v35 = vld [vmem:[#allocation5 + $0xa8] sm:$0xff] }
 0x816   : > { %3377 = vrot.lane.b32.xlu1 %v7055_v38, %s5981_s20 }
 0x820   : > { %v2843_v47 = vpop.xlane.xlu0 %2842 }
 0x821   : > { %v7404_v59 = vmax.f32 %v7399_v6, %v2843_v47 }
 0x822   : > { %v2845_v53 = vpop.xlane.xlu1 %2844 }
 0x823   : > { %v7409_v18 = vmax.f32 %v7401_v44, %v2845_v53  ;;  %3291 = vst.msk [vmem:[#allocation5 + $0x90] sm:$0xff] %vm1637_vm12, %v7404_v59 }
 0x824   : > { %v2847_v38 = vpop.xlane.xlu0 %2846 }
 0x825   : > { %8372 = vst [vmem:[#allocation77_spill] sm:$0xff] %v7409_v18  ;;  %3292 = vst.msk [vmem:[#allocation5 + $0x98] sm:$0xff] %vm1637_vm12, %v7409_v18  ;;  %2903 = vperm.xlu0 %5708, %v7409_v18   ;;  %v7423_v47 = vmax.f32 %v7406_v13, %v2847_v38 }
 0x826   : > { %v2849_v53 = vpop.xlane.xlu1 %2848 }
 0x827   : > { %v7428_v55 = vmax.f32 %v7415_v35, %v2849_v53  ;;  %3293 = vst.msk [vmem:[#allocation5 + $0xa0] sm:$0xff] %vm1637_vm12, %v7423_v47 }
 0x828   : > { %v2851_v44 = vpop.xlane.xlu0 %2850 }
 0x829   : > { %3294 = vst.msk [vmem:[#allocation5 + $0xa8] sm:$0xff] %vm1637_vm12, %v7428_v55  ;;  %2913 = vperm.xlu1 %5709, %v7428_v55   ;;  %2898 = vperm.xlu0 %5708, %v7404_v59   ;;  %v7443_v38 = vmax.f32 %v7425_v39, %v2851_v44 }
 0x82a   : > { %v2853_v53 = vpop.xlane.xlu1 %2852 }
 0x82b   : > { %v7446_v6 = vmax.f32 %v7434_v49, %v2853_v53  ;;  %3295 = vst.msk [vmem:[#allocation5 + $0xb0] sm:$0xff] %vm1637_vm12, %v7443_v38 }
 0x82d   : > { %3296 = vst.msk [vmem:[#allocation5 + $0xb8] sm:$0xff] %vm1637_vm12, %v7446_v6  ;;  %3375 = vrot.lane.b32.xlu0 %v7112_v36, %s5981_s20  ;;  %2908 = vperm.xlu1 %5709, %v7423_v47  }
 0x831   : > { %3373 = vrot.lane.b32.xlu1 %v7121_v9, %s5981_s20  ;;  %2918 = vperm.xlu0 %5708, %v7443_v38  }
 0x835   : > { %3371 = vrot.lane.b32.xlu1 %v7126_v41, %s5981_s20  ;;  %2923 = vperm.xlu0 %5708, %v7446_v6  }
 0x839   : > { %3367 = vrot.lane.b32.xlu1 %v7131_v51, %s5981_s20  ;;  %3369 = vrot.lane.b32.xlu0 %v7133_v25, %s5981_s20 }
 0x83d   : > { %3363 = vrot.lane.b32.xlu1 %v7139_v2, %s5981_s20  ;;  %3365 = vrot.lane.b32.xlu0 %v7141_v10, %s5981_s20 }
 0x841   : > { %3329 = vrot.lane.b32.xlu1 %v7147_v3, %s5981_s20  ;;  %3361 = vrot.lane.b32.xlu0 %v7149_v46, %s5981_s20 }
 0x845   : > { %3333 = vrot.lane.b32.xlu1 %v7155_v52, %s5981_s20  ;;  %3331 = vrot.lane.b32.xlu0 %v7157_v16, %s5981_s20  ;;  %v8373_v52 = vld [vmem:[#allocation22_spill] sm:$0xff] }
 0x849   : > { %3337 = vrot.lane.b32.xlu1 %v7163_v8, %s5981_s20  ;;  %3335 = vrot.lane.b32.xlu0 %v7165_v7, %s5981_s20 }
 0x84d   : > { %3341 = vrot.lane.b32.xlu1 %v7171_v0, %s5981_s20  ;;  %3339 = vrot.lane.b32.xlu0 %v7173_v26, %s5981_s20 }
 0x851   : > { %3343 = vrot.lane.b32.xlu0 %v7179_v11, %s5981_s20 }
 0x869   : > { %v2894_v25 = vpop.permute.xlu1 %2893 }
 0x86a   : > { %v2927_v8 = vsub.f32 %v7279_v57, %v2894_v25 }
 0x86b   : > { %v2889_v46 = vpop.permute.xlu0 %2888 }
 0x86c   : > { %v2926_v2 = vsub.f32 %v7284_v62, %v2889_v46  ;;  %v2936_v7 = vmul.f32 1.442695, %v2927_v8 }
 0x86d   : > { %v3106_v3 = vpop.permute.xlu1 %3105 }
 0x86e   : > { %v2934_v51 = vmul.f32 1.442695, %v2926_v2 }
 0x86f   : > { %v3108_v16 = vpop.permute.xlu0 %3107 }
 0x870   : > { %5742 = vpow2.f32 %v2934_v51  ;;  %1615 = vadd.xlane.f32.xlu0 %v6843_v20  ;;  %5444 = vmatprep.subr.mxu1 %v3108_v16 }
 0x871   : > { %v3102_v0 = vpop.permute.xlu1 %3101  ;;  %1613 = vadd.xlane.f32.xlu1 %v6840_v17  ;;  %5445 = vmatpush3.msra.mxu1 %v3108_v16  ;;  %5744 = vpow2.f32 %v2936_v7 }
 0x872   : > { %5446 = vmatprep.subr.mxu1 %v3106_v3 }
 0x873   : > { %5447 = vmatpush3.msra.mxu1 %v3106_v3  ;;  %v3104_v26 = vpop.permute.xlu0 %3103 }
 0x874   : > { %1617 = vadd.xlane.f32.xlu0 %v6850_v37  ;;  %5448 = vmatprep.subr.mxu1 %v3104_v26 }
 0x875   : > { %v3098_v11 = vpop.permute.xlu1 %3097  ;;  %1619 = vadd.xlane.f32.xlu1 %v6853_v43  ;;  %5449 = vmatpush3.msra.mxu1 %v3104_v26 }
 0x876   : > { %5450 = vmatprep.subr.mxu1 %v3102_v0 }
 0x877   : > { %5451 = vmatpush3.msra.mxu1 %v3102_v0  ;;  %v3100_v36 = vpop.permute.xlu0 %3099 }
 0x878   : > { %1621 = vadd.xlane.f32.xlu0 %v6886_v19  ;;  %5452 = vmatprep.subr.mxu1 %v3100_v36 }
 0x879   : > { %v3094_v17 = vpop.permute.xlu1 %3093  ;;  %1623 = vadd.xlane.f32.xlu1 %v6889_v21  ;;  %5453 = vmatpush3.msra.mxu1 %v3100_v36  ;;  %v8374_v21 = vld [vmem:[#allocation24_spill] sm:$0xff] }
 0x87a   : > { %5454 = vmatprep.subr.mxu1 %v3098_v11  ;;  %v8375_v10 = vsub.f32 %v8373_v52, %v8374_v21 }
 0x87b   : > { %5455 = vmatpush3.msra.mxu1 %v3098_v11  ;;  %v3096_v20 = vpop.permute.xlu0 %3095 }
 0x87c   : > { %1625 = vadd.xlane.f32.xlu0 %v6892_v58  ;;  %5456 = vmatprep.subr.mxu1 %v3096_v20  ;;  %v1517_v9 = vmul.f32 1.442695, %v8375_v10 }
 0x87d   : > { %v7500_v37 = vpop.eup %5742  ;;  %1627 = vadd.xlane.f32.xlu1 %v6898_v14  ;;  %5457 = vmatpush3.msra.mxu1 %v3096_v20  ;;  %v3090_v43 = vpop.permute.xlu1 %3089  ;;  %v8376_v14 = vld [vmem:[#allocation23_spill] sm:$0xff] }
 0x87e   : > { %5458 = vmatprep.subr.mxu1 %v3094_v17  ;;  %5466 = vmatprep.mubr.f32.mxu1 %v7500_v37  ;;  %5746 = vpow2.f32 %v1517_v9  ;;  %v8377_v41 = vsub.f32 %v8376_v14, %v6716_v27  ;;  %v7511_v62 = vpop.eup %5744 }
 0x87f   : > { %5459 = vmatpush3.msra.mxu1 %v3094_v17  ;;  %v3092_v19 = vpop.permute.xlu0 %3091 }
 0x880   : > { %5460 = vmatprep.subr.mxu1 %v3092_v19  ;;  %v1523_v57 = vmul.f32 1.442695, %v8377_v41 }
 0x881   : > { %2244 = vadd.xlane.f32.xlu1 %v7194_v12  ;;  %5461 = vmatpush3.msra.mxu1 %v3092_v19  ;;  %v3392_v44 = vpop.permute.xlu1 %3391 }
 0x882   : > { %5462 = vmatprep.subr.mxu1 %v3090_v43  ;;  %5748 = vpow2.f32 %v1523_v57 }
 0x883   : > { %5463 = vmatpush3.msra.mxu1 %v3090_v43  ;;  %v3088_v58 = vpop.permute.xlu0 %3087 }
 0x884   : > { %5464 = vmatprep.subr.mxu1 %v3088_v58 }
 0x885   : > { %2248 = vadd.xlane.f32.xlu1 %v7230_v22  ;;  %5465 = vmatpush3.msra.mxu1 %v3088_v58  ;;  %v3388_v27 = vpop.permute.xlu1 %3387 }
 0x886   : > { %5467 = vmatmul.mubr.f32.vlgmr.msra.gmra.mxu1 %v7511_v62  ;;  %5478 = vmatprep.subr.msk.mxu1 %vm1291_vm3, %v3392_v44 }
 0x887   : > { %5479 = vmatpush3.xpose.msk.msra.mxu1 %vm1291_vm3, %v3392_v44  ;;  %v3390_v12 = vpop.permute.xlu0 %3389 }
 0x888   : > { %5480 = vmatprep.subr.msk.mxu1 %vm1291_vm3, %v3390_v12 }
 0x889   : > { %2252 = vadd.xlane.f32.xlu1 %v7239_v33  ;;  %v3384_v25 = vpop.permute.xlu1 %3383 }
 0x88b   : > { %5481 = vmatpush3.xpose.msk.msra.mxu1 %vm1291_vm3, %v3390_v12  ;;  %v3386_v53 = vpop.permute.xlu0 %3385  ;;  %v7523_v22 = vpop.eup %5746 }
 0x88c   : > { %5482 = vmatprep.subr.msk.mxu1 %vm1291_vm3, %v3388_v27 }
 0x88d   : > { %v3380_v2 = vpop.permute.xlu1 %3379 }
 0x88f   : > { %5483 = vmatpush3.xpose.msk.msra.mxu1 %vm1291_vm3, %v3388_v27  ;;  %v7528_v33 = vpop.eup %5748  ;;  %v3382_v46 = vpop.permute.xlu0 %3381 }
 0x890   : > { %5484 = vmatprep.subr.msk.mxu1 %vm1291_vm3, %v3386_v53 }
 0x891   : > { %v3378_v3 = vpop.permute.xlu1 %3377 }
 0x892   : > { %1656 = vperm.xlu0 %5708, %v7523_v22  }
 0x893   : > { %5485 = vmatpush3.xpose.msk.msra.mxu1 %vm1291_vm3, %v3386_v53 }
 0x894   : > { %5486 = vmatprep.subr.msk.mxu1 %vm1291_vm3, %v3384_v25 }
 0x896   : > { %1671 = vperm.xlu0 %5708, %v7528_v33  }
 0x897   : > { %5487 = vmatpush3.xpose.msk.msra.mxu1 %vm1291_vm3, %v3384_v25 }
 0x898   : > { %5488 = vmatprep.subr.msk.mxu1 %vm1291_vm3, %v3382_v46 }
 0x89b   : > { %5489 = vmatpush3.xpose.msk.msra.mxu1 %vm1291_vm3, %v3382_v46 }
 0x89c   : > { %5490 = vmatprep.subr.msk.mxu1 %vm1291_vm3, %v3380_v2 }
 0x89f   : > { %5491 = vmatpush3.xpose.msk.msra.mxu1 %vm1291_vm3, %v3380_v2 }
 0x8a0   : > { %5492 = vmatprep.subr.msk.mxu1 %vm1291_vm3, %v3378_v3  ;;  %v2904_v51 = vpop.permute.xlu0 %2903 }
 0x8a1   : > { %v2929_v16 = vsub.f32 %v7301_v1, %v2904_v51 }
 0x8a3   : > { %5493 = vmatpush3.xpose.msk.msra.mxu1 %vm1291_vm3, %v3378_v3  ;;  %v2940_v7 = vmul.f32 1.442695, %v2929_v16 }
 0x8a4   : > { %v2914_v8 = vpop.permute.xlu1 %2913  ;;  %v2899_v0 = vpop.permute.xlu0 %2898 }
 0x8a5   : > { %v2928_v26 = vsub.f32 %v7297_v63, %v2899_v0  ;;  %v2931_v11 = vsub.f32 %v7311_v4, %v2914_v8  ;;  %v8378_v8 = vld [vmem:[#allocation25_spill] sm:$0xff]  ;;  %v8379_v0 = vld [vmem:[#allocation27_spill] sm:$0xff] }
 0x8a7   : > { %v2938_v36 = vmul.f32 1.442695, %v2928_v26  ;;  %v2944_v1 = vmul.f32 1.442695, %v2931_v11  ;;  %v8380_v26 = vsub.f32 %v8378_v8, %v8379_v0  ;;  %v8381_v11 = vld [vmem:[#allocation26_spill] sm:$0xff] }
 0x8a8   : > { %v2909_v17 = vpop.permute.xlu1 %2908  ;;  %v3376_v20 = vpop.permute.xlu0 %3375 }
 0x8a9   : > { %v2930_v43 = vsub.f32 %v7306_v15, %v2909_v17  ;;  %5494 = vmatprep.subr.msk.mxu1 %vm1291_vm3, %v3376_v20  ;;  %5750 = vpow2.f32 %v2938_v36  ;;  %v8382_v36 = vld [vmem:[#allocation28_spill] sm:$0xff] }
 0x8aa   : > { %5495 = vmatpush3.xpose.msk.msra.mxu1 %vm1291_vm3, %v3376_v20  ;;  %5752 = vpow2.f32 %v2940_v7  ;;  %v1519_v7 = vmul.f32 1.442695, %v8380_v26  ;;  %v8383_v17 = vsub.f32 %v8381_v11, %v8382_v36 }
 0x8ab   : > { %v2942_v19 = vmul.f32 1.442695, %v2930_v43  ;;  %v8384_v43 = vsub.f32 %v6727_v60, %v6745_v23  ;;  %v8394_v60 = vld [vmem:[#allocation43_spill] sm:$0xff]  ;;  %v8395_v23 = vld [vmem:[#allocation45_spill] sm:$0xff] }
 0x8ac   : > { %v3374_v52 = vpop.permute.xlu1 %3373  ;;  %v2919_v21 = vpop.permute.xlu0 %2918  ;;  %v1521_v20 = vmul.f32 1.442695, %v8383_v17  ;;  %v1600_v17 = vld [vmem:[#allocation6 + $0x18] sm:$0xff] }
 0x8ad   : > { %5754 = vpow2.f32 %v2942_v19  ;;  %v2932_v63 = vsub.f32 %v7316_v61, %v2919_v21  ;;  %5496 = vmatprep.subr.msk.mxu1 %vm1291_vm3, %v3374_v52  ;;  %v8385_v19 = vld [vmem:[#allocation29_spill] sm:$0xff] }
 0x8ae   : > { %5497 = vmatpush3.xpose.msk.msra.mxu1 %vm1291_vm3, %v3374_v52  ;;  %5756 = vpow2.f32 %v2944_v1  ;;  %v1525_v1 = vmul.f32 1.442695, %v8384_v43  ;;  %v8386_v52 = vld [vmem:[#allocation31_spill] sm:$0xff] }
 0x8af   : > { %v2946_v4 = vmul.f32 1.442695, %v2932_v63  ;;  %v8387_v21 = vsub.f32 %v8385_v19, %v8386_v52  ;;  %v8400_v19 = vld [vmem:[#allocation48_spill] sm:$0xff]  ;;  %v8401_v52 = vld [vmem:[#allocation51_spill] sm:$0xff] }
 0x8b0   : > { %v3372_v15 = vpop.permute.xlu1 %3371  ;;  %v2924_v10 = vpop.permute.xlu0 %2923 }
 0x8b1   : > { %5758 = vpow2.f32 %v2946_v4  ;;  %v2933_v9 = vsub.f32 %v7321_v50, %v2924_v10  ;;  %5498 = vmatprep.subr.msk.mxu1 %vm1291_vm3, %v3372_v15  ;;  %v1527_v63 = vmul.f32 1.442695, %v8387_v21  ;;  %v8388_v4 = vld [vmem:[#allocation30_spill] sm:$0xff]  ;;  %v8402_v21 = vsub.f32 %v8400_v19, %v8401_v52 }
 0x8b2   : > { %5499 = vmatpush3.xpose.msk.msra.mxu1 %vm1291_vm3, %v3372_v15  ;;  %v8389_v15 = vld [vmem:[#allocation33_spill] sm:$0xff]  ;;  %v2229_v19 = vld [vmem:[#allocation6 + $0x58] sm:$0xff] }
 0x8b3   : > { %v2948_v58 = vmul.f32 1.442695, %v2933_v9  ;;  %v8390_v10 = vsub.f32 %v8388_v4, %v8389_v15  ;;  %v1601_v15 = vld [vmem:[#allocation6 + $0x20] sm:$0xff] }
 0x8b4   : > { %v3368_v14 = vpop.permute.xlu1 %3367  ;;  %v3370_v41 = vpop.permute.xlu0 %3369 }
 0x8b5   : > { %5760 = vpow2.f32 %v2948_v58  ;;  %2242 = vadd.xlane.f32.xlu0 %v7191_v24  ;;  %5500 = vmatprep.subr.msk.mxu1 %vm1291_vm3, %v3370_v41  ;;  %v1529_v9 = vmul.f32 1.442695, %v8390_v10  ;;  %v8391_v58 = vld [vmem:[#allocation32_spill] sm:$0xff] }
 0x8b6   : > { %5501 = vmatpush3.xpose.msk.msra.mxu1 %vm1291_vm3, %v3370_v41  ;;  %v7553_v61 = vpop.eup %5750  ;;  %5762 = vpow2.f32 %v1519_v7  ;;  %v1599_v7 = vld [vmem:[#allocation6 + $0x10] sm:$0xff] }
 0x8b7   : > { %5502 = vmatprep.subr.msk.mxu1 %vm1291_vm3, %v3368_v14  ;;  %v7556_v57 = vpop.eup %5752  ;;  %5469 = vmatprep.mubr.f32.mxu1 %v7553_v61  ;;  %5764 = vpow2.f32 %v1521_v20 }
 0x8b8   : > { %v3366_v50 = vpop.permute.xlu0 %3365  ;;  %v3364_v44 = vpop.permute.xlu1 %3363  ;;  %5470 = vmatmul.mubr.f32.gmra.mxu1 %v7556_v57  ;;  %5766 = vpow2.f32 %v1525_v1 }
 0x8b9   : > { %2246 = vadd.xlane.f32.xlu0 %v7227_v5  ;;  %5768 = vpow2.f32 %v1527_v63  ;;  %v2155_v63 = vmul.f32 1.442695, %v8402_v21  ;;  %v1646_v21 = vld [vmem:[#allocation7] sm:$0xff] }
 0x8ba   : > { %v7561_v12 = vpop.eup %5754  ;;  %5503 = vmatpush3.xpose.msk.msra.mxu1 %vm1291_vm3, %v3368_v14  ;;  %v8392_v14 = vld [vmem:[#allocation34_spill] sm:$0xff]  ;;  %5770 = vpow2.f32 %v1529_v9 }
 0x8bb   : > { %5472 = vmatprep.mubr.f32.mxu1 %v7561_v12  ;;  %5504 = vmatprep.subr.msk.mxu1 %vm1291_vm3, %v3366_v50  ;;  %v7566_v24 = vpop.eup %5756  ;;  %v8393_v41 = vsub.f32 %v8391_v58, %v8392_v14  ;;  %v1602_v14 = vld [vmem:[#allocation6 + $0x28] sm:$0xff] }
 0x8bc   : > { %v3362_v27 = vpop.permute.xlu0 %3361  ;;  %5473 = vmatmul.mubr.f32.gmra.mxu1 %v7566_v24  ;;  %v3330_v53 = vpop.permute.xlu1 %3329 }
 0x8bd   : > { %2250 = vadd.xlane.f32.xlu0 %v7234_v42 }
 0x8be   : > { %v7570_v25 = vpop.eup %5758  ;;  %5505 = vmatpush3.xpose.msk.msra.mxu1 %vm1291_vm3, %v3366_v50  ;;  %v1531_v50 = vmul.f32 1.442695, %v8393_v41 }
 0x8bf   : > { %5475 = vmatprep.mubr.f32.mxu1 %v7570_v25  ;;  %5506 = vmatprep.subr.msk.mxu1 %vm1291_vm3, %v3364_v44 }
 0x8c0   : > { %v3332_v5 = vpop.permute.xlu0 %3331  ;;  %v3334_v42 = vpop.permute.xlu1 %3333  ;;  %5772 = vpow2.f32 %v1531_v50 }
 0x8c1   : > { %2254 = vadd.xlane.f32.xlu0 %v7242_v29 }
 0x8c2   : > { %v7576_v46 = vpop.eup %5760  ;;  %5507 = vmatpush3.xpose.msk.msra.mxu1 %vm1291_vm3, %v3364_v44 }
 0x8c3   : > { %5476 = vmatmul.mubr.f32.gmra.mxu1 %v7576_v46  ;;  %5508 = vmatprep.subr.msk.mxu1 %vm1291_vm3, %v3362_v27  ;;  %v7608_v44 = vpop.eup %5762 }
 0x8c4   : > { %5510 = vmatprep.mubr.msk.f32.mxu1 %vm1291_vm3, %v3330_v53  ;;  %v3336_v2 = vpop.permute.xlu0 %3335  ;;  %v3338_v3 = vpop.permute.xlu1 %3337 }
 0x8c6   : > { %5509 = vmatpush3.xpose.msk.msra.mxu1 %vm1291_vm3, %v3362_v27  ;;  %v8396_v27 = vsub.f32 %v8394_v60, %v8395_v23 }
 0x8c8   : > { %v3340_v29 = vpop.permute.xlu0 %3339  ;;  %v3342_v51 = vpop.permute.xlu1 %3341  ;;  %v2147_v53 = vmul.f32 1.442695, %v8396_v27 }
 0x8c9   : > { %5511 = vmatmul.mubr.msk.f32.vlgmr.msra.gmra.mxu1 %vm1291_vm3, %v3332_v5  ;;  %v1598_v5 = vld [vmem:[#allocation6 + $0x8] sm:$0xff] }
 0x8ca   : > { %5513 = vmatprep.mubr.msk.f32.mxu1 %vm1291_vm3, %v3334_v42  ;;  %v1597_v42 = vld [vmem:[#allocation6] sm:$0xff]  ;;  %5774 = vpow2.f32 %v2147_v53 }
 0x8cb   : > { %v1605_v26 = vmul.f32 %v7523_v22, %v1597_v42  ;;  %v1608_v22 = vmul.f32 %v7528_v33, %v1600_v17  ;;  %v1603_v33 = vld [vmem:[#allocation6 + $0x30] sm:$0xff] }
 0x8cc   : > { %v3344_v16 = vpop.permute.xlu0 %3343 }
 0x8cd   : > { %5514 = vmatmul.mubr.msk.f32.gmra.mxu1 %vm1291_vm3, %v3336_v2  ;;  %v1606_v2 = vmul.f32 %v7608_v44, %v1598_v5 }
 0x8ce   : > { %5516 = vmatprep.mubr.msk.f32.mxu1 %vm1291_vm3, %v3338_v3  ;;  %v7614_v3 = vpop.eup %5764 }
 0x8cf   : > { %v1607_v43 = vmul.f32 %v7614_v3, %v1599_v7  ;;  %v7622_v1 = vpop.eup %5766 }
 0x8d0   : > { %v7629_v10 = vpop.eup %5768  ;;  %v1609_v50 = vmul.f32 %v7622_v1, %v1601_v15 }
 0x8d1   : > { %5517 = vmatmul.mubr.msk.f32.gmra.mxu1 %vm1291_vm3, %v3340_v29  ;;  %v8397_v29 = vld [vmem:[#allocation20_spill] sm:$0xff]  ;;  %v7633_v60 = vpop.eup %5770  ;;  %v1610_v27 = vmul.f32 %v7629_v10, %v1602_v14 }
 0x8d2   : > { %5519 = vmatprep.mubr.msk.f32.mxu1 %vm1291_vm3, %v3342_v51  ;;  %v8398_v51 = vld [vmem:[#allocation47_spill] sm:$0xff]  ;;  %v7637_v53 = vpop.eup %5772 }
 0x8d5   : > { %5520 = vmatmul.mubr.msk.f32.gmra.mxu1 %vm1291_vm3, %v3344_v16  ;;  %v8399_v16 = vsub.f32 %v8397_v29, %v8398_v51  ;;  %v1611_v51 = vmul.f32 %v7633_v60, %v1603_v33 }
 0x8d7   : > { %v2151_v8 = vmul.f32 1.442695, %v8399_v16 }
 0x8d9   : > { %5776 = vpow2.f32 %v2151_v8 }
 0x8da   : > { %5778 = vpow2.f32 %v2155_v63 }
 0x8f9   : > { %v1616_v0 = vpop.xlane.xlu0 %1615 }
 0x8fa   : > { %v1630_v11 = vadd.f32 %v1616_v0, %v1606_v2  ;;  %v1614_v36 = vpop.xlane.xlu1 %1613  ;;  %v1604_v2 = vld [vmem:[#allocation6 + $0x38] sm:$0xff]  ;;  %v7643_v0 = vpop.eup %5774 }
 0x8fb   : > { %v1629_v20 = vadd.f32 %v1614_v36, %v1605_v26  ;;  %v1612_v8 = vmul.f32 %v7637_v53, %v1604_v2 }
 0x8fc   : > { %1639 = vst.msk [vmem:[#allocation6 + $0x8] sm:$0xff] %vm1637_vm12, %v1630_v11  ;;  %v2227_v11 = vld [vmem:[#allocation6 + $0x48] sm:$0xff] }
 0x8fd   : > { %1638 = vst.msk [vmem:[#allocation6] sm:$0xff] %vm1637_vm12, %v1629_v20  ;;  %v1618_v4 = vpop.xlane.xlu0 %1617  ;;  %v2235_v17 = vmul.f32 %v7643_v0, %v2227_v11  ;;  %v7648_v20 = vpop.eup %5776  ;;  %v8408_v11 = vld [vmem:[#allocation18_spill] sm:$0xff] }
 0x8fe   : > { %v1631_v9 = vadd.f32 %v1618_v4, %v1607_v43  ;;  %v1620_v58 = vpop.xlane.xlu1 %1619  ;;  %v2237_v4 = vmul.f32 %v7648_v20, %v2229_v19  ;;  %v8411_v19 = vld [vmem:[#allocation21_spill] sm:$0xff] }
 0x8ff   : > { %v1632_v41 = vadd.f32 %v1620_v58, %v1608_v22  ;;  %v7652_v22 = vpop.eup %5778  ;;  %v2231_v58 = vld [vmem:[#allocation6 + $0x68] sm:$0xff] }
 0x900   : > { %1640 = vst.msk [vmem:[#allocation6 + $0x10] sm:$0xff] %vm1637_vm12, %v1631_v9  ;;  %v2239_v33 = vmul.f32 %v7652_v22, %v2231_v58 }
 0x901   : > { %1641 = vst.msk [vmem:[#allocation6 + $0x18] sm:$0xff] %vm1637_vm12, %v1632_v41  ;;  %v1622_v23 = vpop.xlane.xlu0 %1621  ;;  %v1649_v41 = vld [vmem:[#allocation7 + $0x18] sm:$0xff] }
 0x902   : > { %v1633_v5 = vadd.f32 %v1622_v23, %v1609_v50  ;;  %v1624_v42 = vpop.xlane.xlu1 %1623  ;;  %v8403_v50 = vld [vmem:[#allocation36_spill] sm:$0xff] }
 0x903   : > { %v1634_v29 = vadd.f32 %v1624_v42, %v1610_v27 }
 0x904   : > { %1642 = vst.msk [vmem:[#allocation6 + $0x20] sm:$0xff] %vm1637_vm12, %v1633_v5 }
 0x905   : > { %1643 = vst.msk [vmem:[#allocation6 + $0x28] sm:$0xff] %vm1637_vm12, %v1634_v29  ;;  %v1626_v16 = vpop.xlane.xlu0 %1625  ;;  %v8404_v29 = vld [vmem:[#allocation37_spill] sm:$0xff] }
 0x906   : > { %v1635_v26 = vadd.f32 %v1626_v16, %v1611_v51  ;;  %v1628_v7 = vpop.xlane.xlu1 %1627  ;;  %v8405_v16 = vld [vmem:[#allocation44_spill] sm:$0xff] }
 0x907   : > { %v1636_v36 = vadd.f32 %v1628_v7, %v1612_v8  ;;  %v8406_v8 = vld [vmem:[#allocation46_spill] sm:$0xff] }
 0x908   : > { %1644 = vst.msk [vmem:[#allocation6 + $0x30] sm:$0xff] %vm1637_vm12, %v1635_v26  ;;  %v8407_v26 = vsub.f32 %v8405_v16, %v8406_v8 }
 0x909   : > { %1645 = vst.msk [vmem:[#allocation6 + $0x38] sm:$0xff] %vm1637_vm12, %v1636_v36  ;;  %v8409_v36 = vld [vmem:[#allocation19_spill] sm:$0xff] }
 0x90a   : > { %v2245_v43 = vpop.xlane.xlu1 %2244  ;;  %v2145_v7 = vmul.f32 1.442695, %v8407_v26 }
 0x90b   : > { %v2259_v52 = vadd.f32 %v2245_v43, %v2235_v17  ;;  %v8410_v17 = vsub.f32 %v8408_v11, %v8409_v36  ;;  %v2232_v11 = vld [vmem:[#allocation6 + $0x70] sm:$0xff] }
 0x90c   : > { %5780 = vpow2.f32 %v2145_v7 }
 0x90d   : > { %2267 = vst.msk [vmem:[#allocation6 + $0x48] sm:$0xff] %vm1637_vm12, %v2259_v52  ;;  %v1657_v63 = vpop.permute.xlu0 %1656  ;;  %v2149_v43 = vmul.f32 1.442695, %v8410_v17  ;;  %v8412_v52 = vld [vmem:[#allocation49_spill] sm:$0xff] }
 0x90e   : > { %v1694_v15 = vmul.f32 %v1657_v63, %v1646_v21  ;;  %v2249_v9 = vpop.xlane.xlu1 %2248  ;;  %v8413_v21 = vsub.f32 %v8411_v19, %v8412_v52 }
 0x90f   : > { %v2261_v14 = vadd.f32 %v2249_v9, %v2237_v4  ;;  %5782 = vpow2.f32 %v2149_v43  ;;  %v8414_v4 = vld [vmem:[#allocation50_spill] sm:$0xff] }
 0x910   : > { %v1823_v23 = vadd.f32 %v8403_v50, %v1694_v15  ;;  %v2153_v63 = vmul.f32 1.442695, %v8413_v21  ;;  %v8415_v15 = vld [vmem:[#allocation53_spill] sm:$0xff] }
 0x911   : > { %2269 = vst.msk [vmem:[#allocation6 + $0x58] sm:$0xff] %vm1637_vm12, %v2261_v14  ;;  %v1672_v27 = vpop.permute.xlu0 %1671  ;;  %v8416_v9 = vsub.f32 %v8414_v4, %v8415_v15 }
 0x912   : > { %1831 = vst.msk [vmem:[#allocation7] sm:$0xff] %vm1291_vm3, %v1823_v23  ;;  %v1697_v5 = vmul.f32 %v1672_v27, %v1649_v41  ;;  %v2253_v42 = vpop.xlane.xlu1 %2252  ;;  %5784 = vpow2.f32 %v2153_v63  ;;  %v2226_v41 = vld [vmem:[#allocation6 + $0x40] sm:$0xff] }
 0x913   : > { %v2263_v2 = vadd.f32 %v2253_v42, %v2239_v33  ;;  %v2157_v58 = vmul.f32 1.442695, %v8416_v9  ;;  %v2228_v33 = vld [vmem:[#allocation6 + $0x50] sm:$0xff] }
 0x914   : > { %v1826_v51 = vadd.f32 %v8404_v29, %v1697_v5 }
 0x915   : > { %2271 = vst.msk [vmem:[#allocation6 + $0x68] sm:$0xff] %vm1637_vm12, %v2263_v2  ;;  %5786 = vpow2.f32 %v2157_v58 }
 0x916   : > { %1834 = vst.msk [vmem:[#allocation7 + $0x18] sm:$0xff] %vm1291_vm3, %v1826_v51  ;;  %v2230_v51 = vld [vmem:[#allocation6 + $0x60] sm:$0xff] }
 0x919   : > { %v7673_v14 = vpop.eup %5780 }
 0x91a   : > { %v2234_v50 = vmul.f32 %v7673_v14, %v2226_v41 }
 0x91c   : > { %v7676_v23 = vpop.eup %5782 }
 0x91d   : > { %v2236_v42 = vmul.f32 %v7676_v23, %v2228_v33 }
 0x91f   : > { %v7680_v2 = vpop.eup %5784 }
 0x920   : > { %v2238_v8 = vmul.f32 %v7680_v2, %v2230_v51 }
 0x922   : > { %v7684_v26 = vpop.eup %5786 }
 0x923   : > { %v2240_v17 = vmul.f32 %v7684_v26, %v2232_v11 }
 0x93e   : > { %v2243_v27 = vpop.xlane.xlu0 %2242 }
 0x93f   : > { %v2258_v5 = vadd.f32 %v2243_v27, %v2234_v50 }
 0x941   : > { %2266 = vst.msk [vmem:[#allocation6 + $0x40] sm:$0xff] %vm1637_vm12, %v2258_v5 }
 0x942   : > { %v2247_v29 = vpop.xlane.xlu0 %2246 }
 0x943   : > { %v2260_v16 = vadd.f32 %v2247_v29, %v2236_v42 }
 0x945   : > { %2268 = vst.msk [vmem:[#allocation6 + $0x50] sm:$0xff] %vm1637_vm12, %v2260_v16 }
 0x946   : > { %v2251_v7 = vpop.xlane.xlu0 %2250  ;;  %v7689_v52 = vpop.f32.mrf.mxu1 }
 0x947   : > { %v2262_v36 = vadd.f32 %v2251_v7, %v2238_v8  ;;  %v8434_v7 = vld [vmem:[#allocation54_spill] sm:$0xff] }
 0x948   : > { %v7691_v21 = vpop.f32.mrf.mxu1 }
 0x949   : > { %2270 = vst.msk [vmem:[#allocation6 + $0x60] sm:$0xff] %vm1637_vm12, %v2262_v36 }
 0x94a   : > { %v2255_v43 = vpop.xlane.xlu0 %2254 }
 0x94b   : > { %v2264_v19 = vadd.f32 %v2255_v43, %v2240_v17 }
 0x94d   : > { %2272 = vst.msk [vmem:[#allocation6 + $0x70] sm:$0xff] %vm1637_vm12, %v2264_v19  ;;  %v8422_v19 = vld [vmem:[#allocation55_spill] sm:$0xff] }
 0x978   : > { %v7693_v63 = vpop.f32.mrf.mxu1 }
 0x97a   : > { %v7695_v4 = vpop.f32.mrf.mxu1 }
 0x97c   : > { %v7697_v15 = vpop.f32.mrf.mxu1 }
 0x97d   : > { %8417 = vst [vmem:[#allocation22_spill] sm:$0xff] %v7697_v15 }
 0x97e   : > { %v7699_v9 = vpop.f32.mrf.mxu1 }
 0x983   : > { %v7701_v58 = vpop.f32.mrf.mxu1 }
 0x984   : > { %8418 = vst [vmem:[#allocation24_spill] sm:$0xff] %v7701_v58  ;;  %v8437_v58 = vld [vmem:[#allocation39_spill] sm:$0xff] }
 0x985   : > { %v7703_v41 = vpop.f32.mrf.mxu1 }
 0x989   : > { %v5512_v50 = vpop.f32.mrf.mxu1 }
 0x98a   : > { %v7707_v27 = vsel %vm1260_vm6, -1.25e+19, %v5512_v50  ;;  %v3795_v50 = vld [vmem:[#allocation4 + $0x78] sm:$0xff] }
 0x98b   : > { %3565 = vmax.xlane.f32.xlu0 %v7707_v27  ;;  %v3507_v33 = vpop.f32.mrf.mxu1 }
 0x98c   : > { %v7712_v5 = vsel %vm1259_vm4, -1.25e+19, %v3507_v33  ;;  %v3794_v33 = vld [vmem:[#allocation4 + $0x70] sm:$0xff] }
 0x98d   : > { %3563 = vmax.xlane.f32.xlu1 %v7712_v5  ;;  %v5515_v42 = vpop.f32.mrf.mxu1 }
 0x98e   : > { %v7717_v29 = vsel %vm1262_vm5, -1.25e+19, %v5515_v42  ;;  %v8423_v42 = vld [vmem:[#allocation65_spill] sm:$0xff] }
 0x98f   : > { %v3517_v51 = vpop.f32.mrf.mxu1 }
 0x990   : > { %v7721_v31 = vsel %vm1261_vm7, -1.25e+19, %v3517_v51  ;;  %v8424_v51 = vld [vmem:[#allocation64_spill] sm:$0xff] }
 0x991   : > { %3569 = vmax.xlane.f32.xlu1 %v7717_v29  ;;  %3567 = vmax.xlane.f32.xlu0 %v7721_v31  ;;  %v5518_v16 = vpop.f32.mrf.mxu1 }
 0x992   : > { %v7727_v28 = vsel %vm1264_vm9, -1.25e+19, %v5518_v16  ;;  %v3793_v16 = vld [vmem:[#allocation4 + $0x68] sm:$0xff] }
 0x993   : > { %v3527_v8 = vpop.f32.mrf.mxu1 }
 0x994   : > { %v7731_v30 = vsel %vm1263_vm8, -1.25e+19, %v3527_v8  ;;  %v8432_v8 = vld [vmem:[#allocation63_spill] sm:$0xff] }
 0x995   : > { %3573 = vmax.xlane.f32.xlu1 %v7727_v28  ;;  %3571 = vmax.xlane.f32.xlu0 %v7731_v30  ;;  %v5521_v32 = vpop.f32.mrf.mxu1 }
 0x996   : > { %v7737_v36 = vsel %vm1266_vm11, -1.25e+19, %v5521_v32 }
 0x997   : > { %v3537_v17 = vpop.f32.mrf.mxu1 }
 0x998   : > { %v7741_v40 = vsel %vm1265_vm10, -1.25e+19, %v3537_v17  ;;  %v7786_v17 = vld [vmem:[#allocation5 + $0xc8] sm:$0xff] }
 0x999   : > { %3577 = vmax.xlane.f32.xlu1 %v7737_v36  ;;  %3575 = vmax.xlane.f32.xlu0 %v7741_v40 }
 0x99d   : > { %2256 = vadd.xlane.f32.xlu1 %v8422_v19  ;;  %v7788_v19 = vld [vmem:[#allocation5 + $0xc0] sm:$0xff] }
 0x9ae   : > { %3842 = vrot.lane.b32.xlu1 %v3795_v50, %s5981_s20 }
 0x9af   : > { %1681 = vperm.xlu0 %5708, %v7629_v10   ;;  %v8425_v10 = vld [vmem:[#allocation70_spill] sm:$0xff] }
 0x9b2   : > { %3840 = vrot.lane.b32.xlu1 %v3794_v33, %s5981_s20 }
 0x9b3   : > { %1691 = vperm.xlu0 %5708, %v7637_v53   ;;  %v8426_v53 = vld [vmem:[#allocation71_spill] sm:$0xff] }
 0x9b6   : > { %3836 = vrot.lane.b32.xlu1 %v8423_v42, %s5981_s20 }
 0x9b7   : > { %2284 = vperm.xlu0 %5708, %v7673_v14   ;;  %v8430_v14 = vld [vmem:[#allocation59_spill] sm:$0xff] }
 0x9ba   : > { %3834 = vrot.lane.b32.xlu1 %v8424_v51, %s5981_s20  ;;  %v7802_v51 = vld [vmem:[#allocation5 + $0xd8] sm:$0xff] }
 0x9bb   : > { %3838 = vrot.lane.b32.xlu0 %v3793_v16, %s5981_s20  ;;  %v7804_v16 = vld [vmem:[#allocation5 + $0xd0] sm:$0xff] }
 0x9be   : > { %3832 = vrot.lane.b32.xlu1 %v7349_v34, %s5981_s20  ;;  %v8427_v34 = vld [vmem:[#allocation72_spill] sm:$0xff] }
 0x9c2   : > { %3830 = vrot.lane.b32.xlu1 %v7345_v48, %s5981_s20  ;;  %v8428_v48 = vld [vmem:[#allocation73_spill] sm:$0xff] }
 0x9c6   : > { %3828 = vrot.lane.b32.xlu1 %v7357_v54, %s5981_s20  ;;  %v8429_v54 = vld [vmem:[#allocation57_spill] sm:$0xff] }
 0x9ca   : > { %3826 = vrot.lane.b32.xlu1 %v8425_v10, %s5981_s20 }
 0x9ce   : > { %3824 = vrot.lane.b32.xlu1 %v7365_v45, %s5981_s20  ;;  %v8431_v45 = vld [vmem:[#allocation61_spill] sm:$0xff] }
 0x9d2   : > { %3822 = vrot.lane.b32.xlu1 %v8426_v53, %s5981_s20 }
 0x9d6   : > { %3820 = vrot.lane.b32.xlu1 %v7370_v56, %s5981_s20  ;;  %v8433_v56 = vld [vmem:[#allocation52_spill] sm:$0xff] }
 0x9d7   : > { %v8435_v32 = vsub.f32 %v8433_v56, %v8434_v7 }
 0x9d9   : > { %v2159_v11 = vmul.f32 1.442695, %v8435_v32 }
 0x9da   : > { %3816 = vrot.lane.b32.xlu1 %v8427_v34, %s5981_s20 }
 0x9db   : > { %5788 = vpow2.f32 %v2159_v11  ;;  %v7838_v11 = vld [vmem:[#allocation5 + $0xf8] sm:$0xff] }
 0x9dc   : > { %8436 = vst [vmem:[#allocation23_spill] sm:$0xff] %v7838_v11 }
 0x9de   : > { %3812 = vrot.lane.b32.xlu1 %v8428_v48, %s5981_s20 }
 0x9e2   : > { %2523 = vrot.lane.b32.xlu1 %v8429_v54, %s5982_s22  ;;  %v7818_v54 = vld [vmem:[#allocation5 + $0xe8] sm:$0xff] }
 0x9e6   : > { %2527 = vrot.lane.b32.xlu1 %v8430_v14, %s5982_s22  ;;  %v7820_v14 = vld [vmem:[#allocation5 + $0xe0] sm:$0xff] }
 0x9ea   : > { %2531 = vrot.lane.b32.xlu1 %v8431_v45, %s5982_s22 }
 0x9ee   : > { %2535 = vrot.lane.b32.xlu1 %v8432_v8, %s5982_s22 }
 0xa12   : > { %2967 = vadd.xlane.f32.xlu1 %v7500_v37 }
 0xa14   : > { %v3566_v43 = vpop.xlane.xlu0 %3565 }
 0xa15   : > { %v7791_v50 = vmax.f32 %v7786_v17, %v3566_v43  ;;  %v7840_v43 = vld [vmem:[#allocation5 + $0xf0] sm:$0xff] }
 0xa16   : > { %v3564_v33 = vpop.xlane.xlu1 %3563  ;;  %2973 = vadd.xlane.f32.xlu1 %v7556_v57 }
 0xa17   : > { %4015 = vst.msk [vmem:[#allocation5 + $0xc8] sm:$0xff] %vm1637_vm12, %v7791_v50  ;;  %v7799_v37 = vmax.f32 %v7788_v19, %v3564_v33  ;;  %3618 = vperm.xlu0 %5708, %v7791_v50  }
 0xa19   : > { %4014 = vst.msk [vmem:[#allocation5 + $0xc0] sm:$0xff] %vm1637_vm12, %v7799_v37 }
 0xa1a   : > { %v3570_v57 = vpop.xlane.xlu1 %3569  ;;  %2977 = vadd.xlane.f32.xlu1 %v7566_v24  ;;  %v3568_v53 = vpop.xlane.xlu0 %3567 }
 0xa1b   : > { %v7812_v34 = vmax.f32 %v7802_v51, %v3570_v57  ;;  %3613 = vperm.xlu0 %5708, %v7799_v37   ;;  %v7816_v48 = vmax.f32 %v7804_v16, %v3568_v53  ;;  %v7850_v57 = vpop.eup %5788 }
 0xa1d   : > { %4017 = vst.msk [vmem:[#allocation5 + $0xd8] sm:$0xff] %vm1637_vm12, %v7812_v34  ;;  %4016 = vst.msk [vmem:[#allocation5 + $0xd0] sm:$0xff] %vm1637_vm12, %v7816_v48 }
 0xa1e   : > { %v3574_v8 = vpop.xlane.xlu1 %3573  ;;  %2981 = vadd.xlane.f32.xlu1 %v7576_v46  ;;  %v3572_v56 = vpop.xlane.xlu0 %3571 }
 0xa1f   : > { %v7832_v7 = vmax.f32 %v7818_v54, %v3574_v8  ;;  %3628 = vperm.xlu0 %5708, %v7812_v34   ;;  %v7836_v32 = vmax.f32 %v7820_v14, %v3572_v56  ;;  %v2233_v8 = vld [vmem:[#allocation6 + $0x78] sm:$0xff] }
 0xa20   : > { %v2241_v18 = vmul.f32 %v7850_v57, %v2233_v8  ;;  %v1653_v8 = vld [vmem:[#allocation7 + $0x38] sm:$0xff] }
 0xa21   : > { %4019 = vst.msk [vmem:[#allocation5 + $0xe8] sm:$0xff] %vm1637_vm12, %v7832_v7  ;;  %4018 = vst.msk [vmem:[#allocation5 + $0xe0] sm:$0xff] %vm1637_vm12, %v7836_v32 }
 0xa22   : > { %v3578_v53 = vpop.xlane.xlu1 %3577  ;;  %v3576_v56 = vpop.xlane.xlu0 %3575 }
 0xa23   : > { %v7853_v45 = vmax.f32 %v7838_v11, %v3578_v53  ;;  %3623 = vperm.xlu0 %5708, %v7816_v48   ;;  %v7857_v33 = vmax.f32 %v7840_v43, %v3576_v56  ;;  %v1651_v56 = vld [vmem:[#allocation7 + $0x28] sm:$0xff] }
 0xa25   : > { %4021 = vst.msk [vmem:[#allocation5 + $0xf8] sm:$0xff] %vm1637_vm12, %v7853_v45  ;;  %4020 = vst.msk [vmem:[#allocation5 + $0xf0] sm:$0xff] %vm1637_vm12, %v7857_v33 }
 0xa26   : > { %v2257_v53 = vpop.xlane.xlu1 %2256 }
 0xa27   : > { %v2265_v24 = vadd.f32 %v2257_v53, %v2241_v18  ;;  %3638 = vperm.xlu0 %5708, %v7832_v7  }
 0xa29   : > { %2273 = vst.msk [vmem:[#allocation6 + $0x78] sm:$0xff] %vm1637_vm12, %v2265_v24  ;;  %v8438_v24 = vld [vmem:[#allocation41_spill] sm:$0xff] }
 0xa2a   : > { %v3843_v42 = vpop.permute.xlu1 %3842  ;;  %v1682_v10 = vpop.permute.xlu0 %1681 }
 0xa2b   : > { %v1699_v13 = vmul.f32 %v1682_v10, %v1651_v56  ;;  %5522 = vmatprep.subr.mxu0 %v3843_v42  ;;  %3633 = vperm.xlu0 %5708, %v7836_v32  }
 0xa2c   : > { %5523 = vmatpush3.msra.mxu0 %v3843_v42  ;;  %v8440_v42 = vld [vmem:[#allocation68_spill] sm:$0xff] }
 0xa2d   : > { %v1828_v46 = vadd.f32 %v8437_v58, %v1699_v13 }
 0xa2e   : > { %v3841_v11 = vpop.permute.xlu1 %3840  ;;  %v1692_v15 = vpop.permute.xlu0 %1691 }
 0xa2f   : > { %1836 = vst.msk [vmem:[#allocation7 + $0x28] sm:$0xff] %vm1291_vm3, %v1828_v46  ;;  %v1701_v18 = vmul.f32 %v1692_v15, %v1653_v8  ;;  %1661 = vperm.xlu1 %5709, %v7608_v44   ;;  %5524 = vmatprep.subr.mxu0 %v3841_v11  ;;  %v3783_v44 = vld [vmem:[#allocation4 + $0x18] sm:$0xff] }
 0xa30   : > { %3648 = vperm.xlu0 %5708, %v7853_v45   ;;  %5525 = vmatpush3.msra.mxu0 %v3841_v11  ;;  %v8439_v15 = vld [vmem:[#allocation66_spill] sm:$0xff] }
 0xa31   : > { %v1830_v10 = vadd.f32 %v8438_v24, %v1701_v18  ;;  %v8441_v11 = vsub.f32 %v8439_v15, %v8440_v42 }
 0xa32   : > { %v3837_v53 = vpop.permute.xlu1 %3836  ;;  %v7876_v56 = vpop.permute.xlu0 %2284 }
 0xa33   : > { %1838 = vst.msk [vmem:[#allocation7 + $0x38] sm:$0xff] %vm1291_vm3, %v1830_v10  ;;  %1666 = vperm.xlu1 %5709, %v7614_v3   ;;  %v2872_v46 = vmul.f32 1.442695, %v8441_v11  ;;  %v3781_v3 = vld [vmem:[#allocation4 + $0x8] sm:$0xff] }
 0xa34   : > { %3643 = vperm.xlu0 %5708, %v7857_v33  }
 0xa35   : > { %5790 = vpow2.f32 %v2872_v46  ;;  %v8450_v46 = vld [vmem:[#allocation62_spill] sm:$0xff] }
 0xa36   : > { %v3835_v13 = vpop.permute.xlu1 %3834  ;;  %v3839_v58 = vpop.permute.xlu0 %3838 }
 0xa37   : > { %1676 = vperm.xlu1 %5709, %v7622_v1   ;;  %5526 = vmatprep.subr.mxu0 %v3839_v58  ;;  %v8442_v1 = vld [vmem:[#allocation74_spill] sm:$0xff] }
 0xa38   : > { %3818 = vrot.lane.b32.xlu0 %v3783_v44, %s5981_s20  ;;  %5527 = vmatpush3.msra.mxu0 %v3839_v58  ;;  %v8443_v18 = vsub.f32 %v8442_v1, %v7404_v59  ;;  %v8447_v59 = vld [vmem:[#allocation58_spill] sm:$0xff] }
 0xa39   : > { %5528 = vmatprep.subr.mxu0 %v3837_v53 }
 0xa3a   : > { %v3833_v8 = vpop.permute.xlu1 %3832  ;;  %5529 = vmatpush3.msra.mxu0 %v3837_v53  ;;  %v2874_v24 = vmul.f32 1.442695, %v8443_v18  ;;  %v8444_v53 = vld [vmem:[#allocation56_spill] sm:$0xff]  ;;  %v8451_v18 = vsub.f32 %v7786_v17, %v7791_v50  ;;  %v8453_v17 = vsub.f32 %v7820_v14, %v7836_v32  ;;  %v8456_v14 = vld [vmem:[#allocation69_spill] sm:$0xff] }
 0xa3b   : > { %1686 = vperm.xlu1 %5709, %v7633_v60   ;;  %5530 = vmatprep.subr.mxu0 %v3835_v13  ;;  %v8445_v60 = vld [vmem:[#allocation76_spill] sm:$0xff] }
 0xa3c   : > { %3814 = vrot.lane.b32.xlu0 %v3781_v3, %s5981_s20  ;;  %5531 = vmatpush3.msra.mxu0 %v3835_v13  ;;  %5792 = vpow2.f32 %v2874_v24  ;;  %v8446_v58 = vsub.f32 %v8445_v60, %v7423_v47  ;;  %v8449_v47 = vld [vmem:[#allocation60_spill] sm:$0xff]  ;;  %v3597_v24 = vmul.f32 1.442695, %v8451_v18  ;;  %v8452_v60 = vsub.f32 %v7804_v16, %v7816_v48 }
 0xa3d   : > { %5532 = vmatprep.subr.mxu0 %v3833_v8  ;;  %v3603_v50 = vmul.f32 1.442695, %v8453_v17  ;;  %v2956_v17 = vld [vmem:[#allocation6 + $0xa8] sm:$0xff] }
 0xa3e   : > { %v3831_v10 = vpop.permute.xlu1 %3830  ;;  %5533 = vmatpush3.msra.mxu0 %v3833_v8  ;;  %v2878_v13 = vmul.f32 1.442695, %v8446_v58  ;;  %v3599_v58 = vmul.f32 1.442695, %v8452_v60  ;;  %v2954_v60 = vld [vmem:[#allocation6 + $0x98] sm:$0xff] }
 0xa3f   : > { %2294 = vperm.xlu1 %5709, %v7676_v23   ;;  %5534 = vmatprep.subr.mxu0 %v3831_v10  ;;  %v8448_v23 = vsub.f32 %v7425_v39, %v7443_v38 }
 0xa40   : > { %2525 = vrot.lane.b32.xlu0 %v8444_v53, %s5982_s22  ;;  %5535 = vmatpush3.msra.mxu0 %v3831_v10  ;;  %5794 = vpow2.f32 %v2878_v13  ;;  %v2274_v53 = vld [vmem:[#allocation7] sm:$0xff] }
 0xa41   : > { %v2882_v15 = vmul.f32 1.442695, %v8448_v23  ;;  %v2322_v13 = vmul.f32 %v7876_v56, %v2274_v53 }
 0xa42   : > { %v3829_v44 = vpop.permute.xlu1 %3828 }
 0xa43   : > { %2304 = vperm.xlu1 %5709, %v7680_v2   ;;  %5536 = vmatprep.subr.mxu0 %v3829_v44  ;;  %5796 = vpow2.f32 %v2882_v15  ;;  %v7906_v2 = vpop.eup %5790 }
 0xa44   : > { %2529 = vrot.lane.b32.xlu0 %v8447_v59, %s5982_s22  ;;  %5537 = vmatpush3.msra.mxu0 %v3829_v44  ;;  %5798 = vpow2.f32 %v3597_v24 }
 0xa45   : > { %5800 = vpow2.f32 %v3599_v58 }
 0xa46   : > { %v3827_v42 = vpop.permute.xlu1 %3826  ;;  %5802 = vpow2.f32 %v3603_v50 }
 0xa47   : > { %2314 = vperm.xlu1 %5709, %v7684_v26   ;;  %5538 = vmatprep.subr.mxu0 %v3827_v42 }
 0xa48   : > { %2533 = vrot.lane.b32.xlu0 %v8449_v47, %s5982_s22  ;;  %5539 = vmatpush3.msra.mxu0 %v3827_v42  ;;  %v8462_v47 = vsub.f32 %v7434_v49, %v7446_v6 }
 0xa49   : > { %v7911_v39 = vpop.eup %5792 }
 0xa4a   : > { %v3825_v11 = vpop.permute.xlu1 %3824 }
 0xa4b   : > { %3014 = vperm.xlu1 %5709, %v7906_v2   ;;  %5540 = vmatprep.subr.mxu0 %v3825_v11 }
 0xa4c   : > { %2537 = vrot.lane.b32.xlu0 %v8450_v46, %s5982_s22  ;;  %5541 = vmatpush3.msra.mxu0 %v3825_v11  ;;  %v2884_v11 = vmul.f32 1.442695, %v8462_v47 }
 0xa4d   : > { %v7914_v26 = vpop.eup %5794 }
 0xa4e   : > { %v3823_v38 = vpop.permute.xlu1 %3822 }
 0xa4f   : > { %3019 = vperm.xlu1 %5709, %v7911_v39   ;;  %5542 = vmatprep.subr.mxu0 %v3823_v38 }
 0xa50   : > { %5543 = vmatpush3.msra.mxu0 %v3823_v38  ;;  %v7917_v3 = vpop.eup %5796 }
 0xa52   : > { %v3821_v8 = vpop.permute.xlu1 %3820 }
 0xa53   : > { %3029 = vperm.xlu1 %5709, %v7914_v26   ;;  %5544 = vmatprep.subr.mxu0 %v3821_v8 }
 0xa54   : > { %5545 = vmatpush3.msra.mxu0 %v3821_v8 }
 0xa56   : > { %v7919_v1 = vpop.permute.xlu1 %3816 }
 0xa57   : > { %3039 = vperm.xlu1 %5709, %v7917_v3  }
 0xa5a   : > { %v7925_v10 = vpop.permute.xlu1 %3812 }
 0xa5b   : > { %3248 = vrot.lane.b32.xlu1 %v7691_v21, %s5983_s28  ;;  %v8454_v21 = vsub.f32 %v7840_v43, %v7857_v33  ;;  %v8459_v33 = vld [vmem:[#allocation77_spill] sm:$0xff] }
 0xa5d   : > { %v3607_v16 = vmul.f32 1.442695, %v8454_v21 }
 0xa5e   : > { %v2524_v44 = vpop.permute.xlu1 %2523 }
 0xa5f   : > { %v2547_v59 = vadd.f32 %v2524_v44, %v2322_v13  ;;  %3252 = vrot.lane.b32.xlu1 %v7695_v4, %s5983_s28  ;;  %5804 = vpow2.f32 %v3607_v16  ;;  %v7946_v4 = vpop.eup %5798 }
 0xa60   : > { %v7950_v48 = vpop.eup %5800 }
 0xa61   : > { %2556 = vst.msk [vmem:[#allocation7] sm:$0xff] %vm2555_vm13, %v2547_v59 }
 0xa62   : > { %v7968_v15 = vpop.permute.xlu1 %2527 }
 0xa63   : > { %3256 = vrot.lane.b32.xlu1 %v7699_v9, %s5983_s28  ;;  %v7954_v9 = vpop.eup %5802 }
 0xa66   : > { %v7974_v42 = vpop.permute.xlu1 %2531 }
 0xa67   : > { %3260 = vrot.lane.b32.xlu1 %v7703_v41, %s5983_s28 }
 0xa6a   : > { %v7981_v8 = vpop.permute.xlu1 %2535 }
 0xa6b   : > { %2969 = vadd.xlane.f32.xlu0 %v7511_v62  ;;  %3739 = vperm.xlu1 %5709, %v7946_v4   ;;  %v8455_v62 = vld [vmem:[#allocation67_spill] sm:$0xff] }
 0xa6c   : > { %v7958_v41 = vpop.eup %5804  ;;  %v8457_v32 = vsub.f32 %v8455_v62, %v8456_v14  ;;  %v2958_v14 = vld [vmem:[#allocation6 + $0xb8] sm:$0xff] }
 0xa6e   : > { %v2870_v43 = vmul.f32 1.442695, %v8457_v32 }
 0xa6f   : > { %2971 = vadd.xlane.f32.xlu0 %v7553_v61  ;;  %3744 = vperm.xlu1 %5709, %v7950_v48   ;;  %v8458_v61 = vld [vmem:[#allocation75_spill] sm:$0xff] }
 0xa70   : > { %5806 = vpow2.f32 %v2870_v43  ;;  %v8460_v56 = vsub.f32 %v8458_v61, %v8459_v33 }
 0xa72   : > { %v2876_v23 = vmul.f32 1.442695, %v8460_v56 }
 0xa73   : > { %2975 = vadd.xlane.f32.xlu0 %v7561_v12  ;;  %3754 = vperm.xlu1 %5709, %v7954_v9   ;;  %v8461_v12 = vsub.f32 %v7415_v35, %v7428_v55  ;;  %v2951_v35 = vld [vmem:[#allocation6 + $0x80] sm:$0xff] }
 0xa74   : > { %5808 = vpow2.f32 %v2876_v23 }
 0xa77   : > { %2979 = vadd.xlane.f32.xlu0 %v7570_v25  ;;  %3764 = vperm.xlu1 %5709, %v7958_v41   ;;  %v2880_v25 = vmul.f32 1.442695, %v8461_v12 }
 0xa79   : > { %5810 = vpow2.f32 %v2880_v25 }
 0xa7a   : > { %5812 = vpow2.f32 %v2884_v11 }
 0xa8d   : > { %2289 = vperm.xlu0 %5708, %v7643_v0   ;;  %v5807_v0 = vpop.eup %5806 }
 0xa8e   : > { %v2959_v24 = vmul.f32 %v5807_v0, %v2951_v35  ;;  %v5809_v53 = vpop.eup %5808 }
 0xa8f   : > { %v2962_v44 = vmul.f32 %v5809_v53, %v2954_v60 }
 0xa91   : > { %2299 = vperm.xlu0 %5708, %v7648_v20  }
 0xa92   : > { %v3619_v46 = vpop.permute.xlu0 %3618 }
 0xa93   : > { %v3652_v61 = vsub.f32 %v7707_v27, %v3619_v46 }
 0xa95   : > { %2309 = vperm.xlu0 %5708, %v7652_v22  }
 0xa96   : > { %v3614_v38 = vpop.permute.xlu0 %3613 }
 0xa97   : > { %v3651_v55 = vsub.f32 %v7712_v5, %v3614_v38  ;;  %v5811_v5 = vpop.eup %5810  ;;  %v1647_v38 = vld [vmem:[#allocation7 + $0x8] sm:$0xff] }
 0xa98   : > { %v2964_v21 = vmul.f32 %v5811_v5, %v2956_v17 }
 0xa99   : > { %v3659_v18 = vmul.f32 1.442695, %v3651_v55  ;;  %2319 = vperm.xlu0 %5708, %v7850_v57  }
 0xa9a   : > { %v3629_v20 = vpop.permute.xlu0 %3628 }
 0xa9b   : > { %5814 = vpow2.f32 %v3659_v18  ;;  %v3654_v49 = vsub.f32 %v7717_v29, %v3629_v20  ;;  %v2968_v6 = vpop.xlane.xlu1 %2967  ;;  %v5813_v29 = vpop.eup %5812 }
 0xa9c   : > { %v2983_v22 = vadd.f32 %v2968_v6, %v2959_v24  ;;  %v2966_v56 = vmul.f32 %v5813_v29, %v2958_v14 }
 0xa9d   : > { %v3665_v58 = vmul.f32 1.442695, %v3654_v49  ;;  %3009 = vperm.xlu0 %5708, %v5807_v0   ;;  %v3661_v0 = vmul.f32 1.442695, %v3652_v61 }
 0xa9e   : > { %2991 = vst.msk [vmem:[#allocation6 + $0x80] sm:$0xff] %vm1637_vm12, %v2983_v22  ;;  %v3624_v13 = vpop.permute.xlu0 %3623 }
 0xa9f   : > { %5816 = vpow2.f32 %v3665_v58  ;;  %v2974_v59 = vpop.xlane.xlu1 %2973  ;;  %v3653_v23 = vsub.f32 %v7721_v31, %v3624_v13  ;;  %v1650_v58 = vld [vmem:[#allocation7 + $0x20] sm:$0xff]  ;;  %v8467_v13 = vld [vmem:[#allocation38_spill] sm:$0xff] }
 0xaa0   : > { %v2986_v57 = vadd.f32 %v2974_v59, %v2962_v44 }
 0xaa1   : > { %3024 = vperm.xlu0 %5708, %v5809_v53   ;;  %v3663_v27 = vmul.f32 1.442695, %v3653_v23  ;;  %v8465_v53 = vld [vmem:[#allocation35_spill] sm:$0xff] }
 0xaa2   : > { %2994 = vst.msk [vmem:[#allocation6 + $0x98] sm:$0xff] %vm1637_vm12, %v2986_v57  ;;  %v3639_v50 = vpop.permute.xlu0 %3638 }
 0xaa3   : > { %v3656_v16 = vsub.f32 %v7727_v28, %v3639_v50  ;;  %v2978_v62 = vpop.xlane.xlu1 %2977  ;;  %v8463_v28 = vsub.f32 %v7788_v19, %v7799_v37  ;;  %v1648_v19 = vld [vmem:[#allocation7 + $0x10] sm:$0xff]  ;;  %v8464_v37 = vsub.f32 %v7802_v51, %v7812_v34  ;;  %v8466_v51 = vsub.f32 %v7818_v54, %v7832_v7  ;;  %v8468_v50 = vld [vmem:[#allocation22_spill] sm:$0xff]  ;;  %v8470_v7 = vld [vmem:[#allocation23_spill] sm:$0xff] }
 0xaa4   : > { %v2988_v32 = vadd.f32 %v2978_v62, %v2964_v21  ;;  %v8469_v21 = vld [vmem:[#allocation40_spill] sm:$0xff] }
 0xaa5   : > { %v3669_v43 = vmul.f32 1.442695, %v3656_v16  ;;  %3034 = vperm.xlu0 %5708, %v5811_v5   ;;  %v3595_v11 = vmul.f32 1.442695, %v8463_v28  ;;  %v3601_v24 = vmul.f32 1.442695, %v8464_v37 }
 0xaa6   : > { %2996 = vst.msk [vmem:[#allocation6 + $0xa8] sm:$0xff] %vm1637_vm12, %v2988_v32  ;;  %v3634_v33 = vpop.permute.xlu0 %3633  ;;  %v3605_v34 = vmul.f32 1.442695, %v8466_v51 }
 0xaa7   : > { %5818 = vpow2.f32 %v3669_v43  ;;  %v2982_v12 = vpop.xlane.xlu1 %2981  ;;  %v3655_v46 = vsub.f32 %v7731_v30, %v3634_v33  ;;  %v8472_v43 = vld [vmem:[#allocation24_spill] sm:$0xff]  ;;  %v8473_v33 = vld [vmem:[#allocation42_spill] sm:$0xff] }
 0xaa8   : > { %v5815_v25 = vpop.eup %5814  ;;  %v2990_v47 = vadd.f32 %v2982_v12, %v2966_v56  ;;  %5820 = vpow2.f32 %v3595_v11 }
 0xaa9   : > { %3044 = vperm.xlu0 %5708, %v5813_v29   ;;  %3692 = vadd.xlane.f32.xlu1 %v5815_v25  ;;  %5822 = vpow2.f32 %v3661_v0  ;;  %v3667_v6 = vmul.f32 1.442695, %v3655_v46  ;;  %v8471_v29 = vsub.f32 %v8470_v7, %v7853_v45 }
 0xaaa   : > { %2998 = vst.msk [vmem:[#allocation6 + $0xb8] sm:$0xff] %vm1637_vm12, %v2990_v47  ;;  %5554 = vmatprep.mubr.f32.mxu0 %v5815_v25  ;;  %5824 = vpow2.f32 %v3663_v27 }
 0xaab   : > { %v3649_v55 = vpop.permute.xlu0 %3648  ;;  %v1662_v31 = vpop.permute.xlu1 %1661  ;;  %v3609_v16 = vmul.f32 1.442695, %v8471_v29 }
 0xaac   : > { %v7997_v35 = vpop.eup %5816  ;;  %v3658_v18 = vsub.f32 %v7737_v36, %v3649_v55  ;;  %v1695_v20 = vmul.f32 %v1662_v31, %v1647_v38 }
 0xaad   : > { %3250 = vrot.lane.b32.xlu0 %v7689_v52, %s5983_s28  ;;  %3698 = vadd.xlane.f32.xlu1 %v7997_v35 }
 0xaae   : > { %v3673_v30 = vmul.f32 1.442695, %v3658_v18  ;;  %v1824_v49 = vadd.f32 %v8465_v53, %v1695_v20 }
 0xaaf   : > { %v3644_v60 = vpop.permute.xlu0 %3643  ;;  %v1667_v36 = vpop.permute.xlu1 %1666 }
 0xab0   : > { %5826 = vpow2.f32 %v3673_v30  ;;  %1832 = vst.msk [vmem:[#allocation7 + $0x8] sm:$0xff] %vm1291_vm3, %v1824_v49  ;;  %v3657_v52 = vsub.f32 %v7741_v40, %v3644_v60  ;;  %v1696_v22 = vmul.f32 %v1667_v36, %v1648_v19 }
 0xab1   : > { %3254 = vrot.lane.b32.xlu0 %v7693_v63, %s5983_s28  ;;  %5828 = vpow2.f32 %v3601_v24  ;;  %v1652_v63 = vld [vmem:[#allocation7 + $0x30] sm:$0xff] }
 0xab2   : > { %v1825_v44 = vadd.f32 %v8467_v13, %v1696_v22  ;;  %5830 = vpow2.f32 %v3667_v6  ;;  %v3671_v5 = vmul.f32 1.442695, %v3657_v52 }
 0xab3   : > { %v3819_v59 = vpop.permute.xlu0 %3818  ;;  %v1677_v17 = vpop.permute.xlu1 %1676  ;;  %5832 = vpow2.f32 %v3605_v34 }
 0xab4   : > { %v5819_v57 = vpop.eup %5818  ;;  %1833 = vst.msk [vmem:[#allocation7 + $0x10] sm:$0xff] %vm1291_vm3, %v1825_v44  ;;  %v1698_v40 = vmul.f32 %v1677_v17, %v1650_v58  ;;  %5546 = vmatprep.subr.mxu0 %v3819_v59  ;;  %5834 = vpow2.f32 %v3671_v5 }
 0xab5   : > { %3258 = vrot.lane.b32.xlu0 %v8468_v50, %s5983_s28  ;;  %5547 = vmatpush3.msra.mxu0 %v3819_v59  ;;  %v8027_v61 = vpop.eup %5820  ;;  %5836 = vpow2.f32 %v3609_v16  ;;  %v2955_v16 = vld [vmem:[#allocation6 + $0xa0] sm:$0xff] }
 0xab6   : > { %v1827_v54 = vadd.f32 %v8469_v21, %v1698_v40  ;;  %3702 = vadd.xlane.f32.xlu1 %v5819_v57  ;;  %5548 = vmatprep.subr.mxu0 %v7919_v1  ;;  %v5823_v45 = vpop.eup %5822  ;;  %v2952_v40 = vld [vmem:[#allocation6 + $0x88] sm:$0xff]  ;;  %v2953_v21 = vld [vmem:[#allocation6 + $0x90] sm:$0xff] }
 0xab7   : > { %5549 = vmatpush3.msra.mxu0 %v7919_v1  ;;  %v3815_v62 = vpop.permute.xlu0 %3814  ;;  %v1687_v14 = vpop.permute.xlu1 %1686  ;;  %v2960_v50 = vmul.f32 %v7906_v2, %v2952_v40  ;;  %v2961_v7 = vmul.f32 %v7911_v39, %v2953_v21  ;;  %v3679_v21 = vld [vmem:[#allocation6 + $0xd8] sm:$0xff] }
 0xab8   : > { %1835 = vst.msk [vmem:[#allocation7 + $0x20] sm:$0xff] %vm1291_vm3, %v1827_v54  ;;  %v1700_v32 = vmul.f32 %v1687_v14, %v1652_v63  ;;  %5550 = vmatprep.subr.mxu0 %v3815_v62  ;;  %v5825_v12 = vpop.eup %5824  ;;  %v2963_v14 = vmul.f32 %v7914_v26, %v2955_v16 }
 0xab9   : > { %3262 = vrot.lane.b32.xlu0 %v8472_v43, %s5983_s28  ;;  %5551 = vmatpush3.msra.mxu0 %v3815_v62  ;;  %v2957_v43 = vld [vmem:[#allocation6 + $0xb0] sm:$0xff] }
 0xaba   : > { %v1829_v56 = vadd.f32 %v8473_v33, %v1700_v32  ;;  %5552 = vmatprep.subr.mxu0 %v7925_v10  ;;  %v2965_v2 = vmul.f32 %v7917_v3, %v2957_v43 }
 0xabb   : > { %5553 = vmatpush3.msra.mxu0 %v7925_v10  ;;  %v2276_v1 = vld [vmem:[#allocation7 + $0x10] sm:$0xff]  ;;  %v2295_v23 = vpop.permute.xlu1 %2294  ;;  %v2526_v52 = vpop.permute.xlu0 %2525 }
 0xabc   : > { %1837 = vst.msk [vmem:[#allocation7 + $0x30] sm:$0xff] %vm1291_vm3, %v1829_v56  ;;  %v2324_v25 = vmul.f32 %v2295_v23, %v2276_v1  ;;  %5555 = vmatmul.mubr.f32.vlgmr.msra.gmra.mxu0 %v5823_v45  ;;  %v2275_v1 = vld [vmem:[#allocation7 + $0x8] sm:$0xff] }
 0xabd   : > { %v5827_v47 = vpop.eup %5826  ;;  %3734 = vperm.xlu0 %5708, %v8027_v61   ;;  %5557 = vmatprep.mubr.f32.mxu0 %v5825_v12 }
 0xabe   : > { %v2549_v28 = vadd.f32 %v7968_v15, %v2324_v25  ;;  %3706 = vadd.xlane.f32.xlu1 %v5827_v47  ;;  %v8035_v11 = vpop.eup %5828  ;;  %v2277_v25 = vld [vmem:[#allocation7 + $0x18] sm:$0xff] }
 0xabf   : > { %v2278_v38 = vld [vmem:[#allocation7 + $0x20] sm:$0xff]  ;;  %v2305_v0 = vpop.permute.xlu1 %2304  ;;  %v5831_v27 = vpop.eup %5830 }
 0xac0   : > { %2558 = vst.msk [vmem:[#allocation7 + $0x10] sm:$0xff] %vm2555_vm13, %v2549_v28  ;;  %v2326_v10 = vmul.f32 %v2305_v0, %v2278_v38  ;;  %5558 = vmatmul.mubr.f32.gmra.mxu0 %v7997_v35  ;;  %v8041_v55 = vpop.eup %5832  ;;  %v2530_v5 = vpop.permute.xlu0 %2529  ;;  %v2279_v38 = vld [vmem:[#allocation7 + $0x28] sm:$0xff] }
 0xac1   : > { %3749 = vperm.xlu0 %5708, %v8035_v11   ;;  %5560 = vmatprep.mubr.f32.mxu0 %v5831_v27  ;;  %v5835_v18 = vpop.eup %5834 }
 0xac2   : > { %v2551_v46 = vadd.f32 %v7974_v42, %v2326_v10  ;;  %v8048_v37 = vpop.eup %5836  ;;  %v2281_v10 = vld [vmem:[#allocation7 + $0x38] sm:$0xff] }
 0xac3   : > { %v2280_v31 = vld [vmem:[#allocation7 + $0x30] sm:$0xff]  ;;  %v2315_v15 = vpop.permute.xlu1 %2314 }
 0xac4   : > { %2560 = vst.msk [vmem:[#allocation7 + $0x20] sm:$0xff] %vm2555_vm13, %v2551_v46  ;;  %v2328_v20 = vmul.f32 %v2315_v15, %v2280_v31  ;;  %5561 = vmatmul.mubr.f32.gmra.mxu0 %v5819_v57  ;;  %v2534_v17 = vpop.permute.xlu0 %2533 }
 0xac5   : > { %3759 = vperm.xlu0 %5708, %v8041_v55   ;;  %5563 = vmatprep.mubr.f32.mxu0 %v5835_v18 }
 0xac6   : > { %v2553_v19 = vadd.f32 %v7981_v8, %v2328_v20 }
 0xac7   : > { %v8046_v35 = vpop.permute.xlu1 %3014  ;;  %v3001_v49 = vld [vmem:[#allocation7 + $0x10] sm:$0xff] }
 0xac8   : > { %2562 = vst.msk [vmem:[#allocation7 + $0x30] sm:$0xff] %vm2555_vm13, %v2553_v19  ;;  %5564 = vmatmul.mubr.f32.gmra.mxu0 %v5827_v47  ;;  %v2538_v57 = vpop.permute.xlu0 %2537 }
 0xac9   : > { %3769 = vperm.xlu0 %5708, %v8048_v37  }
 0xacb   : > { %v3020_v42 = vpop.permute.xlu1 %3019  ;;  %v3003_v8 = vld [vmem:[#allocation7 + $0x20] sm:$0xff] }
 0xacc   : > { %v3049_v6 = vmul.f32 %v3020_v42, %v3001_v49 }
 0xacf   : > { %v3030_v24 = vpop.permute.xlu1 %3029  ;;  %v3005_v34 = vld [vmem:[#allocation7 + $0x30] sm:$0xff] }
 0xad0   : > { %v3051_v22 = vmul.f32 %v3030_v24, %v3003_v8 }
 0xad3   : > { %v3040_v30 = vpop.permute.xlu1 %3039 }
 0xad4   : > { %v3053_v13 = vmul.f32 %v3040_v30, %v3005_v34 }
 0xad7   : > { %v8052_v53 = vpop.permute.xlu1 %3248 }
 0xadb   : > { %v3253_v60 = vpop.permute.xlu1 %3252 }
 0xadc   : > { %v3274_v36 = vadd.f32 %v3253_v60, %v3049_v6 }
 0xade   : > { %3283 = vst.msk [vmem:[#allocation7 + $0x10] sm:$0xff] %vm3280_vm14, %v3274_v36 }
 0xadf   : > { %v3257_v58 = vpop.permute.xlu1 %3256 }
 0xae0   : > { %v3276_v51 = vadd.f32 %v3257_v58, %v3051_v22 }
 0xae2   : > { %3285 = vst.msk [vmem:[#allocation7 + $0x20] sm:$0xff] %vm3280_vm14, %v3276_v51 }
 0xae3   : > { %v3261_v44 = vpop.permute.xlu1 %3260 }
 0xae4   : > { %v3278_v59 = vadd.f32 %v3261_v44, %v3053_v13 }
 0xae6   : > { %3287 = vst.msk [vmem:[#allocation7 + $0x30] sm:$0xff] %vm3280_vm14, %v3278_v59  ;;  %v3676_v59 = vld [vmem:[#allocation6 + $0xc0] sm:$0xff] }
 0xae7   : > { %v8070_v24 = vpop.permute.xlu1 %3739 }
 0xae8   : > { %3694 = vadd.xlane.f32.xlu0 %v5823_v45 }
 0xaeb   : > { %v8073_v6 = vpop.permute.xlu1 %3744 }
 0xaec   : > { %3696 = vadd.xlane.f32.xlu0 %v5825_v12 }
 0xaf0   : > { %3700 = vadd.xlane.f32.xlu0 %v5831_v27 }
 0xaf4   : > { %3704 = vadd.xlane.f32.xlu0 %v5835_v18  ;;  %v2970_v63 = vpop.xlane.xlu0 %2969  ;;  %v2999_v18 = vld [vmem:[#allocation7] sm:$0xff] }
 0xaf5   : > { %v2984_v54 = vadd.f32 %v2970_v63, %v2960_v50 }
 0xaf7   : > { %2992 = vst.msk [vmem:[#allocation6 + $0x88] sm:$0xff] %vm1637_vm12, %v2984_v54 }
 0xaf8   : > { %v2972_v29 = vpop.xlane.xlu0 %2971 }
 0xaf9   : > { %v2985_v62 = vadd.f32 %v2972_v29, %v2961_v7 }
 0xafb   : > { %2993 = vst.msk [vmem:[#allocation6 + $0x90] sm:$0xff] %vm1637_vm12, %v2985_v62  ;;  %v3687_v62 = vmul.f32 %v8035_v11, %v3679_v21 }
 0xafc   : > { %v2976_v32 = vpop.xlane.xlu0 %2975 }
 0xafd   : > { %v2987_v33 = vadd.f32 %v2976_v32, %v2963_v14 }
 0xaff   : > { %2995 = vst.msk [vmem:[#allocation6 + $0xa0] sm:$0xff] %vm1637_vm12, %v2987_v33 }
 0xb00   : > { %v2980_v56 = vpop.xlane.xlu0 %2979 }
 0xb01   : > { %v2989_v45 = vadd.f32 %v2980_v56, %v2965_v2  ;;  %v3683_v56 = vld [vmem:[#allocation6 + $0xf8] sm:$0xff] }
 0xb03   : > { %2997 = vst.msk [vmem:[#allocation6 + $0xb0] sm:$0xff] %vm1637_vm12, %v2989_v45  ;;  %v3691_v45 = vmul.f32 %v8048_v37, %v3683_v56 }
 0xb08   : > { %v2290_v39 = vpop.permute.xlu0 %2289 }
 0xb09   : > { %v2323_v23 = vmul.f32 %v2290_v39, %v2275_v1 }
 0xb0b   : > { %v2548_v12 = vadd.f32 %v2526_v52, %v2323_v23  ;;  %v8076_v52 = vpop.permute.xlu1 %3754 }
 0xb0c   : > { %v2300_v47 = vpop.permute.xlu0 %2299 }
 0xb0d   : > { %2557 = vst.msk [vmem:[#allocation7 + $0x8] sm:$0xff] %vm2555_vm13, %v2548_v12  ;;  %v2325_v26 = vmul.f32 %v2300_v47, %v2277_v25  ;;  %v3677_v47 = vld [vmem:[#allocation6 + $0xc8] sm:$0xff] }
 0xb0f   : > { %v2550_v28 = vadd.f32 %v2530_v5, %v2325_v26  ;;  %v8079_v44 = vpop.permute.xlu1 %3764  ;;  %v3685_v26 = vmul.f32 %v7946_v4, %v3677_v47 }
 0xb10   : > { %v2310_v0 = vpop.permute.xlu0 %2309 }
 0xb11   : > { %2559 = vst.msk [vmem:[#allocation7 + $0x18] sm:$0xff] %vm2555_vm13, %v2550_v28  ;;  %v2327_v27 = vmul.f32 %v2310_v0, %v2279_v38  ;;  %v3678_v28 = vld [vmem:[#allocation6 + $0xd0] sm:$0xff] }
 0xb12   : > { %v3686_v0 = vmul.f32 %v7950_v48, %v3678_v28 }
 0xb13   : > { %v2552_v3 = vadd.f32 %v2534_v17, %v2327_v27  ;;  %v3680_v27 = vld [vmem:[#allocation6 + $0xe0] sm:$0xff] }
 0xb14   : > { %v2320_v46 = vpop.permute.xlu0 %2319  ;;  %v3000_v36 = vld [vmem:[#allocation7 + $0x8] sm:$0xff] }
 0xb15   : > { %2561 = vst.msk [vmem:[#allocation7 + $0x28] sm:$0xff] %vm2555_vm13, %v2552_v3  ;;  %v2329_v31 = vmul.f32 %v2320_v46, %v2281_v10  ;;  %v3048_v8 = vmul.f32 %v8046_v35, %v3000_v36  ;;  %v3684_v35 = vmul.f32 %v8027_v61, %v3676_v59  ;;  %v3681_v61 = vld [vmem:[#allocation6 + $0xe8] sm:$0xff]  ;;  %v3688_v10 = vmul.f32 %v7954_v9, %v3680_v27 }
 0xb16   : > { %v3689_v43 = vmul.f32 %v8041_v55, %v3681_v61  ;;  %v3730_v61 = vld [vmem:[#allocation7 + $0x30] sm:$0xff] }
 0xb17   : > { %v2554_v15 = vadd.f32 %v2538_v57, %v2329_v31  ;;  %v3682_v31 = vld [vmem:[#allocation6 + $0xf0] sm:$0xff] }
 0xb18   : > { %v3010_v20 = vpop.permute.xlu0 %3009  ;;  %v3002_v51 = vld [vmem:[#allocation7 + $0x18] sm:$0xff] }
 0xb19   : > { %2563 = vst.msk [vmem:[#allocation7 + $0x38] sm:$0xff] %vm2555_vm13, %v2554_v15  ;;  %v3047_v19 = vmul.f32 %v3010_v20, %v2999_v18  ;;  %v3690_v18 = vmul.f32 %v7958_v41, %v3682_v31 }
 0xb1b   : > { %v3272_v42 = vadd.f32 %v8052_v53, %v3047_v19 }
 0xb1c   : > { %v3025_v30 = vpop.permute.xlu0 %3024  ;;  %v3004_v5 = vld [vmem:[#allocation7 + $0x28] sm:$0xff] }
 0xb1d   : > { %3281 = vst.msk [vmem:[#allocation7] sm:$0xff] %vm3280_vm14, %v3272_v42  ;;  %v3050_v34 = vmul.f32 %v3025_v30, %v3002_v51 }
 0xb20   : > { %v3035_v49 = vpop.permute.xlu0 %3034  ;;  %v3006_v50 = vld [vmem:[#allocation7 + $0x38] sm:$0xff] }
 0xb21   : > { %v3052_v17 = vmul.f32 %v3035_v49, %v3004_v5 }
 0xb24   : > { %v3045_v60 = vpop.permute.xlu0 %3044 }
 0xb25   : > { %v3054_v54 = vmul.f32 %v3045_v60, %v3006_v50 }
 0xb28   : > { %v3251_v22 = vpop.permute.xlu0 %3250 }
 0xb29   : > { %v3273_v58 = vadd.f32 %v3251_v22, %v3048_v8  ;;  %v3724_v22 = vld [vmem:[#allocation7] sm:$0xff] }
 0xb2b   : > { %3282 = vst.msk [vmem:[#allocation7 + $0x8] sm:$0xff] %vm3280_vm14, %v3273_v58 }
 0xb2c   : > { %v3255_v53 = vpop.permute.xlu0 %3254 }
 0xb2d   : > { %v3275_v13 = vadd.f32 %v3255_v53, %v3050_v34 }
 0xb2f   : > { %3284 = vst.msk [vmem:[#allocation7 + $0x18] sm:$0xff] %vm3280_vm14, %v3275_v13 }
 0xb30   : > { %v3259_v57 = vpop.permute.xlu0 %3258 }
 0xb31   : > { %v3277_v40 = vadd.f32 %v3259_v57, %v3052_v17  ;;  %v3726_v17 = vld [vmem:[#allocation7 + $0x10] sm:$0xff] }
 0xb32   : > { %v3693_v63 = vpop.xlane.xlu1 %3692  ;;  %v3725_v41 = vld [vmem:[#allocation7 + $0x8] sm:$0xff] }
 0xb33   : > { %3286 = vst.msk [vmem:[#allocation7 + $0x28] sm:$0xff] %vm3280_vm14, %v3277_v40  ;;  %v3708_v7 = vadd.f32 %v3693_v63, %v3684_v35  ;;  %v3773_v8 = vmul.f32 %v8070_v24, %v3725_v41  ;;  %v3774_v40 = vmul.f32 %v8073_v6, %v3726_v17 }
 0xb34   : > { %v3263_v29 = vpop.permute.xlu0 %3262 }
 0xb35   : > { %3716 = vst.msk [vmem:[#allocation6 + $0xc0] sm:$0xff] %vm1637_vm12, %v3708_v7  ;;  %v3279_v16 = vadd.f32 %v3263_v29, %v3054_v54  ;;  %v3728_v54 = vld [vmem:[#allocation7 + $0x20] sm:$0xff] }
 0xb36   : > { %v3699_v14 = vpop.xlane.xlu1 %3698  ;;  %v3727_v53 = vld [vmem:[#allocation7 + $0x18] sm:$0xff]  ;;  %v3776_v29 = vmul.f32 %v8076_v52, %v3728_v54 }
 0xb37   : > { %3288 = vst.msk [vmem:[#allocation7 + $0x38] sm:$0xff] %vm3280_vm14, %v3279_v16  ;;  %v3711_v32 = vadd.f32 %v3699_v14, %v3687_v62 }
 0xb38   : > { %v3735_v11 = vpop.permute.xlu0 %3734 }
 0xb39   : > { %3719 = vst.msk [vmem:[#allocation6 + $0xd8] sm:$0xff] %vm1637_vm12, %v3711_v32  ;;  %v3772_v51 = vmul.f32 %v3735_v11, %v3724_v22 }
 0xb3a   : > { %v3729_v50 = vld [vmem:[#allocation7 + $0x28] sm:$0xff] }
 0xb3c   : > { %v3750_v23 = vpop.permute.xlu0 %3749 }
 0xb3d   : > { %v3775_v5 = vmul.f32 %v3750_v23, %v3727_v53 }
 0xb3e   : > { %v3731_v62 = vld [vmem:[#allocation7 + $0x38] sm:$0xff] }
 0xb3f   : > { %v3703_v33 = vpop.xlane.xlu1 %3702 }
 0xb40   : > { %v3713_v2 = vadd.f32 %v3703_v33, %v3689_v43  ;;  %v3760_v12 = vpop.permute.xlu0 %3759  ;;  %v3778_v33 = vmul.f32 %v8079_v44, %v3730_v61 }
 0xb41   : > { %v3777_v63 = vmul.f32 %v3760_v12, %v3729_v50 }
 0xb42   : > { %3721 = vst.msk [vmem:[#allocation6 + $0xe8] sm:$0xff] %vm1637_vm12, %v3713_v2 }
 0xb44   : > { %v8092_v25 = vpop.permute.xlu0 %3769 }
 0xb45   : > { %v3779_v6 = vmul.f32 %v8092_v25, %v3731_v62 }
 0xb47   : > { %v3707_v1 = vpop.xlane.xlu1 %3706 }
 0xb48   : > { %v3715_v39 = vadd.f32 %v3707_v1, %v3691_v45 }
 0xb4a   : > { %3723 = vst.msk [vmem:[#allocation6 + $0xf8] sm:$0xff] %vm1637_vm12, %v3715_v39 }
 0xb71   : > { %v3695_v55 = vpop.xlane.xlu0 %3694 }
 0xb72   : > { %v3709_v38 = vadd.f32 %v3695_v55, %v3685_v26 }
 0xb74   : > { %3717 = vst.msk [vmem:[#allocation6 + $0xc8] sm:$0xff] %vm1637_vm12, %v3709_v38 }
 0xb75   : > { %v3697_v37 = vpop.xlane.xlu0 %3696 }
 0xb76   : > { %v3710_v3 = vadd.f32 %v3697_v37, %v3686_v0 }
 0xb78   : > { %3718 = vst.msk [vmem:[#allocation6 + $0xd0] sm:$0xff] %vm1637_vm12, %v3710_v3 }
 0xb79   : > { %v3701_v46 = vpop.xlane.xlu0 %3700 }
 0xb7a   : > { %v3712_v15 = vadd.f32 %v3701_v46, %v3688_v10 }
 0xb7c   : > { %3720 = vst.msk [vmem:[#allocation6 + $0xe0] sm:$0xff] %vm1637_vm12, %v3712_v15  ;;  %v5556_v4 = vpop.f32.mrf.mxu0 }
 0xb7d   : > { %3975 = vrot.lane.b32.xlu0 %v5556_v4, %s5984_s23  ;;  %v3705_v20 = vpop.xlane.xlu0 %3704 }
 0xb7e   : > { %v3714_v19 = vadd.f32 %v3705_v20, %v3690_v18  ;;  %v3926_v48 = vpop.f32.mrf.mxu0 }
 0xb7f   : > { %3973 = vrot.lane.b32.xlu1 %v3926_v48, %s5984_s23 }
 0xb80   : > { %3722 = vst.msk [vmem:[#allocation6 + $0xf0] sm:$0xff] %vm1637_vm12, %v3714_v19  ;;  %v5559_v42 = vpop.f32.mrf.mxu0 }
 0xb81   : > { %3979 = vrot.lane.b32.xlu0 %v5559_v42, %s5984_s23 }
 0xb82   : > { %v3936_v30 = vpop.f32.mrf.mxu0 }
 0xb83   : > { %3977 = vrot.lane.b32.xlu1 %v3936_v30, %s5984_s23 }
 0xb84   : > { %v5562_v9 = vpop.f32.mrf.mxu0 }
 0xb85   : > { %3983 = vrot.lane.b32.xlu0 %v5562_v9, %s5984_s23 }
 0xb86   : > { %v3946_v49 = vpop.f32.mrf.mxu0 }
 0xb87   : > { %3981 = vrot.lane.b32.xlu1 %v3946_v49, %s5984_s23 }
 0xb88   : > { %v5565_v60 = vpop.f32.mrf.mxu0 }
 0xb89   : > { %3987 = vrot.lane.b32.xlu0 %v5565_v60, %s5984_s23 }
 0xb8a   : > { %v3956_v36 = vpop.f32.mrf.mxu0 }
 0xb8b   : > { %3985 = vrot.lane.b32.xlu1 %v3956_v36, %s5984_s23 }
 0xbef   : > { %v3976_v58 = vpop.permute.xlu0 %3975 }
 0xbf0   : > { %v3998_v34 = vadd.f32 %v3976_v58, %v3773_v8 }
 0xbf1   : > { %v3974_v13 = vpop.permute.xlu1 %3973 }
 0xbf2   : > { %4007 = vst.msk [vmem:[#allocation7 + $0x8] sm:$0xff] %vm4005_vm15, %v3998_v34  ;;  %v3997_v59 = vadd.f32 %v3974_v13, %v3772_v51 }
 0xbf3   : > { %v3980_v57 = vpop.permute.xlu0 %3979 }
 0xbf4   : > { %4006 = vst.msk [vmem:[#allocation7] sm:$0xff] %vm4005_vm15, %v3997_v59  ;;  %v4000_v35 = vadd.f32 %v3980_v57, %v3775_v5 }
 0xbf5   : > { %v3978_v24 = vpop.permute.xlu1 %3977 }
 0xbf6   : > { %4009 = vst.msk [vmem:[#allocation7 + $0x18] sm:$0xff] %vm4005_vm15, %v4000_v35  ;;  %v3999_v21 = vadd.f32 %v3978_v24, %v3774_v40 }
 0xbf7   : > { %v3984_v7 = vpop.permute.xlu0 %3983 }
 0xbf8   : > { %4008 = vst.msk [vmem:[#allocation7 + $0x10] sm:$0xff] %vm4005_vm15, %v3999_v21  ;;  %v4002_v16 = vadd.f32 %v3984_v7, %v3777_v63 }
 0xbf9   : > { %v3982_v14 = vpop.permute.xlu1 %3981 }
 0xbfa   : > { %4011 = vst.msk [vmem:[#allocation7 + $0x28] sm:$0xff] %vm4005_vm15, %v4002_v16  ;;  %v4001_v32 = vadd.f32 %v3982_v14, %v3776_v29 }
 0xbfb   : > { %v3988_v43 = vpop.permute.xlu0 %3987 }
 0xbfc   : > { %4010 = vst.msk [vmem:[#allocation7 + $0x20] sm:$0xff] %vm4005_vm15, %v4001_v32  ;;  %v4004_v2 = vadd.f32 %v3988_v43, %v3779_v6  ;;  %4025 = sbr.rel (%p4821_p1) target bundleno = 3481 (0xd99), region = 102 }
 0xbfd   : > { %v3986_v56 = vpop.permute.xlu1 %3985 }
 0xbfe   : > { %4013 = vst.msk [vmem:[#allocation7 + $0x38] sm:$0xff] %vm4005_vm15, %v4004_v2  ;;  %v4003_v52 = vadd.f32 %v3986_v56, %v3778_v33 }
 0xc00   : > { %4012 = vst.msk [vmem:[#allocation7 + $0x30] sm:$0xff] %vm4005_vm15, %v4003_v52 }
 0xc01   : > { %v4027_v45 = vld [vmem:[#allocation6 + $0x8] sm:$0xff]  ;;  %v4026_v1 = vld [vmem:[#allocation6] sm:$0xff]  ;;  %v5985_v11 = vmov 0   ;;  %v4032_v23 = vld [vmem:[#allocation6 + $0x30] sm:$0xff] }
 0xc02   : > { %v4031_v39 = vld [vmem:[#allocation6 + $0x28] sm:$0xff]  ;;  %5839 = vset.pattern.permute.xlu1 %v5985_v11  ;;  %5838 = vset.pattern.permute.xlu0 %v5985_v11  ;;  %5840 = vrcp.f32 %v4027_v45  ;;  %v4030_v44 = vld [vmem:[#allocation6 + $0x20] sm:$0xff]  ;;  %v4028_v12 = vld [vmem:[#allocation6 + $0x10] sm:$0xff] }
 0xc03   : > { %5842 = vrcp.f32 %v4026_v1  ;;  %v4033_v25 = vld [vmem:[#allocation6 + $0x38] sm:$0xff]  ;;  %v4110_v26 = vld [vmem:[#allocation6 + $0x60] sm:$0xff]  ;;  %v4111_v37 = vld [vmem:[#allocation6 + $0x68] sm:$0xff] }
 0xc04   : > { %5844 = vrcp.f32 %v4031_v39  ;;  %v4029_v47 = vld [vmem:[#allocation6 + $0x18] sm:$0xff]  ;;  %v4106_v55 = vld [vmem:[#allocation6 + $0x40] sm:$0xff]  ;;  %v4107_v3 = vld [vmem:[#allocation6 + $0x48] sm:$0xff] }
 0xc05   : > { %5846 = vrcp.f32 %v4030_v44  ;;  %v4112_v46 = vld [vmem:[#allocation6 + $0x70] sm:$0xff]  ;;  %v4113_v18 = vld [vmem:[#allocation6 + $0x78] sm:$0xff]  ;;  %v4190_v42 = vld [vmem:[#allocation6 + $0xa0] sm:$0xff] }
 0xc06   : > { %5848 = vrcp.f32 %v4032_v23  ;;  %v4108_v15 = vld [vmem:[#allocation6 + $0x50] sm:$0xff]  ;;  %v4109_v19 = vld [vmem:[#allocation6 + $0x58] sm:$0xff]  ;;  %v4186_v9 = vld [vmem:[#allocation6 + $0x80] sm:$0xff] }
 0xc07   : > { %5850 = vrcp.f32 %v4028_v12  ;;  %v4191_v60 = vld [vmem:[#allocation6 + $0xa8] sm:$0xff]  ;;  %v4192_v22 = vld [vmem:[#allocation6 + $0xb0] sm:$0xff]  ;;  %v4193_v53 = vld [vmem:[#allocation6 + $0xb8] sm:$0xff] }
 0xc08   : > { %5852 = vrcp.f32 %v4033_v25  ;;  %v4187_v41 = vld [vmem:[#allocation6 + $0x88] sm:$0xff]  ;;  %v4188_v51 = vld [vmem:[#allocation6 + $0x90] sm:$0xff]  ;;  %v4189_v5 = vld [vmem:[#allocation6 + $0x98] sm:$0xff] }
 0xc09   : > { %5854 = vrcp.f32 %v4029_v47  ;;  %v4270_v17 = vld [vmem:[#allocation6 + $0xe0] sm:$0xff]  ;;  %v4271_v50 = vld [vmem:[#allocation6 + $0xe8] sm:$0xff]  ;;  %v4272_v54 = vld [vmem:[#allocation6 + $0xf0] sm:$0xff] }
 0xc0a   : > { %5856 = vrcp.f32 %v4110_v26  ;;  %v4266_v40 = vld [vmem:[#allocation6 + $0xc0] sm:$0xff]  ;;  %v4267_v63 = vld [vmem:[#allocation6 + $0xc8] sm:$0xff]  ;;  %v4268_v29 = vld [vmem:[#allocation6 + $0xd0] sm:$0xff] }
 0xc0b   : > { %5858 = vrcp.f32 %v4106_v55  ;;  %v4273_v62 = vld [vmem:[#allocation6 + $0xf8] sm:$0xff]  ;;  %v4360_v61 = vld [vmem:[%s8233_s7 + $0x30] sm:$0xff]  ;;  %v4359_v2 = vld [vmem:[%s8233_s7 + $0x28] sm:$0xff] }
 0xc0c   : > { %5860 = vrcp.f32 %v4111_v37  ;;  %v4269_v6 = vld [vmem:[#allocation6 + $0xd8] sm:$0xff]  ;;  %v4358_v56 = vld [vmem:[%s8233_s7 + $0x20] sm:$0xff]  ;;  %v4356_v11 = vld [vmem:[%s8233_s7 + $0x10] sm:$0xff] }
 0xc0d   : > { %5862 = vrcp.f32 %v4107_v3  ;;  %v4361_v32 = vld [vmem:[%s8233_s7 + $0x38] sm:$0xff]  ;;  %v4355_v23 = vld [vmem:[%s8233_s7 + $0x8] sm:$0xff]  ;;  %v4354_v47 = vld [vmem:[%s8233_s7] sm:$0xff] }
 0xc0e   : > { %5864 = vrcp.f32 %v4112_v46  ;;  %5566 = vmatprep.subr.mxu0 %v4361_v32  ;;  %5610 = vmatprep.subr.mxu1 %v4361_v32  ;;  %v4357_v1 = vld [vmem:[%s8233_s7 + $0x18] sm:$0xff]  ;;  %v4043_v26 = vld [vmem:[#allocation7 + $0x8] sm:$0xff]  ;;  %v4042_v55 = vld [vmem:[#allocation7] sm:$0xff] }
 0xc0f   : > { %v5841_v28 = vpop.eup %5840  ;;  %5866 = vrcp.f32 %v4108_v15  ;;  %5567 = vmatpush3.msra.mxu0 %v4361_v32  ;;  %5618 = vmatpush3.msra.mxu1 %v4361_v32  ;;  %v4046_v3 = vld [vmem:[#allocation7 + $0x20] sm:$0xff] }
 0xc10   : > { %v5843_v38 = vpop.eup %5842  ;;  %4057 = vperm.xlu1 %5839, %v5841_v28   ;;  %5868 = vrcp.f32 %v4113_v18  ;;  %5568 = vmatprep.subr.mxu0 %v4360_v61  ;;  %v4044_v18 = vld [vmem:[#allocation7 + $0x10] sm:$0xff] }
 0xc11   : > { %v5845_v0 = vpop.eup %5844  ;;  %4052 = vperm.xlu0 %5838, %v5843_v38   ;;  %5870 = vrcp.f32 %v4109_v19  ;;  %5611 = vmatprep.subr.mxu1 %v4360_v61 }
 0xc12   : > { %v5847_v27 = vpop.eup %5846  ;;  %5872 = vrcp.f32 %v4190_v42  ;;  %5569 = vmatpush3.msra.mxu0 %v4360_v61  ;;  %5619 = vmatpush3.msra.mxu1 %v4360_v61 }
 0xc13   : > { %v5849_v10 = vpop.eup %5848  ;;  %5874 = vrcp.f32 %v4186_v9  ;;  %5570 = vmatprep.subr.mxu0 %v4359_v2  ;;  %5612 = vmatprep.subr.mxu1 %v4359_v2  ;;  %v4045_v9 = vld [vmem:[#allocation7 + $0x18] sm:$0xff] }
 0xc14   : > { %4077 = vperm.xlu1 %5839, %v5845_v0   ;;  %v5851_v31 = vpop.eup %5850  ;;  %5876 = vrcp.f32 %v4191_v60  ;;  %5571 = vmatpush3.msra.mxu0 %v4359_v2 }
 0xc15   : > { %4072 = vperm.xlu0 %5838, %v5847_v27   ;;  %v5853_v4 = vpop.eup %5852  ;;  %5878 = vrcp.f32 %v4187_v41  ;;  %5620 = vmatpush3.msra.mxu1 %v4359_v2  ;;  %v4047_v27 = vld [vmem:[#allocation7 + $0x28] sm:$0xff] }
 0xc16   : > { %v5855_v20 = vpop.eup %5854  ;;  %5880 = vrcp.f32 %v4192_v22  ;;  %5572 = vmatprep.subr.mxu0 %v4358_v56  ;;  %5613 = vmatprep.subr.mxu1 %v4358_v56 }
 0xc17   : > { %v5857_v48 = vpop.eup %5856  ;;  %5882 = vrcp.f32 %v4188_v51  ;;  %5573 = vmatpush3.msra.mxu0 %v4358_v56  ;;  %5621 = vmatpush3.msra.mxu1 %v4358_v56 }
 0xc18   : > { %4082 = vperm.xlu1 %5839, %v5849_v10   ;;  %v5859_v30 = vpop.eup %5858  ;;  %5884 = vrcp.f32 %v4193_v53  ;;  %5574 = vmatprep.subr.mxu0 %v4357_v1 }
 0xc19   : > { %4062 = vperm.xlu0 %5838, %v5851_v31   ;;  %v5861_v49 = vpop.eup %5860  ;;  %5886 = vrcp.f32 %v4189_v5  ;;  %5614 = vmatprep.subr.mxu1 %v4357_v1 }
 0xc1a   : > { %v5863_v36 = vpop.eup %5862  ;;  %5888 = vrcp.f32 %v4270_v17  ;;  %5575 = vmatpush3.msra.mxu0 %v4357_v1  ;;  %5622 = vmatpush3.msra.mxu1 %v4357_v1 }
 0xc1b   : > { %v5865_v8 = vpop.eup %5864  ;;  %5890 = vrcp.f32 %v4266_v40  ;;  %5576 = vmatprep.subr.mxu0 %v4356_v11  ;;  %5615 = vmatprep.subr.mxu1 %v4356_v11 }
 0xc1c   : > { %4087 = vperm.xlu1 %5839, %v5853_v4   ;;  %v5867_v58 = vpop.eup %5866  ;;  %5892 = vrcp.f32 %v4271_v50  ;;  %5577 = vmatpush3.msra.mxu0 %v4356_v11  ;;  %v4048_v4 = vld [vmem:[#allocation7 + $0x30] sm:$0xff] }
 0xc1d   : > { %4067 = vperm.xlu0 %5838, %v5855_v20   ;;  %v5869_v34 = vpop.eup %5868  ;;  %5894 = vrcp.f32 %v4267_v63  ;;  %5623 = vmatpush3.msra.mxu1 %v4356_v11 }
 0xc1e   : > { %v5871_v13 = vpop.eup %5870  ;;  %5896 = vrcp.f32 %v4272_v54  ;;  %5578 = vmatprep.subr.mxu0 %v4355_v23  ;;  %5616 = vmatprep.subr.mxu1 %v4355_v23 }
 0xc1f   : > { %v5873_v59 = vpop.eup %5872  ;;  %5898 = vrcp.f32 %v4268_v29  ;;  %5579 = vmatpush3.msra.mxu0 %v4355_v23  ;;  %5624 = vmatpush3.msra.mxu1 %v4355_v23 }
 0xc20   : > { %4152 = vperm.xlu1 %5839, %v5857_v48   ;;  %v5875_v57 = vpop.eup %5874  ;;  %5900 = vrcp.f32 %v4273_v62  ;;  %5580 = vmatprep.subr.mxu0 %v4354_v47 }
 0xc21   : > { %4132 = vperm.xlu0 %5838, %v5859_v30   ;;  %v5877_v35 = vpop.eup %5876  ;;  %5902 = vrcp.f32 %v4269_v6  ;;  %5617 = vmatprep.subr.mxu1 %v4354_v47  ;;  %v4049_v30 = vld [vmem:[#allocation7 + $0x38] sm:$0xff] }
 0xc22   : > { %v5879_v24 = vpop.eup %5878  ;;  %5581 = vmatpush3.msra.mxu0 %v4354_v47  ;;  %5625 = vmatpush3.msra.mxu1 %v4354_v47 }
 0xc23   : > { %v5881_v21 = vpop.eup %5880 }
 0xc24   : > { %4157 = vperm.xlu1 %5839, %v5861_v49   ;;  %v5883_v7 = vpop.eup %5882 }
 0xc25   : > { %4137 = vperm.xlu0 %5838, %v5863_v36   ;;  %v5885_v16 = vpop.eup %5884 }
 0xc26   : > { %v5887_v14 = vpop.eup %5886 }
 0xc27   : > { %v5889_v43 = vpop.eup %5888 }
 0xc28   : > { %4162 = vperm.xlu1 %5839, %v5865_v8   ;;  %v5891_v33 = vpop.eup %5890 }
 0xc29   : > { %4142 = vperm.xlu0 %5838, %v5867_v58   ;;  %v5893_v52 = vpop.eup %5892 }
 0xc2a   : > { %v5895_v45 = vpop.eup %5894 }
 0xc2b   : > { %v5897_v39 = vpop.eup %5896 }
 0xc2c   : > { %4167 = vperm.xlu1 %5839, %v5869_v34   ;;  %v5899_v44 = vpop.eup %5898 }
 0xc2d   : > { %4147 = vperm.xlu0 %5838, %v5871_v13   ;;  %v5901_v12 = vpop.eup %5900 }
 0xc2e   : > { %v5903_v25 = vpop.eup %5902 }
 0xc30   : > { %4232 = vperm.xlu1 %5839, %v5873_v59  }
 0xc31   : > { %4212 = vperm.xlu0 %5838, %v5875_v57  }
 0xc34   : > { %4237 = vperm.xlu1 %5839, %v5877_v35  }
 0xc35   : > { %4217 = vperm.xlu0 %5838, %v5879_v24  }
 0xc38   : > { %4242 = vperm.xlu1 %5839, %v5881_v21  }
 0xc39   : > { %4222 = vperm.xlu0 %5838, %v5883_v7  }
 0xc3c   : > { %4247 = vperm.xlu1 %5839, %v5885_v16  }
 0xc3d   : > { %4227 = vperm.xlu0 %5838, %v5887_v14  }
 0xc40   : > { %4312 = vperm.xlu1 %5839, %v5889_v43  }
 0xc41   : > { %4292 = vperm.xlu0 %5838, %v5891_v33  }
 0xc44   : > { %4317 = vperm.xlu1 %5839, %v5893_v52  }
 0xc45   : > { %4297 = vperm.xlu0 %5838, %v5895_v45  }
 0xc48   : > { %4322 = vperm.xlu1 %5839, %v5897_v39  }
 0xc49   : > { %4302 = vperm.xlu0 %5838, %v5899_v44  }
 0xc4c   : > { %4327 = vperm.xlu1 %5839, %v5901_v12  }
 0xc4d   : > { %4307 = vperm.xlu0 %5838, %v5903_v25  }
 0xc8b   : > { %v4058_v28 = vpop.permute.xlu1 %4057 }
 0xc8c   : > { %v4091_v38 = vmul.f32 %v4058_v28, %v4043_v26  ;;  %v4053_v0 = vpop.permute.xlu0 %4052 }
 0xc8d   : > { %v4090_v37 = vmul.f32 %v4053_v0, %v4042_v55 }
 0xc8e   : > { %4099 = vst.msk [vmem:[#allocation7 + $0x8] sm:$0xff] %vm1291_vm3, %v4091_v38 }
 0xc8f   : > { %4098 = vst.msk [vmem:[#allocation7] sm:$0xff] %vm1291_vm3, %v4090_v37  ;;  %v4078_v10 = vpop.permute.xlu1 %4077 }
 0xc90   : > { %v4095_v46 = vmul.f32 %v4078_v10, %v4047_v27  ;;  %v4073_v31 = vpop.permute.xlu0 %4072 }
 0xc91   : > { %v4094_v15 = vmul.f32 %v4073_v31, %v4046_v3 }
 0xc92   : > { %4103 = vst.msk [vmem:[#allocation7 + $0x28] sm:$0xff] %vm1291_vm3, %v4095_v46 }
 0xc93   : > { %4102 = vst.msk [vmem:[#allocation7 + $0x20] sm:$0xff] %vm1291_vm3, %v4094_v15  ;;  %v4083_v20 = vpop.permute.xlu1 %4082 }
 0xc94   : > { %v4096_v19 = vmul.f32 %v4083_v20, %v4048_v4  ;;  %v4063_v48 = vpop.permute.xlu0 %4062 }
 0xc95   : > { %v4092_v42 = vmul.f32 %v4063_v48, %v4044_v18  ;;  %v4123_v17 = vld [vmem:[#allocation7 + $0x8] sm:$0xff] }
 0xc96   : > { %4104 = vst.msk [vmem:[#allocation7 + $0x30] sm:$0xff] %vm1291_vm3, %v4096_v19  ;;  %v4122_v51 = vld [vmem:[#allocation7] sm:$0xff] }
 0xc97   : > { %4100 = vst.msk [vmem:[#allocation7 + $0x10] sm:$0xff] %vm1291_vm3, %v4092_v42  ;;  %v4088_v49 = vpop.permute.xlu1 %4087 }
 0xc98   : > { %v4097_v60 = vmul.f32 %v4088_v49, %v4049_v30  ;;  %v4068_v36 = vpop.permute.xlu0 %4067 }
 0xc99   : > { %v4093_v41 = vmul.f32 %v4068_v36, %v4045_v9  ;;  %v4127_v13 = vld [vmem:[#allocation7 + $0x28] sm:$0xff] }
 0xc9a   : > { %4105 = vst.msk [vmem:[#allocation7 + $0x38] sm:$0xff] %vm1291_vm3, %v4097_v60  ;;  %v4126_v22 = vld [vmem:[#allocation7 + $0x20] sm:$0xff] }
 0xc9b   : > { %4101 = vst.msk [vmem:[#allocation7 + $0x18] sm:$0xff] %vm1291_vm3, %v4093_v41  ;;  %v4153_v8 = vpop.permute.xlu1 %4152 }
 0xc9c   : > { %v4174_v58 = vmul.f32 %v4153_v8, %v4126_v22  ;;  %v4133_v34 = vpop.permute.xlu0 %4132 }
 0xc9d   : > { %v4170_v53 = vmul.f32 %v4133_v34, %v4122_v51  ;;  %v4128_v35 = vld [vmem:[#allocation7 + $0x30] sm:$0xff] }
 0xc9e   : > { %4182 = vst.msk [vmem:[#allocation7 + $0x20] sm:$0xff] %vm2555_vm13, %v4174_v58  ;;  %v4124_v63 = vld [vmem:[#allocation7 + $0x10] sm:$0xff] }
 0xc9f   : > { %4178 = vst.msk [vmem:[#allocation7] sm:$0xff] %vm2555_vm13, %v4170_v53  ;;  %v4158_v5 = vpop.permute.xlu1 %4157 }
 0xca0   : > { %v4175_v59 = vmul.f32 %v4158_v5, %v4127_v13  ;;  %v4138_v57 = vpop.permute.xlu0 %4137 }
 0xca1   : > { %v4171_v40 = vmul.f32 %v4138_v57, %v4123_v17  ;;  %v4129_v7 = vld [vmem:[#allocation7 + $0x38] sm:$0xff] }
 0xca2   : > { %4183 = vst.msk [vmem:[#allocation7 + $0x28] sm:$0xff] %vm2555_vm13, %v4175_v59  ;;  %v4125_v62 = vld [vmem:[#allocation7 + $0x18] sm:$0xff] }
 0xca3   : > { %4179 = vst.msk [vmem:[#allocation7 + $0x8] sm:$0xff] %vm2555_vm13, %v4171_v40  ;;  %v4163_v50 = vpop.permute.xlu1 %4162 }
 0xca4   : > { %v4176_v24 = vmul.f32 %v4163_v50, %v4128_v35  ;;  %v4143_v21 = vpop.permute.xlu0 %4142 }
 0xca5   : > { %v4172_v54 = vmul.f32 %v4143_v21, %v4124_v63  ;;  %v4206_v61 = vld [vmem:[#allocation7 + $0x20] sm:$0xff] }
 0xca6   : > { %4184 = vst.msk [vmem:[#allocation7 + $0x30] sm:$0xff] %vm2555_vm13, %v4176_v24  ;;  %v4202_v33 = vld [vmem:[#allocation7] sm:$0xff] }
 0xca7   : > { %4180 = vst.msk [vmem:[#allocation7 + $0x10] sm:$0xff] %vm2555_vm13, %v4172_v54  ;;  %v4168_v29 = vpop.permute.xlu1 %4167  ;;  %v4822_v21 = vld [vmem:[%s8234_s8 + $0x3] ss:$0 sm:$0xff] }
 0xca8   : > { %v4177_v16 = vmul.f32 %v4168_v29, %v4129_v7  ;;  %v4148_v14 = vpop.permute.xlu0 %4147 }
 0xca9   : > { %v4173_v6 = vmul.f32 %v4148_v14, %v4125_v62  ;;  %v4207_v52 = vld [vmem:[#allocation7 + $0x28] sm:$0xff] }
 0xcaa   : > { %4185 = vst.msk [vmem:[#allocation7 + $0x38] sm:$0xff] %vm2555_vm13, %v4177_v16  ;;  %v4203_v39 = vld [vmem:[#allocation7 + $0x8] sm:$0xff] }
 0xcab   : > { %4181 = vst.msk [vmem:[#allocation7 + $0x18] sm:$0xff] %vm2555_vm13, %v4173_v6  ;;  %v4233_v32 = vpop.permute.xlu1 %4232 }
 0xcac   : > { %v4254_v43 = vmul.f32 %v4233_v32, %v4206_v61  ;;  %v4213_v2 = vpop.permute.xlu0 %4212 }
 0xcad   : > { %v4250_v56 = vmul.f32 %v4213_v2, %v4202_v33  ;;  %v4208_v23 = vld [vmem:[#allocation7 + $0x30] sm:$0xff] }
 0xcae   : > { %4262 = vst.msk [vmem:[#allocation7 + $0x20] sm:$0xff] %vm3280_vm14, %v4254_v43  ;;  %v4204_v47 = vld [vmem:[#allocation7 + $0x10] sm:$0xff] }
 0xcaf   : > { %4258 = vst.msk [vmem:[#allocation7] sm:$0xff] %vm3280_vm14, %v4250_v56  ;;  %v4238_v45 = vpop.permute.xlu1 %4237 }
 0xcb0   : > { %v4255_v1 = vmul.f32 %v4238_v45, %v4207_v52  ;;  %v4218_v11 = vpop.permute.xlu0 %4217 }
 0xcb1   : > { %v4251_v44 = vmul.f32 %v4218_v11, %v4203_v39  ;;  %v4209_v28 = vld [vmem:[#allocation7 + $0x38] sm:$0xff] }
 0xcb2   : > { %4263 = vst.msk [vmem:[#allocation7 + $0x28] sm:$0xff] %vm3280_vm14, %v4255_v1  ;;  %v4205_v37 = vld [vmem:[#allocation7 + $0x18] sm:$0xff] }
 0xcb3   : > { %4259 = vst.msk [vmem:[#allocation7 + $0x8] sm:$0xff] %vm3280_vm14, %v4251_v44  ;;  %v4243_v12 = vpop.permute.xlu1 %4242 }
 0xcb4   : > { %v4256_v25 = vmul.f32 %v4243_v12, %v4208_v23  ;;  %v4223_v26 = vpop.permute.xlu0 %4222 }
 0xcb5   : > { %v4252_v55 = vmul.f32 %v4223_v26, %v4204_v47  ;;  %v4286_v46 = vld [vmem:[#allocation7 + $0x20] sm:$0xff] }
 0xcb6   : > { %4264 = vst.msk [vmem:[#allocation7 + $0x30] sm:$0xff] %vm3280_vm14, %v4256_v25  ;;  %v4282_v15 = vld [vmem:[#allocation7] sm:$0xff] }
 0xcb7   : > { %4260 = vst.msk [vmem:[#allocation7 + $0x10] sm:$0xff] %vm3280_vm14, %v4252_v55  ;;  %v4248_v38 = vpop.permute.xlu1 %4247 }
 0xcb8   : > { %v4257_v0 = vmul.f32 %v4248_v38, %v4209_v28  ;;  %v4228_v27 = vpop.permute.xlu0 %4227 }
 0xcb9   : > { %v4253_v3 = vmul.f32 %v4228_v27, %v4205_v37  ;;  %v4287_v20 = vld [vmem:[#allocation7 + $0x28] sm:$0xff] }
 0xcba   : > { %4265 = vst.msk [vmem:[#allocation7 + $0x38] sm:$0xff] %vm3280_vm14, %v4257_v0  ;;  %v4283_v42 = vld [vmem:[#allocation7 + $0x8] sm:$0xff] }
 0xcbb   : > { %4261 = vst.msk [vmem:[#allocation7 + $0x18] sm:$0xff] %vm3280_vm14, %v4253_v3  ;;  %v4313_v10 = vpop.permute.xlu1 %4312 }
 0xcbc   : > { %v4334_v31 = vmul.f32 %v4313_v10, %v4286_v46  ;;  %v4293_v4 = vpop.permute.xlu0 %4292 }
 0xcbd   : > { %v4330_v18 = vmul.f32 %v4293_v4, %v4282_v15  ;;  %v4288_v49 = vld [vmem:[#allocation7 + $0x30] sm:$0xff] }
 0xcbe   : > { %4342 = vst.msk [vmem:[#allocation7 + $0x20] sm:$0xff] %vm4005_vm15, %v4334_v31  ;;  %v4284_v41 = vld [vmem:[#allocation7 + $0x10] sm:$0xff] }
 0xcbf   : > { %4338 = vst.msk [vmem:[#allocation7] sm:$0xff] %vm4005_vm15, %v4330_v18  ;;  %v4318_v19 = vpop.permute.xlu1 %4317 }
 0xcc0   : > { %v4335_v48 = vmul.f32 %v4318_v19, %v4287_v20  ;;  %v4298_v30 = vpop.permute.xlu0 %4297 }
 0xcc1   : > { %v4331_v9 = vmul.f32 %v4298_v30, %v4283_v42  ;;  %v4289_v34 = vld [vmem:[#allocation7 + $0x38] sm:$0xff] }
 0xcc2   : > { %4343 = vst.msk [vmem:[#allocation7 + $0x28] sm:$0xff] %vm4005_vm15, %v4335_v48  ;;  %v4285_v5 = vld [vmem:[#allocation7 + $0x18] sm:$0xff] }
 0xcc3   : > { %4339 = vst.msk [vmem:[#allocation7 + $0x8] sm:$0xff] %vm4005_vm15, %v4331_v9  ;;  %v4323_v60 = vpop.permute.xlu1 %4322 }
 0xcc4   : > { %v4336_v36 = vmul.f32 %v4323_v60, %v4288_v49  ;;  %v4303_v8 = vpop.permute.xlu0 %4302 }
 0xcc5   : > { %v4332_v22 = vmul.f32 %v4303_v8, %v4284_v41  ;;  %v4350_v58 = vld [vmem:[#allocation7 + $0x20] sm:$0xff] }
 0xcc6   : > { %4344 = vst.msk [vmem:[#allocation7 + $0x30] sm:$0xff] %vm4005_vm15, %v4336_v36  ;;  %v4346_v51 = vld [vmem:[#allocation7] sm:$0xff]  ;;  %5588 = vmatprep.mubr.msk.f32.mxu1 %vm817_vm2, %v4350_v58 }
 0xcc7   : > { %4340 = vst.msk [vmem:[#allocation7 + $0x10] sm:$0xff] %vm4005_vm15, %v4332_v22  ;;  %5582 = vmatprep.mubr.msk.f32.mxu0 %vm817_vm2, %v4346_v51  ;;  %v4328_v53 = vpop.permute.xlu1 %4327 }
 0xcc8   : > { %v4337_v13 = vmul.f32 %v4328_v53, %v4289_v34  ;;  %v4308_v59 = vpop.permute.xlu0 %4307 }
 0xcc9   : > { %v4333_v17 = vmul.f32 %v4308_v59, %v4285_v5  ;;  %v4351_v57 = vld [vmem:[#allocation7 + $0x28] sm:$0xff] }
 0xcca   : > { %4345 = vst.msk [vmem:[#allocation7 + $0x38] sm:$0xff] %vm4005_vm15, %v4337_v13  ;;  %v4347_v40 = vld [vmem:[#allocation7 + $0x8] sm:$0xff]  ;;  %5589 = vmatmul.mubr.msk.f32.vlgmr.msra.gmra.mxu1 %vm817_vm2, %v4351_v57 }
 0xccb   : > { %4341 = vst.msk [vmem:[#allocation7 + $0x18] sm:$0xff] %vm4005_vm15, %v4333_v17  ;;  %5583 = vmatmul.mubr.msk.f32.vlgmr.msra.gmra.mxu0 %vm817_vm2, %v4347_v40 }
 0xccd   : > { %v4352_v35 = vld [vmem:[#allocation7 + $0x30] sm:$0xff] }
 0xcce   : > { %v4348_v50 = vld [vmem:[#allocation7 + $0x10] sm:$0xff]  ;;  %5591 = vmatprep.mubr.msk.f32.mxu1 %vm817_vm2, %v4352_v35 }
 0xccf   : > { %5585 = vmatprep.mubr.msk.f32.mxu0 %vm817_vm2, %v4348_v50 }
 0xcd1   : > { %v4353_v24 = vld [vmem:[#allocation7 + $0x38] sm:$0xff] }
 0xcd2   : > { %v4349_v63 = vld [vmem:[#allocation7 + $0x18] sm:$0xff]  ;;  %5592 = vmatmul.mubr.msk.f32.gmra.mxu1 %vm817_vm2, %v4353_v24 }
 0xcd3   : > { %5586 = vmatmul.mubr.msk.f32.gmra.mxu0 %vm817_vm2, %v4349_v63 }
 0xd8a   : > { %v5590_v54 = vpop.f32.mrf.mxu1 }
 0xd8b   : > { %v5584_v7 = vpop.f32.mrf.mxu0  ;;  %v4483_v29 = vadd.f32 %v5590_v54, %v4822_v21 }
 0xd8c   : > { %v4463_v16 = vadd.f32 %v5584_v7, %v4822_v21  ;;  %v4477_v62 = vpop.f32.mrf.mxu1 }
 0xd8d   : > { %4501 = vst.msk [vmem:[%s6136_s27 + $0x28] sm:$0xff] %vm817_vm2, %v4483_v29  ;;  %v4457_v14 = vpop.f32.mrf.mxu0  ;;  %v4478_v6 = vadd.f32 %v4822_v21, %v4477_v62 }
 0xd8e   : > { %4497 = vst.msk [vmem:[%s6136_s27 + $0x8] sm:$0xff] %vm817_vm2, %v4463_v16  ;;  %v4458_v32 = vadd.f32 %v4822_v21, %v4457_v14 }
 0xd8f   : > { %4500 = vst.msk [vmem:[%s6136_s27 + $0x20] sm:$0xff] %vm817_vm2, %v4478_v6 }
 0xd90   : > { %4496 = vst.msk [vmem:[%s6136_s27] sm:$0xff] %vm817_vm2, %v4458_v32 }
 0xd92   : > { %v5593_v61 = vpop.f32.mrf.mxu1 }
 0xd93   : > { %v5587_v43 = vpop.f32.mrf.mxu0  ;;  %v4493_v33 = vadd.f32 %v5593_v61, %v4822_v21 }
 0xd94   : > { %v4473_v2 = vadd.f32 %v5587_v43, %v4822_v21  ;;  %v4487_v56 = vpop.f32.mrf.mxu1 }
 0xd95   : > { %4503 = vst.msk [vmem:[%s6136_s27 + $0x38] sm:$0xff] %vm817_vm2, %v4493_v33  ;;  %v4467_v52 = vpop.f32.mrf.mxu0  ;;  %v4488_v45 = vadd.f32 %v4822_v21, %v4487_v56 }
 0xd96   : > { %4499 = vst.msk [vmem:[%s6136_s27 + $0x18] sm:$0xff] %vm817_vm2, %v4473_v2  ;;  %v4468_v1 = vadd.f32 %v4822_v21, %v4467_v52 }
 0xd97   : > { %4502 = vst.msk [vmem:[%s6136_s27 + $0x30] sm:$0xff] %vm817_vm2, %v4488_v45 }
 0xd98   : > { %4498 = vst.msk [vmem:[%s6136_s27 + $0x10] sm:$0xff] %vm817_vm2, %v4468_v1 }
 0xd99 PF: > { %s19_s17 = sadd.s32 1, %s5974_s17   ;;  %s8474_s11 = sld [smem:[#allocation14_spill]] }
 0xd9a   : > { %p16_p2 = scmp.ge.s32.totalorder %s19_s17, 10   ;;  %s8475_s12 = sld [smem:[#allocation9_spill]] }
 0xd9b   : > { %s8476_s13 = sld [smem:[#allocation10_spill]]  ;;  %s8480_s30 = smov %s5946_s10 }
 0xd9c   : > { %s8477_s26 = sld [smem:[#allocation12_spill]] }
 0xd9d   : > { %s8478_s15 = sld [smem:[#allocation11_spill]] }
 0xd9e   : > { %s8479_s16 = sld [smem:[#allocation13_spill]]  ;;  %18 = sbr.rel (!%p16_p2) target bundleno = 7 (0x7), region = 152 }
 0xd9f   : > { %s8481_s10 = smov %s8474_s11  ;;  %s8482_s11 = smov %s5962_s14 }
 0xda2   : > { %s8483_s14 = smov %s8477_s26 }

</bundles_post_ra>
